<compile_context>
chip_gen: v6e
topology: v6e:2x2x1
jax: 0.10.0
libtpu: 0.0.40
codegen_flags: <defaults>
</compile_context>

<pallas_src>
import jax
import jax.numpy as jnp
import numpy as np
from jax import lax
from jax.experimental import pallas as pl
from jax.experimental.pallas import tpu as pltpu


# ----------------------------- kernel ----------------------------------------

def _make_pointnet_kernel(bs, tn, cpad, bb_dims, head_dims, ncp,
                          n_points, mask_tail):
    """Fused backbone + max-pool + classifier head, all dims static."""
    d1, d2, d3, d4, d5 = bb_dims          # (64, 64, 64, 128, 1024)
    da, db = head_dims                    # (512, 256)

    def kernel(x_ref, aff_ref, w1_ref, w2_ref, w3_ref, w4_ref, w5_ref,
               wa_ref, wb_ref, wc_ref, out_ref, gmax_ref):
        n = pl.program_id(1)

        @pl.when(n == 0)
        def _init():
            gmax_ref[...] = jnp.full_like(gmax_ref, -jnp.inf)

        def mm(hin, w_ref):
            return jnp.dot(hin.astype(jnp.bfloat16), w_ref[...],
                           preferred_element_type=jnp.float32)

        def mm_bias_relu(hin, w_ref, row, width):
            # BN scale already folded into the bf16 weights; add shift + ReLU.
            return jnp.maximum(mm(hin, w_ref) + aff_ref[row:row + 1, :width],
                               0.0)

        # ---- backbone: 5 fused conv1d(k=1)+BN+ReLU layers, one MXU call each
        #      with M = bs*tn rows (batch folded into the tile).
        x = x_ref[0].reshape(bs * tn, cpad)          # bf16, channels padded to 8
        h = mm_bias_relu(x, w1_ref, 0, d1)
        h = mm_bias_relu(h, w2_ref, 1, d2)
        h = mm_bias_relu(h, w3_ref, 2, d3)
        h = mm_bias_relu(h, w4_ref, 3, d4)
        h = mm_bias_relu(h, w5_ref, 4, d5)           # (bs*tn, 1024) f32

        # ---- running max over points: per-batch (8, 1024) sublane-partial
        #      accumulator (pure VALU vmax); padded tail rows masked to -inf.
        if mask_tail:
            pid = n * tn + lax.broadcasted_iota(jnp.int32, (tn, 1), 0)
            valid = pid < n_points
        for b in range(bs):
            hb = h[b * tn:(b + 1) * tn, :]
            if mask_tail:
                hb = jnp.where(valid, hb, -jnp.inf)
            part = hb.reshape(tn // 8, 8, d5).max(axis=0)      # (8, d5)
            gmax_ref[b] = jnp.maximum(gmax_ref[b], part)

        # ---- classifier head, fused onto the last point-tile (M = bs rows).
        @pl.when(n == pl.num_programs(1) - 1)
        def _head():
            g = jnp.concatenate(
                [jnp.max(gmax_ref[b], axis=0, keepdims=True)   # 8 -> 1 reduce,
                 for b in range(bs)], axis=0)                  # once per batch
            ha = mm_bias_relu(g, wa_ref, 5, da)
            # TODO(synk): Dropout(p=0.7) is identity in eval mode; not applied.
            hb2 = mm_bias_relu(ha, wb_ref, 6, db)
            out_ref[0] = mm(hb2, wc_ref) + aff_ref[7:8, :ncp]  # lane-padded

    return kernel


# ----------------------------- wrapper ----------------------------------------

def pointnet_cls_forward(x, params, num_classes=40, tile_points=2048,
                         batch_split=1):
    """x: (B, N, C) float32  ->  logits (B, num_classes) float32.

    batch_split=1 folds the whole batch into the tile (best for single-TC
    v5e/v6e); batch_split=2 keeps a 2-way parallel grid axis for v7x megacore.
    """
    B, N, C = x.shape
    backbone = params["backbone"]
    (wa, sa, ta), (wb, sb, tb), (wc, bc) = params["head"]

    if B % batch_split != 0:
        batch_split = 1
    nb = batch_split
    bs = B // nb

    # ---- point tiling: big tiles (grid-step overhead dominates this tiny
    #      workload); cap M = bs*tn so the f32 layer-5 activation stays small.
    cpad = 8
    m_cap = 2048
    tn = min(tile_points, max(8, (m_cap // bs) // 8 * 8), -(-N // 8) * 8)
    tn = max(8, (tn // 8) * 8)
    nt = -(-N // tn)
    mask_tail = (nt * tn) > N            # partial last tile -> in-kernel mask

    # ---- channels padded 3 -> 8 and cast to bf16 so layer 1 runs on the MXU.
    x_in = jnp.pad(x, ((0, 0), (0, 0), (0, cpad - C))).astype(jnp.bfloat16)
    x_in = x_in.reshape(nb, bs, N, cpad)

    # ---- fold BN scale into the bf16 weight columns (epilogue = add+ReLU).
    def fold(w, s):
        return (w * s).astype(jnp.bfloat16)

    w1_raw, s1, _ = backbone[0]
    w1p = (jnp.zeros((cpad, w1_raw.shape[1]), jnp.float32)
           .at[:C].set(w1_raw * s1).astype(jnp.bfloat16))
    w_mxu = [fold(w, s) for (w, s, _) in backbone[1:]]          # w2..w5
    wa_b, wb_b = fold(wa, sa), fold(wb, sb)

    ncp = -(-num_classes // 128) * 128                          # lane-pad logits
    wc_b = (jnp.zeros((wc.shape[0], ncp), jnp.float32)
            .at[:, :num_classes].set(wc).astype(jnp.bfloat16))

    # ---- shift slab: 8 rows x lanes (rows 0..4 conv-BN shifts, 5..6 fc-BN
    #      shifts, 7 final bias), indexed per-use inside the kernel.
    d5 = backbone[-1][0].shape[1]
    lanes = max(d5, ncp)

    def _row(v):
        v = v.reshape(-1)
        return jnp.zeros((lanes,), jnp.float32).at[:v.shape[0]].set(v)

    aff = jnp.stack([_row(t) for (_, _, t) in backbone]
                    + [_row(ta), _row(tb), _row(bc)], axis=0)   # (8, lanes)

    bb_dims = tuple(w.shape[1] for (w, _, _) in backbone)       # (64,...,1024)
    kernel = _make_pointnet_kernel(bs, tn, cpad, bb_dims,
                                   (wa.shape[1], wb.shape[1]),
                                   ncp, N, mask_tail)

    const = lambda g, n: (0, 0)
    in_specs = (
        [pl.BlockSpec((1, bs, tn, cpad), lambda g, n: (g, 0, n, 0)),
         pl.BlockSpec(aff.shape, const),
         pl.BlockSpec(w1p.shape, const)]
        + [pl.BlockSpec(w.shape, const) for w in w_mxu]
        + [pl.BlockSpec(wa_b.shape, const),
           pl.BlockSpec(wb_b.shape, const),
           pl.BlockSpec(wc_b.shape, const)]
    )

    # ---- right-sized VMEM request (don't ask for v7x's full 64 MiB).
    consts = [aff, w1p, *w_mxu, wa_b, wb_b, wc_b]
    const_bytes = sum(int(np.prod(a.shape)) * a.dtype.itemsize for a in consts)
    est = 2 * const_bytes + 10 * bs * tn * d5 + 4 * bs * tn * cpad + (12 << 20)
    vmem_limit = int(min(56 << 20, max(16 << 20, est)))

    out = pl.pallas_call(
        kernel,
        out_shape=jax.ShapeDtypeStruct((nb, bs, ncp), jnp.float32),
        grid=(nb, nt),
        in_specs=in_specs,
        out_specs=pl.BlockSpec((1, bs, ncp), lambda g, n: (g, 0, 0)),
        scratch_shapes=[pltpu.VMEM((bs, 8, d5), jnp.float32)],
        compiler_params=pltpu.CompilerParams(
            dimension_semantics=("parallel", "arbitrary"),
            vmem_limit_bytes=vmem_limit),
    )(x_in, aff, w1p, *w_mxu, wa_b, wb_b, wc_b)

    return out.reshape(B, ncp)[:, :num_classes]


# ----------------------------- parameters -------------------------------------

def init_params(key, input_dim=3, num_classes=40, eps=1e-5):
    """Deterministic synthetic parameters.  Conv/FC + eval-mode BatchNorm are
    returned as (W^T, scale, shift) per layer (f32); the wrapper folds the
    scale into the weights."""
    keys = iter(jax.random.split(key, 64))

    def layer_with_bn(cin, cout):
        w = 0.1 * jax.random.normal(next(keys), (cout, cin), jnp.float32)
        b = 0.1 * jax.random.normal(next(keys), (cout,), jnp.float32)
        gamma = 1.0 + 0.1 * jax.random.normal(next(keys), (cout,), jnp.float32)
        beta = 0.1 * jax.random.normal(next(keys), (cout,), jnp.float32)
        rmean = 0.1 * jax.random.normal(next(keys), (cout,), jnp.float32)
        rvar = 1.0 + 0.1 * jnp.abs(jax.random.normal(next(keys), (cout,), jnp.float32))
        s = gamma / jnp.sqrt(rvar + eps)              # BN scale
        t = (b - rmean) * s + beta                    # BN shift with bias folded
        return w.T, s.reshape(1, cout), t.reshape(1, cout)

    dims = [input_dim, 64, 64, 64, 128, 1024]
    backbone = [layer_with_bn(dims[i], dims[i + 1]) for i in range(5)]

    head_a = layer_with_bn(1024, 512)
    head_b = layer_with_bn(512, 256)
    wc = 0.1 * jax.random.normal(next(keys), (num_classes, 256), jnp.float32)
    bc = 0.1 * jax.random.normal(next(keys), (num_classes,), jnp.float32)
    head_c = (wc.T, bc.reshape(1, num_classes))

    return {"backbone": backbone, "head": (head_a, head_b, head_c)}


def reference_forward(x, params):
    """Pure-JAX reference mirroring the kernel numerics: BN scale folded into
    the weights before the bf16 cast, bf16 matmul inputs, f32 accumulation."""
    def bdot(a, b):
        return jnp.dot(a.astype(jnp.bfloat16), b.astype(jnp.bfloat16),
                       preferred_element_type=jnp.float32)

    h = x
    for w, s, t in params["backbone"]:
        h = jnp.maximum(bdot(h, w * s) + t, 0.0)
    g = jnp.max(h, axis=1)
    (wa, sa, ta), (wb, sb, tb), (wc, bc) = params["head"]
    h = jnp.maximum(bdot(g, wa * sa) + ta, 0.0)
    h = jnp.maximum(bdot(h, wb * sb) + tb, 0.0)
    return bdot(h, wc) + bc


# ----------------------------- main --------------------------------------------

if __name__ == "__main__":
    key = jax.random.PRNGKey(0)
    kx, kp = jax.random.split(key)

    B, N, C = 2, 512, 3          # (batch, num_points, point_dim)
    NUM_CLASSES = 40

    x = jax.random.normal(kx, (B, N, C), dtype=jnp.float32)
    params = init_params(kp, input_dim=C, num_classes=NUM_CLASSES)
    ref = np.asarray(reference_forward(x, params))

    # Default path: batch folded into the tile (single-TC v5e/v6e).
    logits = jax.block_until_ready(
        pointnet_cls_forward(x, params, num_classes=NUM_CLASSES))
    np.testing.assert_allclose(np.asarray(logits), ref, rtol=1e-2, atol=1e-2)
    assert logits.shape == (B, NUM_CLASSES)

    # v7x-oriented path: 2-way parallel batch split (also correct on 1-TC chips).
    logits2 = jax.block_until_ready(
        pointnet_cls_forward(x, params, num_classes=NUM_CLASSES, batch_split=2))
    np.testing.assert_allclose(np.asarray(logits2), ref, rtol=1e-2, atol=1e-2)

    print("KERNEL_OK")
</pallas_src>

<mosaic_0001>
module attributes {stable_mosaic.version = 11 : i64} {
  func.func @kernel(%arg0: i32, %arg1: i32, %arg2: memref<1x2x512x8xbf16, #tpu.memory_space<vmem>>, %arg3: memref<8x1024xf32, #tpu.memory_space<vmem>>, %arg4: memref<8x64xbf16, #tpu.memory_space<vmem>>, %arg5: memref<64x64xbf16, #tpu.memory_space<vmem>>, %arg6: memref<64x64xbf16, #tpu.memory_space<vmem>>, %arg7: memref<64x128xbf16, #tpu.memory_space<vmem>>, %arg8: memref<128x1024xbf16, #tpu.memory_space<vmem>>, %arg9: memref<1024x512xbf16, #tpu.memory_space<vmem>>, %arg10: memref<512x256xbf16, #tpu.memory_space<vmem>>, %arg11: memref<256x128xbf16, #tpu.memory_space<vmem>>, %arg12: memref<1x2x128xf32, #tpu.memory_space<vmem>>, %arg13: memref<2x8x1024xf32, #tpu.memory_space<vmem>>) attributes {dimension_semantics = [#tpu.dimension_semantics<parallel>, #tpu.dimension_semantics<arbitrary>], iteration_bounds = array<i64: 1, 1>, scalar_prefetch = 0 : i64, scratch_operands = 1 : i64, tpu.core_type = #tpu.core_type<tc>, window_params = [{transform_indices = @transform_0, window_bounds = array<i64: 1, 2, 512, 8>}, {pipeline_mode = #tpu.pipeline_mode<synchronous>, transform_indices = @transform_1, window_bounds = array<i64: 8, 1024>}, {pipeline_mode = #tpu.pipeline_mode<synchronous>, transform_indices = @transform_2, window_bounds = array<i64: 8, 64>}, {pipeline_mode = #tpu.pipeline_mode<synchronous>, transform_indices = @transform_3, window_bounds = array<i64: 64, 64>}, {pipeline_mode = #tpu.pipeline_mode<synchronous>, transform_indices = @transform_4, window_bounds = array<i64: 64, 64>}, {pipeline_mode = #tpu.pipeline_mode<synchronous>, transform_indices = @transform_5, window_bounds = array<i64: 64, 128>}, {pipeline_mode = #tpu.pipeline_mode<synchronous>, transform_indices = @transform_6, window_bounds = array<i64: 128, 1024>}, {pipeline_mode = #tpu.pipeline_mode<synchronous>, transform_indices = @transform_7, window_bounds = array<i64: 1024, 512>}, {pipeline_mode = #tpu.pipeline_mode<synchronous>, transform_indices = @transform_8, window_bounds = array<i64: 512, 256>}, {pipeline_mode = #tpu.pipeline_mode<synchronous>, transform_indices = @transform_9, window_bounds = array<i64: 256, 128>}, {transform_indices = @transform_10, window_bounds = array<i64: 1, 2, 128>}]} {
    %c0_i32 = arith.constant 0 : i32
    %0 = arith.cmpi eq, %arg1, %c0_i32 : i32
    %1 = arith.extui %0 : i1 to i32
    %c0_i32_0 = arith.constant 0 : i32
    %2 = arith.cmpi ne, %1, %c0_i32_0 : i32
    scf.if %2 {
      %cst_45 = arith.constant 0xFF800000 : f32
      %66 = vector.broadcast %cst_45 : f32 to vector<2x8x1024xf32>
      %c0_46 = arith.constant 0 : index
      %c0_47 = arith.constant 0 : index
      %c0_48 = arith.constant 0 : index
      %67 = vector.load %arg13[%c0_46, %c0_47, %c0_48] : memref<2x8x1024xf32, #tpu.memory_space<vmem>>, vector<2x8x1024xf32>
      tpu.vector_store %arg13[%c0_46, %c0_47, %c0_48], %66 {strides = array<i32>} : memref<2x8x1024xf32, #tpu.memory_space<vmem>>, vector<2x8x1024xf32>,
    } else {
    }
    %c0 = arith.constant 0 : index
    %c0_1 = arith.constant 0 : index
    %c0_2 = arith.constant 0 : index
    %c0_3 = arith.constant 0 : index
    %3 = vector.load %arg2[%c0, %c0_1, %c0_2, %c0_3] : memref<1x2x512x8xbf16, #tpu.memory_space<vmem>>, vector<1x2x512x8xbf16>
    %4 = vector.shape_cast %3 : vector<1x2x512x8xbf16> to vector<2x512x8xbf16>
    %5 = vector.shape_cast %4 : vector<2x512x8xbf16> to vector<1024x8xbf16>
    %c0_4 = arith.constant 0 : index
    %c0_5 = arith.constant 0 : index
    %6 = vector.load %arg4[%c0_4, %c0_5] : memref<8x64xbf16, #tpu.memory_space<vmem>>, vector<8x64xbf16>
    %cst = arith.constant dense<0.000000e+00> : vector<1024x64xf32>
    %7 = tpu.matmul %5, %6, %cst {dimension_numbers = #tpu.dot_dimension_numbers<[1], [0], [0], [1], [0, 0, 1, 1], [], []>} : vector<1024x8xbf16>, vector<8x64xbf16>, vector<1024x64xf32> -> vector<1024x64xf32>
    %c0_6 = arith.constant 0 : index
    %c0_7 = arith.constant 0 : index
    %8 = vector.load %arg3[%c0_6, %c0_7] : memref<8x1024xf32, #tpu.memory_space<vmem>>, vector<1x64xf32>
    %9 = vector.broadcast %8 : vector<1x64xf32> to vector<1024x64xf32>
    %10 = arith.addf %7, %9 : vector<1024x64xf32>
    %cst_8 = arith.constant 0.000000e+00 : f32
    %11 = vector.broadcast %cst_8 : f32 to vector<1024x64xf32>
    %12 = arith.maximumf %10, %11 : vector<1024x64xf32>
    %13 = arith.truncf %12 : vector<1024x64xf32> to vector<1024x64xbf16>
    %c0_9 = arith.constant 0 : index
    %c0_10 = arith.constant 0 : index
    %14 = vector.load %arg5[%c0_9, %c0_10] : memref<64x64xbf16, #tpu.memory_space<vmem>>, vector<64x64xbf16>
    %cst_11 = arith.constant dense<0.000000e+00> : vector<1024x64xf32>
    %15 = tpu.matmul %13, %14, %cst_11 {dimension_numbers = #tpu.dot_dimension_numbers<[1], [0], [0], [1], [0, 0, 1, 1], [], []>} : vector<1024x64xbf16>, vector<64x64xbf16>, vector<1024x64xf32> -> vector<1024x64xf32>
    %c1 = arith.constant 1 : index
    %c0_12 = arith.constant 0 : index
    %16 = vector.load %arg3[%c1, %c0_12] : memref<8x1024xf32, #tpu.memory_space<vmem>>, vector<1x64xf32>
    %17 = vector.broadcast %16 : vector<1x64xf32> to vector<1024x64xf32>
    %18 = arith.addf %15, %17 : vector<1024x64xf32>
    %cst_13 = arith.constant 0.000000e+00 : f32
    %19 = vector.broadcast %cst_13 : f32 to vector<1024x64xf32>
    %20 = arith.maximumf %18, %19 : vector<1024x64xf32>
    %21 = arith.truncf %20 : vector<1024x64xf32> to vector<1024x64xbf16>
    %c0_14 = arith.constant 0 : index
    %c0_15 = arith.constant 0 : index
    %22 = vector.load %arg6[%c0_14, %c0_15] : memref<64x64xbf16, #tpu.memory_space<vmem>>, vector<64x64xbf16>
    %cst_16 = arith.constant dense<0.000000e+00> : vector<1024x64xf32>
    %23 = tpu.matmul %21, %22, %cst_16 {dimension_numbers = #tpu.dot_dimension_numbers<[1], [0], [0], [1], [0, 0, 1, 1], [], []>} : vector<1024x64xbf16>, vector<64x64xbf16>, vector<1024x64xf32> -> vector<1024x64xf32>
    %c2 = arith.constant 2 : index
    %c0_17 = arith.constant 0 : index
    %24 = vector.load %arg3[%c2, %c0_17] : memref<8x1024xf32, #tpu.memory_space<vmem>>, vector<1x64xf32>
    %25 = vector.broadcast %24 : vector<1x64xf32> to vector<1024x64xf32>
    %26 = arith.addf %23, %25 : vector<1024x64xf32>
    %cst_18 = arith.constant 0.000000e+00 : f32
    %27 = vector.broadcast %cst_18 : f32 to vector<1024x64xf32>
    %28 = arith.maximumf %26, %27 : vector<1024x64xf32>
    %29 = arith.truncf %28 : vector<1024x64xf32> to vector<1024x64xbf16>
    %c0_19 = arith.constant 0 : index
    %c0_20 = arith.constant 0 : index
    %30 = vector.load %arg7[%c0_19, %c0_20] : memref<64x128xbf16, #tpu.memory_space<vmem>>, vector<64x128xbf16>
    %cst_21 = arith.constant dense<0.000000e+00> : vector<1024x128xf32>
    %31 = tpu.matmul %29, %30, %cst_21 {dimension_numbers = #tpu.dot_dimension_numbers<[1], [0], [0], [1], [0, 0, 1, 1], [], []>} : vector<1024x64xbf16>, vector<64x128xbf16>, vector<1024x128xf32> -> vector<1024x128xf32>
    %c3 = arith.constant 3 : index
    %c0_22 = arith.constant 0 : index
    %32 = vector.load %arg3[%c3, %c0_22] : memref<8x1024xf32, #tpu.memory_space<vmem>>, vector<1x128xf32>
    %33 = vector.broadcast %32 : vector<1x128xf32> to vector<1024x128xf32>
    %34 = arith.addf %31, %33 : vector<1024x128xf32>
    %cst_23 = arith.constant 0.000000e+00 : f32
    %35 = vector.broadcast %cst_23 : f32 to vector<1024x128xf32>
    %36 = arith.maximumf %34, %35 : vector<1024x128xf32>
    %37 = arith.truncf %36 : vector<1024x128xf32> to vector<1024x128xbf16>
    %c0_24 = arith.constant 0 : index
    %c0_25 = arith.constant 0 : index
    %38 = vector.load %arg8[%c0_24, %c0_25] : memref<128x1024xbf16, #tpu.memory_space<vmem>>, vector<128x1024xbf16>
    %cst_26 = arith.constant dense<0.000000e+00> : vector<1024x1024xf32>
    %39 = tpu.matmul %37, %38, %cst_26 {dimension_numbers = #tpu.dot_dimension_numbers<[1], [0], [0], [1], [0, 0, 1, 1], [], []>} : vector<1024x128xbf16>, vector<128x1024xbf16>, vector<1024x1024xf32> -> vector<1024x1024xf32>
    %c4 = arith.constant 4 : index
    %c0_27 = arith.constant 0 : index
    %40 = vector.load %arg3[%c4, %c0_27] : memref<8x1024xf32, #tpu.memory_space<vmem>>, vector<1x1024xf32>
    %41 = vector.broadcast %40 : vector<1x1024xf32> to vector<1024x1024xf32>
    %42 = arith.addf %39, %41 : vector<1024x1024xf32>
    %cst_28 = arith.constant 0.000000e+00 : f32
    %43 = vector.broadcast %cst_28 : f32 to vector<1024x1024xf32>
    %44 = arith.maximumf %42, %43 : vector<1024x1024xf32>
    %45 = vector.extract_strided_slice %44 {offsets = [0, 0], sizes = [512, 1024], strides = [1, 1]} : vector<1024x1024xf32> to vector<512x1024xf32>
    %46 = vector.shape_cast %45 : vector<512x1024xf32> to vector<64x8x1024xf32>
    %cst_29 = arith.constant dense<0xFF800000> : vector<8x1024xf32>
    %47 = vector.multi_reduction <maximumf>, %46, %cst_29 [0] : vector<64x8x1024xf32> to vector<8x1024xf32>
    %c0_30 = arith.constant 0 : index
    %c0_31 = arith.constant 0 : index
    %c0_32 = arith.constant 0 : index
    %48 = vector.load %arg13[%c0_30, %c0_31, %c0_32] : memref<2x8x1024xf32, #tpu.memory_space<vmem>>, vector<1x8x1024xf32>
    %49 = vector.shape_cast %48 : vector<1x8x1024xf32> to vector<8x1024xf32>
    %50 = arith.maximumf %49, %47 : vector<8x1024xf32>
    %c0_33 = arith.constant 0 : index
    %c0_34 = arith.constant 0 : index
    %c0_35 = arith.constant 0 : index
    %51 = vector.load %arg13[%c0_33, %c0_34, %c0_35] : memref<2x8x1024xf32, #tpu.memory_space<vmem>>, vector<1x8x1024xf32>
    %52 = vector.shape_cast %51 : vector<1x8x1024xf32> to vector<8x1024xf32>
    %53 = vector.shape_cast %50 : vector<8x1024xf32> to vector<1x8x1024xf32>
    tpu.vector_store %arg13[%c0_33, %c0_34, %c0_35], %53 {strides = array<i32>} : memref<2x8x1024xf32, #tpu.memory_space<vmem>>, vector<1x8x1024xf32>,
    %54 = vector.extract_strided_slice %44 {offsets = [512, 0], sizes = [512, 1024], strides = [1, 1]} : vector<1024x1024xf32> to vector<512x1024xf32>
    %55 = vector.shape_cast %54 : vector<512x1024xf32> to vector<64x8x1024xf32>
    %cst_36 = arith.constant dense<0xFF800000> : vector<8x1024xf32>
    %56 = vector.multi_reduction <maximumf>, %55, %cst_36 [0] : vector<64x8x1024xf32> to vector<8x1024xf32>
    %c1_37 = arith.constant 1 : index
    %c0_38 = arith.constant 0 : index
    %c0_39 = arith.constant 0 : index
    %57 = vector.load %arg13[%c1_37, %c0_38, %c0_39] : memref<2x8x1024xf32, #tpu.memory_space<vmem>>, vector<1x8x1024xf32>
    %58 = vector.shape_cast %57 : vector<1x8x1024xf32> to vector<8x1024xf32>
    %59 = arith.maximumf %58, %56 : vector<8x1024xf32>
    %c1_40 = arith.constant 1 : index
    %c0_41 = arith.constant 0 : index
    %c0_42 = arith.constant 0 : index
    %60 = vector.load %arg13[%c1_40, %c0_41, %c0_42] : memref<2x8x1024xf32, #tpu.memory_space<vmem>>, vector<1x8x1024xf32>
    %61 = vector.shape_cast %60 : vector<1x8x1024xf32> to vector<8x1024xf32>
    %62 = vector.shape_cast %59 : vector<8x1024xf32> to vector<1x8x1024xf32>
    tpu.vector_store %arg13[%c1_40, %c0_41, %c0_42], %62 {strides = array<i32>} : memref<2x8x1024xf32, #tpu.memory_space<vmem>>, vector<1x8x1024xf32>,
    %c0_i32_43 = arith.constant 0 : i32
    %63 = arith.cmpi eq, %arg1, %c0_i32_43 : i32
    %64 = arith.extui %63 : i1 to i32
    %c0_i32_44 = arith.constant 0 : i32
    %65 = arith.cmpi ne, %64, %c0_i32_44 : i32
    scf.if %65 {
      %c0_45 = arith.constant 0 : index
      %c0_46 = arith.constant 0 : index
      %c0_47 = arith.constant 0 : index
      %66 = vector.load %arg13[%c0_45, %c0_46, %c0_47] : memref<2x8x1024xf32, #tpu.memory_space<vmem>>, vector<1x8x1024xf32>
      %67 = vector.shape_cast %66 : vector<1x8x1024xf32> to vector<8x1024xf32>
      %cst_48 = arith.constant dense<0xFF800000> : vector<1024xf32>
      %68 = vector.multi_reduction <maximumf>, %67, %cst_48 [0] : vector<8x1024xf32> to vector<1024xf32>
      %69 = vector.shape_cast %68 : vector<1024xf32> to vector<1x1024xf32>
      %c1_49 = arith.constant 1 : index
      %c0_50 = arith.constant 0 : index
      %c0_51 = arith.constant 0 : index
      %70 = vector.load %arg13[%c1_49, %c0_50, %c0_51] : memref<2x8x1024xf32, #tpu.memory_space<vmem>>, vector<1x8x1024xf32>
      %71 = vector.shape_cast %70 : vector<1x8x1024xf32> to vector<8x1024xf32>
      %cst_52 = arith.constant dense<0xFF800000> : vector<1024xf32>
      %72 = vector.multi_reduction <maximumf>, %71, %cst_52 [0] : vector<8x1024xf32> to vector<1024xf32>
      %73 = vector.shape_cast %72 : vector<1024xf32> to vector<1x1024xf32>
      %74 = tpu.concatenate %69, %73 in 0 : vector<1x1024xf32>, vector<1x1024xf32> -> vector<2x1024xf32>
      %75 = arith.truncf %74 : vector<2x1024xf32> to vector<2x1024xbf16>
      %c0_53 = arith.constant 0 : index
      %c0_54 = arith.constant 0 : index
      %76 = vector.load %arg9[%c0_53, %c0_54] : memref<1024x512xbf16, #tpu.memory_space<vmem>>, vector<1024x512xbf16>
      %cst_55 = arith.constant dense<0.000000e+00> : vector<2x512xf32>
      %77 = tpu.matmul %75, %76, %cst_55 {dimension_numbers = #tpu.dot_dimension_numbers<[1], [0], [0], [1], [0, 0, 1, 1], [], []>} : vector<2x1024xbf16>, vector<1024x512xbf16>, vector<2x512xf32> -> vector<2x512xf32>
      %c5 = arith.constant 5 : index
      %c0_56 = arith.constant 0 : index
      %78 = vector.load %arg3[%c5, %c0_56] : memref<8x1024xf32, #tpu.memory_space<vmem>>, vector<1x512xf32>
      %79 = vector.broadcast %78 : vector<1x512xf32> to vector<2x512xf32>
      %80 = arith.addf %77, %79 : vector<2x512xf32>
      %cst_57 = arith.constant 0.000000e+00 : f32
      %81 = vector.broadcast %cst_57 : f32 to vector<2x512xf32>
      %82 = arith.maximumf %80, %81 : vector<2x512xf32>
      %83 = arith.truncf %82 : vector<2x512xf32> to vector<2x512xbf16>
      %c0_58 = arith.constant 0 : index
      %c0_59 = arith.constant 0 : index
      %84 = vector.load %arg10[%c0_58, %c0_59] : memref<512x256xbf16, #tpu.memory_space<vmem>>, vector<512x256xbf16>
      %cst_60 = arith.constant dense<0.000000e+00> : vector<2x256xf32>
      %85 = tpu.matmul %83, %84, %cst_60 {dimension_numbers = #tpu.dot_dimension_numbers<[1], [0], [0], [1], [0, 0, 1, 1], [], []>} : vector<2x512xbf16>, vector<512x256xbf16>, vector<2x256xf32> -> vector<2x256xf32>
      %c6 = arith.constant 6 : index
      %c0_61 = arith.constant 0 : index
      %86 = vector.load %arg3[%c6, %c0_61] : memref<8x1024xf32, #tpu.memory_space<vmem>>, vector<1x256xf32>
      %87 = vector.broadcast %86 : vector<1x256xf32> to vector<2x256xf32>
      %88 = arith.addf %85, %87 : vector<2x256xf32>
      %cst_62 = arith.constant 0.000000e+00 : f32
      %89 = vector.broadcast %cst_62 : f32 to vector<2x256xf32>
      %90 = arith.maximumf %88, %89 : vector<2x256xf32>
      %91 = arith.truncf %90 : vector<2x256xf32> to vector<2x256xbf16>
      %c0_63 = arith.constant 0 : index
      %c0_64 = arith.constant 0 : index
      %92 = vector.load %arg11[%c0_63, %c0_64] : memref<256x128xbf16, #tpu.memory_space<vmem>>, vector<256x128xbf16>
      %cst_65 = arith.constant dense<0.000000e+00> : vector<2x128xf32>
      %93 = tpu.matmul %91, %92, %cst_65 {dimension_numbers = #tpu.dot_dimension_numbers<[1], [0], [0], [1], [0, 0, 1, 1], [], []>} : vector<2x256xbf16>, vector<256x128xbf16>, vector<2x128xf32> -> vector<2x128xf32>
      %c7 = arith.constant 7 : index
      %c0_66 = arith.constant 0 : index
      %94 = vector.load %arg3[%c7, %c0_66] : memref<8x1024xf32, #tpu.memory_space<vmem>>, vector<1x128xf32>
      %95 = vector.broadcast %94 : vector<1x128xf32> to vector<2x128xf32>
      %96 = arith.addf %93, %95 : vector<2x128xf32>
      %c0_67 = arith.constant 0 : index
      %c0_68 = arith.constant 0 : index
      %c0_69 = arith.constant 0 : index
      %97 = vector.load %arg12[%c0_67, %c0_68, %c0_69] : memref<1x2x128xf32, #tpu.memory_space<vmem>>, vector<1x2x128xf32>
      %98 = vector.shape_cast %97 : vector<1x2x128xf32> to vector<2x128xf32>
      %99 = vector.shape_cast %96 : vector<2x128xf32> to vector<1x2x128xf32>
      tpu.vector_store %arg12[%c0_67, %c0_68, %c0_69], %99 {strides = array<i32>} : memref<1x2x128xf32, #tpu.memory_space<vmem>>, vector<1x2x128xf32>,
    } else {
    }
    return
  }
  func.func @transform_0(%arg0: i32, %arg1: i32) -> (i32, i32, i32, i32) {
    %c0_i32 = arith.constant 0 : i32
    %c0_i32_0 = arith.constant 0 : i32
    %c0_i32_1 = arith.constant 0 : i32
    return %arg0, %c0_i32, %arg1, %c0_i32_0 : i32, i32, i32, i32
  }
  func.func @transform_1(%arg0: i32, %arg1: i32) -> (i32, i32) {
    %c0_i32 = arith.constant 0 : i32
    %c0_i32_0 = arith.constant 0 : i32
    %c0_i32_1 = arith.constant 0 : i32
    return %c0_i32, %c0_i32_0 : i32, i32
  }
  func.func @transform_2(%arg0: i32, %arg1: i32) -> (i32, i32) {
    %c0_i32 = arith.constant 0 : i32
    %c0_i32_0 = arith.constant 0 : i32
    %c0_i32_1 = arith.constant 0 : i32
    return %c0_i32, %c0_i32_0 : i32, i32
  }
  func.func @transform_3(%arg0: i32, %arg1: i32) -> (i32, i32) {
    %c0_i32 = arith.constant 0 : i32
    %c0_i32_0 = arith.constant 0 : i32
    %c0_i32_1 = arith.constant 0 : i32
    return %c0_i32, %c0_i32_0 : i32, i32
  }
  func.func @transform_4(%arg0: i32, %arg1: i32) -> (i32, i32) {
    %c0_i32 = arith.constant 0 : i32
    %c0_i32_0 = arith.constant 0 : i32
    %c0_i32_1 = arith.constant 0 : i32
    return %c0_i32, %c0_i32_0 : i32, i32
  }
  func.func @transform_5(%arg0: i32, %arg1: i32) -> (i32, i32) {
    %c0_i32 = arith.constant 0 : i32
    %c0_i32_0 = arith.constant 0 : i32
    %c0_i32_1 = arith.constant 0 : i32
    return %c0_i32, %c0_i32_0 : i32, i32
  }
  func.func @transform_6(%arg0: i32, %arg1: i32) -> (i32, i32) {
    %c0_i32 = arith.constant 0 : i32
    %c0_i32_0 = arith.constant 0 : i32
    %c0_i32_1 = arith.constant 0 : i32
    return %c0_i32, %c0_i32_0 : i32, i32
  }
  func.func @transform_7(%arg0: i32, %arg1: i32) -> (i32, i32) {
    %c0_i32 = arith.constant 0 : i32
    %c0_i32_0 = arith.constant 0 : i32
    %c0_i32_1 = arith.constant 0 : i32
    return %c0_i32, %c0_i32_0 : i32, i32
  }
  func.func @transform_8(%arg0: i32, %arg1: i32) -> (i32, i32) {
    %c0_i32 = arith.constant 0 : i32
    %c0_i32_0 = arith.constant 0 : i32
    %c0_i32_1 = arith.constant 0 : i32
    return %c0_i32, %c0_i32_0 : i32, i32
  }
  func.func @transform_9(%arg0: i32, %arg1: i32) -> (i32, i32) {
    %c0_i32 = arith.constant 0 : i32
    %c0_i32_0 = arith.constant 0 : i32
    %c0_i32_1 = arith.constant 0 : i32
    return %c0_i32, %c0_i32_0 : i32, i32
  }
  func.func @transform_10(%arg0: i32, %arg1: i32) -> (i32, i32, i32) {
    %c0_i32 = arith.constant 0 : i32
    %c0_i32_0 = arith.constant 0 : i32
    %c0_i32_1 = arith.constant 0 : i32
    return %arg0, %c0_i32, %c0_i32_0 : i32, i32, i32
  }
}

</mosaic_0001>

<bundles_post_ra>
// kernel: tpu_custom_call.1
= control target key start
LH: loop header
LB: loop body
LE: loop exit
PB: predicated region body
PF: predicated region fallthrough
CT: control target
= control target key end

     0   :  { %15 = vsyncpa [#allocation4], 0  ;;  %s18165_s0 = inlined_call_operand.vmem [shape: bf16[1,2,512,8], index: 0, kind: input, shape index: {}]   ;;  %s18166_s1 = inlined_call_operand.hbm [shape: f32[8,1024], index: 1, kind: input, shape index: {}]   ;;  %s18167_s2 = inlined_call_operand.vmem [shape: bf16[8,64], index: 2, kind: input, shape index: {}]   ;;  %s18168_s3 = inlined_call_operand.vmem [shape: bf16[64,64], index: 3, kind: input, shape index: {}]   ;;  %s18169_s4 = inlined_call_operand.hbm [shape: bf16[64,64], index: 4, kind: input, shape index: {}]   ;;  %s18170_s5 = inlined_call_operand.hbm [shape: bf16[64,128], index: 5, kind: input, shape index: {}]   ;;  %s18171_s6 = inlined_call_operand.vmem [shape: bf16[128,1024], index: 6, kind: input, shape index: {}]   ;;  %s18172_s7 = inlined_call_operand.hbm [shape: bf16[1024,512], index: 7, kind: input, shape index: {}]   ;;  %s18173_s8 = inlined_call_operand.hbm [shape: bf16[512,256], index: 8, kind: input, shape index: {}]   ;;  %s18174_s9 = inlined_call_operand.hbm [shape: bf16[256,128], index: 9, kind: input, shape index: {}]   ;;  %s18175_s10 = inlined_call_operand.hbm [shape: f32[1,2,128], index: 10, kind: output, shape index: {}]  }
   0x1   :  { %16 = vsyncpa [#allocation7], 0 }
   0x2   :  { %17 = vsyncpa [#allocation10], 0 }
   0x3   :  { %18 = vsyncpa [#allocation13], 0 }
   0x4   :  { %19 = vsyncpa [#allocation5], 0  ;;  %s14613_s13 = smov [#allocation6]  }
   0x5   :  { %s41_s14 = sshll.u32 %s14613_s13, 4  ;;  %s42_s14 = int_to_ptr.vmem [resolvable:$true] %s41_s14 }
   0x6   :  { %s14471_s15 = scalar_lea.vmem %s42_s14, 512  ;;  %p14476_p1 = scmp.lt.s32.totalorder %s42_s14, %s42_s14 }
   0x7   :  { %p14472_p0 = scmp.ne.s32.totalorder %s42_s14, %s14471_s15  ;;  %p14477_p2 = scmp.lt.s32.totalorder %s14471_s15, %s14471_s15 }
   0x9   :  { %p14478_p3 = por %p14477_p2, %p14476_p1 }
   0xb   :  { %p14479_p4 = pnand %p14478_p3, %p14472_p0 }
   0xd   :  { %14482 = shalt.err (!%p14479_p4)
}
   0xe   :  { %s14614_s16 = smov 64   ;;  %s14615_s17 = smov 4  }
   0xf   :  { %47 = dma.hbm_to_vmem [thread:$0]  %s18169_s4, 512, %s42_s14, [#allocation7], %s14614_s16, %s14614_s16, %s14615_s17  }
  0x10   :  { %s14616_s20 = smov [#allocation9]  }
  0x11   :  { %s67_s21 = sshll.u32 %s14616_s20, 4  ;;  %s68_s21 = int_to_ptr.vmem [resolvable:$true] %s67_s21 }
  0x12   :  { %s14491_s22 = scalar_lea.vmem %s68_s21, 32768  ;;  %p14496_p6 = scmp.lt.s32.totalorder %s68_s21, %s68_s21 }
  0x13   :  { %p14492_p5 = scmp.ne.s32.totalorder %s68_s21, %s14491_s22  ;;  %p14497_p7 = scmp.lt.s32.totalorder %s14491_s22, %s14491_s22 }
  0x15   :  { %p14498_p8 = por %p14497_p7, %p14496_p6 }
  0x17   :  { %p14499_p9 = pnand %p14498_p8, %p14492_p5 }
  0x19   :  { %14502 = shalt.err (!%p14499_p9)
}
  0x1a   :  { %s14617_s23 = smov 256   ;;  %s14618_s24 = smov 16  }
  0x1b   :  { %73 = dma.hbm_to_vmem [thread:$0]  %s18172_s7, 32768, %s68_s21, [#allocation10], %s14617_s23, %s14617_s23, %s14618_s24  }
  0x1c   :  { %s14619_s27 = smov [#allocation3]   ;;  %s14620_s29 = smov [#allocation8]  }
  0x1d   :  { %s28_s28 = sshll.u32 %s14619_s27, 4  ;;  %s53_s4 = sshll.u32 %s14620_s29, 4  ;;  %s29_s28 = int_to_ptr.vmem [resolvable:$true] %s28_s28  ;;  %s54_s4 = int_to_ptr.vmem [resolvable:$true] %s53_s4 }
  0x1e   :  { %s14511_s30 = scalar_lea.vmem %s29_s28, 1024  ;;  %p14516_p11 = scmp.lt.s32.totalorder %s29_s28, %s29_s28 }
  0x1f   :  { %p14512_p10 = scmp.ne.s32.totalorder %s29_s28, %s14511_s30  ;;  %p14517_p12 = scmp.lt.s32.totalorder %s14511_s30, %s14511_s30 }
  0x21   :  { %p14518_p13 = por %p14517_p12, %p14516_p11 }
  0x23   :  { %p14519_p0 = pnand %p14518_p13, %p14512_p10 }
  0x25   :  { %14522 = shalt.err (!%p14519_p0)
}
  0x26   :  { %31 = dma.hbm_to_vmem [thread:$0]  %s18166_s1, 1024, %s29_s28, [#allocation4]  }
  0x27   :  { %s14531_s13 = scalar_lea.vmem %s54_s4, 512  ;;  %p14536_p2 = scmp.lt.s32.totalorder %s54_s4, %s54_s4 }
  0x28   :  { %p14532_p1 = scmp.ne.s32.totalorder %s54_s4, %s14531_s13  ;;  %p14537_p3 = scmp.lt.s32.totalorder %s14531_s13, %s14531_s13 }
  0x2a   :  { %p14538_p4 = por %p14537_p3, %p14536_p2 }
  0x2c   :  { %p14539_p5 = pnand %p14538_p4, %p14532_p1 }
  0x2e   :  { %14542 = shalt.err (!%p14539_p5)
}
  0x2f   :  { %59 = dma.hbm_to_vmem [thread:$0]  %s18170_s5, 512, %s54_s4, [#allocation7], %s14614_s16, %s14614_s16, %s14615_s17  }
  0x30   :  { %s14621_s15 = smov [#allocation11]  }
  0x31   :  { %s79_s18 = sshll.u32 %s14621_s15, 4  ;;  %s80_s18 = int_to_ptr.vmem [resolvable:$true] %s79_s18 }
  0x32   :  { %s14551_s19 = scalar_lea.vmem %s80_s18, 8192  ;;  %p14556_p7 = scmp.lt.s32.totalorder %s80_s18, %s80_s18 }
  0x33   :  { %p14552_p6 = scmp.ne.s32.totalorder %s80_s18, %s14551_s19  ;;  %p14557_p8 = scmp.lt.s32.totalorder %s14551_s19, %s14551_s19 }
  0x35   :  { %p14558_p9 = por %p14557_p8, %p14556_p7 }
  0x37   :  { %p14559_p10 = pnand %p14558_p9, %p14552_p6 }
  0x39   :  { %14562 = shalt.err (!%p14559_p10)
}
  0x3a   :  { %s14622_s1 = smov 128   ;;  %s14623_s20 = smov 8  }
  0x3b   :  { %85 = dma.hbm_to_vmem [thread:$0]  %s18173_s8, 8192, %s80_s18, [#allocation10], %s14622_s1, %s14622_s1, %s14623_s20  }
  0x3c   :  { %s14624_s23 = smov [#allocation12]  }
  0x3d   :  { %s91_s24 = sshll.u32 %s14624_s23, 4  ;;  %s92_s24 = int_to_ptr.vmem [resolvable:$true] %s91_s24 }
  0x3e   :  { %s14571_s5 = scalar_lea.vmem %s92_s24, 2048  ;;  %p14576_p12 = scmp.lt.s32.totalorder %s92_s24, %s92_s24 }
  0x3f   :  { %p14572_p11 = scmp.ne.s32.totalorder %s92_s24, %s14571_s5  ;;  %p14577_p13 = scmp.lt.s32.totalorder %s14571_s5, %s14571_s5 }
  0x41   :  { %p14578_p0 = por %p14577_p13, %p14576_p12 }
  0x43   :  { %p14579_p1 = pnand %p14578_p0, %p14572_p11 }
  0x45   :  { %14582 = shalt.err (!%p14579_p1)
}
  0x46   :  { %97 = dma.hbm_to_vmem [thread:$0]  %s18174_s9, 2048, %s92_s24, [#allocation13], %s14614_s16, %s14614_s16, %s14615_s17  }
  0x47   :  { %14603 = dma.done.wait [#allocation4], 1024  }
  0x48   :  { %14604 = vsyncadd [#allocation4], 4294966272 }
  0x49   :  { %14605 = dma.done.wait [#allocation7], 1024  }
  0x4a   :  { %14606 = vsyncadd [#allocation7], 4294966272 }
  0x4b   :  { %14607 = dma.done.wait [#allocation10], 40960  }
  0x4c   :  { %14608 = vsyncadd [#allocation10], 4294926336 }
  0x4d   :  { %14609 = dma.done.wait [#allocation13], 2048  }
  0x4e   :  { %14610 = vsyncadd [#allocation13], 4294965248  ;;  %vm780_vm0 = vcmask 1043456   ;;  %vm587_vm1 = vcmask 64512   ;;  %v265_v0 = vld [vmem:[%s18167_s2] sm:$0xf] }
  0x4f   :  { %13871 = vmatprep.subr.msk.bf16.mxu0 %vm780_vm0, %v265_v0  ;;  %v782_v1 = vsel %vm780_vm0, %v265_v0, 0  ;;  %v13887_v2 = vld [vmem:[%s18165_s0] sm:$0xff]   ;;  %13872 = vmatprep.subr.msk.bf16.mxu1 %vm780_vm0, %v265_v0  ;;  %v13888_v3 = vld [vmem:[%s18165_s0 + $0x8] sm:$0xff]   ;;  %v13889_v4 = vld [vmem:[%s18165_s0 + $0x10] sm:$0xff]   ;;  %vm1554_vm2 = vcmask 523264   ;;  %vm9725_vm3 = vcmask 1040384  }
  0x50   :  { %13332 = vmatpush3.bf16.msra.mxu0 %v782_v1  ;;  %13870 = vmatpush3.bf16.msra.mxu1 %v782_v1  ;;  %v13890_v5 = vld [vmem:[%s18165_s0 + $0x18] sm:$0xff]   ;;  %v13891_v6 = vld [vmem:[%s18165_s0 + $0x20] sm:$0xff]   ;;  %v13892_v7 = vld [vmem:[%s18165_s0 + $0x28] sm:$0xff]  }
  0x51   :  { %13333 = vmatprep.mubr.msk.bf16.mxu0 %vm587_vm1, %v13887_v2  ;;  %v13893_v8 = vld [vmem:[%s18165_s0 + $0x30] sm:$0xff]   ;;  %v13894_v9 = vld [vmem:[%s18165_s0 + $0x38] sm:$0xff]   ;;  %v13895_v10 = vld [vmem:[%s18165_s0 + $0x40] sm:$0xff]  }
  0x52   :  { %v13896_v11 = vld [vmem:[%s18165_s0 + $0x48] sm:$0xff]   ;;  %v13897_v12 = vld [vmem:[%s18165_s0 + $0x50] sm:$0xff]   ;;  %v13898_v13 = vld [vmem:[%s18165_s0 + $0x58] sm:$0xff]  }
  0x53   :  { %13334 = vmatmul.mubr.msk.bf16.vlgmr.msra.gmra.mxu0 %vm587_vm1, %v13888_v3  ;;  %v13899_v14 = vld [vmem:[%s18165_s0 + $0x60] sm:$0xff]   ;;  %v13931_v15 = vld [vmem:[#allocation6 + $0x18] sm:$0xff]   ;;  %v13900_v16 = vld [vmem:[%s18165_s0 + $0x68] sm:$0xff]  }
  0x54   :  { %13337 = vmatprep.mubr.msk.bf16.mxu0 %vm587_vm1, %v13889_v4  ;;  %13597 = vmatprep.subr.bf16.mxu0 %v13931_v15  ;;  %v13901_v17 = vld [vmem:[%s18165_s0 + $0x70] sm:$0xff]   ;;  %v13935_v18 = vld [vmem:[%s18165_s0 + $0x1e0] sm:$0xff]   ;;  %v13902_v19 = vld [vmem:[%s18165_s0 + $0x78] sm:$0xff]  }
  0x55   :  { %13598 = vmatpush3.bf16.msra.mxu0 %v13931_v15  ;;  %v13903_v20 = vld [vmem:[%s18165_s0 + $0x80] sm:$0xff]   ;;  %13453 = vmatprep.mubr.msk.bf16.mxu1 %vm587_vm1, %v13935_v18  ;;  %v13937_v21 = vld [vmem:[%s18165_s0 + $0x1e8] sm:$0xff]   ;;  %v13938_v22 = vld [vmem:[%s18168_s3 + $0x18] sm:$0xff]  }
  0x56   :  { %13454 = vmatmul.mubr.msk.bf16.vlgmr.msra.gmra.mxu1 %vm587_vm1, %v13937_v21  ;;  %v13940_v23 = vld [vmem:[%s18165_s0 + $0x1f0] sm:$0xff]   ;;  %v13904_v24 = vld [vmem:[%s18165_s0 + $0x88] sm:$0xff]   ;;  %13461 = vmatprep.subr.bf16.mxu1 %v13938_v22  ;;  %v13942_v26 = vld [vmem:[%s18165_s0 + $0x1f8] sm:$0xff]  }
  0x57   :  { %v13905_v25 = vld [vmem:[%s18165_s0 + $0x90] sm:$0xff]   ;;  %13462 = vmatpush3.bf16.msra.mxu1 %v13938_v22  ;;  %13457 = vmatprep.mubr.msk.bf16.mxu1 %vm587_vm1, %v13940_v23  ;;  %v13906_v28 = vld [vmem:[%s18165_s0 + $0x98] sm:$0xff]   ;;  %v13944_v29 = vld [vmem:[%s18168_s3 + $0x8] sm:$0xff]  }
  0x58   :  { %v13943_v27 = vld [vmem:[%s18168_s3 + $0x10] sm:$0xff]   ;;  %v13907_v30 = vld [vmem:[%s18165_s0 + $0xa0] sm:$0xff]   ;;  %v13908_v32 = vld [vmem:[%s18165_s0 + $0xa8] sm:$0xff]  }
  0x59   :  { %13463 = vmatprep.subr.bf16.mxu1 %v13943_v27  ;;  %v13947_v31 = vld [vmem:[%s18168_s3] sm:$0xff]   ;;  %v13909_v33 = vld [vmem:[%s18165_s0 + $0xb0] sm:$0xff]   ;;  %v13910_v34 = vld [vmem:[%s18165_s0 + $0xb8] sm:$0xff]  }
  0x5a   :  { %v13911_v35 = vld [vmem:[%s18165_s0 + $0xc0] sm:$0xff]   ;;  %v13912_v36 = vld [vmem:[%s18165_s0 + $0xc8] sm:$0xff]   ;;  %v13913_v37 = vld [vmem:[%s18165_s0 + $0xd0] sm:$0xff]  }
  0x5b   :  { %13338 = vmatmul.mubr.msk.bf16.gmra.mxu0 %vm587_vm1, %v13890_v5  ;;  %13464 = vmatpush3.bf16.msra.mxu1 %v13943_v27  ;;  %v13914_v38 = vld [vmem:[%s18165_s0 + $0xd8] sm:$0xff]   ;;  %v13915_v39 = vld [vmem:[%s18165_s0 + $0xe0] sm:$0xff]   ;;  %v13916_v40 = vld [vmem:[%s18165_s0 + $0xe8] sm:$0xff]  }
  0x5c   :  { %13341 = vmatprep.mubr.msk.bf16.mxu0 %vm587_vm1, %v13891_v6  ;;  %13465 = vmatprep.subr.bf16.mxu1 %v13944_v29  ;;  %v13917_v41 = vld [vmem:[%s18165_s0 + $0xf0] sm:$0xff]   ;;  %v13918_v43 = vld [vmem:[%s18165_s0 + $0xf8] sm:$0xff]   ;;  %v13919_v44 = vld [vmem:[%s18165_s0 + $0x100] sm:$0xff]  }
  0x5d   :  { %v13955_v42 = vld [vmem:[#allocation6 + $0x10] sm:$0xff]   ;;  %v13920_v45 = vld [vmem:[%s18165_s0 + $0x108] sm:$0xff]   ;;  %v13922_v47 = vld [vmem:[%s18165_s0 + $0x118] sm:$0xff]  }
  0x5e   :  { %13458 = vmatmul.mubr.msk.bf16.gmra.mxu1 %vm587_vm1, %v13942_v26  ;;  %13599 = vmatprep.subr.bf16.mxu0 %v13955_v42  ;;  %v13921_v46 = vld [vmem:[%s18165_s0 + $0x110] sm:$0xff]   ;;  %v13923_v48 = vld [vmem:[%s18165_s0 + $0x120] sm:$0xff]   ;;  %v13924_v49 = vld [vmem:[%s18165_s0 + $0x128] sm:$0xff]  }
  0x5f   :  { %13466 = vmatpush3.bf16.msra.mxu1 %v13944_v29  ;;  %13600 = vmatpush3.bf16.msra.mxu0 %v13955_v42  ;;  %v13925_v50 = vld [vmem:[%s18165_s0 + $0x130] sm:$0xff]   ;;  %v13926_v51 = vld [vmem:[%s18165_s0 + $0x138] sm:$0xff]   ;;  %v13927_v52 = vld [vmem:[%s18165_s0 + $0x140] sm:$0xff]  }
  0x60   :  { %13467 = vmatprep.subr.bf16.mxu1 %v13947_v31  ;;  %v13928_v53 = vld [vmem:[%s18165_s0 + $0x148] sm:$0xff]   ;;  %v13929_v54 = vld [vmem:[%s18165_s0 + $0x150] sm:$0xff]   ;;  %v13930_v55 = vld [vmem:[%s18165_s0 + $0x158] sm:$0xff]  }
  0x61   :  { %v13932_v56 = vld [vmem:[%s18165_s0 + $0x160] sm:$0xff]   ;;  %v13957_v57 = vld [vmem:[#allocation6 + $0x8] sm:$0xff]   ;;  %v13934_v59 = vld [vmem:[%s18165_s0 + $0x170] sm:$0xff]  }
  0x62   :  { %13601 = vmatprep.subr.bf16.mxu0 %v13957_v57  ;;  %v13933_v58 = vld [vmem:[%s18165_s0 + $0x168] sm:$0xff]   ;;  %v13936_v60 = vld [vmem:[%s18165_s0 + $0x178] sm:$0xff]   ;;  %v13939_v61 = vld [vmem:[%s18165_s0 + $0x180] sm:$0xff]  }
  0x63   :  { %13342 = vmatmul.mubr.msk.bf16.gmra.mxu0 %vm587_vm1, %v13892_v7  ;;  %13468 = vmatpush3.bf16.msra.mxu1 %v13947_v31  ;;  %v13941_v62 = vld [vmem:[%s18165_s0 + $0x188] sm:$0xff]   ;;  %v13945_v63 = vld [vmem:[%s18165_s0 + $0x190] sm:$0xff]   ;;  %v14944_v2 = vld [vmem:[#allocation3] ss:$0 sm:$0xff] }
  0x64   :  { %13345 = vmatprep.mubr.msk.bf16.mxu0 %vm587_vm1, %v13893_v8  ;;  %13602 = vmatpush3.bf16.msra.mxu0 %v13957_v57  ;;  %v13946_v4 = vld [vmem:[%s18165_s0 + $0x198] sm:$0xff]   ;;  %v13948_v7 = vld [vmem:[%s18165_s0 + $0x1a0] sm:$0xff]   ;;  %v13950_v23 = vld [vmem:[%s18165_s0 + $0x1b0] sm:$0xff]  }
  0x6b   :  { %13346 = vmatmul.mubr.msk.bf16.gmra.mxu0 %vm587_vm1, %v13894_v9 }
  0x6c   :  { %13349 = vmatprep.mubr.msk.bf16.mxu0 %vm587_vm1, %v13895_v10 }
  0x73   :  { %13350 = vmatmul.mubr.msk.bf16.gmra.mxu0 %vm587_vm1, %v13896_v11 }
  0x74   :  { %13353 = vmatprep.mubr.msk.bf16.mxu0 %vm587_vm1, %v13897_v12 }
  0x7b   :  { %13354 = vmatmul.mubr.msk.bf16.gmra.mxu0 %vm587_vm1, %v13898_v13 }
  0x7c   :  { %13357 = vmatprep.mubr.msk.bf16.mxu0 %vm587_vm1, %v13899_v14 }
  0x83   :  { %13358 = vmatmul.mubr.msk.bf16.gmra.mxu0 %vm587_vm1, %v13900_v16 }
  0x84   :  { %13361 = vmatprep.mubr.msk.bf16.mxu0 %vm587_vm1, %v13901_v17 }
  0x8b   :  { %13362 = vmatmul.mubr.msk.bf16.gmra.mxu0 %vm587_vm1, %v13902_v19 }
  0x8c   :  { %13365 = vmatprep.mubr.msk.bf16.mxu0 %vm587_vm1, %v13903_v20  ;;  %v13949_v20 = vld [vmem:[%s18165_s0 + $0x1a8] sm:$0xff]  }
  0x93   :  { %13366 = vmatmul.mubr.msk.bf16.gmra.mxu0 %vm587_vm1, %v13904_v24 }
  0x94   :  { %13369 = vmatprep.mubr.msk.bf16.mxu0 %vm587_vm1, %v13905_v25 }
  0x9b   :  { %13370 = vmatmul.mubr.msk.bf16.gmra.mxu0 %vm587_vm1, %v13906_v28 }
  0x9c   :  { %13373 = vmatprep.mubr.msk.bf16.mxu0 %vm587_vm1, %v13907_v30 }
  0xa3   :  { %13374 = vmatmul.mubr.msk.bf16.gmra.mxu0 %vm587_vm1, %v13908_v32 }
  0xa4   :  { %13377 = vmatprep.mubr.msk.bf16.mxu0 %vm587_vm1, %v13909_v33 }
  0xab   :  { %13378 = vmatmul.mubr.msk.bf16.gmra.mxu0 %vm587_vm1, %v13910_v34 }
  0xac   :  { %13381 = vmatprep.mubr.msk.bf16.mxu0 %vm587_vm1, %v13911_v35 }
  0xb3   :  { %13382 = vmatmul.mubr.msk.bf16.gmra.mxu0 %vm587_vm1, %v13912_v36  ;;  %v13951_v36 = vld [vmem:[%s18165_s0 + $0x1b8] sm:$0xff]  }
  0xb4   :  { %13385 = vmatprep.mubr.msk.bf16.mxu0 %vm587_vm1, %v13913_v37 }
  0xbb   :  { %13386 = vmatmul.mubr.msk.bf16.gmra.mxu0 %vm587_vm1, %v13914_v38 }
  0xbc   :  { %13389 = vmatprep.mubr.msk.bf16.mxu0 %vm587_vm1, %v13915_v39  ;;  %v13952_v39 = vld [vmem:[%s18165_s0 + $0x1c0] sm:$0xff]  }
  0xc3   :  { %13390 = vmatmul.mubr.msk.bf16.gmra.mxu0 %vm587_vm1, %v13916_v40 }
  0xc4   :  { %13393 = vmatprep.mubr.msk.bf16.mxu0 %vm587_vm1, %v13917_v41 }
  0xcb   :  { %13394 = vmatmul.mubr.msk.bf16.gmra.mxu0 %vm587_vm1, %v13918_v43 }
  0xcc   :  { %13397 = vmatprep.mubr.msk.bf16.mxu0 %vm587_vm1, %v13919_v44 }
  0xd3   :  { %13398 = vmatmul.mubr.msk.bf16.gmra.mxu0 %vm587_vm1, %v13920_v45 }
  0xd4   :  { %13401 = vmatprep.mubr.msk.bf16.mxu0 %vm587_vm1, %v13921_v46 }
  0xdb   :  { %13402 = vmatmul.mubr.msk.bf16.gmra.mxu0 %vm587_vm1, %v13922_v47 }
  0xdc   :  { %13405 = vmatprep.mubr.msk.bf16.mxu0 %vm587_vm1, %v13923_v48 }
  0xe3   :  { %13406 = vmatmul.mubr.msk.bf16.gmra.mxu0 %vm587_vm1, %v13924_v49 }
  0xe4   :  { %13409 = vmatprep.mubr.msk.bf16.mxu0 %vm587_vm1, %v13925_v50 }
  0xeb   :  { %13410 = vmatmul.mubr.msk.bf16.gmra.mxu0 %vm587_vm1, %v13926_v51 }
  0xec   :  { %13413 = vmatprep.mubr.msk.bf16.mxu0 %vm587_vm1, %v13927_v52  ;;  %v13953_v52 = vld [vmem:[%s18165_s0 + $0x1c8] sm:$0xff]  }
  0xf3   :  { %13414 = vmatmul.mubr.msk.bf16.gmra.mxu0 %vm587_vm1, %v13928_v53 }
  0xf4   :  { %13417 = vmatprep.mubr.msk.bf16.mxu0 %vm587_vm1, %v13929_v54 }
  0xfb   :  { %13418 = vmatmul.mubr.msk.bf16.gmra.mxu0 %vm587_vm1, %v13930_v55  ;;  %v13954_v55 = vld [vmem:[%s18165_s0 + $0x1d0] sm:$0xff]  }
  0xfc   :  { %13421 = vmatprep.mubr.msk.bf16.mxu0 %vm587_vm1, %v13932_v56 }
 0x103   :  { %13422 = vmatmul.mubr.msk.bf16.gmra.mxu0 %vm587_vm1, %v13933_v58 }
 0x104   :  { %13425 = vmatprep.mubr.msk.bf16.mxu0 %vm587_vm1, %v13934_v59 }
 0x10b   :  { %13426 = vmatmul.mubr.msk.bf16.gmra.mxu0 %vm587_vm1, %v13936_v60 }
 0x10c   :  { %13429 = vmatprep.mubr.msk.bf16.mxu0 %vm587_vm1, %v13939_v61 }
 0x113   :  { %v13335_v0 = vpop.f32.mrf.mxu0  ;;  %13430 = vmatmul.mubr.msk.bf16.gmra.mxu0 %vm587_vm1, %v13941_v62 }
 0x114   :  { %13433 = vmatprep.mubr.msk.bf16.mxu0 %vm587_vm1, %v13945_v63  ;;  %v827_v8 = vadd.f32 %v13335_v0, %v14944_v2 }
 0x115   :  { %v818_v1 = vpop.f32.mrf.mxu0 }
 0x116   :  { %v819_v5 = vadd.f32 %v818_v1, %v14944_v2  ;;  %v1331_v15 = vmax.f32 %v827_v8, 0.0 }
 0x117   :  { %v13336_v3 = vpop.f32.mrf.mxu0 }
 0x118   :  { %v830_v6 = vadd.f32 %v13336_v3, %v14944_v2  ;;  %v1329_v13 = vmax.f32 %v819_v5, 0.0  ;;  %v13958_v3 = vld [vmem:[#allocation6] sm:$0xff]  }
 0x119   :  { %v821_v9 = vpop.f32.mrf.mxu0  ;;  %13603 = vmatprep.subr.bf16.mxu0 %v13958_v3 }
 0x11a   :  { %v822_v10 = vadd.f32 %v821_v9, %v14944_v2  ;;  %v1332_v11 = vmax.f32 %v830_v6, 0.0  ;;  %v13956_v6 = vld [vmem:[%s18165_s0 + $0x1d8] sm:$0xff]   ;;  %13604 = vmatpush3.bf16.msra.mxu0 %v13958_v3 }
 0x11b   :  { %v13339_v12 = vpop.f32.mrf.mxu0  ;;  %13434 = vmatmul.mubr.msk.bf16.gmra.mxu0 %vm587_vm1, %v13946_v4 }
 0x11c   :  { %v1330_v14 = vmax.f32 %v822_v10, 0.0  ;;  %13437 = vmatprep.mubr.msk.bf16.mxu0 %vm587_vm1, %v13948_v7  ;;  %v1458_v18 = vpack.c.bf16 %v1332_v11, %v1331_v15  ;;  %v843_v24 = vadd.f32 %v13339_v12, %v14944_v2 }
 0x11d   :  { %v834_v16 = vpop.f32.mrf.mxu0 }
 0x11e   :  { %v1457_v17 = vpack.c.bf16 %v1330_v14, %v1329_v13  ;;  %v835_v21 = vadd.f32 %v834_v16, %v14944_v2  ;;  %v1335_v31 = vmax.f32 %v843_v24, 0.0 }
 0x11f   :  { %v13340_v19 = vpop.f32.mrf.mxu0 }
 0x120   :  { %v846_v22 = vadd.f32 %v13340_v19, %v14944_v2  ;;  %13469 = vmatprep.mubr.msk.bf16.mxu1 %vm1554_vm2, %v1457_v17  ;;  %v1333_v29 = vmax.f32 %v835_v21, 0.0  ;;  %v13959_v19 = vld [vmem:[#allocation8 + $0x18] sm:$0xff]  }
 0x121   :  { %v837_v25 = vpop.f32.mrf.mxu0  ;;  %13470 = vmatmul.mubr.msk.bf16.vlgmr.msra.gmra.mxu1 %vm1554_vm2, %v1458_v18  ;;  %13733 = vmatprep.subr.bf16.mxu1 %v13959_v19 }
 0x122   :  { %v838_v26 = vadd.f32 %v837_v25, %v14944_v2  ;;  %v1336_v27 = vmax.f32 %v846_v22, 0.0  ;;  %13734 = vmatpush3.bf16.msra.mxu1 %v13959_v19 }
 0x123   :  { %v13343_v28 = vpop.f32.mrf.mxu0  ;;  %13438 = vmatmul.mubr.msk.bf16.gmra.mxu0 %vm587_vm1, %v13949_v20 }
 0x124   :  { %v1334_v30 = vmax.f32 %v838_v26, 0.0  ;;  %13441 = vmatprep.mubr.msk.bf16.mxu0 %vm587_vm1, %v13950_v23  ;;  %v1460_v34 = vpack.c.bf16 %v1336_v27, %v1335_v31  ;;  %v859_v40 = vadd.f32 %v13343_v28, %v14944_v2 }
 0x125   :  { %v850_v32 = vpop.f32.mrf.mxu0 }
 0x126   :  { %v1459_v33 = vpack.c.bf16 %v1334_v30, %v1333_v29  ;;  %v851_v37 = vadd.f32 %v850_v32, %v14944_v2  ;;  %v1339_v47 = vmax.f32 %v859_v40, 0.0 }
 0x127   :  { %v13344_v35 = vpop.f32.mrf.mxu0 }
 0x128   :  { %v862_v38 = vadd.f32 %v13344_v35, %v14944_v2  ;;  %13473 = vmatprep.mubr.msk.bf16.mxu1 %vm1554_vm2, %v1459_v33  ;;  %v1337_v45 = vmax.f32 %v851_v37, 0.0 }
 0x129   :  { %v853_v41 = vpop.f32.mrf.mxu0  ;;  %13474 = vmatmul.mubr.msk.bf16.gmra.mxu1 %vm1554_vm2, %v1460_v34 }
 0x12a   :  { %v854_v42 = vadd.f32 %v853_v41, %v14944_v2  ;;  %v1340_v43 = vmax.f32 %v862_v38, 0.0 }
 0x12b   :  { %v13347_v44 = vpop.f32.mrf.mxu0  ;;  %13442 = vmatmul.mubr.msk.bf16.gmra.mxu0 %vm587_vm1, %v13951_v36 }
 0x12c   :  { %v1338_v46 = vmax.f32 %v854_v42, 0.0  ;;  %13445 = vmatprep.mubr.msk.bf16.mxu0 %vm587_vm1, %v13952_v39  ;;  %v1462_v50 = vpack.c.bf16 %v1340_v43, %v1339_v47  ;;  %v875_v56 = vadd.f32 %v13347_v44, %v14944_v2 }
 0x12d   :  { %v866_v48 = vpop.f32.mrf.mxu0 }
 0x12e   :  { %v1461_v49 = vpack.c.bf16 %v1338_v46, %v1337_v45  ;;  %v867_v53 = vadd.f32 %v866_v48, %v14944_v2  ;;  %v1343_v63 = vmax.f32 %v875_v56, 0.0 }
 0x12f   :  { %v13348_v51 = vpop.f32.mrf.mxu0 }
 0x130   :  { %v878_v54 = vadd.f32 %v13348_v51, %v14944_v2  ;;  %13477 = vmatprep.mubr.msk.bf16.mxu1 %vm1554_vm2, %v1461_v49  ;;  %v1341_v61 = vmax.f32 %v867_v53, 0.0 }
 0x131   :  { %v869_v57 = vpop.f32.mrf.mxu0  ;;  %13478 = vmatmul.mubr.msk.bf16.gmra.mxu1 %vm1554_vm2, %v1462_v50 }
 0x132   :  { %v870_v58 = vadd.f32 %v869_v57, %v14944_v2  ;;  %v1344_v59 = vmax.f32 %v878_v54, 0.0 }
 0x133   :  { %v13351_v60 = vpop.f32.mrf.mxu0  ;;  %13446 = vmatmul.mubr.msk.bf16.gmra.mxu0 %vm587_vm1, %v13953_v52 }
 0x134   :  { %v1342_v62 = vmax.f32 %v870_v58, 0.0  ;;  %13449 = vmatprep.mubr.msk.bf16.mxu0 %vm587_vm1, %v13954_v55  ;;  %v1464_v4 = vpack.c.bf16 %v1344_v59, %v1343_v63  ;;  %v891_v9 = vadd.f32 %v13351_v60, %v14944_v2 }
 0x135   :  { %v882_v0 = vpop.f32.mrf.mxu0 }
 0x136   :  { %v1463_v1 = vpack.c.bf16 %v1342_v62, %v1341_v61  ;;  %v883_v7 = vadd.f32 %v882_v0, %v14944_v2  ;;  %v1347_v16 = vmax.f32 %v891_v9, 0.0 }
 0x137   :  { %v13352_v5 = vpop.f32.mrf.mxu0 }
 0x138   :  { %v894_v8 = vadd.f32 %v13352_v5, %v14944_v2  ;;  %13481 = vmatprep.mubr.msk.bf16.mxu1 %vm1554_vm2, %v1463_v1  ;;  %v1345_v14 = vmax.f32 %v883_v7, 0.0 }
 0x139   :  { %v885_v10 = vpop.f32.mrf.mxu0  ;;  %13482 = vmatmul.mubr.msk.bf16.gmra.mxu1 %vm1554_vm2, %v1464_v4 }
 0x13a   :  { %v886_v11 = vadd.f32 %v885_v10, %v14944_v2  ;;  %v1348_v12 = vmax.f32 %v894_v8, 0.0 }
 0x13b   :  { %v13355_v13 = vpop.f32.mrf.mxu0  ;;  %13450 = vmatmul.mubr.msk.bf16.gmra.mxu0 %vm587_vm1, %v13956_v6 }
 0x13c   :  { %v1346_v15 = vmax.f32 %v886_v11, 0.0  ;;  %v1466_v20 = vpack.c.bf16 %v1348_v12, %v1347_v16  ;;  %v907_v24 = vadd.f32 %v13355_v13, %v14944_v2 }
 0x13d   :  { %v898_v17 = vpop.f32.mrf.mxu0 }
 0x13e   :  { %v1465_v18 = vpack.c.bf16 %v1346_v15, %v1345_v14  ;;  %v899_v22 = vadd.f32 %v898_v17, %v14944_v2  ;;  %v1351_v31 = vmax.f32 %v907_v24, 0.0 }
 0x13f   :  { %v13356_v21 = vpop.f32.mrf.mxu0 }
 0x140   :  { %v910_v23 = vadd.f32 %v13356_v21, %v14944_v2  ;;  %13485 = vmatprep.mubr.msk.bf16.mxu1 %vm1554_vm2, %v1465_v18  ;;  %v1349_v29 = vmax.f32 %v899_v22, 0.0 }
 0x141   :  { %v901_v25 = vpop.f32.mrf.mxu0  ;;  %13486 = vmatmul.mubr.msk.bf16.gmra.mxu1 %vm1554_vm2, %v1466_v20 }
 0x142   :  { %v902_v26 = vadd.f32 %v901_v25, %v14944_v2  ;;  %v1352_v27 = vmax.f32 %v910_v23, 0.0 }
 0x143   :  { %v13359_v28 = vpop.f32.mrf.mxu0 }
 0x144   :  { %v1350_v30 = vmax.f32 %v902_v26, 0.0  ;;  %v1468_v34 = vpack.c.bf16 %v1352_v27, %v1351_v31  ;;  %v923_v38 = vadd.f32 %v13359_v28, %v14944_v2 }
 0x145   :  { %v914_v32 = vpop.f32.mrf.mxu0 }
 0x146   :  { %v1467_v33 = vpack.c.bf16 %v1350_v30, %v1349_v29  ;;  %v915_v36 = vadd.f32 %v914_v32, %v14944_v2  ;;  %v1355_v45 = vmax.f32 %v923_v38, 0.0 }
 0x147   :  { %v13360_v35 = vpop.f32.mrf.mxu0 }
 0x148   :  { %v926_v37 = vadd.f32 %v13360_v35, %v14944_v2  ;;  %13489 = vmatprep.mubr.msk.bf16.mxu1 %vm1554_vm2, %v1467_v33  ;;  %v1353_v43 = vmax.f32 %v915_v36, 0.0 }
 0x149   :  { %v917_v39 = vpop.f32.mrf.mxu0  ;;  %13490 = vmatmul.mubr.msk.bf16.gmra.mxu1 %vm1554_vm2, %v1468_v34 }
 0x14a   :  { %v918_v40 = vadd.f32 %v917_v39, %v14944_v2  ;;  %v1356_v41 = vmax.f32 %v926_v37, 0.0 }
 0x14b   :  { %v13363_v42 = vpop.f32.mrf.mxu0 }
 0x14c   :  { %v1354_v44 = vmax.f32 %v918_v40, 0.0  ;;  %v1470_v48 = vpack.c.bf16 %v1356_v41, %v1355_v45  ;;  %v939_v52 = vadd.f32 %v13363_v42, %v14944_v2 }
 0x14d   :  { %v930_v46 = vpop.f32.mrf.mxu0 }
 0x14e   :  { %v1469_v47 = vpack.c.bf16 %v1354_v44, %v1353_v43  ;;  %v931_v50 = vadd.f32 %v930_v46, %v14944_v2  ;;  %v1359_v59 = vmax.f32 %v939_v52, 0.0 }
 0x14f   :  { %v13364_v49 = vpop.f32.mrf.mxu0 }
 0x150   :  { %v942_v51 = vadd.f32 %v13364_v49, %v14944_v2  ;;  %13493 = vmatprep.mubr.msk.bf16.mxu1 %vm1554_vm2, %v1469_v47  ;;  %v1357_v57 = vmax.f32 %v931_v50, 0.0 }
 0x151   :  { %v933_v53 = vpop.f32.mrf.mxu0  ;;  %13494 = vmatmul.mubr.msk.bf16.gmra.mxu1 %vm1554_vm2, %v1470_v48 }
 0x152   :  { %v934_v54 = vadd.f32 %v933_v53, %v14944_v2  ;;  %v1360_v55 = vmax.f32 %v942_v51, 0.0 }
 0x153   :  { %v13367_v56 = vpop.f32.mrf.mxu0 }
 0x154   :  { %v1358_v58 = vmax.f32 %v934_v54, 0.0  ;;  %v1472_v62 = vpack.c.bf16 %v1360_v55, %v1359_v59  ;;  %v955_v3 = vadd.f32 %v13367_v56, %v14944_v2 }
 0x155   :  { %v946_v60 = vpop.f32.mrf.mxu0 }
 0x156   :  { %v1471_v61 = vpack.c.bf16 %v1358_v58, %v1357_v57  ;;  %v947_v0 = vadd.f32 %v946_v60, %v14944_v2  ;;  %v1363_v10 = vmax.f32 %v955_v3, 0.0 }
 0x157   :  { %v13368_v63 = vpop.f32.mrf.mxu0 }
 0x158   :  { %v958_v1 = vadd.f32 %v13368_v63, %v14944_v2  ;;  %13497 = vmatprep.mubr.msk.bf16.mxu1 %vm1554_vm2, %v1471_v61  ;;  %v1361_v8 = vmax.f32 %v947_v0, 0.0 }
 0x159   :  { %v949_v4 = vpop.f32.mrf.mxu0  ;;  %13498 = vmatmul.mubr.msk.bf16.gmra.mxu1 %vm1554_vm2, %v1472_v62 }
 0x15a   :  { %v950_v5 = vadd.f32 %v949_v4, %v14944_v2  ;;  %v1364_v6 = vmax.f32 %v958_v1, 0.0 }
 0x15b   :  { %v13371_v7 = vpop.f32.mrf.mxu0 }
 0x15c   :  { %v1362_v9 = vmax.f32 %v950_v5, 0.0  ;;  %v1474_v13 = vpack.c.bf16 %v1364_v6, %v1363_v10  ;;  %v971_v17 = vadd.f32 %v13371_v7, %v14944_v2 }
 0x15d   :  { %v962_v11 = vpop.f32.mrf.mxu0 }
 0x15e   :  { %v1473_v12 = vpack.c.bf16 %v1362_v9, %v1361_v8  ;;  %v963_v15 = vadd.f32 %v962_v11, %v14944_v2  ;;  %v1367_v24 = vmax.f32 %v971_v17, 0.0  ;;  %v13960_v8 = vld [vmem:[#allocation8 + $0x10] sm:$0xff]  }
 0x15f   :  { %v13372_v14 = vpop.f32.mrf.mxu0  ;;  %13735 = vmatprep.subr.bf16.mxu1 %v13960_v8 }
 0x160   :  { %v974_v16 = vadd.f32 %v13372_v14, %v14944_v2  ;;  %13501 = vmatprep.mubr.msk.bf16.mxu1 %vm1554_vm2, %v1473_v12  ;;  %v1365_v22 = vmax.f32 %v963_v15, 0.0  ;;  %13736 = vmatpush3.bf16.msra.mxu1 %v13960_v8 }
 0x161   :  { %v965_v18 = vpop.f32.mrf.mxu0  ;;  %13502 = vmatmul.mubr.msk.bf16.gmra.mxu1 %vm1554_vm2, %v1474_v13 }
 0x162   :  { %v966_v19 = vadd.f32 %v965_v18, %v14944_v2  ;;  %v1368_v20 = vmax.f32 %v974_v16, 0.0 }
 0x163   :  { %v13375_v21 = vpop.f32.mrf.mxu0 }
 0x164   :  { %v1366_v23 = vmax.f32 %v966_v19, 0.0  ;;  %v1476_v27 = vpack.c.bf16 %v1368_v20, %v1367_v24  ;;  %v987_v31 = vadd.f32 %v13375_v21, %v14944_v2 }
 0x165   :  { %v978_v25 = vpop.f32.mrf.mxu0 }
 0x166   :  { %v1475_v26 = vpack.c.bf16 %v1366_v23, %v1365_v22  ;;  %v979_v29 = vadd.f32 %v978_v25, %v14944_v2  ;;  %v1371_v38 = vmax.f32 %v987_v31, 0.0 }
 0x167   :  { %v13376_v28 = vpop.f32.mrf.mxu0 }
 0x168   :  { %v990_v30 = vadd.f32 %v13376_v28, %v14944_v2  ;;  %13505 = vmatprep.mubr.msk.bf16.mxu1 %vm1554_vm2, %v1475_v26  ;;  %v1369_v36 = vmax.f32 %v979_v29, 0.0 }
 0x169   :  { %v981_v32 = vpop.f32.mrf.mxu0  ;;  %13506 = vmatmul.mubr.msk.bf16.gmra.mxu1 %vm1554_vm2, %v1476_v27 }
 0x16a   :  { %v982_v33 = vadd.f32 %v981_v32, %v14944_v2  ;;  %v1372_v34 = vmax.f32 %v990_v30, 0.0 }
 0x16b   :  { %v13379_v35 = vpop.f32.mrf.mxu0 }
 0x16c   :  { %v1370_v37 = vmax.f32 %v982_v33, 0.0  ;;  %v1478_v41 = vpack.c.bf16 %v1372_v34, %v1371_v38  ;;  %v1003_v45 = vadd.f32 %v13379_v35, %v14944_v2 }
 0x16d   :  { %v994_v39 = vpop.f32.mrf.mxu0 }
 0x16e   :  { %v1477_v40 = vpack.c.bf16 %v1370_v37, %v1369_v36  ;;  %v995_v43 = vadd.f32 %v994_v39, %v14944_v2  ;;  %v1375_v52 = vmax.f32 %v1003_v45, 0.0 }
 0x16f   :  { %v13380_v42 = vpop.f32.mrf.mxu0 }
 0x170   :  { %v1006_v44 = vadd.f32 %v13380_v42, %v14944_v2  ;;  %13509 = vmatprep.mubr.msk.bf16.mxu1 %vm1554_vm2, %v1477_v40  ;;  %v1373_v50 = vmax.f32 %v995_v43, 0.0 }
 0x171   :  { %v997_v46 = vpop.f32.mrf.mxu0  ;;  %13510 = vmatmul.mubr.msk.bf16.gmra.mxu1 %vm1554_vm2, %v1478_v41 }
 0x172   :  { %v998_v47 = vadd.f32 %v997_v46, %v14944_v2  ;;  %v1376_v48 = vmax.f32 %v1006_v44, 0.0 }
 0x173   :  { %v13383_v49 = vpop.f32.mrf.mxu0 }
 0x174   :  { %v1374_v51 = vmax.f32 %v998_v47, 0.0  ;;  %v1480_v55 = vpack.c.bf16 %v1376_v48, %v1375_v52  ;;  %v1019_v59 = vadd.f32 %v13383_v49, %v14944_v2 }
 0x175   :  { %v1010_v53 = vpop.f32.mrf.mxu0 }
 0x176   :  { %v1479_v54 = vpack.c.bf16 %v1374_v51, %v1373_v50  ;;  %v1011_v57 = vadd.f32 %v1010_v53, %v14944_v2  ;;  %v1379_v3 = vmax.f32 %v1019_v59, 0.0 }
 0x177   :  { %v13384_v56 = vpop.f32.mrf.mxu0 }
 0x178   :  { %v1022_v58 = vadd.f32 %v13384_v56, %v14944_v2  ;;  %13513 = vmatprep.mubr.msk.bf16.mxu1 %vm1554_vm2, %v1479_v54  ;;  %v1377_v0 = vmax.f32 %v1011_v57, 0.0 }
 0x179   :  { %v1013_v60 = vpop.f32.mrf.mxu0  ;;  %13514 = vmatmul.mubr.msk.bf16.gmra.mxu1 %vm1554_vm2, %v1480_v55 }
 0x17a   :  { %v1014_v61 = vadd.f32 %v1013_v60, %v14944_v2  ;;  %v1380_v62 = vmax.f32 %v1022_v58, 0.0 }
 0x17b   :  { %v13387_v63 = vpop.f32.mrf.mxu0 }
 0x17c   :  { %v1378_v1 = vmax.f32 %v1014_v61, 0.0  ;;  %v1482_v6 = vpack.c.bf16 %v1380_v62, %v1379_v3  ;;  %v1035_v11 = vadd.f32 %v13387_v63, %v14944_v2 }
 0x17d   :  { %v1026_v4 = vpop.f32.mrf.mxu0 }
 0x17e   :  { %v1481_v5 = vpack.c.bf16 %v1378_v1, %v1377_v0  ;;  %v1027_v9 = vadd.f32 %v1026_v4, %v14944_v2  ;;  %v1383_v18 = vmax.f32 %v1035_v11, 0.0 }
 0x17f   :  { %v13388_v7 = vpop.f32.mrf.mxu0 }
 0x180   :  { %v1038_v10 = vadd.f32 %v13388_v7, %v14944_v2  ;;  %13517 = vmatprep.mubr.msk.bf16.mxu1 %vm1554_vm2, %v1481_v5  ;;  %v1381_v16 = vmax.f32 %v1027_v9, 0.0 }
 0x181   :  { %v1029_v12 = vpop.f32.mrf.mxu0  ;;  %13518 = vmatmul.mubr.msk.bf16.gmra.mxu1 %vm1554_vm2, %v1482_v6 }
 0x182   :  { %v1030_v13 = vadd.f32 %v1029_v12, %v14944_v2  ;;  %v1384_v14 = vmax.f32 %v1038_v10, 0.0 }
 0x183   :  { %v13391_v15 = vpop.f32.mrf.mxu0 }
 0x184   :  { %v1382_v17 = vmax.f32 %v1030_v13, 0.0  ;;  %v1484_v21 = vpack.c.bf16 %v1384_v14, %v1383_v18  ;;  %v1051_v25 = vadd.f32 %v13391_v15, %v14944_v2 }
 0x185   :  { %v1042_v19 = vpop.f32.mrf.mxu0 }
 0x186   :  { %v1483_v20 = vpack.c.bf16 %v1382_v17, %v1381_v16  ;;  %v1043_v23 = vadd.f32 %v1042_v19, %v14944_v2  ;;  %v1387_v32 = vmax.f32 %v1051_v25, 0.0 }
 0x187   :  { %v13392_v22 = vpop.f32.mrf.mxu0 }
 0x188   :  { %v1054_v24 = vadd.f32 %v13392_v22, %v14944_v2  ;;  %13521 = vmatprep.mubr.msk.bf16.mxu1 %vm1554_vm2, %v1483_v20  ;;  %v1385_v30 = vmax.f32 %v1043_v23, 0.0 }
 0x189   :  { %v1045_v26 = vpop.f32.mrf.mxu0  ;;  %13522 = vmatmul.mubr.msk.bf16.gmra.mxu1 %vm1554_vm2, %v1484_v21 }
 0x18a   :  { %v1046_v27 = vadd.f32 %v1045_v26, %v14944_v2  ;;  %v1388_v28 = vmax.f32 %v1054_v24, 0.0 }
 0x18b   :  { %v13395_v29 = vpop.f32.mrf.mxu0 }
 0x18c   :  { %v1386_v31 = vmax.f32 %v1046_v27, 0.0  ;;  %v1486_v35 = vpack.c.bf16 %v1388_v28, %v1387_v32  ;;  %v1067_v39 = vadd.f32 %v13395_v29, %v14944_v2 }
 0x18d   :  { %v1058_v33 = vpop.f32.mrf.mxu0 }
 0x18e   :  { %v1485_v34 = vpack.c.bf16 %v1386_v31, %v1385_v30  ;;  %v1059_v37 = vadd.f32 %v1058_v33, %v14944_v2  ;;  %v1391_v46 = vmax.f32 %v1067_v39, 0.0 }
 0x18f   :  { %v13396_v36 = vpop.f32.mrf.mxu0 }
 0x190   :  { %v1070_v38 = vadd.f32 %v13396_v36, %v14944_v2  ;;  %13525 = vmatprep.mubr.msk.bf16.mxu1 %vm1554_vm2, %v1485_v34  ;;  %v1389_v44 = vmax.f32 %v1059_v37, 0.0 }
 0x191   :  { %v1061_v40 = vpop.f32.mrf.mxu0  ;;  %13526 = vmatmul.mubr.msk.bf16.gmra.mxu1 %vm1554_vm2, %v1486_v35 }
 0x192   :  { %v1062_v41 = vadd.f32 %v1061_v40, %v14944_v2  ;;  %v1392_v42 = vmax.f32 %v1070_v38, 0.0 }
 0x193   :  { %v13399_v43 = vpop.f32.mrf.mxu0 }
 0x194   :  { %v1390_v45 = vmax.f32 %v1062_v41, 0.0  ;;  %v1488_v49 = vpack.c.bf16 %v1392_v42, %v1391_v46  ;;  %v1083_v53 = vadd.f32 %v13399_v43, %v14944_v2 }
 0x195   :  { %v1074_v47 = vpop.f32.mrf.mxu0 }
 0x196   :  { %v1487_v48 = vpack.c.bf16 %v1390_v45, %v1389_v44  ;;  %v1075_v51 = vadd.f32 %v1074_v47, %v14944_v2  ;;  %v1395_v60 = vmax.f32 %v1083_v53, 0.0 }
 0x197   :  { %v13400_v50 = vpop.f32.mrf.mxu0 }
 0x198   :  { %v1086_v52 = vadd.f32 %v13400_v50, %v14944_v2  ;;  %13529 = vmatprep.mubr.msk.bf16.mxu1 %vm1554_vm2, %v1487_v48  ;;  %v1393_v58 = vmax.f32 %v1075_v51, 0.0 }
 0x199   :  { %v1077_v54 = vpop.f32.mrf.mxu0  ;;  %13530 = vmatmul.mubr.msk.bf16.gmra.mxu1 %vm1554_vm2, %v1488_v49 }
 0x19a   :  { %v1078_v55 = vadd.f32 %v1077_v54, %v14944_v2  ;;  %v1396_v56 = vmax.f32 %v1086_v52, 0.0 }
 0x19b   :  { %v13403_v57 = vpop.f32.mrf.mxu0 }
 0x19c   :  { %v1394_v59 = vmax.f32 %v1078_v55, 0.0  ;;  %v1490_v63 = vpack.c.bf16 %v1396_v56, %v1395_v60  ;;  %v1099_v4 = vadd.f32 %v13403_v57, %v14944_v2  ;;  %v13961_v56 = vld [vmem:[#allocation8 + $0x8] sm:$0xff]  }
 0x19d   :  { %v1090_v61 = vpop.f32.mrf.mxu0  ;;  %13737 = vmatprep.subr.bf16.mxu1 %v13961_v56 }
 0x19e   :  { %v1489_v62 = vpack.c.bf16 %v1394_v59, %v1393_v58  ;;  %v1091_v1 = vadd.f32 %v1090_v61, %v14944_v2  ;;  %v1399_v11 = vmax.f32 %v1099_v4, 0.0  ;;  %13738 = vmatpush3.bf16.msra.mxu1 %v13961_v56 }
 0x19f   :  { %v13404_v0 = vpop.f32.mrf.mxu0 }
 0x1a0   :  { %v1102_v3 = vadd.f32 %v13404_v0, %v14944_v2  ;;  %13533 = vmatprep.mubr.msk.bf16.mxu1 %vm1554_vm2, %v1489_v62  ;;  %v1397_v9 = vmax.f32 %v1091_v1, 0.0 }
 0x1a1   :  { %v1093_v5 = vpop.f32.mrf.mxu0  ;;  %13534 = vmatmul.mubr.msk.bf16.gmra.mxu1 %vm1554_vm2, %v1490_v63 }
 0x1a2   :  { %v1094_v6 = vadd.f32 %v1093_v5, %v14944_v2  ;;  %v1400_v7 = vmax.f32 %v1102_v3, 0.0  ;;  %v15112_v3 = vpop.f32.mrf.mxu1 }
 0x1a3   :  { %v13407_v8 = vpop.f32.mrf.mxu0 }
 0x1a4   :  { %v1398_v10 = vmax.f32 %v1094_v6, 0.0  ;;  %v1492_v14 = vpack.c.bf16 %v1400_v7, %v1399_v11  ;;  %v1115_v18 = vadd.f32 %v13407_v8, %v14944_v2  ;;  %v15114_v11 = vpop.f32.mrf.mxu1 }
 0x1a5   :  { %v1106_v12 = vpop.f32.mrf.mxu0 }
 0x1a6   :  { %v1491_v13 = vpack.c.bf16 %v1398_v10, %v1397_v9  ;;  %v1107_v16 = vadd.f32 %v1106_v12, %v14944_v2  ;;  %v1403_v25 = vmax.f32 %v1115_v18, 0.0 }
 0x1a7   :  { %v13408_v15 = vpop.f32.mrf.mxu0 }
 0x1a8   :  { %v1118_v17 = vadd.f32 %v13408_v15, %v14944_v2  ;;  %13537 = vmatprep.mubr.msk.bf16.mxu1 %vm1554_vm2, %v1491_v13  ;;  %v1401_v23 = vmax.f32 %v1107_v16, 0.0 }
 0x1a9   :  { %v1109_v19 = vpop.f32.mrf.mxu0  ;;  %13538 = vmatmul.mubr.msk.bf16.gmra.mxu1 %vm1554_vm2, %v1492_v14 }
 0x1aa   :  { %v1110_v20 = vadd.f32 %v1109_v19, %v14944_v2  ;;  %v1404_v21 = vmax.f32 %v1118_v17, 0.0  ;;  %v15122_v19 = vpop.f32.mrf.mxu1 }
 0x1ab   :  { %v13411_v22 = vpop.f32.mrf.mxu0 }
 0x1ac   :  { %v1402_v24 = vmax.f32 %v1110_v20, 0.0  ;;  %v1494_v28 = vpack.c.bf16 %v1404_v21, %v1403_v25  ;;  %v1131_v32 = vadd.f32 %v13411_v22, %v14944_v2 }
 0x1ad   :  { %v1122_v26 = vpop.f32.mrf.mxu0 }
 0x1ae   :  { %v1493_v27 = vpack.c.bf16 %v1402_v24, %v1401_v23  ;;  %v1123_v30 = vadd.f32 %v1122_v26, %v14944_v2  ;;  %v1407_v39 = vmax.f32 %v1131_v32, 0.0 }
 0x1af   :  { %v13412_v29 = vpop.f32.mrf.mxu0 }
 0x1b0   :  { %v1134_v31 = vadd.f32 %v13412_v29, %v14944_v2  ;;  %13541 = vmatprep.mubr.msk.bf16.mxu1 %vm1554_vm2, %v1493_v27  ;;  %v1405_v37 = vmax.f32 %v1123_v30, 0.0  ;;  %v15124_v27 = vpop.f32.mrf.mxu1 }
 0x1b1   :  { %v1125_v33 = vpop.f32.mrf.mxu0  ;;  %13542 = vmatmul.mubr.msk.bf16.gmra.mxu1 %vm1554_vm2, %v1494_v28 }
 0x1b2   :  { %v1126_v34 = vadd.f32 %v1125_v33, %v14944_v2  ;;  %v1408_v35 = vmax.f32 %v1134_v31, 0.0 }
 0x1b3   :  { %v13415_v36 = vpop.f32.mrf.mxu0 }
 0x1b4   :  { %v1406_v38 = vmax.f32 %v1126_v34, 0.0  ;;  %v1496_v42 = vpack.c.bf16 %v1408_v35, %v1407_v39  ;;  %v1147_v46 = vadd.f32 %v13415_v36, %v14944_v2  ;;  %v15132_v35 = vpop.f32.mrf.mxu1 }
 0x1b5   :  { %v1138_v40 = vpop.f32.mrf.mxu0 }
 0x1b6   :  { %v1495_v41 = vpack.c.bf16 %v1406_v38, %v1405_v37  ;;  %v1139_v44 = vadd.f32 %v1138_v40, %v14944_v2  ;;  %v1411_v53 = vmax.f32 %v1147_v46, 0.0 }
 0x1b7   :  { %v13416_v43 = vpop.f32.mrf.mxu0 }
 0x1b8   :  { %v1150_v45 = vadd.f32 %v13416_v43, %v14944_v2  ;;  %13545 = vmatprep.mubr.msk.bf16.mxu1 %vm1554_vm2, %v1495_v41  ;;  %v1409_v51 = vmax.f32 %v1139_v44, 0.0 }
 0x1b9   :  { %v1141_v47 = vpop.f32.mrf.mxu0  ;;  %13546 = vmatmul.mubr.msk.bf16.gmra.mxu1 %vm1554_vm2, %v1496_v42  ;;  %v15134_v42 = vpop.f32.mrf.mxu1 }
 0x1ba   :  { %v1142_v48 = vadd.f32 %v1141_v47, %v14944_v2  ;;  %v1412_v49 = vmax.f32 %v1150_v45, 0.0 }
 0x1bb   :  { %v13419_v50 = vpop.f32.mrf.mxu0 }
 0x1bc   :  { %v1410_v52 = vmax.f32 %v1142_v48, 0.0  ;;  %v1498_v57 = vpack.c.bf16 %v1412_v49, %v1411_v53  ;;  %v1163_v61 = vadd.f32 %v13419_v50, %v14944_v2  ;;  %v15142_v50 = vpop.f32.mrf.mxu1 }
 0x1bd   :  { %v1154_v54 = vpop.f32.mrf.mxu0 }
 0x1be   :  { %v1497_v55 = vpack.c.bf16 %v1410_v52, %v1409_v51  ;;  %v1155_v59 = vadd.f32 %v1154_v54, %v14944_v2  ;;  %v1415_v6 = vmax.f32 %v1163_v61, 0.0 }
 0x1bf   :  { %v13420_v58 = vpop.f32.mrf.mxu0 }
 0x1c0   :  { %v1166_v60 = vadd.f32 %v13420_v58, %v14944_v2  ;;  %13549 = vmatprep.mubr.msk.bf16.mxu1 %vm1554_vm2, %v1497_v55  ;;  %v1413_v4 = vmax.f32 %v1155_v59, 0.0  ;;  %v15144_v58 = vpop.f32.mrf.mxu1 }
 0x1c1   :  { %v1157_v62 = vpop.f32.mrf.mxu0  ;;  %13550 = vmatmul.mubr.msk.bf16.gmra.mxu1 %vm1554_vm2, %v1498_v57 }
 0x1c2   :  { %v1158_v63 = vadd.f32 %v1157_v62, %v14944_v2  ;;  %v1416_v0 = vmax.f32 %v1166_v60, 0.0 }
 0x1c3   :  { %v13423_v1 = vpop.f32.mrf.mxu0 }
 0x1c4   :  { %v1414_v5 = vmax.f32 %v1158_v63, 0.0  ;;  %v1500_v9 = vpack.c.bf16 %v1416_v0, %v1415_v6  ;;  %v1179_v14 = vadd.f32 %v13423_v1, %v14944_v2 }
 0x1c5   :  { %v1170_v7 = vpop.f32.mrf.mxu0 }
 0x1c6   :  { %v1499_v8 = vpack.c.bf16 %v1414_v5, %v1413_v4  ;;  %v1171_v12 = vadd.f32 %v1170_v7, %v14944_v2  ;;  %v1419_v22 = vmax.f32 %v1179_v14, 0.0 }
 0x1c7   :  { %v13424_v10 = vpop.f32.mrf.mxu0 }
 0x1c8   :  { %v1182_v13 = vadd.f32 %v13424_v10, %v14944_v2  ;;  %13553 = vmatprep.mubr.msk.bf16.mxu1 %vm1554_vm2, %v1499_v8  ;;  %v1417_v20 = vmax.f32 %v1171_v12, 0.0 }
 0x1c9   :  { %v1173_v15 = vpop.f32.mrf.mxu0  ;;  %13554 = vmatmul.mubr.msk.bf16.gmra.mxu1 %vm1554_vm2, %v1500_v9  ;;  %v15152_v9 = vld [vmem:[#allocation3 + $0x1] ss:$0 sm:$0xff] }
 0x1ca   :  { %v1174_v16 = vadd.f32 %v1173_v15, %v14944_v2  ;;  %v1420_v17 = vmax.f32 %v1182_v13, 0.0 }
 0x1cb   :  { %v13427_v18 = vpop.f32.mrf.mxu0 }
 0x1cc   :  { %v1418_v21 = vmax.f32 %v1174_v16, 0.0  ;;  %v1502_v25 = vpack.c.bf16 %v1420_v17, %v1419_v22  ;;  %v1195_v30 = vadd.f32 %v13427_v18, %v14944_v2 }
 0x1cd   :  { %v1186_v23 = vpop.f32.mrf.mxu0 }
 0x1ce   :  { %v1501_v24 = vpack.c.bf16 %v1418_v21, %v1417_v20  ;;  %v1187_v28 = vadd.f32 %v1186_v23, %v14944_v2  ;;  %v1423_v38 = vmax.f32 %v1195_v30, 0.0 }
 0x1cf   :  { %v13428_v26 = vpop.f32.mrf.mxu0 }
 0x1d0   :  { %v1198_v29 = vadd.f32 %v13428_v26, %v14944_v2  ;;  %13557 = vmatprep.mubr.msk.bf16.mxu1 %vm1554_vm2, %v1501_v24  ;;  %v1421_v36 = vmax.f32 %v1187_v28, 0.0 }
 0x1d1   :  { %v1189_v31 = vpop.f32.mrf.mxu0  ;;  %13558 = vmatmul.mubr.msk.bf16.gmra.mxu1 %vm1554_vm2, %v1502_v25 }
 0x1d2   :  { %v1190_v32 = vadd.f32 %v1189_v31, %v14944_v2  ;;  %v1424_v33 = vmax.f32 %v1198_v29, 0.0 }
 0x1d3   :  { %v13431_v34 = vpop.f32.mrf.mxu0 }
 0x1d4   :  { %v1422_v37 = vmax.f32 %v1190_v32, 0.0  ;;  %v1504_v41 = vpack.c.bf16 %v1424_v33, %v1423_v38  ;;  %v1211_v46 = vadd.f32 %v13431_v34, %v14944_v2 }
 0x1d5   :  { %v1202_v39 = vpop.f32.mrf.mxu0 }
 0x1d6   :  { %v1503_v40 = vpack.c.bf16 %v1422_v37, %v1421_v36  ;;  %v1203_v44 = vadd.f32 %v1202_v39, %v14944_v2  ;;  %v1427_v54 = vmax.f32 %v1211_v46, 0.0 }
 0x1d7   :  { %v13432_v43 = vpop.f32.mrf.mxu0 }
 0x1d8   :  { %v1214_v45 = vadd.f32 %v13432_v43, %v14944_v2  ;;  %13561 = vmatprep.mubr.msk.bf16.mxu1 %vm1554_vm2, %v1503_v40  ;;  %v1425_v52 = vmax.f32 %v1203_v44, 0.0 }
 0x1d9   :  { %v1205_v47 = vpop.f32.mrf.mxu0  ;;  %13562 = vmatmul.mubr.msk.bf16.gmra.mxu1 %vm1554_vm2, %v1504_v41 }
 0x1da   :  { %v1206_v48 = vadd.f32 %v1205_v47, %v14944_v2  ;;  %v1428_v49 = vmax.f32 %v1214_v45, 0.0 }
 0x1db   :  { %v13435_v51 = vpop.f32.mrf.mxu0 }
 0x1dc   :  { %v1426_v53 = vmax.f32 %v1206_v48, 0.0  ;;  %v1506_v57 = vpack.c.bf16 %v1428_v49, %v1427_v54  ;;  %v1227_v62 = vadd.f32 %v13435_v51, %v14944_v2 }
 0x1dd   :  { %v1218_v55 = vpop.f32.mrf.mxu0 }
 0x1de   :  { %v1505_v56 = vpack.c.bf16 %v1426_v53, %v1425_v52  ;;  %v1219_v60 = vadd.f32 %v1218_v55, %v14944_v2  ;;  %v1431_v10 = vmax.f32 %v1227_v62, 0.0 }
 0x1df   :  { %v13436_v59 = vpop.f32.mrf.mxu0 }
 0x1e0   :  { %v1230_v61 = vadd.f32 %v13436_v59, %v14944_v2  ;;  %13565 = vmatprep.mubr.msk.bf16.mxu1 %vm1554_vm2, %v1505_v56  ;;  %v1429_v7 = vmax.f32 %v1219_v60, 0.0 }
 0x1e1   :  { %v1221_v63 = vpop.f32.mrf.mxu0  ;;  %v13471_v0 = vpop.f32.mrf.mxu1  ;;  %13566 = vmatmul.mubr.msk.bf16.gmra.mxu1 %vm1554_vm2, %v1506_v57 }
 0x1e2   :  { %v1222_v1 = vadd.f32 %v1221_v63, %v14944_v2  ;;  %v1432_v4 = vmax.f32 %v1230_v61, 0.0  ;;  %v1790_v18 = vadd.f32 %v13471_v0, %v15152_v9 }
 0x1e3   :  { %v13439_v5 = vpop.f32.mrf.mxu0  ;;  %v1781_v6 = vpop.f32.mrf.mxu1 }
 0x1e4   :  { %v1430_v8 = vmax.f32 %v1222_v1, 0.0  ;;  %v1782_v15 = vadd.f32 %v1781_v6, %v15152_v9  ;;  %v1508_v17 = vpack.c.bf16 %v1432_v4, %v1431_v10  ;;  %v1243_v25 = vadd.f32 %v13439_v5, %v14944_v2 }
 0x1e5   :  { %v1234_v12 = vpop.f32.mrf.mxu0  ;;  %v13472_v13 = vpop.f32.mrf.mxu1  ;;  %v2294_v33 = vmax.f32 %v1790_v18, 0.0 }
 0x1e6   :  { %v1507_v14 = vpack.c.bf16 %v1430_v8, %v1429_v7  ;;  %v1793_v16 = vadd.f32 %v13472_v13, %v15152_v9  ;;  %v1235_v22 = vadd.f32 %v1234_v12, %v14944_v2  ;;  %v2292_v30 = vmax.f32 %v1782_v15, 0.0 }
 0x1e7   :  { %v13440_v20 = vpop.f32.mrf.mxu0  ;;  %v1784_v21 = vpop.f32.mrf.mxu1  ;;  %v1435_v41 = vmax.f32 %v1243_v25, 0.0 }
 0x1e8   :  { %v1246_v23 = vadd.f32 %v13440_v20, %v14944_v2  ;;  %v1785_v24 = vadd.f32 %v1784_v21, %v15152_v9  ;;  %13569 = vmatprep.mubr.msk.bf16.mxu1 %vm1554_vm2, %v1507_v14  ;;  %v2295_v26 = vmax.f32 %v1793_v16, 0.0  ;;  %v1433_v38 = vmax.f32 %v1235_v22, 0.0 }
 0x1e9   :  { %v1237_v28 = vpop.f32.mrf.mxu0  ;;  %v13475_v29 = vpop.f32.mrf.mxu1  ;;  %13570 = vmatmul.mubr.msk.bf16.gmra.mxu1 %vm1554_vm2, %v1508_v17 }
 0x1ea   :  { %v2293_v31 = vmax.f32 %v1785_v24, 0.0  ;;  %v1238_v32 = vadd.f32 %v1237_v28, %v14944_v2  ;;  %v1436_v34 = vmax.f32 %v1246_v23, 0.0  ;;  %v2421_v43 = vpack.c.bf16 %v2295_v26, %v2294_v33  ;;  %v15181_v23 = vld [vmem:[#allocation3] ss:$0 sm:$0xff] }
 0x1eb   :  { %v13443_v36 = vpop.f32.mrf.mxu0  ;;  %v1797_v37 = vpop.f32.mrf.mxu1  ;;  %v1806_v51 = vadd.f32 %v13475_v29, %v15152_v9 }
 0x1ec   :  { %v2420_v39 = vpack.c.bf16 %v2293_v31, %v2292_v30  ;;  %v1434_v40 = vmax.f32 %v1238_v32, 0.0  ;;  %v1798_v47 = vadd.f32 %v1797_v37, %v15152_v9  ;;  %v1510_v49 = vpack.c.bf16 %v1436_v34, %v1435_v41 }
 0x1ed   :  { %v1250_v44 = vpop.f32.mrf.mxu0  ;;  %v13476_v45 = vpop.f32.mrf.mxu1  ;;  %v1259_v57 = vadd.f32 %v13443_v36, %v14944_v2  ;;  %v2298_v1 = vmax.f32 %v1806_v51, 0.0 }
 0x1ee   :  { %v1509_v46 = vpack.c.bf16 %v1434_v40, %v1433_v38  ;;  %v1809_v48 = vadd.f32 %v13476_v45, %v15152_v9  ;;  %13605 = vmatprep.mubr.msk.bf16.mxu0 %vm1554_vm2, %v2420_v39  ;;  %v1251_v54 = vadd.f32 %v1250_v44, %v14944_v2  ;;  %v2296_v62 = vmax.f32 %v1798_v47, 0.0 }
 0x1ef   :  { %v13444_v52 = vpop.f32.mrf.mxu0  ;;  %v1800_v53 = vpop.f32.mrf.mxu1  ;;  %13606 = vmatmul.mubr.msk.bf16.vlgmr.msra.gmra.mxu0 %vm1554_vm2, %v2421_v43  ;;  %v1439_v12 = vmax.f32 %v1259_v57, 0.0 }
 0x1f0   :  { %v1262_v55 = vadd.f32 %v13444_v52, %v14944_v2  ;;  %v1801_v56 = vadd.f32 %v1800_v53, %v15152_v9  ;;  %13573 = vmatprep.mubr.msk.bf16.mxu1 %vm1554_vm2, %v1509_v46  ;;  %v2299_v59 = vmax.f32 %v1809_v48, 0.0  ;;  %v1437_v7 = vmax.f32 %v1251_v54, 0.0  ;;  %v13962_v52 = vld [vmem:[#allocation8] sm:$0xff]  }
 0x1f1   :  { %v1253_v60 = vpop.f32.mrf.mxu0  ;;  %v13479_v61 = vpop.f32.mrf.mxu1  ;;  %13574 = vmatmul.mubr.msk.bf16.gmra.mxu1 %vm1554_vm2, %v1510_v49  ;;  %v1299_v53 = vadd.f32 %v15181_v23, %v15114_v11  ;;  %v1302_v54 = vadd.f32 %v15181_v23, %v15124_v27  ;;  %13739 = vmatprep.subr.bf16.mxu1 %v13962_v52 }
 0x1f2   :  { %v2297_v63 = vmax.f32 %v1801_v56, 0.0  ;;  %v1254_v0 = vadd.f32 %v1253_v60, %v14944_v2  ;;  %v1440_v4 = vmax.f32 %v1262_v55, 0.0  ;;  %v2423_v13 = vpack.c.bf16 %v2299_v59, %v2298_v1  ;;  %13740 = vmatpush3.bf16.msra.mxu1 %v13962_v52 }
 0x1f3   :  { %v13447_v5 = vpop.f32.mrf.mxu0  ;;  %v1813_v6 = vpop.f32.mrf.mxu1  ;;  %v1822_v2 = vadd.f32 %v13479_v61, %v15152_v9 }
 0x1f4   :  { %v2422_v8 = vpack.c.bf16 %v2297_v63, %v2296_v62  ;;  %v1438_v10 = vmax.f32 %v1254_v0, 0.0  ;;  %v1814_v17 = vadd.f32 %v1813_v6, %v15152_v9  ;;  %v1512_v20 = vpack.c.bf16 %v1440_v4, %v1439_v12 }
 0x1f5   :  { %v1266_v14 = vpop.f32.mrf.mxu0  ;;  %v13480_v15 = vpop.f32.mrf.mxu1  ;;  %v1275_v28 = vadd.f32 %v15181_v23, %v13447_v5  ;;  %v2302_v36 = vmax.f32 %v1822_v2, 0.0  ;;  %v1449_v6 = vmax.f32 %v1299_v53, 0.0  ;;  %v1450_v12 = vmax.f32 %v1302_v54, 0.0 }
 0x1f6   :  { %v1511_v16 = vpack.c.bf16 %v1438_v10, %v1437_v7  ;;  %v1825_v18 = vadd.f32 %v13480_v15, %v15152_v9  ;;  %13609 = vmatprep.mubr.msk.bf16.mxu0 %vm1554_vm2, %v2422_v8  ;;  %v1267_v24 = vadd.f32 %v15181_v23, %v1266_v14  ;;  %v2300_v32 = vmax.f32 %v1814_v17, 0.0 }
 0x1f7   :  { %v13448_v21 = vpop.f32.mrf.mxu0  ;;  %v1816_v22 = vpop.f32.mrf.mxu1  ;;  %13610 = vmatmul.mubr.msk.bf16.gmra.mxu0 %vm1554_vm2, %v2423_v13  ;;  %v1443_v44 = vmax.f32 %v1275_v28, 0.0 }
 0x1f8   :  { %v1278_v25 = vadd.f32 %v15181_v23, %v13448_v21  ;;  %v1817_v26 = vadd.f32 %v1816_v22, %v15152_v9  ;;  %13577 = vmatprep.mubr.msk.bf16.mxu1 %vm1554_vm2, %v1511_v16  ;;  %v2303_v29 = vmax.f32 %v1825_v18, 0.0  ;;  %v1441_v40 = vmax.f32 %v1267_v24, 0.0 }
 0x1f9   :  { %v1269_v30 = vpop.f32.mrf.mxu0  ;;  %v13483_v31 = vpop.f32.mrf.mxu1  ;;  %13578 = vmatmul.mubr.msk.bf16.gmra.mxu1 %vm1554_vm2, %v1512_v20  ;;  %v1307_v22 = vadd.f32 %v15181_v23, %v15112_v3  ;;  %v1310_v24 = vadd.f32 %v15181_v23, %v15122_v19 }
 0x1fa   :  { %v2301_v33 = vmax.f32 %v1817_v26, 0.0  ;;  %v1270_v34 = vadd.f32 %v15181_v23, %v1269_v30  ;;  %v1444_v37 = vmax.f32 %v1278_v25, 0.0  ;;  %v2425_v45 = vpack.c.bf16 %v2303_v29, %v2302_v36 }
 0x1fb   :  { %v13451_v38 = vpop.f32.mrf.mxu0  ;;  %v1829_v39 = vpop.f32.mrf.mxu1  ;;  %v1838_v56 = vadd.f32 %v13483_v31, %v15152_v9  ;;  %v1517_v29 = vpack.c.bf16 %v1450_v12, %v1449_v6  ;;  %v1315_v30 = vadd.f32 %v15181_v23, %v15134_v42  ;;  %v1318_v31 = vadd.f32 %v15181_v23, %v15144_v58 }
 0x1fc   :  { %v2424_v41 = vpack.c.bf16 %v2301_v33, %v2300_v32  ;;  %v1442_v43 = vmax.f32 %v1270_v34, 0.0  ;;  %v1830_v49 = vadd.f32 %v1829_v39, %v15152_v9  ;;  %v1514_v55 = vpack.c.bf16 %v1444_v37, %v1443_v44 }
 0x1fd   :  { %v1282_v46 = vpop.f32.mrf.mxu0  ;;  %v13484_v47 = vpop.f32.mrf.mxu1  ;;  %v1291_v11 = vadd.f32 %v15181_v23, %v13451_v38  ;;  %v2306_v7 = vmax.f32 %v1838_v56, 0.0  ;;  %v1451_v36 = vmax.f32 %v1307_v22, 0.0  ;;  %v1452_v37 = vmax.f32 %v1310_v24, 0.0 }
 0x1fe   :  { %v1513_v48 = vpack.c.bf16 %v1442_v43, %v1441_v40  ;;  %v1841_v51 = vadd.f32 %v13484_v47, %v15152_v9  ;;  %13613 = vmatprep.mubr.msk.bf16.mxu0 %vm1554_vm2, %v2424_v41  ;;  %v1283_v60 = vadd.f32 %v15181_v23, %v1282_v46  ;;  %v2304_v1 = vmax.f32 %v1830_v49, 0.0 }
 0x1ff   :  { %v13452_v57 = vpop.f32.mrf.mxu0  ;;  %v1832_v59 = vpop.f32.mrf.mxu1  ;;  %13614 = vmatmul.mubr.msk.bf16.gmra.mxu0 %vm1554_vm2, %v2425_v45  ;;  %v1447_v16 = vmax.f32 %v1291_v11, 0.0  ;;  %v1453_v42 = vmax.f32 %v1315_v30, 0.0  ;;  %v1454_v40 = vmax.f32 %v1318_v31, 0.0  ;;  %v1518_v46 = vpack.c.bf16 %v1452_v37, %v1451_v36 }
 0x200   :  { %v1294_v61 = vadd.f32 %v15181_v23, %v13452_v57  ;;  %v1833_v62 = vadd.f32 %v1832_v59, %v15152_v9  ;;  %13581 = vmatprep.mubr.msk.bf16.mxu1 %vm1554_vm2, %v1513_v48  ;;  %v2307_v63 = vmax.f32 %v1841_v51, 0.0  ;;  %v1445_v13 = vmax.f32 %v1283_v60, 0.0 }
 0x201   :  { %v1285_v27 = vpop.f32.mrf.mxu0  ;;  %v13487_v0 = vpop.f32.mrf.mxu1  ;;  %13582 = vmatmul.mubr.msk.bf16.gmra.mxu1 %vm1554_vm2, %v1514_v55  ;;  %v1323_v47 = vadd.f32 %v15181_v23, %v15132_v35  ;;  %v1326_v48 = vadd.f32 %v15181_v23, %v15142_v50  ;;  %v1519_v52 = vpack.c.bf16 %v1454_v40, %v1453_v42 }
 0x202   :  { %v2305_v4 = vmax.f32 %v1833_v62, 0.0  ;;  %v1286_v5 = vadd.f32 %v15181_v23, %v1285_v27  ;;  %v1448_v8 = vmax.f32 %v1294_v61, 0.0  ;;  %v2427_v17 = vpack.c.bf16 %v2307_v63, %v2306_v7 }
 0x203   :  { %v1845_v10 = vpop.f32.mrf.mxu1  ;;  %v1854_v26 = vadd.f32 %v13487_v0, %v15152_v9  ;;  %v1455_v35 = vmax.f32 %v1323_v47, 0.0  ;;  %v1456_v59 = vmax.f32 %v1326_v48, 0.0 }
 0x204   :  { %v2426_v14 = vpack.c.bf16 %v2305_v4, %v2304_v1  ;;  %v1446_v15 = vmax.f32 %v1286_v5, 0.0  ;;  %v1846_v2 = vadd.f32 %v1845_v10, %v15152_v9  ;;  %v1516_v25 = vpack.c.bf16 %v1448_v8, %v1447_v16 }
 0x205   :  { %v13488_v18 = vpop.f32.mrf.mxu1  ;;  %v2310_v38 = vmax.f32 %v1854_v26, 0.0  ;;  %v1520_v27 = vpack.c.bf16 %v1456_v59, %v1455_v35 }
 0x206   :  { %v1515_v20 = vpack.c.bf16 %v1446_v15, %v1445_v13  ;;  %v1857_v21 = vadd.f32 %v13488_v18, %v15152_v9  ;;  %13617 = vmatprep.mubr.msk.bf16.mxu0 %vm1554_vm2, %v2426_v14  ;;  %v2308_v19 = vmax.f32 %v1846_v2, 0.0 }
 0x207   :  { %v1848_v28 = vpop.f32.mrf.mxu1  ;;  %13618 = vmatmul.mubr.msk.bf16.gmra.mxu0 %vm1554_vm2, %v2427_v17 }
 0x208   :  { %v1849_v32 = vadd.f32 %v1848_v28, %v15152_v9  ;;  %13585 = vmatprep.mubr.msk.bf16.mxu1 %vm1554_vm2, %v1515_v20  ;;  %v2311_v3 = vmax.f32 %v1857_v21, 0.0 }
 0x209   :  { %v13491_v33 = vpop.f32.mrf.mxu1  ;;  %13586 = vmatmul.mubr.msk.bf16.gmra.mxu1 %vm1554_vm2, %v1516_v25 }
 0x20a   :  { %v2309_v34 = vmax.f32 %v1849_v32, 0.0  ;;  %13589 = vmatprep.mubr.msk.bf16.mxu1 %vm1554_vm2, %v1517_v29  ;;  %v2429_v58 = vpack.c.bf16 %v2311_v3, %v2310_v38  ;;  %v1870_v49 = vadd.f32 %v13491_v33, %v15152_v9 }
 0x20b   :  { %v1861_v39 = vpop.f32.mrf.mxu1 }
 0x20c   :  { %v2428_v41 = vpack.c.bf16 %v2309_v34, %v2308_v19  ;;  %v1862_v44 = vadd.f32 %v1861_v39, %v15152_v9  ;;  %v2314_v60 = vmax.f32 %v1870_v49, 0.0 }
 0x20d   :  { %v13492_v43 = vpop.f32.mrf.mxu1 }
 0x20e   :  { %v1873_v45 = vadd.f32 %v13492_v43, %v15152_v9  ;;  %13621 = vmatprep.mubr.msk.bf16.mxu0 %vm1554_vm2, %v2428_v41  ;;  %v2312_v56 = vmax.f32 %v1862_v44, 0.0 }
 0x20f   :  { %v1864_v51 = vpop.f32.mrf.mxu1  ;;  %13622 = vmatmul.mubr.msk.bf16.gmra.mxu0 %vm1554_vm2, %v2429_v58 }
 0x210   :  { %v1865_v53 = vadd.f32 %v1864_v51, %v15152_v9  ;;  %v2315_v54 = vmax.f32 %v1873_v45, 0.0 }
 0x211   :  { %v13495_v55 = vpop.f32.mrf.mxu1  ;;  %13590 = vmatmul.mubr.msk.bf16.gmra.mxu1 %vm1554_vm2, %v1518_v46 }
 0x212   :  { %v2313_v57 = vmax.f32 %v1865_v53, 0.0  ;;  %13593 = vmatprep.mubr.msk.bf16.mxu1 %vm1554_vm2, %v1519_v52  ;;  %v2431_v61 = vpack.c.bf16 %v2315_v54, %v2314_v60  ;;  %v1886_v0 = vadd.f32 %v13495_v55, %v15152_v9 }
 0x213   :  { %v1877_v50 = vpop.f32.mrf.mxu1 }
 0x214   :  { %v2430_v23 = vpack.c.bf16 %v2313_v57, %v2312_v56  ;;  %v1878_v11 = vadd.f32 %v1877_v50, %v15152_v9  ;;  %v2318_v10 = vmax.f32 %v1886_v0, 0.0 }
 0x215   :  { %v13496_v62 = vpop.f32.mrf.mxu1 }
 0x216   :  { %v1889_v63 = vadd.f32 %v13496_v62, %v15152_v9  ;;  %13625 = vmatprep.mubr.msk.bf16.mxu0 %vm1554_vm2, %v2430_v23  ;;  %v2316_v7 = vmax.f32 %v1878_v11, 0.0 }
 0x217   :  { %v1880_v1 = vpop.f32.mrf.mxu1  ;;  %13626 = vmatmul.mubr.msk.bf16.gmra.mxu0 %vm1554_vm2, %v2431_v61 }
 0x218   :  { %v1881_v4 = vadd.f32 %v1880_v1, %v15152_v9  ;;  %v2319_v5 = vmax.f32 %v1889_v63, 0.0 }
 0x219   :  { %v13499_v6 = vpop.f32.mrf.mxu1  ;;  %13594 = vmatmul.mubr.msk.bf16.gmra.mxu1 %vm1554_vm2, %v1520_v27 }
 0x21a   :  { %v2317_v8 = vmax.f32 %v1881_v4, 0.0  ;;  %v2433_v14 = vpack.c.bf16 %v2319_v5, %v2318_v10  ;;  %v1902_v18 = vadd.f32 %v13499_v6, %v15152_v9 }
 0x21b   :  { %v1893_v12 = vpop.f32.mrf.mxu1 }
 0x21c   :  { %v2432_v13 = vpack.c.bf16 %v2317_v8, %v2316_v7  ;;  %v1894_v16 = vadd.f32 %v1893_v12, %v15152_v9  ;;  %v2322_v26 = vmax.f32 %v1902_v18, 0.0  ;;  %v4464_v7 = vld [vmem:[%s18171_s6 + $0x1c0] sm:$0xff]  ;;  %v15281_v18 = vld [vmem:[%s18171_s6 + $0x1c8] sm:$0xff] }
 0x21d   :  { %v13500_v15 = vpop.f32.mrf.mxu1  ;;  %v4468_v8 = vld [vmem:[%s18171_s6 + $0x1e0] sm:$0xff] }
 0x21e   :  { %v1905_v17 = vadd.f32 %v13500_v15, %v15152_v9  ;;  %13629 = vmatprep.mubr.msk.bf16.mxu0 %vm1554_vm2, %v2432_v13  ;;  %v2320_v24 = vmax.f32 %v1894_v16, 0.0  ;;  %v12696_v13 = vcombine.low %v4464_v7, %v4468_v8 }
 0x21f   :  { %v1896_v20 = vpop.f32.mrf.mxu1  ;;  %13630 = vmatmul.mubr.msk.bf16.gmra.mxu0 %vm1554_vm2, %v2433_v14  ;;  %v12697_v14 = vcombine.high %v4464_v7, %v4468_v8  ;;  %v4456_v8 = vld [vmem:[%s18171_s6 + $0x180] sm:$0xff] }
 0x220   :  { %v1897_v2 = vadd.f32 %v1896_v20, %v15152_v9  ;;  %v2323_v21 = vmax.f32 %v1905_v17, 0.0  ;;  %v15286_v20 = vld [vmem:[%s18171_s6 + $0x1e8] sm:$0xff] }
 0x221   :  { %v13503_v22 = vpop.f32.mrf.mxu1  ;;  %4837 = vmatprep.subr.bf16.mxu0 %v12697_v14 }
 0x222   :  { %v2321_v25 = vmax.f32 %v1897_v2, 0.0  ;;  %v2435_v30 = vpack.c.bf16 %v2323_v21, %v2322_v26  ;;  %v1918_v33 = vadd.f32 %v13503_v22, %v15152_v9  ;;  %4838 = vmatpush1.bf16.msra.mxu0 %v12696_v13  ;;  %v12698_v22 = vcombine.low %v15281_v18, %v15286_v20 }
 0x223   :  { %v1909_v28 = vpop.f32.mrf.mxu1 }
 0x224   :  { %v2434_v29 = vpack.c.bf16 %v2321_v25, %v2320_v24  ;;  %v1910_v32 = vadd.f32 %v1909_v28, %v15152_v9  ;;  %v2326_v42 = vmax.f32 %v1918_v33, 0.0  ;;  %v12699_v24 = vcombine.high %v15281_v18, %v15286_v20  ;;  %v4441_v18 = vld [vmem:[%s18171_s6 + $0x108] sm:$0xff] }
 0x225   :  { %v13504_v31 = vpop.f32.mrf.mxu1  ;;  %v4445_v20 = vld [vmem:[%s18171_s6 + $0x128] sm:$0xff] }
 0x226   :  { %v1921_v3 = vadd.f32 %v13504_v31, %v15152_v9  ;;  %13633 = vmatprep.mubr.msk.bf16.mxu0 %vm1554_vm2, %v2434_v29  ;;  %v2324_v38 = vmax.f32 %v1910_v32, 0.0  ;;  %5510 = vmatprep.subr.bf16.mxu1 %v12699_v24 }
 0x227   :  { %v1912_v19 = vpop.f32.mrf.mxu1  ;;  %13634 = vmatmul.mubr.msk.bf16.gmra.mxu0 %vm1554_vm2, %v2435_v30 }
 0x228   :  { %v1913_v34 = vadd.f32 %v1912_v19, %v15152_v9  ;;  %v2327_v36 = vmax.f32 %v1921_v3, 0.0 }
 0x229   :  { %v13507_v37 = vpop.f32.mrf.mxu1 }
 0x22a   :  { %v2325_v39 = vmax.f32 %v1913_v34, 0.0  ;;  %v2437_v58 = vpack.c.bf16 %v2327_v36, %v2326_v42  ;;  %v1934_v46 = vadd.f32 %v13507_v37, %v15152_v9 }
 0x22b   :  { %v1925_v40 = vpop.f32.mrf.mxu1 }
 0x22c   :  { %v2436_v41 = vpack.c.bf16 %v2325_v39, %v2324_v38  ;;  %v1926_v44 = vadd.f32 %v1925_v40, %v15152_v9  ;;  %v2330_v54 = vmax.f32 %v1934_v46, 0.0 }
 0x22d   :  { %v13508_v43 = vpop.f32.mrf.mxu1 }
 0x22e   :  { %v1937_v45 = vadd.f32 %v13508_v43, %v15152_v9  ;;  %13637 = vmatprep.mubr.msk.bf16.mxu0 %vm1554_vm2, %v2436_v41  ;;  %v2328_v52 = vmax.f32 %v1926_v44, 0.0 }
 0x22f   :  { %v1928_v47 = vpop.f32.mrf.mxu1  ;;  %13638 = vmatmul.mubr.msk.bf16.gmra.mxu0 %vm1554_vm2, %v2437_v58 }
 0x230   :  { %v1929_v48 = vadd.f32 %v1928_v47, %v15152_v9  ;;  %v2331_v49 = vmax.f32 %v1937_v45, 0.0 }
 0x231   :  { %v13511_v51 = vpop.f32.mrf.mxu1 }
 0x232   :  { %v2329_v53 = vmax.f32 %v1929_v48, 0.0  ;;  %v2439_v57 = vpack.c.bf16 %v2331_v49, %v2330_v54  ;;  %v1950_v50 = vadd.f32 %v13511_v51, %v15152_v9 }
 0x233   :  { %v1941_v55 = vpop.f32.mrf.mxu1 }
 0x234   :  { %v2438_v56 = vpack.c.bf16 %v2329_v53, %v2328_v52  ;;  %v1942_v59 = vadd.f32 %v1941_v55, %v15152_v9  ;;  %v2334_v0 = vmax.f32 %v1950_v50, 0.0 }
 0x235   :  { %v13512_v35 = vpop.f32.mrf.mxu1 }
 0x236   :  { %v1953_v60 = vadd.f32 %v13512_v35, %v15152_v9  ;;  %13641 = vmatprep.mubr.msk.bf16.mxu0 %vm1554_vm2, %v2438_v56  ;;  %v2332_v63 = vmax.f32 %v1942_v59, 0.0 }
 0x237   :  { %v1944_v23 = vpop.f32.mrf.mxu1  ;;  %13642 = vmatmul.mubr.msk.bf16.gmra.mxu0 %vm1554_vm2, %v2439_v57 }
 0x238   :  { %v1945_v61 = vadd.f32 %v1944_v23, %v15152_v9  ;;  %v2335_v62 = vmax.f32 %v1953_v60, 0.0 }
 0x239   :  { %v13515_v11 = vpop.f32.mrf.mxu1 }
 0x23a   :  { %v2333_v27 = vmax.f32 %v1945_v61, 0.0  ;;  %v2441_v5 = vpack.c.bf16 %v2335_v62, %v2334_v0  ;;  %v1966_v15 = vadd.f32 %v13515_v11, %v15152_v9 }
 0x23b   :  { %v1957_v1 = vpop.f32.mrf.mxu1 }
 0x23c   :  { %v2440_v4 = vpack.c.bf16 %v2333_v27, %v2332_v63  ;;  %v1958_v10 = vadd.f32 %v1957_v1, %v15152_v9  ;;  %v2338_v28 = vmax.f32 %v1966_v15, 0.0 }
 0x23d   :  { %v13516_v6 = vpop.f32.mrf.mxu1 }
 0x23e   :  { %v1969_v12 = vadd.f32 %v13516_v6, %v15152_v9  ;;  %13645 = vmatprep.mubr.msk.bf16.mxu0 %vm1554_vm2, %v2440_v4  ;;  %v2336_v25 = vmax.f32 %v1958_v10, 0.0  ;;  %v4460_v10 = vld [vmem:[%s18171_s6 + $0x1a0] sm:$0xff] }
 0x23f   :  { %v1960_v16 = vpop.f32.mrf.mxu1  ;;  %13646 = vmatmul.mubr.msk.bf16.gmra.mxu0 %vm1554_vm2, %v2441_v5  ;;  %v12688_v14 = vcombine.low %v4456_v8, %v4460_v10  ;;  %v12689_v15 = vcombine.high %v4456_v8, %v4460_v10 }
 0x240   :  { %v1961_v17 = vadd.f32 %v1960_v16, %v15152_v9  ;;  %v2339_v2 = vmax.f32 %v1969_v12, 0.0 }
 0x241   :  { %v13519_v21 = vpop.f32.mrf.mxu1  ;;  %4839 = vmatprep.subr.bf16.mxu0 %v12689_v15 }
 0x242   :  { %v2337_v26 = vmax.f32 %v1961_v17, 0.0  ;;  %v2443_v31 = vpack.c.bf16 %v2339_v2, %v2338_v28  ;;  %v1982_v19 = vadd.f32 %v13519_v21, %v15152_v9  ;;  %4840 = vmatpush1.bf16.msra.mxu0 %v12688_v14 }
 0x243   :  { %v1973_v29 = vpop.f32.mrf.mxu1 }
 0x244   :  { %v2442_v30 = vpack.c.bf16 %v2337_v26, %v2336_v25  ;;  %v1974_v3 = vadd.f32 %v1973_v29, %v15152_v9  ;;  %v2342_v40 = vmax.f32 %v1982_v19, 0.0 }
 0x245   :  { %v13520_v32 = vpop.f32.mrf.mxu1 }
 0x246   :  { %v1985_v33 = vadd.f32 %v13520_v32, %v15152_v9  ;;  %13649 = vmatprep.mubr.msk.bf16.mxu0 %vm1554_vm2, %v2442_v30  ;;  %v2340_v39 = vmax.f32 %v1974_v3, 0.0 }
 0x247   :  { %v1976_v34 = vpop.f32.mrf.mxu1  ;;  %13650 = vmatmul.mubr.msk.bf16.gmra.mxu0 %vm1554_vm2, %v2443_v31 }
 0x248   :  { %v1977_v36 = vadd.f32 %v1976_v34, %v15152_v9  ;;  %v2343_v37 = vmax.f32 %v1985_v33, 0.0 }
 0x249   :  { %v13523_v38 = vpop.f32.mrf.mxu1 }
 0x24a   :  { %v2341_v42 = vmax.f32 %v1977_v36, 0.0  ;;  %v2445_v43 = vpack.c.bf16 %v2343_v37, %v2342_v40  ;;  %v1998_v47 = vadd.f32 %v13523_v38, %v15152_v9 }
 0x24b   :  { %v1989_v41 = vpop.f32.mrf.mxu1 }
 0x24c   :  { %v2444_v58 = vpack.c.bf16 %v2341_v42, %v2340_v39  ;;  %v1990_v45 = vadd.f32 %v1989_v41, %v15152_v9  ;;  %v2346_v55 = vmax.f32 %v1998_v47, 0.0 }
 0x24d   :  { %v13524_v44 = vpop.f32.mrf.mxu1 }
 0x24e   :  { %v2001_v46 = vadd.f32 %v13524_v44, %v15152_v9  ;;  %13653 = vmatprep.mubr.msk.bf16.mxu0 %vm1554_vm2, %v2444_v58  ;;  %v2344_v53 = vmax.f32 %v1990_v45, 0.0 }
 0x24f   :  { %v1992_v48 = vpop.f32.mrf.mxu1  ;;  %13654 = vmatmul.mubr.msk.bf16.gmra.mxu0 %vm1554_vm2, %v2445_v43 }
 0x250   :  { %v1993_v49 = vadd.f32 %v1992_v48, %v15152_v9  ;;  %v2347_v51 = vmax.f32 %v2001_v46, 0.0 }
 0x251   :  { %v13527_v52 = vpop.f32.mrf.mxu1 }
 0x252   :  { %v2345_v54 = vmax.f32 %v1993_v49, 0.0  ;;  %v2447_v35 = vpack.c.bf16 %v2347_v51, %v2346_v55  ;;  %v2014_v23 = vadd.f32 %v13527_v52, %v15152_v9 }
 0x253   :  { %v2005_v56 = vpop.f32.mrf.mxu1 }
 0x254   :  { %v2446_v57 = vpack.c.bf16 %v2345_v54, %v2344_v53  ;;  %v2006_v60 = vadd.f32 %v2005_v56, %v15152_v9  ;;  %v2350_v1 = vmax.f32 %v2014_v23, 0.0 }
 0x255   :  { %v13528_v59 = vpop.f32.mrf.mxu1 }
 0x256   :  { %v2017_v50 = vadd.f32 %v13528_v59, %v15152_v9  ;;  %13657 = vmatprep.mubr.msk.bf16.mxu0 %vm1554_vm2, %v2446_v57  ;;  %v2348_v27 = vmax.f32 %v2006_v60, 0.0 }
 0x257   :  { %v2008_v61 = vpop.f32.mrf.mxu1  ;;  %13658 = vmatmul.mubr.msk.bf16.gmra.mxu0 %vm1554_vm2, %v2447_v35 }
 0x258   :  { %v2009_v62 = vadd.f32 %v2008_v61, %v15152_v9  ;;  %v2351_v11 = vmax.f32 %v2017_v50, 0.0 }
 0x259   :  { %v13531_v63 = vpop.f32.mrf.mxu1 }
 0x25a   :  { %v2349_v0 = vmax.f32 %v2009_v62, 0.0  ;;  %v2449_v6 = vpack.c.bf16 %v2351_v11, %v2350_v1  ;;  %v2030_v16 = vadd.f32 %v13531_v63, %v15152_v9 }
 0x25b   :  { %v2021_v4 = vpop.f32.mrf.mxu1 }
 0x25c   :  { %v2448_v5 = vpack.c.bf16 %v2349_v0, %v2348_v27  ;;  %v2022_v12 = vadd.f32 %v2021_v4, %v15152_v9  ;;  %v2354_v28 = vmax.f32 %v2030_v16, 0.0 }
 0x25d   :  { %v13532_v7 = vpop.f32.mrf.mxu1 }
 0x25e   :  { %v2033_v13 = vadd.f32 %v13532_v7, %v15152_v9  ;;  %13661 = vmatprep.mubr.msk.bf16.mxu0 %vm1554_vm2, %v2448_v5  ;;  %v2352_v25 = vmax.f32 %v2022_v12, 0.0  ;;  %v4452_v7 = vld [vmem:[%s18171_s6 + $0x160] sm:$0xff] }
 0x25f   :  { %v2024_v17 = vpop.f32.mrf.mxu1  ;;  %13662 = vmatmul.mubr.msk.bf16.gmra.mxu0 %vm1554_vm2, %v2449_v6  ;;  %v4448_v6 = vld [vmem:[%s18171_s6 + $0x140] sm:$0xff] }
 0x260   :  { %v2025_v2 = vadd.f32 %v2024_v17, %v15152_v9  ;;  %v2355_v21 = vmax.f32 %v2033_v13, 0.0  ;;  %v12680_v12 = vcombine.low %v4448_v6, %v4452_v7  ;;  %v12681_v13 = vcombine.high %v4448_v6, %v4452_v7  ;;  %v4440_v6 = vld [vmem:[%s18171_s6 + $0x100] sm:$0xff] }
 0x261   :  { %v13535_v24 = vpop.f32.mrf.mxu1  ;;  %v4444_v7 = vld [vmem:[%s18171_s6 + $0x120] sm:$0xff] }
 0x262   :  { %v2353_v26 = vmax.f32 %v2025_v2, 0.0  ;;  %v2451_v31 = vpack.c.bf16 %v2355_v21, %v2354_v28  ;;  %v2046_v19 = vadd.f32 %v13535_v24, %v15152_v9  ;;  %4841 = vmatprep.subr.bf16.mxu0 %v12681_v13  ;;  %v12673_v13 = vcombine.high %v4440_v6, %v4444_v7 }
 0x263   :  { %v2037_v29 = vpop.f32.mrf.mxu1  ;;  %4842 = vmatpush1.bf16.msra.mxu0 %v12680_v12  ;;  %v12672_v12 = vcombine.low %v4440_v6, %v4444_v7 }
 0x264   :  { %v2450_v30 = vpack.c.bf16 %v2353_v26, %v2352_v25  ;;  %v2038_v3 = vadd.f32 %v2037_v29, %v15152_v9  ;;  %v2358_v40 = vmax.f32 %v2046_v19, 0.0  ;;  %4843 = vmatprep.subr.bf16.mxu0 %v12673_v13 }
 0x265   :  { %v13536_v32 = vpop.f32.mrf.mxu1 }
 0x266   :  { %v2049_v33 = vadd.f32 %v13536_v32, %v15152_v9  ;;  %13665 = vmatprep.mubr.msk.bf16.mxu0 %vm1554_vm2, %v2450_v30  ;;  %v2356_v39 = vmax.f32 %v2038_v3, 0.0 }
 0x267   :  { %v2040_v34 = vpop.f32.mrf.mxu1  ;;  %13666 = vmatmul.mubr.msk.bf16.gmra.mxu0 %vm1554_vm2, %v2451_v31 }
 0x268   :  { %v2041_v36 = vadd.f32 %v2040_v34, %v15152_v9  ;;  %v2359_v37 = vmax.f32 %v2049_v33, 0.0  ;;  %4844 = vmatpush1.bf16.msra.mxu0 %v12672_v12 }
 0x269   :  { %v13539_v38 = vpop.f32.mrf.mxu1 }
 0x26a   :  { %v2357_v42 = vmax.f32 %v2041_v36, 0.0  ;;  %v2453_v43 = vpack.c.bf16 %v2359_v37, %v2358_v40  ;;  %v2062_v47 = vadd.f32 %v13539_v38, %v15152_v9 }
 0x26b   :  { %v2053_v41 = vpop.f32.mrf.mxu1 }
 0x26c   :  { %v2452_v58 = vpack.c.bf16 %v2357_v42, %v2356_v39  ;;  %v2054_v45 = vadd.f32 %v2053_v41, %v15152_v9  ;;  %v2362_v55 = vmax.f32 %v2062_v47, 0.0 }
 0x26d   :  { %v13540_v44 = vpop.f32.mrf.mxu1 }
 0x26e   :  { %v2065_v46 = vadd.f32 %v13540_v44, %v15152_v9  ;;  %13669 = vmatprep.mubr.msk.bf16.mxu0 %vm1554_vm2, %v2452_v58  ;;  %v2360_v53 = vmax.f32 %v2054_v45, 0.0 }
 0x26f   :  { %v2056_v48 = vpop.f32.mrf.mxu1  ;;  %13670 = vmatmul.mubr.msk.bf16.gmra.mxu0 %vm1554_vm2, %v2453_v43 }
 0x270   :  { %v2057_v49 = vadd.f32 %v2056_v48, %v15152_v9  ;;  %v2363_v51 = vmax.f32 %v2065_v46, 0.0 }
 0x271   :  { %v13543_v52 = vpop.f32.mrf.mxu1 }
 0x272   :  { %v2361_v54 = vmax.f32 %v2057_v49, 0.0  ;;  %v2455_v35 = vpack.c.bf16 %v2363_v51, %v2362_v55  ;;  %v2078_v23 = vadd.f32 %v13543_v52, %v15152_v9 }
 0x273   :  { %v2069_v56 = vpop.f32.mrf.mxu1 }
 0x274   :  { %v2454_v57 = vpack.c.bf16 %v2361_v54, %v2360_v53  ;;  %v2070_v60 = vadd.f32 %v2069_v56, %v15152_v9  ;;  %v2366_v1 = vmax.f32 %v2078_v23, 0.0 }
 0x275   :  { %v13544_v59 = vpop.f32.mrf.mxu1 }
 0x276   :  { %v2081_v50 = vadd.f32 %v13544_v59, %v15152_v9  ;;  %13673 = vmatprep.mubr.msk.bf16.mxu0 %vm1554_vm2, %v2454_v57  ;;  %v2364_v27 = vmax.f32 %v2070_v60, 0.0 }
 0x277   :  { %v2072_v61 = vpop.f32.mrf.mxu1  ;;  %13674 = vmatmul.mubr.msk.bf16.gmra.mxu0 %vm1554_vm2, %v2455_v35 }
 0x278   :  { %v2073_v62 = vadd.f32 %v2072_v61, %v15152_v9  ;;  %v2367_v11 = vmax.f32 %v2081_v50, 0.0 }
 0x279   :  { %v13547_v63 = vpop.f32.mrf.mxu1 }
 0x27a   :  { %v2365_v0 = vmax.f32 %v2073_v62, 0.0  ;;  %v2457_v8 = vpack.c.bf16 %v2367_v11, %v2366_v1  ;;  %v2094_v16 = vadd.f32 %v13547_v63, %v15152_v9 }
 0x27b   :  { %v2085_v4 = vpop.f32.mrf.mxu1 }
 0x27c   :  { %v2456_v5 = vpack.c.bf16 %v2365_v0, %v2364_v27  ;;  %v2086_v14 = vadd.f32 %v2085_v4, %v15152_v9  ;;  %v2370_v28 = vmax.f32 %v2094_v16, 0.0 }
 0x27d   :  { %v13548_v10 = vpop.f32.mrf.mxu1 }
 0x27e   :  { %v2097_v15 = vadd.f32 %v13548_v10, %v15152_v9  ;;  %13677 = vmatprep.mubr.msk.bf16.mxu0 %vm1554_vm2, %v2456_v5  ;;  %v2368_v25 = vmax.f32 %v2086_v14, 0.0 }
 0x27f   :  { %v2088_v17 = vpop.f32.mrf.mxu1  ;;  %13678 = vmatmul.mubr.msk.bf16.gmra.mxu0 %vm1554_vm2, %v2457_v8 }
 0x280   :  { %v2089_v2 = vadd.f32 %v2088_v17, %v15152_v9  ;;  %v2371_v21 = vmax.f32 %v2097_v15, 0.0 }
 0x281   :  { %v13551_v24 = vpop.f32.mrf.mxu1 }
 0x282   :  { %v2369_v26 = vmax.f32 %v2089_v2, 0.0  ;;  %v2459_v31 = vpack.c.bf16 %v2371_v21, %v2370_v28  ;;  %v2110_v19 = vadd.f32 %v13551_v24, %v15152_v9 }
 0x283   :  { %v2101_v29 = vpop.f32.mrf.mxu1 }
 0x284   :  { %v2458_v30 = vpack.c.bf16 %v2369_v26, %v2368_v25  ;;  %v2102_v3 = vadd.f32 %v2101_v29, %v15152_v9  ;;  %v2374_v40 = vmax.f32 %v2110_v19, 0.0 }
 0x285   :  { %v13552_v32 = vpop.f32.mrf.mxu1 }
 0x286   :  { %v2113_v33 = vadd.f32 %v13552_v32, %v15152_v9  ;;  %13681 = vmatprep.mubr.msk.bf16.mxu0 %vm1554_vm2, %v2458_v30  ;;  %v2372_v39 = vmax.f32 %v2102_v3, 0.0 }
 0x287   :  { %v2104_v34 = vpop.f32.mrf.mxu1  ;;  %13682 = vmatmul.mubr.msk.bf16.gmra.mxu0 %vm1554_vm2, %v2459_v31 }
 0x288   :  { %v2105_v36 = vadd.f32 %v2104_v34, %v15152_v9  ;;  %v2375_v37 = vmax.f32 %v2113_v33, 0.0 }
 0x289   :  { %v13555_v38 = vpop.f32.mrf.mxu1 }
 0x28a   :  { %v2373_v42 = vmax.f32 %v2105_v36, 0.0  ;;  %v2461_v43 = vpack.c.bf16 %v2375_v37, %v2374_v40  ;;  %v2126_v47 = vadd.f32 %v13555_v38, %v15152_v9  ;;  %v15387_v36 = vld [vmem:[#allocation3 + $0x1] ss:$0 sm:$0xff] }
 0x28b   :  { %v2117_v41 = vpop.f32.mrf.mxu1 }
 0x28c   :  { %v2460_v58 = vpack.c.bf16 %v2373_v42, %v2372_v39  ;;  %v2118_v45 = vadd.f32 %v2117_v41, %v15152_v9  ;;  %v2378_v55 = vmax.f32 %v2126_v47, 0.0 }
 0x28d   :  { %v13556_v44 = vpop.f32.mrf.mxu1 }
 0x28e   :  { %v2129_v46 = vadd.f32 %v13556_v44, %v15152_v9  ;;  %13685 = vmatprep.mubr.msk.bf16.mxu0 %vm1554_vm2, %v2460_v58  ;;  %v2376_v53 = vmax.f32 %v2118_v45, 0.0 }
 0x28f   :  { %v2120_v48 = vpop.f32.mrf.mxu1  ;;  %13686 = vmatmul.mubr.msk.bf16.gmra.mxu0 %vm1554_vm2, %v2461_v43 }
 0x290   :  { %v2121_v49 = vadd.f32 %v2120_v48, %v15152_v9  ;;  %v2379_v51 = vmax.f32 %v2129_v46, 0.0 }
 0x291   :  { %v13559_v52 = vpop.f32.mrf.mxu1 }
 0x292   :  { %v2377_v54 = vmax.f32 %v2121_v49, 0.0  ;;  %v2463_v35 = vpack.c.bf16 %v2379_v51, %v2378_v55  ;;  %v2142_v23 = vadd.f32 %v13559_v52, %v15152_v9 }
 0x293   :  { %v2133_v56 = vpop.f32.mrf.mxu1 }
 0x294   :  { %v2462_v57 = vpack.c.bf16 %v2377_v54, %v2376_v53  ;;  %v2134_v60 = vadd.f32 %v2133_v56, %v15152_v9  ;;  %v2382_v1 = vmax.f32 %v2142_v23, 0.0 }
 0x295   :  { %v13560_v59 = vpop.f32.mrf.mxu1 }
 0x296   :  { %v2145_v50 = vadd.f32 %v13560_v59, %v15152_v9  ;;  %13689 = vmatprep.mubr.msk.bf16.mxu0 %vm1554_vm2, %v2462_v57  ;;  %v2380_v27 = vmax.f32 %v2134_v60, 0.0  ;;  %v15396_v57 = vld [vmem:[#allocation3 + $0x2] ss:$0 sm:$0xff] }
 0x297   :  { %v2136_v61 = vpop.f32.mrf.mxu1  ;;  %13690 = vmatmul.mubr.msk.bf16.gmra.mxu0 %vm1554_vm2, %v2463_v35 }
 0x298   :  { %v2137_v62 = vadd.f32 %v2136_v61, %v15152_v9  ;;  %v2383_v11 = vmax.f32 %v2145_v50, 0.0 }
 0x299   :  { %v13563_v63 = vpop.f32.mrf.mxu1 }
 0x29a   :  { %v2381_v0 = vmax.f32 %v2137_v62, 0.0  ;;  %v2465_v8 = vpack.c.bf16 %v2383_v11, %v2382_v1  ;;  %v2158_v16 = vadd.f32 %v13563_v63, %v15152_v9 }
 0x29b   :  { %v2149_v4 = vpop.f32.mrf.mxu1 }
 0x29c   :  { %v2464_v5 = vpack.c.bf16 %v2381_v0, %v2380_v27  ;;  %v2150_v14 = vadd.f32 %v2149_v4, %v15152_v9  ;;  %v2386_v28 = vmax.f32 %v2158_v16, 0.0 }
 0x29d   :  { %v13564_v10 = vpop.f32.mrf.mxu1 }
 0x29e   :  { %v2161_v15 = vadd.f32 %v13564_v10, %v15152_v9  ;;  %13693 = vmatprep.mubr.msk.bf16.mxu0 %vm1554_vm2, %v2464_v5  ;;  %v2384_v25 = vmax.f32 %v2150_v14, 0.0  ;;  %v4457_v14 = vld [vmem:[%s18171_s6 + $0x188] sm:$0xff] }
 0x29f   :  { %v2152_v17 = vpop.f32.mrf.mxu1  ;;  %13694 = vmatmul.mubr.msk.bf16.gmra.mxu0 %vm1554_vm2, %v2465_v8 }
 0x2a0   :  { %v2153_v2 = vadd.f32 %v2152_v17, %v15152_v9  ;;  %v2387_v21 = vmax.f32 %v2161_v15, 0.0  ;;  %v4461_v15 = vld [vmem:[%s18171_s6 + $0x1a8] sm:$0xff] }
 0x2a1   :  { %v13567_v24 = vpop.f32.mrf.mxu1 }
 0x2a2   :  { %v2385_v26 = vmax.f32 %v2153_v2, 0.0  ;;  %v2467_v31 = vpack.c.bf16 %v2387_v21, %v2386_v28  ;;  %v2174_v19 = vadd.f32 %v13567_v24, %v15152_v9 }
 0x2a3   :  { %v2165_v29 = vpop.f32.mrf.mxu1 }
 0x2a4   :  { %v2466_v30 = vpack.c.bf16 %v2385_v26, %v2384_v25  ;;  %v2166_v3 = vadd.f32 %v2165_v29, %v15152_v9  ;;  %v2390_v41 = vmax.f32 %v2174_v19, 0.0 }
 0x2a5   :  { %v13568_v32 = vpop.f32.mrf.mxu1 }
 0x2a6   :  { %v2177_v33 = vadd.f32 %v13568_v32, %v15152_v9  ;;  %13697 = vmatprep.mubr.msk.bf16.mxu0 %vm1554_vm2, %v2466_v30  ;;  %v2388_v42 = vmax.f32 %v2166_v3, 0.0  ;;  %v12691_v32 = vcombine.high %v4457_v14, %v4461_v15  ;;  %v15417_v3 = vld [vmem:[%s18171_s6 + $0x148] sm:$0xff] }
 0x2a7   :  { %v2168_v34 = vpop.f32.mrf.mxu1  ;;  %13698 = vmatmul.mubr.msk.bf16.gmra.mxu0 %vm1554_vm2, %v2467_v31 }
 0x2a8   :  { %v2169_v37 = vadd.f32 %v15387_v36, %v2168_v34  ;;  %v2391_v38 = vmax.f32 %v2177_v33, 0.0 }
 0x2a9   :  { %v13571_v39 = vpop.f32.mrf.mxu1 }
 0x2aa   :  { %v2389_v40 = vmax.f32 %v2169_v37, 0.0  ;;  %v2469_v44 = vpack.c.bf16 %v2391_v38, %v2390_v41  ;;  %v2190_v47 = vadd.f32 %v15387_v36, %v13571_v39  ;;  %v12690_v37 = vcombine.low %v4457_v14, %v4461_v15  ;;  %v4453_v38 = vld [vmem:[%s18171_s6 + $0x168] sm:$0xff]  ;;  %v4432_v39 = vld [vmem:[%s18171_s6 + $0xc0] sm:$0xff] }
 0x2ab   :  { %v2181_v58 = vpop.f32.mrf.mxu1  ;;  %v12674_v15 = vcombine.low %v4441_v18, %v4445_v20 }
 0x2ac   :  { %v2468_v43 = vpack.c.bf16 %v2389_v40, %v2388_v42  ;;  %v2182_v46 = vadd.f32 %v15387_v36, %v2181_v58  ;;  %v2394_v35 = vmax.f32 %v2190_v47, 0.0  ;;  %v4436_v42 = vld [vmem:[%s18171_s6 + $0xe0] sm:$0xff] }
 0x2ad   :  { %v13572_v45 = vpop.f32.mrf.mxu1 }
 0x2ae   :  { %v2193_v9 = vadd.f32 %v15387_v36, %v13572_v45  ;;  %13701 = vmatprep.mubr.msk.bf16.mxu0 %vm1554_vm2, %v2468_v43  ;;  %v2392_v55 = vmax.f32 %v2182_v46, 0.0  ;;  %v12665_v45 = vcombine.high %v4432_v39, %v4436_v42 }
 0x2af   :  { %v2184_v48 = vpop.f32.mrf.mxu1  ;;  %v13607_v49 = vpop.f32.mrf.mxu0  ;;  %13702 = vmatmul.mubr.msk.bf16.gmra.mxu0 %vm1554_vm2, %v2469_v44  ;;  %v12664_v44 = vcombine.low %v4432_v39, %v4436_v42 }
 0x2b0   :  { %v2185_v51 = vadd.f32 %v15387_v36, %v2184_v48  ;;  %v2395_v52 = vmax.f32 %v2193_v9, 0.0  ;;  %v2752_v11 = vadd.f32 %v13607_v49, %v15396_v57  ;;  %4845 = vmatprep.subr.bf16.mxu0 %v12665_v45 }
 0x2b1   :  { %v13575_v53 = vpop.f32.mrf.mxu1  ;;  %v2743_v54 = vpop.f32.mrf.mxu0  ;;  %4846 = vmatpush1.bf16.msra.mxu0 %v12664_v44 }
 0x2b2   :  { %v2393_v56 = vmax.f32 %v2185_v51, 0.0  ;;  %v2744_v23 = vadd.f32 %v2743_v54, %v15396_v57  ;;  %v2471_v62 = vpack.c.bf16 %v2395_v52, %v2394_v35  ;;  %v2206_v5 = vadd.f32 %v15387_v36, %v13575_v53 }
 0x2b3   :  { %v2197_v59 = vpop.f32.mrf.mxu1  ;;  %v13608_v60 = vpop.f32.mrf.mxu0  ;;  %v3256_v16 = vmax.f32 %v2752_v11, 0.0  ;;  %v12683_v53 = vcombine.high %v15417_v3, %v4453_v38 }
 0x2b4   :  { %v2470_v50 = vpack.c.bf16 %v2393_v56, %v2392_v55  ;;  %v2755_v61 = vadd.f32 %v13608_v60, %v15396_v57  ;;  %v2198_v0 = vadd.f32 %v15387_v36, %v2197_v59  ;;  %v3254_v10 = vmax.f32 %v2744_v23, 0.0 }
 0x2b5   :  { %v13576_v63 = vpop.f32.mrf.mxu1  ;;  %v2746_v27 = vpop.f32.mrf.mxu0  ;;  %v2398_v28 = vmax.f32 %v2206_v5, 0.0 }
 0x2b6   :  { %v2209_v1 = vadd.f32 %v15387_v36, %v13576_v63  ;;  %v2747_v4 = vadd.f32 %v2746_v27, %v15396_v57  ;;  %13705 = vmatprep.mubr.msk.bf16.mxu0 %vm1554_vm2, %v2470_v50  ;;  %v3257_v6 = vmax.f32 %v2755_v61, 0.0  ;;  %v2396_v24 = vmax.f32 %v2198_v0, 0.0 }
 0x2b7   :  { %v2200_v7 = vpop.f32.mrf.mxu1  ;;  %v13611_v8 = vpop.f32.mrf.mxu0  ;;  %13706 = vmatmul.mubr.msk.bf16.gmra.mxu0 %vm1554_vm2, %v2471_v62  ;;  %v12682_v62 = vcombine.low %v15417_v3, %v4453_v38 }
 0x2b8   :  { %v3255_v12 = vmax.f32 %v2747_v4, 0.0  ;;  %v2201_v13 = vadd.f32 %v15387_v36, %v2200_v7  ;;  %v2399_v17 = vmax.f32 %v2209_v1, 0.0  ;;  %v3383_v29 = vpack.c.bf16 %v3257_v6, %v3256_v16  ;;  %v4433_v7 = vld [vmem:[%s18171_s6 + $0xc8] sm:$0xff] }
 0x2b9   :  { %v13579_v2 = vpop.f32.mrf.mxu1  ;;  %v2759_v21 = vpop.f32.mrf.mxu0  ;;  %v2768_v41 = vadd.f32 %v13611_v8, %v15396_v57  ;;  %v12675_v1 = vcombine.high %v4441_v18, %v4445_v20  ;;  %v4437_v8 = vld [vmem:[%s18171_s6 + $0xe8] sm:$0xff] }
 0x2ba   :  { %v3382_v25 = vpack.c.bf16 %v3255_v12, %v3254_v10  ;;  %v2397_v26 = vmax.f32 %v2201_v13, 0.0  ;;  %v2760_v19 = vadd.f32 %v2759_v21, %v15396_v57  ;;  %v2473_v40 = vpack.c.bf16 %v2399_v17, %v2398_v28 }
 0x2bb   :  { %v2213_v30 = vpop.f32.mrf.mxu1  ;;  %v13612_v31 = vpop.f32.mrf.mxu0  ;;  %v2222_v48 = vadd.f32 %v15387_v36, %v13579_v2  ;;  %v12667_v28 = vcombine.high %v4433_v7, %v4437_v8  ;;  %v12666_v39 = vcombine.low %v4433_v7, %v4437_v8 }
 0x2bc   :  { %v2472_v33 = vpack.c.bf16 %v2397_v26, %v2396_v24  ;;  %v2771_v34 = vadd.f32 %v13612_v31, %v15396_v57  ;;  %13741 = vmatprep.mubr.msk.bf16.mxu1 %vm1554_vm2, %v3382_v25  ;;  %v2214_v46 = vadd.f32 %v15387_v36, %v2213_v30  ;;  %v3258_v54 = vmax.f32 %v2760_v19, 0.0 }
 0x2bd   :  { %v13580_v58 = vpop.f32.mrf.mxu1  ;;  %v2762_v43 = vpop.f32.mrf.mxu0  ;;  %13742 = vmatmul.mubr.msk.bf16.vlgmr.msra.gmra.mxu1 %vm1554_vm2, %v3383_v29  ;;  %v2402_v11 = vmax.f32 %v2222_v48, 0.0 }
 0x2be   :  { %v2225_v9 = vadd.f32 %v15387_v36, %v13580_v58  ;;  %v2763_v47 = vadd.f32 %v2762_v43, %v15396_v57  ;;  %5511 = vmatpush1.bf16.msra.mxu1 %v12698_v22  ;;  %13709 = vmatprep.mubr.msk.bf16.mxu0 %vm1554_vm2, %v2472_v33  ;;  %v3261_v49 = vmax.f32 %v2771_v34, 0.0  ;;  %v3260_v22 = vmax.f32 %v2768_v41, 0.0 }
 0x2bf   :  { %v2216_v51 = vpop.f32.mrf.mxu1  ;;  %v13615_v52 = vpop.f32.mrf.mxu0  ;;  %13710 = vmatmul.mubr.msk.bf16.gmra.mxu0 %vm1554_vm2, %v2473_v40  ;;  %5512 = vmatprep.subr.bf16.mxu1 %v12691_v32  ;;  %v2400_v50 = vmax.f32 %v2214_v46, 0.0 }
 0x2c0   :  { %v3259_v55 = vmax.f32 %v2763_v47, 0.0  ;;  %v2217_v56 = vadd.f32 %v15387_v36, %v2216_v51  ;;  %v2403_v35 = vmax.f32 %v2225_v9, 0.0  ;;  %v3385_v63 = vpack.c.bf16 %v3261_v49, %v3260_v22 }
 0x2c1   :  { %v13583_v59 = vpop.f32.mrf.mxu1  ;;  %v2775_v60 = vpop.f32.mrf.mxu0  ;;  %v2784_v12 = vadd.f32 %v13615_v52, %v15396_v57 }
 0x2c2   :  { %v3384_v23 = vpack.c.bf16 %v3259_v55, %v3258_v54  ;;  %v2401_v61 = vmax.f32 %v2217_v56, 0.0  ;;  %5513 = vmatpush1.bf16.msra.mxu1 %v12690_v37  ;;  %v2776_v5 = vadd.f32 %v2775_v60, %v15396_v57  ;;  %v2475_v10 = vpack.c.bf16 %v2403_v35, %v2402_v11 }
 0x2c3   :  { %v2229_v27 = vpop.f32.mrf.mxu1  ;;  %v13616_v0 = vpop.f32.mrf.mxu0  ;;  %5514 = vmatprep.subr.bf16.mxu1 %v12683_v53  ;;  %v2238_v21 = vadd.f32 %v15387_v36, %v13583_v59  ;;  %v3264_v32 = vmax.f32 %v2784_v12, 0.0 }
 0x2c4   :  { %v2474_v4 = vpack.c.bf16 %v2401_v61, %v2400_v50  ;;  %v2787_v6 = vadd.f32 %v13616_v0, %v15396_v57  ;;  %13745 = vmatprep.mubr.msk.bf16.mxu1 %vm1554_vm2, %v3384_v23  ;;  %v2230_v16 = vadd.f32 %v15387_v36, %v2229_v27  ;;  %v3262_v29 = vmax.f32 %v2776_v5, 0.0 }
 0x2c5   :  { %v13584_v13 = vpop.f32.mrf.mxu1  ;;  %v2778_v14 = vpop.f32.mrf.mxu0  ;;  %13746 = vmatmul.mubr.msk.bf16.gmra.mxu1 %vm1554_vm2, %v3385_v63  ;;  %v2406_v42 = vmax.f32 %v2238_v21, 0.0 }
 0x2c6   :  { %v2241_v17 = vadd.f32 %v15387_v36, %v13584_v13  ;;  %v2779_v2 = vadd.f32 %v2778_v14, %v15396_v57  ;;  %13713 = vmatprep.mubr.msk.bf16.mxu0 %vm1554_vm2, %v2474_v4  ;;  %5515 = vmatpush1.bf16.msra.mxu1 %v12682_v62  ;;  %v3265_v24 = vmax.f32 %v2787_v6, 0.0  ;;  %v2404_v34 = vmax.f32 %v2230_v16, 0.0 }
 0x2c7   :  { %v2232_v25 = vpop.f32.mrf.mxu1  ;;  %v13619_v26 = vpop.f32.mrf.mxu0  ;;  %13714 = vmatmul.mubr.msk.bf16.gmra.mxu0 %vm1554_vm2, %v2475_v10  ;;  %5516 = vmatprep.subr.bf16.mxu1 %v12675_v1 }
 0x2c8   :  { %v3263_v30 = vmax.f32 %v2779_v2, 0.0  ;;  %v2233_v31 = vadd.f32 %v15387_v36, %v2232_v25  ;;  %v2407_v3 = vmax.f32 %v2241_v17, 0.0  ;;  %v3387_v40 = vpack.c.bf16 %v3265_v24, %v3264_v32 }
 0x2c9   :  { %v13587_v33 = vpop.f32.mrf.mxu1  ;;  %v2791_v19 = vpop.f32.mrf.mxu0  ;;  %v2800_v9 = vadd.f32 %v13619_v26, %v15396_v57 }
 0x2ca   :  { %v3386_v37 = vpack.c.bf16 %v3263_v30, %v3262_v29  ;;  %v2405_v38 = vmax.f32 %v2233_v31, 0.0  ;;  %5517 = vmatpush1.bf16.msra.mxu1 %v12674_v15  ;;  %v2792_v44 = vadd.f32 %v2791_v19, %v15396_v57  ;;  %v2477_v46 = vpack.c.bf16 %v2407_v3, %v2406_v42 }
 0x2cb   :  { %v2245_v41 = vpop.f32.mrf.mxu1  ;;  %v13620_v58 = vpop.f32.mrf.mxu0  ;;  %5518 = vmatprep.subr.bf16.mxu1 %v12667_v28  ;;  %v2254_v53 = vadd.f32 %v15387_v36, %v13587_v33  ;;  %v3268_v35 = vmax.f32 %v2800_v9, 0.0 }
 0x2cc   :  { %v2476_v43 = vpack.c.bf16 %v2405_v38, %v2404_v34  ;;  %v2803_v45 = vadd.f32 %v13620_v58, %v15396_v57  ;;  %13749 = vmatprep.mubr.msk.bf16.mxu1 %vm1554_vm2, %v3386_v37  ;;  %v2246_v49 = vadd.f32 %v15387_v36, %v2245_v41  ;;  %v3266_v18 = vmax.f32 %v2792_v44, 0.0  ;;  %v4428_v41 = vld [vmem:[%s18171_s6 + $0xa0] sm:$0xff] }
 0x2cd   :  { %v13588_v47 = vpop.f32.mrf.mxu1  ;;  %v2794_v48 = vpop.f32.mrf.mxu0  ;;  %13750 = vmatmul.mubr.msk.bf16.gmra.mxu1 %vm1554_vm2, %v3387_v40  ;;  %v2410_v11 = vmax.f32 %v2254_v53, 0.0  ;;  %v4424_v40 = vld [vmem:[%s18171_s6 + $0x80] sm:$0xff] }
 0x2ce   :  { %v2257_v51 = vadd.f32 %v15387_v36, %v13588_v47  ;;  %v2795_v52 = vadd.f32 %v2794_v48, %v15396_v57  ;;  %13717 = vmatprep.mubr.msk.bf16.mxu0 %vm1554_vm2, %v2476_v43  ;;  %5519 = vmatpush1.bf16.msra.mxu1 %v12666_v39  ;;  %v3269_v54 = vmax.f32 %v2803_v45, 0.0  ;;  %v2408_v23 = vmax.f32 %v2246_v49, 0.0 }
 0x2cf   :  { %v2248_v55 = vpop.f32.mrf.mxu1  ;;  %v13623_v56 = vpop.f32.mrf.mxu0  ;;  %13718 = vmatmul.mubr.msk.bf16.gmra.mxu0 %vm1554_vm2, %v2477_v46  ;;  %v12656_v46 = vcombine.low %v4424_v40, %v4428_v41  ;;  %v12657_v9 = vcombine.high %v4424_v40, %v4428_v41 }
 0x2d0   :  { %v3267_v20 = vmax.f32 %v2795_v52, 0.0  ;;  %v2249_v22 = vadd.f32 %v15387_v36, %v2248_v55  ;;  %v2411_v59 = vmax.f32 %v2257_v51, 0.0  ;;  %v3389_v63 = vpack.c.bf16 %v3269_v54, %v3268_v35 }
 0x2d1   :  { %v13591_v60 = vpop.f32.mrf.mxu1  ;;  %v2807_v50 = vpop.f32.mrf.mxu0  ;;  %v2816_v7 = vadd.f32 %v13623_v56, %v15396_v57  ;;  %4847 = vmatprep.subr.bf16.mxu0 %v12657_v9 }
 0x2d2   :  { %v3388_v61 = vpack.c.bf16 %v3267_v20, %v3266_v18  ;;  %v2409_v62 = vmax.f32 %v2249_v22, 0.0  ;;  %v2808_v4 = vadd.f32 %v2807_v50, %v15396_v57  ;;  %v2479_v6 = vpack.c.bf16 %v2411_v59, %v2410_v11  ;;  %4848 = vmatpush1.bf16.msra.mxu0 %v12656_v46  ;;  %v4425_v20 = vld [vmem:[%s18171_s6 + $0x88] sm:$0xff] }
 0x2d3   :  { %v2261_v27 = vpop.f32.mrf.mxu1  ;;  %v13624_v0 = vpop.f32.mrf.mxu0  ;;  %v2270_v15 = vadd.f32 %v15387_v36, %v13591_v60  ;;  %v3272_v26 = vmax.f32 %v2816_v7, 0.0  ;;  %v4429_v22 = vld [vmem:[%s18171_s6 + $0xa8] sm:$0xff] }
 0x2d4   :  { %v2478_v1 = vpack.c.bf16 %v2409_v62, %v2408_v23  ;;  %v2819_v5 = vadd.f32 %v13624_v0, %v15396_v57  ;;  %13753 = vmatprep.mubr.msk.bf16.mxu1 %vm1554_vm2, %v3388_v61  ;;  %v2262_v12 = vadd.f32 %v15387_v36, %v2261_v27  ;;  %v3270_v21 = vmax.f32 %v2808_v4, 0.0 }
 0x2d5   :  { %v13592_v8 = vpop.f32.mrf.mxu1  ;;  %v2810_v10 = vpop.f32.mrf.mxu0  ;;  %13754 = vmatmul.mubr.msk.bf16.gmra.mxu1 %vm1554_vm2, %v3389_v63  ;;  %v2414_v33 = vmax.f32 %v2270_v15, 0.0  ;;  %v12658_v50 = vcombine.low %v4425_v20, %v4429_v22  ;;  %v12659_v23 = vcombine.high %v4425_v20, %v4429_v22 }
 0x2d6   :  { %v2273_v13 = vadd.f32 %v15387_v36, %v13592_v8  ;;  %v2811_v14 = vadd.f32 %v2810_v10, %v15396_v57  ;;  %13721 = vmatprep.mubr.msk.bf16.mxu0 %vm1554_vm2, %v2478_v1  ;;  %v3273_v16 = vmax.f32 %v2819_v5, 0.0  ;;  %v2412_v31 = vmax.f32 %v2262_v12, 0.0 }
 0x2d7   :  { %v2264_v17 = vpop.f32.mrf.mxu1  ;;  %v13627_v2 = vpop.f32.mrf.mxu0  ;;  %13722 = vmatmul.mubr.msk.bf16.gmra.mxu0 %vm1554_vm2, %v2479_v6  ;;  %5520 = vmatprep.subr.bf16.mxu1 %v12659_v23 }
 0x2d8   :  { %v3271_v24 = vmax.f32 %v2811_v14, 0.0  ;;  %v2265_v25 = vadd.f32 %v15387_v36, %v2264_v17  ;;  %v2415_v28 = vmax.f32 %v2273_v13, 0.0  ;;  %v3391_v19 = vpack.c.bf16 %v3273_v16, %v3272_v26  ;;  %5521 = vmatpush1.bf16.msra.mxu1 %v12658_v50 }
 0x2d9   :  { %v13595_v29 = vpop.f32.mrf.mxu1  ;;  %v2823_v30 = vpop.f32.mrf.mxu0  ;;  %v2832_v43 = vadd.f32 %v13627_v2, %v15396_v57 }
 0x2da   :  { %v3390_v32 = vpack.c.bf16 %v3271_v24, %v3270_v21  ;;  %v2413_v3 = vmax.f32 %v2265_v25, 0.0  ;;  %v2824_v39 = vadd.f32 %v2823_v30, %v15396_v57  ;;  %v2481_v58 = vpack.c.bf16 %v2415_v28, %v2414_v33 }
 0x2db   :  { %v2277_v34 = vpop.f32.mrf.mxu1  ;;  %v13628_v37 = vpop.f32.mrf.mxu0  ;;  %v2286_v51 = vadd.f32 %v15387_v36, %v13595_v29  ;;  %v3276_v35 = vmax.f32 %v2832_v43, 0.0 }
 0x2dc   :  { %v2480_v38 = vpack.c.bf16 %v2413_v3, %v2412_v31  ;;  %v2835_v42 = vadd.f32 %v13628_v37, %v15396_v57  ;;  %13757 = vmatprep.mubr.msk.bf16.mxu1 %vm1554_vm2, %v3390_v32  ;;  %v2278_v47 = vadd.f32 %v15387_v36, %v2277_v34  ;;  %v3274_v55 = vmax.f32 %v2824_v39, 0.0 }
 0x2dd   :  { %v13596_v44 = vpop.f32.mrf.mxu1  ;;  %v2826_v45 = vpop.f32.mrf.mxu0  ;;  %13758 = vmatmul.mubr.msk.bf16.gmra.mxu1 %vm1554_vm2, %v3391_v19  ;;  %v2418_v63 = vmax.f32 %v2286_v51, 0.0 }
 0x2de   :  { %v2289_v48 = vadd.f32 %v15387_v36, %v13596_v44  ;;  %v2827_v49 = vadd.f32 %v2826_v45, %v15396_v57  ;;  %13725 = vmatprep.mubr.msk.bf16.mxu0 %vm1554_vm2, %v2480_v38  ;;  %v3277_v52 = vmax.f32 %v2835_v42, 0.0  ;;  %v2416_v61 = vmax.f32 %v2278_v47, 0.0 }
 0x2df   :  { %v2280_v53 = vpop.f32.mrf.mxu1  ;;  %v13631_v54 = vpop.f32.mrf.mxu0  ;;  %13726 = vmatmul.mubr.msk.bf16.gmra.mxu0 %vm1554_vm2, %v2481_v58 }
 0x2e0   :  { %v3275_v56 = vmax.f32 %v2827_v49, 0.0  ;;  %v2281_v18 = vadd.f32 %v15387_v36, %v2280_v53  ;;  %v2419_v59 = vmax.f32 %v2289_v48, 0.0  ;;  %v3393_v27 = vpack.c.bf16 %v3277_v52, %v3276_v35 }
 0x2e1   :  { %v2839_v60 = vpop.f32.mrf.mxu0  ;;  %v2848_v6 = vadd.f32 %v13631_v54, %v15396_v57  ;;  %v4416_v54 = vld [vmem:[%s18171_s6 + $0x40] sm:$0xff] }
 0x2e2   :  { %v3392_v62 = vpack.c.bf16 %v3275_v56, %v3274_v55  ;;  %v2417_v11 = vmax.f32 %v2281_v18, 0.0  ;;  %v2840_v1 = vadd.f32 %v2839_v60, %v15396_v57  ;;  %v2483_v5 = vpack.c.bf16 %v2419_v59, %v2418_v63  ;;  %v4420_v55 = vld [vmem:[%s18171_s6 + $0x60] sm:$0xff] }
 0x2e3   :  { %v13632_v36 = vpop.f32.mrf.mxu0  ;;  %v3280_v15 = vmax.f32 %v2848_v6, 0.0  ;;  %v12648_v20 = vcombine.low %v4416_v54, %v4420_v55  ;;  %v12649_v22 = vcombine.high %v4416_v54, %v4420_v55 }
 0x2e4   :  { %v2482_v0 = vpack.c.bf16 %v2417_v11, %v2416_v61  ;;  %v2851_v4 = vadd.f32 %v13632_v36, %v15396_v57  ;;  %13761 = vmatprep.mubr.msk.bf16.mxu1 %vm1554_vm2, %v3392_v62  ;;  %v3278_v13 = vmax.f32 %v2840_v1, 0.0  ;;  %v4417_v61 = vld [vmem:[%s18171_s6 + $0x48] sm:$0xff] }
 0x2e5   :  { %v2842_v7 = vpop.f32.mrf.mxu0  ;;  %13762 = vmatmul.mubr.msk.bf16.gmra.mxu1 %vm1554_vm2, %v3393_v27  ;;  %4849 = vmatprep.subr.bf16.mxu0 %v12649_v22  ;;  %v4421_v62 = vld [vmem:[%s18171_s6 + $0x68] sm:$0xff] }
 0x2e6   :  { %v2843_v8 = vadd.f32 %v2842_v7, %v15396_v57  ;;  %13729 = vmatprep.mubr.msk.bf16.mxu0 %vm1554_vm2, %v2482_v0  ;;  %v3281_v10 = vmax.f32 %v2851_v4, 0.0  ;;  %4850 = vmatpush1.bf16.msra.mxu0 %v12648_v20  ;;  %v12650_v27 = vcombine.low %v4417_v61, %v4421_v62  ;;  %v12651_v36 = vcombine.high %v4417_v61, %v4421_v62  ;;  %v4408_v7 = vld [vmem:[%s18171_s6] sm:$0xff] }
 0x2e7   :  { %v13635_v12 = vpop.f32.mrf.mxu0  ;;  %13730 = vmatmul.mubr.msk.bf16.gmra.mxu0 %vm1554_vm2, %v2483_v5 }
 0x2e8   :  { %v3279_v14 = vmax.f32 %v2843_v8, 0.0  ;;  %v3395_v2 = vpack.c.bf16 %v3281_v10, %v3280_v15  ;;  %v2864_v26 = vadd.f32 %v13635_v12, %v15396_v57  ;;  %5522 = vmatprep.subr.bf16.mxu1 %v12651_v36  ;;  %v4412_v8 = vld [vmem:[%s18171_s6 + $0x20] sm:$0xff] }
 0x2e9   :  { %v2855_v16 = vpop.f32.mrf.mxu0  ;;  %5523 = vmatpush1.bf16.msra.mxu1 %v12650_v27  ;;  %v12640_v15 = vcombine.low %v4408_v7, %v4412_v8 }
 0x2ea   :  { %v3394_v17 = vpack.c.bf16 %v3279_v14, %v3278_v13  ;;  %v2856_v24 = vadd.f32 %v2855_v16, %v15396_v57  ;;  %v3284_v33 = vmax.f32 %v2864_v26, 0.0  ;;  %v12641_v13 = vcombine.high %v4408_v7, %v4412_v8 }
 0x2eb   :  { %v13636_v21 = vpop.f32.mrf.mxu0 }
 0x2ec   :  { %v2867_v25 = vadd.f32 %v13636_v21, %v15396_v57  ;;  %13765 = vmatprep.mubr.msk.bf16.mxu1 %vm1554_vm2, %v3394_v17  ;;  %v3282_v32 = vmax.f32 %v2856_v24, 0.0  ;;  %4851 = vmatprep.subr.bf16.mxu0 %v12641_v13 }
 0x2ed   :  { %v2858_v28 = vpop.f32.mrf.mxu0  ;;  %13766 = vmatmul.mubr.msk.bf16.gmra.mxu1 %vm1554_vm2, %v3395_v2  ;;  %4852 = vmatpush1.bf16.msra.mxu0 %v12640_v15 }
 0x2ee   :  { %v2859_v29 = vadd.f32 %v2858_v28, %v15396_v57  ;;  %v3285_v30 = vmax.f32 %v2867_v25, 0.0  ;;  %v18176_v28 = vmov 0  }
 0x2ef   :  { %v13639_v31 = vpop.f32.mrf.mxu0  ;;  %4869 = vmatprep.mubr.bf16.mxu0 %v18176_v28 }
 0x2f0   :  { %v3283_v3 = vmax.f32 %v2859_v29, 0.0  ;;  %v3397_v37 = vpack.c.bf16 %v3285_v30, %v3284_v33  ;;  %v2880_v40 = vadd.f32 %v13639_v31, %v15396_v57 }
 0x2f1   :  { %v2871_v19 = vpop.f32.mrf.mxu0 }
 0x2f2   :  { %v3396_v34 = vpack.c.bf16 %v3283_v3, %v3282_v32  ;;  %v2872_v39 = vadd.f32 %v2871_v19, %v15396_v57  ;;  %v3288_v9 = vmax.f32 %v2880_v40, 0.0 }
 0x2f3   :  { %v13640_v38 = vpop.f32.mrf.mxu0 }
 0x2f4   :  { %v2883_v42 = vadd.f32 %v13640_v38, %v15396_v57  ;;  %13769 = vmatprep.mubr.msk.bf16.mxu1 %vm1554_vm2, %v3396_v34  ;;  %v3286_v45 = vmax.f32 %v2872_v39, 0.0 }
 0x2f5   :  { %v2874_v41 = vpop.f32.mrf.mxu0  ;;  %13770 = vmatmul.mubr.msk.bf16.gmra.mxu1 %vm1554_vm2, %v3397_v37 }
 0x2f6   :  { %v2875_v58 = vadd.f32 %v2874_v41, %v15396_v57  ;;  %v3289_v43 = vmax.f32 %v2883_v42, 0.0 }
 0x2f7   :  { %v13643_v44 = vpop.f32.mrf.mxu0 }
 0x2f8   :  { %v3287_v46 = vmax.f32 %v2875_v58, 0.0  ;;  %v3399_v49 = vpack.c.bf16 %v3289_v43, %v3288_v9  ;;  %v2896_v56 = vadd.f32 %v13643_v44, %v15396_v57 }
 0x2f9   :  { %v2887_v47 = vpop.f32.mrf.mxu0 }
 0x2fa   :  { %v3398_v48 = vpack.c.bf16 %v3287_v46, %v3286_v45  ;;  %v2888_v52 = vadd.f32 %v2887_v47, %v15396_v57  ;;  %v3292_v11 = vmax.f32 %v2896_v56, 0.0 }
 0x2fb   :  { %v13644_v51 = vpop.f32.mrf.mxu0 }
 0x2fc   :  { %v2899_v53 = vadd.f32 %v13644_v51, %v15396_v57  ;;  %13773 = vmatprep.mubr.msk.bf16.mxu1 %vm1554_vm2, %v3398_v48  ;;  %v3290_v50 = vmax.f32 %v2888_v52, 0.0 }
 0x2fd   :  { %v2890_v18 = vpop.f32.mrf.mxu0  ;;  %13774 = vmatmul.mubr.msk.bf16.gmra.mxu1 %vm1554_vm2, %v3399_v49 }
 0x2fe   :  { %v2891_v35 = vadd.f32 %v2890_v18, %v15396_v57  ;;  %v3293_v59 = vmax.f32 %v2899_v53, 0.0 }
 0x2ff   :  { %v13647_v60 = vpop.f32.mrf.mxu0 }
 0x300   :  { %v3291_v23 = vmax.f32 %v2891_v35, 0.0  ;;  %v3401_v1 = vpack.c.bf16 %v3293_v59, %v3292_v11  ;;  %v2912_v10 = vadd.f32 %v13647_v60, %v15396_v57  ;;  %v4409_v11 = vld [vmem:[%s18171_s6 + $0x8] sm:$0xff] }
 0x301   :  { %v2903_v63 = vpop.f32.mrf.mxu0 }
 0x302   :  { %v3400_v0 = vpack.c.bf16 %v3291_v23, %v3290_v50  ;;  %v2904_v5 = vadd.f32 %v2903_v63, %v15396_v57  ;;  %v3296_v24 = vmax.f32 %v2912_v10, 0.0  ;;  %v4413_v63 = vld [vmem:[%s18171_s6 + $0x28] sm:$0xff] }
 0x303   :  { %v13648_v4 = vpop.f32.mrf.mxu0 }
 0x304   :  { %v2915_v6 = vadd.f32 %v13648_v4, %v15396_v57  ;;  %13777 = vmatprep.mubr.msk.bf16.mxu1 %vm1554_vm2, %v3400_v0  ;;  %v3294_v2 = vmax.f32 %v2904_v5, 0.0  ;;  %v12642_v0 = vcombine.low %v4409_v11, %v4413_v63 }
 0x305   :  { %v2906_v12 = vpop.f32.mrf.mxu0  ;;  %13778 = vmatmul.mubr.msk.bf16.gmra.mxu1 %vm1554_vm2, %v3401_v1  ;;  %v12643_v1 = vcombine.high %v4409_v11, %v4413_v63 }
 0x306   :  { %v2907_v14 = vadd.f32 %v2906_v12, %v15396_v57  ;;  %v3297_v16 = vmax.f32 %v2915_v6, 0.0 }
 0x307   :  { %v13651_v17 = vpop.f32.mrf.mxu0  ;;  %5524 = vmatprep.subr.bf16.mxu1 %v12643_v1 }
 0x308   :  { %v3295_v21 = vmax.f32 %v2907_v14, 0.0  ;;  %v3403_v29 = vpack.c.bf16 %v3297_v16, %v3296_v24  ;;  %v2928_v3 = vadd.f32 %v13651_v17, %v15396_v57  ;;  %5525 = vmatpush1.bf16.msra.mxu1 %v12642_v0 }
 0x309   :  { %v2919_v25 = vpop.f32.mrf.mxu0 }
 0x30a   :  { %v3402_v26 = vpack.c.bf16 %v3295_v21, %v3294_v2  ;;  %v2920_v31 = vadd.f32 %v2919_v25, %v15396_v57  ;;  %v3300_v42 = vmax.f32 %v2928_v3, 0.0 }
 0x30b   :  { %v13652_v30 = vpop.f32.mrf.mxu0 }
 0x30c   :  { %v2931_v32 = vadd.f32 %v13652_v30, %v15396_v57  ;;  %13781 = vmatprep.mubr.msk.bf16.mxu1 %vm1554_vm2, %v3402_v26  ;;  %v3298_v38 = vmax.f32 %v2920_v31, 0.0 }
 0x30d   :  { %v2922_v33 = vpop.f32.mrf.mxu0  ;;  %13782 = vmatmul.mubr.msk.bf16.gmra.mxu1 %vm1554_vm2, %v3403_v29 }
 0x30e   :  { %v2923_v19 = vadd.f32 %v2922_v33, %v15396_v57  ;;  %v3301_v34 = vmax.f32 %v2931_v32, 0.0 }
 0x30f   :  { %v13655_v37 = vpop.f32.mrf.mxu0 }
 0x310   :  { %v3299_v39 = vmax.f32 %v2923_v19, 0.0  ;;  %v3405_v58 = vpack.c.bf16 %v3301_v34, %v3300_v42  ;;  %v2944_v46 = vadd.f32 %v13655_v37, %v15396_v57 }
 0x311   :  { %v2935_v40 = vpop.f32.mrf.mxu0 }
 0x312   :  { %v3404_v41 = vpack.c.bf16 %v3299_v39, %v3298_v38  ;;  %v2936_v44 = vadd.f32 %v2935_v40, %v15396_v57  ;;  %v3304_v53 = vmax.f32 %v2944_v46, 0.0 }
 0x313   :  { %v13656_v43 = vpop.f32.mrf.mxu0 }
 0x314   :  { %v2947_v45 = vadd.f32 %v13656_v43, %v15396_v57  ;;  %13785 = vmatprep.mubr.msk.bf16.mxu1 %vm1554_vm2, %v3404_v41  ;;  %v3302_v51 = vmax.f32 %v2936_v44, 0.0 }
 0x315   :  { %v2938_v9 = vpop.f32.mrf.mxu0  ;;  %13786 = vmatmul.mubr.msk.bf16.gmra.mxu1 %vm1554_vm2, %v3405_v58 }
 0x316   :  { %v2939_v47 = vadd.f32 %v2938_v9, %v15396_v57  ;;  %v3305_v48 = vmax.f32 %v2947_v45, 0.0 }
 0x317   :  { %v13659_v49 = vpop.f32.mrf.mxu0 }
 0x318   :  { %v3303_v52 = vmax.f32 %v2939_v47, 0.0  ;;  %v3407_v56 = vpack.c.bf16 %v3305_v48, %v3304_v53  ;;  %v2960_v35 = vadd.f32 %v13659_v49, %v15396_v57 }
 0x319   :  { %v2951_v54 = vpop.f32.mrf.mxu0 }
 0x31a   :  { %v3406_v55 = vpack.c.bf16 %v3303_v52, %v3302_v51  ;;  %v2952_v20 = vadd.f32 %v2951_v54, %v15396_v57  ;;  %v3308_v27 = vmax.f32 %v2960_v35, 0.0 }
 0x31b   :  { %v13660_v18 = vpop.f32.mrf.mxu0 }
 0x31c   :  { %v2963_v22 = vadd.f32 %v13660_v18, %v15396_v57  ;;  %13789 = vmatprep.mubr.msk.bf16.mxu1 %vm1554_vm2, %v3406_v55  ;;  %v3306_v61 = vmax.f32 %v2952_v20, 0.0 }
 0x31d   :  { %v2954_v59 = vpop.f32.mrf.mxu0  ;;  %13790 = vmatmul.mubr.msk.bf16.gmra.mxu1 %vm1554_vm2, %v3407_v56 }
 0x31e   :  { %v2955_v60 = vadd.f32 %v2954_v59, %v15396_v57  ;;  %v3309_v50 = vmax.f32 %v2963_v22, 0.0  ;;  %v15619_v59 = vld [vmem:[%s18171_s6 + $0x1d0] sm:$0xff] }
 0x31f   :  { %v13663_v23 = vpop.f32.mrf.mxu0 }
 0x320   :  { %v3307_v62 = vmax.f32 %v2955_v60, 0.0  ;;  %v3409_v5 = vpack.c.bf16 %v3309_v50, %v3308_v27  ;;  %v2976_v10 = vadd.f32 %v13663_v23, %v15396_v57  ;;  %v15624_v60 = vld [vmem:[%s18171_s6 + $0x1f0] sm:$0xff]  ;;  %v15633_v27 = vld [vmem:[%s18171_s6 + $0x1d8] sm:$0xff] }
 0x321   :  { %v2967_v36 = vpop.f32.mrf.mxu0 }
 0x322   :  { %v3408_v4 = vpack.c.bf16 %v3307_v62, %v3306_v61  ;;  %v2968_v7 = vadd.f32 %v2967_v36, %v15396_v57  ;;  %v3312_v2 = vmax.f32 %v2976_v10, 0.0  ;;  %v12700_v61 = vcombine.low %v15619_v59, %v15624_v60  ;;  %v15638_v36 = vld [vmem:[%s18171_s6 + $0x1f8] sm:$0xff] }
 0x323   :  { %v13664_v6 = vpop.f32.mrf.mxu0  ;;  %v12701_v62 = vcombine.high %v15619_v59, %v15624_v60 }
 0x324   :  { %v2979_v8 = vadd.f32 %v13664_v6, %v15396_v57  ;;  %13793 = vmatprep.mubr.msk.bf16.mxu1 %vm1554_vm2, %v3408_v4  ;;  %v3310_v16 = vmax.f32 %v2968_v7, 0.0  ;;  %v12702_v4 = vcombine.low %v15633_v27, %v15638_v36 }
 0x325   :  { %v2970_v12 = vpop.f32.mrf.mxu0  ;;  %13794 = vmatmul.mubr.msk.bf16.gmra.mxu1 %vm1554_vm2, %v3409_v5  ;;  %6183 = vmatprep.subr.bf16.mxu0 %v12701_v62  ;;  %v12703_v5 = vcombine.high %v15633_v27, %v15638_v36 }
 0x326   :  { %v2971_v13 = vadd.f32 %v2970_v12, %v15396_v57  ;;  %v3313_v14 = vmax.f32 %v2979_v8, 0.0 }
 0x327   :  { %v13667_v15 = vpop.f32.mrf.mxu0  ;;  %6856 = vmatprep.subr.bf16.mxu1 %v12703_v5 }
 0x328   :  { %v3311_v17 = vmax.f32 %v2971_v13, 0.0  ;;  %v3411_v25 = vpack.c.bf16 %v3313_v14, %v3312_v2  ;;  %v2992_v31 = vadd.f32 %v13667_v15, %v15396_v57 }
 0x329   :  { %v2983_v21 = vpop.f32.mrf.mxu0 }
 0x32a   :  { %v3410_v24 = vpack.c.bf16 %v3311_v17, %v3310_v16  ;;  %v2984_v29 = vadd.f32 %v2983_v21, %v15396_v57  ;;  %v3316_v38 = vmax.f32 %v2992_v31, 0.0 }
 0x32b   :  { %v13668_v26 = vpop.f32.mrf.mxu0 }
 0x32c   :  { %v2995_v30 = vadd.f32 %v13668_v26, %v15396_v57  ;;  %13797 = vmatprep.mubr.msk.bf16.mxu1 %vm1554_vm2, %v3410_v24  ;;  %v3314_v34 = vmax.f32 %v2984_v29, 0.0 }
 0x32d   :  { %v2986_v32 = vpop.f32.mrf.mxu0  ;;  %13798 = vmatmul.mubr.msk.bf16.gmra.mxu1 %vm1554_vm2, %v3411_v25 }
 0x32e   :  { %v2987_v3 = vadd.f32 %v2986_v32, %v15396_v57  ;;  %v3317_v33 = vmax.f32 %v2995_v30, 0.0 }
 0x32f   :  { %v13671_v19 = vpop.f32.mrf.mxu0 }
 0x330   :  { %v3315_v37 = vmax.f32 %v2987_v3, 0.0  ;;  %v3413_v40 = vpack.c.bf16 %v3317_v33, %v3316_v38  ;;  %v3008_v44 = vadd.f32 %v13671_v19, %v15396_v57 }
 0x331   :  { %v2999_v39 = vpop.f32.mrf.mxu0 }
 0x332   :  { %v3412_v42 = vpack.c.bf16 %v3315_v37, %v3314_v34  ;;  %v3000_v58 = vadd.f32 %v2999_v39, %v15396_v57  ;;  %v3320_v51 = vmax.f32 %v3008_v44, 0.0 }
 0x333   :  { %v13672_v41 = vpop.f32.mrf.mxu0 }
 0x334   :  { %v3011_v43 = vadd.f32 %v13672_v41, %v15396_v57  ;;  %13801 = vmatprep.mubr.msk.bf16.mxu1 %vm1554_vm2, %v3412_v42  ;;  %v3318_v48 = vmax.f32 %v3000_v58, 0.0 }
 0x335   :  { %v3002_v45 = vpop.f32.mrf.mxu0  ;;  %13802 = vmatmul.mubr.msk.bf16.gmra.mxu1 %vm1554_vm2, %v3413_v40 }
 0x336   :  { %v3003_v46 = vadd.f32 %v3002_v45, %v15396_v57  ;;  %v3321_v9 = vmax.f32 %v3011_v43, 0.0 }
 0x337   :  { %v13675_v47 = vpop.f32.mrf.mxu0 }
 0x338   :  { %v3319_v49 = vmax.f32 %v3003_v46, 0.0  ;;  %v3415_v54 = vpack.c.bf16 %v3321_v9, %v3320_v51  ;;  %v3024_v20 = vadd.f32 %v13675_v47, %v15396_v57 }
 0x339   :  { %v3015_v52 = vpop.f32.mrf.mxu0 }
 0x33a   :  { %v3414_v53 = vpack.c.bf16 %v3319_v49, %v3318_v48  ;;  %v3016_v56 = vadd.f32 %v3015_v52, %v15396_v57  ;;  %v3324_v0 = vmax.f32 %v3024_v20, 0.0  ;;  %v15662_v20 = vld [vmem:[#allocation3 + $0x2] ss:$0 sm:$0xff] }
 0x33b   :  { %v13676_v55 = vpop.f32.mrf.mxu0 }
 0x33c   :  { %v3027_v18 = vadd.f32 %v13676_v55, %v15396_v57  ;;  %13805 = vmatprep.mubr.msk.bf16.mxu1 %vm1554_vm2, %v3414_v53  ;;  %v3322_v11 = vmax.f32 %v3016_v56, 0.0 }
 0x33d   :  { %v3018_v22 = vpop.f32.mrf.mxu0  ;;  %13806 = vmatmul.mubr.msk.bf16.gmra.mxu1 %vm1554_vm2, %v3415_v54 }
 0x33e   :  { %v3019_v35 = vadd.f32 %v3018_v22, %v15396_v57  ;;  %v3325_v50 = vmax.f32 %v3027_v18, 0.0 }
 0x33f   :  { %v13679_v23 = vpop.f32.mrf.mxu0 }
 0x340   :  { %v3323_v63 = vmax.f32 %v3019_v35, 0.0  ;;  %v3417_v7 = vpack.c.bf16 %v3325_v50, %v3324_v0  ;;  %v3040_v13 = vadd.f32 %v13679_v23, %v15396_v57 }
 0x341   :  { %v3031_v1 = vpop.f32.mrf.mxu0 }
 0x342   :  { %v3416_v6 = vpack.c.bf16 %v3323_v63, %v3322_v11  ;;  %v3032_v10 = vadd.f32 %v3031_v1, %v15396_v57  ;;  %v3328_v24 = vmax.f32 %v3040_v13, 0.0 }
 0x343   :  { %v13680_v8 = vpop.f32.mrf.mxu0 }
 0x344   :  { %v3043_v12 = vadd.f32 %v13680_v8, %v15396_v57  ;;  %13809 = vmatprep.mubr.msk.bf16.mxu1 %vm1554_vm2, %v3416_v6  ;;  %v3326_v2 = vmax.f32 %v3032_v10, 0.0 }
 0x345   :  { %v3034_v14 = vpop.f32.mrf.mxu0  ;;  %13810 = vmatmul.mubr.msk.bf16.gmra.mxu1 %vm1554_vm2, %v3417_v7 }
 0x346   :  { %v3035_v15 = vadd.f32 %v3034_v14, %v15396_v57  ;;  %v3329_v16 = vmax.f32 %v3043_v12, 0.0 }
 0x347   :  { %v13683_v17 = vpop.f32.mrf.mxu0 }
 0x348   :  { %v3327_v21 = vmax.f32 %v3035_v15, 0.0  ;;  %v3419_v29 = vpack.c.bf16 %v3329_v16, %v3328_v24  ;;  %v3056_v3 = vadd.f32 %v13683_v17, %v15396_v57 }
 0x349   :  { %v3047_v25 = vpop.f32.mrf.mxu0 }
 0x34a   :  { %v3418_v26 = vpack.c.bf16 %v3327_v21, %v3326_v2  ;;  %v3048_v31 = vadd.f32 %v3047_v25, %v15396_v57  ;;  %v3332_v42 = vmax.f32 %v3056_v3, 0.0 }
 0x34b   :  { %v13684_v30 = vpop.f32.mrf.mxu0 }
 0x34c   :  { %v3059_v32 = vadd.f32 %v13684_v30, %v15396_v57  ;;  %13813 = vmatprep.mubr.msk.bf16.mxu1 %vm1554_vm2, %v3418_v26  ;;  %v3330_v38 = vmax.f32 %v3048_v31, 0.0 }
 0x34d   :  { %v3050_v33 = vpop.f32.mrf.mxu0  ;;  %13814 = vmatmul.mubr.msk.bf16.gmra.mxu1 %vm1554_vm2, %v3419_v29 }
 0x34e   :  { %v3051_v19 = vadd.f32 %v3050_v33, %v15396_v57  ;;  %v3333_v34 = vmax.f32 %v3059_v32, 0.0 }
 0x34f   :  { %v13687_v37 = vpop.f32.mrf.mxu0 }
 0x350   :  { %v3331_v39 = vmax.f32 %v3051_v19, 0.0  ;;  %v3421_v58 = vpack.c.bf16 %v3333_v34, %v3332_v42  ;;  %v3072_v46 = vadd.f32 %v13687_v37, %v15396_v57 }
 0x351   :  { %v3063_v40 = vpop.f32.mrf.mxu0 }
 0x352   :  { %v3420_v41 = vpack.c.bf16 %v3331_v39, %v3330_v38  ;;  %v3064_v44 = vadd.f32 %v3063_v40, %v15396_v57  ;;  %v3336_v53 = vmax.f32 %v3072_v46, 0.0 }
 0x353   :  { %v13688_v43 = vpop.f32.mrf.mxu0 }
 0x354   :  { %v3075_v45 = vadd.f32 %v13688_v43, %v15396_v57  ;;  %13817 = vmatprep.mubr.msk.bf16.mxu1 %vm1554_vm2, %v3420_v41  ;;  %v3334_v51 = vmax.f32 %v3064_v44, 0.0 }
 0x355   :  { %v3066_v9 = vpop.f32.mrf.mxu0  ;;  %13818 = vmatmul.mubr.msk.bf16.gmra.mxu1 %vm1554_vm2, %v3421_v58 }
 0x356   :  { %v3067_v47 = vadd.f32 %v3066_v9, %v15396_v57  ;;  %v3337_v48 = vmax.f32 %v3075_v45, 0.0 }
 0x357   :  { %v13691_v49 = vpop.f32.mrf.mxu0 }
 0x358   :  { %v3335_v52 = vmax.f32 %v3067_v47, 0.0  ;;  %v3423_v56 = vpack.c.bf16 %v3337_v48, %v3336_v53  ;;  %v3088_v50 = vadd.f32 %v15662_v20, %v13691_v49 }
 0x359   :  { %v3079_v54 = vpop.f32.mrf.mxu0 }
 0x35a   :  { %v3422_v55 = vpack.c.bf16 %v3335_v52, %v3334_v51  ;;  %v3080_v22 = vadd.f32 %v15662_v20, %v3079_v54  ;;  %v3340_v1 = vmax.f32 %v3088_v50, 0.0 }
 0x35b   :  { %v13692_v18 = vpop.f32.mrf.mxu0 }
 0x35c   :  { %v3091_v35 = vadd.f32 %v15662_v20, %v13692_v18  ;;  %13821 = vmatprep.mubr.msk.bf16.mxu1 %vm1554_vm2, %v3422_v55  ;;  %v3338_v63 = vmax.f32 %v3080_v22, 0.0 }
 0x35d   :  { %v3082_v57 = vpop.f32.mrf.mxu0  ;;  %13822 = vmatmul.mubr.msk.bf16.gmra.mxu1 %vm1554_vm2, %v3423_v56 }
 0x35e   :  { %v3083_v23 = vadd.f32 %v15662_v20, %v3082_v57  ;;  %v3341_v62 = vmax.f32 %v3091_v35, 0.0 }
 0x35f   :  { %v13695_v11 = vpop.f32.mrf.mxu0 }
 0x360   :  { %v3339_v0 = vmax.f32 %v3083_v23, 0.0  ;;  %v3425_v7 = vpack.c.bf16 %v3341_v62, %v3340_v1  ;;  %v3104_v13 = vadd.f32 %v15662_v20, %v13695_v11 }
 0x361   :  { %v3095_v5 = vpop.f32.mrf.mxu0 }
 0x362   :  { %v3424_v6 = vpack.c.bf16 %v3339_v0, %v3338_v63  ;;  %v3096_v10 = vadd.f32 %v15662_v20, %v3095_v5  ;;  %v3344_v24 = vmax.f32 %v3104_v13, 0.0 }
 0x363   :  { %v13696_v8 = vpop.f32.mrf.mxu0 }
 0x364   :  { %v3107_v12 = vadd.f32 %v15662_v20, %v13696_v8  ;;  %13825 = vmatprep.mubr.msk.bf16.mxu1 %vm1554_vm2, %v3424_v6  ;;  %v3342_v2 = vmax.f32 %v3096_v10, 0.0 }
 0x365   :  { %v3098_v14 = vpop.f32.mrf.mxu0  ;;  %13826 = vmatmul.mubr.msk.bf16.gmra.mxu1 %vm1554_vm2, %v3425_v7  ;;  %v15694_v7 = vld [vmem:[#allocation3 + $0x3] ss:$0 sm:$0xff] }
 0x366   :  { %v3099_v15 = vadd.f32 %v15662_v20, %v3098_v14  ;;  %v3345_v16 = vmax.f32 %v3107_v12, 0.0 }
 0x367   :  { %v13699_v17 = vpop.f32.mrf.mxu0 }
 0x368   :  { %v3343_v21 = vmax.f32 %v3099_v15, 0.0  ;;  %v3427_v29 = vpack.c.bf16 %v3345_v16, %v3344_v24  ;;  %v3120_v3 = vadd.f32 %v15662_v20, %v13699_v17  ;;  %v4458_v24 = vld [vmem:[%s18171_s6 + $0x190] sm:$0xff] }
 0x369   :  { %v3111_v25 = vpop.f32.mrf.mxu0 }
 0x36a   :  { %v3426_v26 = vpack.c.bf16 %v3343_v21, %v3342_v2  ;;  %v3112_v31 = vadd.f32 %v15662_v20, %v3111_v25  ;;  %v3348_v42 = vmax.f32 %v3120_v3, 0.0  ;;  %v4462_v25 = vld [vmem:[%s18171_s6 + $0x1b0] sm:$0xff] }
 0x36b   :  { %v13700_v30 = vpop.f32.mrf.mxu0 }
 0x36c   :  { %v3123_v32 = vadd.f32 %v15662_v20, %v13700_v30  ;;  %13829 = vmatprep.mubr.msk.bf16.mxu1 %vm1554_vm2, %v3426_v26  ;;  %v3346_v38 = vmax.f32 %v3112_v31, 0.0 }
 0x36d   :  { %v3114_v33 = vpop.f32.mrf.mxu0  ;;  %13830 = vmatmul.mubr.msk.bf16.gmra.mxu1 %vm1554_vm2, %v3427_v29 }
 0x36e   :  { %v3115_v19 = vadd.f32 %v15662_v20, %v3114_v33  ;;  %v3349_v34 = vmax.f32 %v3123_v32, 0.0 }
 0x36f   :  { %v13703_v37 = vpop.f32.mrf.mxu0 }
 0x370   :  { %v3347_v39 = vmax.f32 %v3115_v19, 0.0  ;;  %v3429_v58 = vpack.c.bf16 %v3349_v34, %v3348_v42  ;;  %v3136_v46 = vadd.f32 %v15662_v20, %v13703_v37  ;;  %v12693_v37 = vcombine.high %v4458_v24, %v4462_v25 }
 0x371   :  { %v3127_v40 = vpop.f32.mrf.mxu0 }
 0x372   :  { %v3428_v41 = vpack.c.bf16 %v3347_v39, %v3346_v38  ;;  %v3128_v44 = vadd.f32 %v15662_v20, %v3127_v40  ;;  %v3352_v53 = vmax.f32 %v3136_v46, 0.0 }
 0x373   :  { %v13704_v43 = vpop.f32.mrf.mxu0 }
 0x374   :  { %v3139_v45 = vadd.f32 %v15662_v20, %v13704_v43  ;;  %13833 = vmatprep.mubr.msk.bf16.mxu1 %vm1554_vm2, %v3428_v41  ;;  %v3350_v51 = vmax.f32 %v3128_v44, 0.0 }
 0x375   :  { %v3130_v9 = vpop.f32.mrf.mxu0  ;;  %13834 = vmatmul.mubr.msk.bf16.gmra.mxu1 %vm1554_vm2, %v3429_v58 }
 0x376   :  { %v3131_v47 = vadd.f32 %v15662_v20, %v3130_v9  ;;  %v3353_v48 = vmax.f32 %v3139_v45, 0.0 }
 0x377   :  { %v13707_v49 = vpop.f32.mrf.mxu0 }
 0x378   :  { %v3351_v52 = vmax.f32 %v3131_v47, 0.0  ;;  %v3431_v56 = vpack.c.bf16 %v3353_v48, %v3352_v53  ;;  %v3152_v50 = vadd.f32 %v15662_v20, %v13707_v49  ;;  %v12692_v48 = vcombine.low %v4458_v24, %v4462_v25 }
 0x379   :  { %v3143_v54 = vpop.f32.mrf.mxu0 }
 0x37a   :  { %v3430_v55 = vpack.c.bf16 %v3351_v52, %v3350_v51  ;;  %v3144_v22 = vadd.f32 %v15662_v20, %v3143_v54  ;;  %v3356_v6 = vmax.f32 %v3152_v50, 0.0 }
 0x37b   :  { %v13708_v18 = vpop.f32.mrf.mxu0 }
 0x37c   :  { %v3155_v35 = vadd.f32 %v15662_v20, %v13708_v18  ;;  %13837 = vmatprep.mubr.msk.bf16.mxu1 %vm1554_vm2, %v3430_v55  ;;  %v3354_v1 = vmax.f32 %v3144_v22, 0.0 }
 0x37d   :  { %v3146_v57 = vpop.f32.mrf.mxu0  ;;  %v13743_v23 = vpop.f32.mrf.mxu1  ;;  %13838 = vmatmul.mubr.msk.bf16.gmra.mxu1 %vm1554_vm2, %v3431_v56 }
 0x37e   :  { %v3147_v62 = vadd.f32 %v15662_v20, %v3146_v57  ;;  %v3357_v11 = vmax.f32 %v3155_v35, 0.0  ;;  %v3714_v44 = vadd.f32 %v13743_v23, %v15694_v7 }
 0x37f   :  { %v13711_v63 = vpop.f32.mrf.mxu0  ;;  %v3705_v0 = vpop.f32.mrf.mxu1 }
 0x380   :  { %v3355_v5 = vmax.f32 %v3147_v62, 0.0  ;;  %v3706_v13 = vadd.f32 %v3705_v0, %v15694_v7  ;;  %v3433_v14 = vpack.c.bf16 %v3357_v11, %v3356_v6  ;;  %v3168_v26 = vadd.f32 %v15662_v20, %v13711_v63 }
 0x381   :  { %v3159_v8 = vpop.f32.mrf.mxu0  ;;  %v13744_v10 = vpop.f32.mrf.mxu1  ;;  %v4218_v56 = vmax.f32 %v3714_v44, 0.0 }
 0x382   :  { %v3432_v12 = vpack.c.bf16 %v3355_v5, %v3354_v1  ;;  %v3160_v17 = vadd.f32 %v15662_v20, %v3159_v8  ;;  %v4216_v31 = vmax.f32 %v3706_v13, 0.0  ;;  %v3717_v39 = vadd.f32 %v13744_v10, %v15694_v7 }
 0x383   :  { %v13712_v15 = vpop.f32.mrf.mxu0  ;;  %v3708_v16 = vpop.f32.mrf.mxu1  ;;  %v3360_v41 = vmax.f32 %v3168_v26, 0.0 }
 0x384   :  { %v3171_v2 = vadd.f32 %v15662_v20, %v13712_v15  ;;  %v3709_v21 = vadd.f32 %v3708_v16, %v15694_v7  ;;  %13841 = vmatprep.mubr.msk.bf16.mxu1 %vm1554_vm2, %v3432_v12  ;;  %v3358_v38 = vmax.f32 %v3160_v17, 0.0  ;;  %v4219_v49 = vmax.f32 %v3717_v39, 0.0 }
 0x385   :  { %v3162_v29 = vpop.f32.mrf.mxu0  ;;  %v15708_v30 = vpop.f32.mrf.mxu1  ;;  %13842 = vmatmul.mubr.msk.bf16.gmra.mxu1 %vm1554_vm2, %v3433_v14 }
 0x386   :  { %v4217_v32 = vmax.f32 %v3709_v21, 0.0  ;;  %v3163_v3 = vadd.f32 %v15662_v20, %v3162_v29  ;;  %v3361_v33 = vmax.f32 %v3171_v2, 0.0  ;;  %v15731_v22 = vpack.c.bf16 %v4219_v49, %v4218_v56 }
 0x387   :  { %v13715_v19 = vpop.f32.mrf.mxu0  ;;  %v3721_v34 = vpop.f32.mrf.mxu1 }
 0x388   :  { %v15713_v42 = vpack.c.bf16 %v4217_v32, %v4216_v31  ;;  %v3359_v40 = vmax.f32 %v3163_v3, 0.0  ;;  %v3435_v46 = vpack.c.bf16 %v3361_v33, %v3360_v41  ;;  %v3184_v53 = vadd.f32 %v15662_v20, %v13715_v19  ;;  %18286 = vst [vmem:[#allocation21_spill] sm:$0xff] %v15731_v22 }
 0x389   :  { %v3175_v58 = vpop.f32.mrf.mxu0  ;;  %v13748_v43 = vpop.f32.mrf.mxu1  ;;  %v3722_v63 = vadd.f32 %v3721_v34, %v15694_v7  ;;  %v3730_v19 = vadd.f32 %v15708_v30, %v15694_v7 }
 0x38a   :  { %18285 = vst [vmem:[#allocation20_spill] sm:$0xff] %v15713_v42  ;;  %v3434_v45 = vpack.c.bf16 %v3359_v40, %v3358_v38  ;;  %4870 = vmatmul.mubr.bf16.vlgmr.msra.gmra.mxu0 %v15713_v42  ;;  %v3176_v51 = vadd.f32 %v15662_v20, %v3175_v58  ;;  %v3364_v23 = vmax.f32 %v3184_v53, 0.0  ;;  %v3733_v25 = vadd.f32 %v13748_v43, %v15694_v7 }
 0x38b   :  { %v13716_v9 = vpop.f32.mrf.mxu0  ;;  %v3724_v47 = vpop.f32.mrf.mxu1  ;;  %4879 = vmatprep.mubr.bf16.mxu0 %v18176_v28  ;;  %6184 = vmatpush1.bf16.msra.mxu0 %v12700_v61  ;;  %v4220_v16 = vmax.f32 %v3722_v63, 0.0 }
 0x38c   :  { %v3187_v52 = vadd.f32 %v15662_v20, %v13716_v9  ;;  %13845 = vmatprep.mubr.msk.bf16.mxu1 %vm1554_vm2, %v3434_v45  ;;  %6185 = vmatprep.subr.bf16.mxu0 %v12693_v37  ;;  %v3362_v35 = vmax.f32 %v3176_v51, 0.0  ;;  %v3725_v50 = vadd.f32 %v3724_v47, %v15694_v7  ;;  %v4223_v40 = vmax.f32 %v3733_v25, 0.0 }
 0x38d   :  { %v3178_v54 = vpop.f32.mrf.mxu0  ;;  %v15725_v55 = vpop.f32.mrf.mxu1  ;;  %13846 = vmatmul.mubr.msk.bf16.gmra.mxu1 %vm1554_vm2, %v3435_v46  ;;  %v4222_v45 = vmax.f32 %v3730_v19, 0.0 }
 0x38e   :  { %v3179_v59 = vadd.f32 %v15662_v20, %v3178_v54  ;;  %v3365_v60 = vmax.f32 %v3187_v52, 0.0  ;;  %v4221_v8 = vmax.f32 %v3725_v50, 0.0 }
 0x38f   :  { %v13719_v61 = vpop.f32.mrf.mxu0  ;;  %v15729_v18 = vpop.f32.mrf.mxu1  ;;  %6186 = vmatpush1.bf16.msra.mxu0 %v12692_v48  ;;  %v15770_v49 = vpack.c.bf16 %v4223_v40, %v4222_v45 }
 0x390   :  { %v3363_v57 = vmax.f32 %v3179_v59, 0.0  ;;  %v3437_v1 = vpack.c.bf16 %v3365_v60, %v3364_v23  ;;  %v3200_v13 = vadd.f32 %v15662_v20, %v13719_v61  ;;  %v15750_v26 = vpack.c.bf16 %v4221_v8, %v4220_v16 }
 0x391   :  { %v3191_v62 = vpop.f32.mrf.mxu0  ;;  %v15734_v11 = vpop.f32.mrf.mxu1  ;;  %18288 = vst [vmem:[#allocation23_spill] sm:$0xff] %v15770_v49  ;;  %v3738_v60 = vadd.f32 %v15729_v18, %v15694_v7 }
 0x392   :  { %v3436_v0 = vpack.c.bf16 %v3363_v57, %v3362_v35  ;;  %4880 = vmatmul.mubr.bf16.gmra.mxu0 %v15731_v22  ;;  %v3192_v10 = vadd.f32 %v15662_v20, %v3191_v62  ;;  %18287 = vst [vmem:[#allocation22_spill] sm:$0xff] %v15750_v26  ;;  %v3368_v32 = vmax.f32 %v3200_v13, 0.0  ;;  %v3749_v13 = vadd.f32 %v15734_v11, %v15694_v7 }
 0x393   :  { %v13720_v5 = vpop.f32.mrf.mxu0  ;;  %v3740_v6 = vpop.f32.mrf.mxu1  ;;  %4889 = vmatprep.mubr.bf16.mxu0 %v18176_v28 }
 0x394   :  { %v3203_v12 = vadd.f32 %v15662_v20, %v13720_v5  ;;  %13849 = vmatprep.mubr.msk.bf16.mxu1 %vm1554_vm2, %v3436_v0  ;;  %v3366_v29 = vmax.f32 %v3192_v10, 0.0  ;;  %v3741_v51 = vadd.f32 %v3740_v6, %v15694_v7  ;;  %v4224_v5 = vmax.f32 %v3738_v60, 0.0 }
 0x395   :  { %v3194_v14 = vpop.f32.mrf.mxu0  ;;  %v15743_v15 = vpop.f32.mrf.mxu1  ;;  %13850 = vmatmul.mubr.msk.bf16.gmra.mxu1 %vm1554_vm2, %v3437_v1  ;;  %v4227_v11 = vmax.f32 %v3749_v13, 0.0 }
 0x396   :  { %v3195_v17 = vadd.f32 %v15662_v20, %v3194_v14  ;;  %v3369_v2 = vmax.f32 %v3203_v12, 0.0  ;;  %v4225_v23 = vmax.f32 %v3741_v51, 0.0 }
 0x397   :  { %v13723_v21 = vpop.f32.mrf.mxu0  ;;  %v15747_v24 = vpop.f32.mrf.mxu1 }
 0x398   :  { %v3367_v31 = vmax.f32 %v3195_v17, 0.0  ;;  %v3439_v37 = vpack.c.bf16 %v3369_v2, %v3368_v32  ;;  %v3216_v43 = vadd.f32 %v15662_v20, %v13723_v21  ;;  %v15793_v14 = vpack.c.bf16 %v4225_v23, %v4224_v5 }
 0x399   :  { %v3207_v3 = vpop.f32.mrf.mxu0  ;;  %v15752_v33 = vpop.f32.mrf.mxu1 }
 0x39a   :  { %v3438_v34 = vpack.c.bf16 %v3367_v31, %v3366_v29  ;;  %4890 = vmatmul.mubr.bf16.gmra.mxu0 %v15750_v26  ;;  %v3208_v41 = vadd.f32 %v15662_v20, %v3207_v3  ;;  %v3372_v54 = vmax.f32 %v3216_v43, 0.0  ;;  %18289 = vst [vmem:[#allocation24_spill] sm:$0xff] %v15793_v14  ;;  %v3746_v29 = vadd.f32 %v15725_v55, %v15694_v7 }
 0x39b   :  { %v13724_v38 = vpop.f32.mrf.mxu0  ;;  %v15757_v39 = vpop.f32.mrf.mxu1  ;;  %4899 = vmatprep.mubr.bf16.mxu0 %v18176_v28 }
 0x39c   :  { %v3219_v58 = vadd.f32 %v15662_v20, %v13724_v38  ;;  %13853 = vmatprep.mubr.msk.bf16.mxu1 %vm1554_vm2, %v3438_v34  ;;  %v3370_v52 = vmax.f32 %v3208_v41, 0.0  ;;  %v4226_v41 = vmax.f32 %v3746_v29, 0.0  ;;  %v4454_v29 = vld [vmem:[%s18171_s6 + $0x170] sm:$0xff] }
 0x39d   :  { %v3210_v44 = vpop.f32.mrf.mxu0  ;;  %v15764_v30 = vpop.f32.mrf.mxu1  ;;  %13854 = vmatmul.mubr.msk.bf16.gmra.mxu1 %vm1554_vm2, %v3439_v37 }
 0x39e   :  { %v3211_v46 = vadd.f32 %v15662_v20, %v3210_v44  ;;  %v3373_v9 = vmax.f32 %v3219_v58, 0.0  ;;  %v15813_v45 = vpack.c.bf16 %v4227_v11, %v4226_v41 }
 0x39f   :  { %v13727_v47 = vpop.f32.mrf.mxu0  ;;  %v15768_v48 = vpop.f32.mrf.mxu1 }
 0x3a0   :  { %v3371_v53 = vmax.f32 %v3211_v46, 0.0  ;;  %v3441_v35 = vpack.c.bf16 %v3373_v9, %v3372_v54  ;;  %v3232_v0 = vadd.f32 %v15662_v20, %v13727_v47  ;;  %18290 = vst [vmem:[#allocation25_spill] sm:$0xff] %v15813_v45  ;;  %v3757_v46 = vadd.f32 %v15757_v39, %v15694_v7 }
 0x3a1   :  { %v3223_v56 = vpop.f32.mrf.mxu0  ;;  %v15773_v59 = vpop.f32.mrf.mxu1 }
 0x3a2   :  { %v3440_v61 = vpack.c.bf16 %v3371_v53, %v3370_v52  ;;  %4900 = vmatmul.mubr.bf16.gmra.mxu0 %v15770_v49  ;;  %v3224_v62 = vadd.f32 %v15662_v20, %v3223_v56  ;;  %v3376_v2 = vmax.f32 %v3232_v0, 0.0  ;;  %v3754_v53 = vadd.f32 %v15747_v24, %v15694_v7 }
 0x3a3   :  { %v13728_v50 = vpop.f32.mrf.mxu0  ;;  %v15778_v57 = vpop.f32.mrf.mxu1  ;;  %4909 = vmatprep.mubr.bf16.mxu0 %v18176_v28  ;;  %v4229_v60 = vmax.f32 %v3757_v46, 0.0  ;;  %v3765_v24 = vadd.f32 %v15752_v33, %v15694_v7 }
 0x3a4   :  { %v3235_v63 = vadd.f32 %v15662_v20, %v13728_v50  ;;  %13857 = vmatprep.mubr.msk.bf16.mxu1 %vm1554_vm2, %v3440_v61  ;;  %v3374_v16 = vmax.f32 %v3224_v62, 0.0  ;;  %v4228_v61 = vmax.f32 %v3754_v53, 0.0  ;;  %v4459_v62 = vld [vmem:[%s18171_s6 + $0x198] sm:$0xff]  ;;  %v3773_v27 = vadd.f32 %v15778_v57, %v15694_v7 }
 0x3a5   :  { %v3226_v1 = vpop.f32.mrf.mxu0  ;;  %v15785_v18 = vpop.f32.mrf.mxu1  ;;  %13858 = vmatmul.mubr.msk.bf16.gmra.mxu1 %vm1554_vm2, %v3441_v35 }
 0x3a6   :  { %v3227_v6 = vadd.f32 %v15662_v20, %v3226_v1  ;;  %v3377_v8 = vmax.f32 %v3235_v63, 0.0  ;;  %v15832_v50 = vpack.c.bf16 %v4229_v60, %v4228_v61  ;;  %v4463_v63 = vld [vmem:[%s18171_s6 + $0x1b8] sm:$0xff]  ;;  %v3762_v1 = vadd.f32 %v15743_v15, %v15694_v7 }
 0x3a7   :  { %v13731_v10 = vpop.f32.mrf.mxu0  ;;  %v15789_v12 = vpop.f32.mrf.mxu1  ;;  %v12694_v15 = vcombine.low %v4459_v62, %v4463_v63  ;;  %v4233_v46 = vmax.f32 %v3773_v27, 0.0  ;;  %v3781_v61 = vadd.f32 %v15773_v59, %v15694_v7 }
 0x3a8   :  { %v3375_v17 = vmax.f32 %v3227_v6, 0.0  ;;  %v3443_v32 = vpack.c.bf16 %v3377_v8, %v3376_v2  ;;  %v3248_v38 = vadd.f32 %v15662_v20, %v13731_v10  ;;  %18291 = vst [vmem:[#allocation26_spill] sm:$0xff] %v15832_v50  ;;  %v12695_v6 = vcombine.high %v4459_v62, %v4463_v63 }
 0x3a9   :  { %v3239_v21 = vpop.f32.mrf.mxu0  ;;  %v15795_v25 = vpop.f32.mrf.mxu1  ;;  %v4231_v8 = vmax.f32 %v3765_v24, 0.0  ;;  %v4235_v59 = vmax.f32 %v3781_v61, 0.0 }
 0x3aa   :  { %v3442_v31 = vpack.c.bf16 %v3375_v17, %v3374_v16  ;;  %4910 = vmatmul.mubr.bf16.gmra.mxu0 %v15793_v14  ;;  %v3240_v34 = vadd.f32 %v15662_v20, %v3239_v21  ;;  %v3380_v51 = vmax.f32 %v3248_v38, 0.0  ;;  %v4230_v17 = vmax.f32 %v3762_v1, 0.0  ;;  %v4450_v21 = vld [vmem:[%s18171_s6 + $0x150] sm:$0xff] }
 0x3ab   :  { %v13732_v3 = vpop.f32.mrf.mxu0  ;;  %v15800_v19 = vpop.f32.mrf.mxu1  ;;  %4919 = vmatprep.mubr.bf16.mxu0 %v18176_v28 }
 0x3ac   :  { %v3251_v37 = vadd.f32 %v15662_v20, %v13732_v3  ;;  %13861 = vmatprep.mubr.msk.bf16.mxu1 %vm1554_vm2, %v3442_v31  ;;  %v3378_v9 = vmax.f32 %v3240_v34, 0.0  ;;  %v12685_v3 = vcombine.high %v4450_v21, %v4454_v29  ;;  %v15861_v11 = vpack.c.bf16 %v4231_v8, %v4230_v17  ;;  %v4455_v34 = vld [vmem:[%s18171_s6 + $0x178] sm:$0xff] }
 0x3ad   :  { %v3242_v40 = vpop.f32.mrf.mxu0  ;;  %v15807_v55 = vpop.f32.mrf.mxu1  ;;  %13862 = vmatmul.mubr.msk.bf16.gmra.mxu1 %vm1554_vm2, %v3443_v32  ;;  %v12684_v32 = vcombine.low %v4450_v21, %v4454_v29 }
 0x3ae   :  { %v3243_v58 = vadd.f32 %v15662_v20, %v3242_v40  ;;  %v3381_v43 = vmax.f32 %v3251_v37, 0.0  ;;  %18293 = vst [vmem:[#allocation28_spill] sm:$0xff] %v15861_v11  ;;  %v3770_v37 = vadd.f32 %v15768_v48, %v15694_v7  ;;  %6187 = vmatprep.subr.bf16.mxu0 %v12685_v3 }
 0x3af   :  { %v15811_v44 = vpop.f32.mrf.mxu1  ;;  %6188 = vmatpush1.bf16.msra.mxu0 %v12684_v32  ;;  %v3789_v32 = vadd.f32 %v15800_v19, %v15694_v7 }
 0x3b0   :  { %v3379_v47 = vmax.f32 %v3243_v58, 0.0  ;;  %v3445_v20 = vpack.c.bf16 %v3381_v43, %v3380_v51  ;;  %v4232_v53 = vmax.f32 %v3770_v37, 0.0 }
 0x3b1   :  { %v15817_v52 = vpop.f32.mrf.mxu1 }
 0x3b2   :  { %v3444_v54 = vpack.c.bf16 %v3379_v47, %v3378_v9  ;;  %4920 = vmatmul.mubr.bf16.gmra.mxu0 %v15813_v45  ;;  %v15885_v24 = vpack.c.bf16 %v4233_v46, %v4232_v53 }
 0x3b3   :  { %v15822_v56 = vpop.f32.mrf.mxu1  ;;  %4929 = vmatprep.mubr.bf16.mxu0 %v18176_v28 }
 0x3b4   :  { %13865 = vmatprep.mubr.msk.bf16.mxu1 %vm1554_vm2, %v3444_v54  ;;  %18295 = vst [vmem:[#allocation30_spill] sm:$0xff] %v15885_v24 }
 0x3b5   :  { %v13771_v39 = vpop.f32.mrf.mxu1  ;;  %13866 = vmatmul.mubr.msk.bf16.gmra.mxu1 %vm1554_vm2, %v3445_v20 }
 0x3b6   :  { %5542 = vmatprep.mubr.bf16.mxu1 %v18176_v28  ;;  %v3826_v23 = vadd.f32 %v13771_v39, %v15694_v7 }
 0x3b7   :  { %v15828_v35 = vpop.f32.mrf.mxu1 }
 0x3b8   :  { %v4246_v10 = vmax.f32 %v3826_v23, 0.0 }
 0x3b9   :  { %v13772_v0 = vpop.f32.mrf.mxu1 }
 0x3ba   :  { %v3829_v5 = vadd.f32 %v13772_v0, %v15694_v7  ;;  %4930 = vmatmul.mubr.bf16.gmra.mxu0 %v15832_v50  ;;  %v3778_v0 = vadd.f32 %v15764_v30, %v15694_v7 }
 0x3bb   :  { %v15845_v33 = vpop.f32.mrf.mxu1  ;;  %4939 = vmatprep.mubr.bf16.mxu0 %v18176_v28 }
 0x3bc   :  { %v4247_v13 = vmax.f32 %v3829_v5, 0.0  ;;  %v4234_v17 = vmax.f32 %v3778_v0, 0.0 }
 0x3bd   :  { %v13775_v16 = vpop.f32.mrf.mxu1  ;;  %5543 = vmatmul.mubr.bf16.vlgmr.msra.gmra.mxu1 %v15713_v42 }
 0x3be   :  { %v15849_v2 = vpack.c.bf16 %v4247_v13, %v4246_v10  ;;  %6857 = vmatpush1.bf16.msra.mxu1 %v12702_v4  ;;  %5552 = vmatprep.mubr.bf16.mxu1 %v18176_v28  ;;  %v3842_v36 = vadd.f32 %v13775_v16, %v15694_v7  ;;  %v4451_v4 = vld [vmem:[%s18171_s6 + $0x158] sm:$0xff] }
 0x3bf   :  { %v3833_v31 = vpop.f32.mrf.mxu1  ;;  %6858 = vmatprep.subr.bf16.mxu1 %v12695_v6  ;;  %v12687_v40 = vcombine.high %v4451_v4, %v4455_v34  ;;  %v12686_v58 = vcombine.low %v4451_v4, %v4455_v34  ;;  %v3786_v4 = vadd.f32 %v15789_v12, %v15694_v7 }
 0x3c0   :  { %18292 = vst [vmem:[#allocation27_spill] sm:$0xff] %v15849_v2  ;;  %v3834_v41 = vadd.f32 %v3833_v31, %v15694_v7  ;;  %v4250_v9 = vmax.f32 %v3842_v36, 0.0  ;;  %v15901_v31 = vpack.c.bf16 %v4235_v59, %v4234_v17  ;;  %v3805_v17 = vadd.f32 %v15822_v56, %v15694_v7 }
 0x3c1   :  { %v13776_v38 = vpop.f32.mrf.mxu1 }
 0x3c2   :  { %v3845_v57 = vadd.f32 %v13776_v38, %v15694_v7  ;;  %4940 = vmatmul.mubr.bf16.gmra.mxu0 %v15861_v11  ;;  %6859 = vmatpush1.bf16.msra.mxu1 %v12694_v15  ;;  %v4248_v54 = vmax.f32 %v3834_v41, 0.0  ;;  %18298 = vst [vmem:[#allocation33_spill] sm:$0xff] %v15901_v31 }
 0x3c3   :  { %v3836_v43 = vpop.f32.mrf.mxu1  ;;  %4949 = vmatprep.mubr.bf16.mxu0 %v18176_v28  ;;  %6860 = vmatprep.subr.bf16.mxu1 %v12687_v40  ;;  %v4237_v40 = vmax.f32 %v3789_v32, 0.0  ;;  %v3802_v32 = vadd.f32 %v15811_v44, %v15694_v7 }
 0x3c4   :  { %v4251_v47 = vmax.f32 %v3845_v57, 0.0  ;;  %v3837_v48 = vadd.f32 %v3836_v43, %v15694_v7  ;;  %v4236_v43 = vmax.f32 %v3786_v4, 0.0 }
 0x3c5   :  { %v13779_v51 = vpop.f32.mrf.mxu1  ;;  %5553 = vmatmul.mubr.bf16.gmra.mxu1 %v15731_v22 }
 0x3c6   :  { %v15880_v20 = vpack.c.bf16 %v4251_v47, %v4250_v9  ;;  %v4249_v60 = vmax.f32 %v3837_v48, 0.0  ;;  %5562 = vmatprep.mubr.bf16.mxu1 %v18176_v28  ;;  %6861 = vmatpush1.bf16.msra.mxu1 %v12686_v58  ;;  %v3858_v62 = vadd.f32 %v13779_v51, %v15694_v7  ;;  %v3797_v48 = vadd.f32 %v15795_v25, %v15694_v7 }
 0x3c7   :  { %v3849_v39 = vpop.f32.mrf.mxu1  ;;  %v15921_v51 = vpack.c.bf16 %v4237_v40, %v4236_v43  ;;  %v3813_v43 = vadd.f32 %v15817_v52, %v15694_v7 }
 0x3c8   :  { %18294 = vst [vmem:[#allocation29_spill] sm:$0xff] %v15880_v20  ;;  %v15887_v23 = vpack.c.bf16 %v4249_v60, %v4248_v54  ;;  %v3850_v1 = vadd.f32 %v3849_v39, %v15694_v7  ;;  %v4254_v8 = vmax.f32 %v3858_v62, 0.0  ;;  %v3794_v39 = vadd.f32 %v15785_v18, %v15694_v7 }
 0x3c9   :  { %v13780_v63 = vpop.f32.mrf.mxu1  ;;  %18301 = vst [vmem:[#allocation36_spill] sm:$0xff] %v15921_v51  ;;  %v4239_v25 = vmax.f32 %v3797_v48, 0.0  ;;  %v4243_v52 = vmax.f32 %v3813_v43, 0.0 }
 0x3ca   :  { %18296 = vst [vmem:[#allocation31_spill] sm:$0xff] %v15887_v23  ;;  %v3861_v5 = vadd.f32 %v13780_v63, %v15694_v7  ;;  %4950 = vmatmul.mubr.bf16.gmra.mxu0 %v15885_v24  ;;  %v4252_v15 = vmax.f32 %v3850_v1, 0.0  ;;  %v4238_v59 = vmax.f32 %v3794_v39, 0.0 }
 0x3cb   :  { %v3852_v6 = vpop.f32.mrf.mxu1  ;;  %4959 = vmatprep.mubr.bf16.mxu0 %v18176_v28 }
 0x3cc   :  { %v4255_v10 = vmax.f32 %v3861_v5, 0.0  ;;  %v3853_v13 = vadd.f32 %v3852_v6, %v15694_v7 }
 0x3cd   :  { %v13783_v16 = vpop.f32.mrf.mxu1  ;;  %5563 = vmatmul.mubr.bf16.gmra.mxu1 %v15750_v26 }
 0x3ce   :  { %v15898_v30 = vpack.c.bf16 %v4255_v10, %v4254_v8  ;;  %v4253_v21 = vmax.f32 %v3853_v13, 0.0  ;;  %5572 = vmatprep.mubr.bf16.mxu1 %v18176_v28  ;;  %v3874_v27 = vadd.f32 %v13783_v16, %v15694_v7  ;;  %v15937_v16 = vpack.c.bf16 %v4239_v25, %v4238_v59 }
 0x3cf   :  { %v3865_v29 = vpop.f32.mrf.mxu1 }
 0x3d0   :  { %18297 = vst [vmem:[#allocation32_spill] sm:$0xff] %v15898_v30  ;;  %v15905_v3 = vpack.c.bf16 %v4253_v21, %v4252_v15  ;;  %v3866_v34 = vadd.f32 %v3865_v29, %v15694_v7  ;;  %v4258_v41 = vmax.f32 %v3874_v27, 0.0  ;;  %18304 = vst [vmem:[#allocation39_spill] sm:$0xff] %v15937_v16 }
 0x3d1   :  { %v13784_v36 = vpop.f32.mrf.mxu1 }
 0x3d2   :  { %18299 = vst [vmem:[#allocation34_spill] sm:$0xff] %v15905_v3  ;;  %v3877_v37 = vadd.f32 %v13784_v36, %v15694_v7  ;;  %4960 = vmatmul.mubr.bf16.gmra.mxu0 %v15901_v31  ;;  %v4256_v46 = vmax.f32 %v3866_v34, 0.0  ;;  %v4241_v34 = vmax.f32 %v3805_v17, 0.0 }
 0x3d3   :  { %v3868_v38 = vpop.f32.mrf.mxu1  ;;  %4969 = vmatprep.mubr.bf16.mxu0 %v18176_v28 }
 0x3d4   :  { %v4259_v19 = vmax.f32 %v3877_v37, 0.0  ;;  %v3869_v57 = vadd.f32 %v3868_v38, %v15694_v7 }
 0x3d5   :  { %v13787_v58 = vpop.f32.mrf.mxu1  ;;  %5573 = vmatmul.mubr.bf16.gmra.mxu1 %v15770_v49 }
 0x3d6   :  { %v15916_v12 = vpack.c.bf16 %v4259_v19, %v4258_v41  ;;  %v4257_v9 = vmax.f32 %v3869_v57, 0.0  ;;  %5582 = vmatprep.mubr.bf16.mxu1 %v18176_v28  ;;  %v3890_v54 = vadd.f32 %v13787_v58, %v15694_v7  ;;  %v4240_v41 = vmax.f32 %v3802_v32, 0.0 }
 0x3d7   :  { %v3881_v47 = vpop.f32.mrf.mxu1 }
 0x3d8   :  { %18300 = vst [vmem:[#allocation35_spill] sm:$0xff] %v15916_v12  ;;  %v15923_v53 = vpack.c.bf16 %v4257_v9, %v4256_v46  ;;  %v3882_v61 = vadd.f32 %v3881_v47, %v15694_v7  ;;  %v4262_v0 = vmax.f32 %v3890_v54, 0.0  ;;  %v15957_v46 = vpack.c.bf16 %v4241_v34, %v4240_v41 }
 0x3d9   :  { %v13788_v60 = vpop.f32.mrf.mxu1  ;;  %v3810_v54 = vadd.f32 %v15807_v55, %v15694_v7 }
 0x3da   :  { %18302 = vst [vmem:[#allocation37_spill] sm:$0xff] %v15923_v53  ;;  %v3893_v62 = vadd.f32 %v13788_v60, %v15694_v7  ;;  %4970 = vmatmul.mubr.bf16.gmra.mxu0 %v15921_v51  ;;  %v4260_v8 = vmax.f32 %v3882_v61, 0.0  ;;  %18306 = vst [vmem:[#allocation41_spill] sm:$0xff] %v15957_v46 }
 0x3db   :  { %v3884_v63 = vpop.f32.mrf.mxu1  ;;  %4979 = vmatprep.mubr.bf16.mxu0 %v18176_v28 }
 0x3dc   :  { %v4263_v1 = vmax.f32 %v3893_v62, 0.0  ;;  %v3885_v5 = vadd.f32 %v3884_v63, %v15694_v7 }
 0x3dd   :  { %v13791_v6 = vpop.f32.mrf.mxu1  ;;  %5583 = vmatmul.mubr.bf16.gmra.mxu1 %v15793_v14 }
 0x3de   :  { %v15934_v18 = vpack.c.bf16 %v4263_v1, %v4262_v0  ;;  %v4261_v10 = vmax.f32 %v3885_v5, 0.0  ;;  %5592 = vmatprep.mubr.bf16.mxu1 %v18176_v28  ;;  %v3906_v21 = vadd.f32 %v13791_v6, %v15694_v7  ;;  %v4242_v1 = vmax.f32 %v3810_v54, 0.0 }
 0x3df   :  { %v3897_v13 = vpop.f32.mrf.mxu1 }
 0x3e0   :  { %18303 = vst [vmem:[#allocation38_spill] sm:$0xff] %v15934_v18  ;;  %v15941_v15 = vpack.c.bf16 %v4261_v10, %v4260_v8  ;;  %v3898_v27 = vadd.f32 %v3897_v13, %v15694_v7  ;;  %v4266_v37 = vmax.f32 %v3906_v21, 0.0  ;;  %v15973_v8 = vpack.c.bf16 %v4243_v52, %v4242_v1 }
 0x3e1   :  { %v13792_v29 = vpop.f32.mrf.mxu1  ;;  %v3821_v10 = vadd.f32 %v15845_v33, %v15694_v7 }
 0x3e2   :  { %18305 = vst [vmem:[#allocation40_spill] sm:$0xff] %v15941_v15  ;;  %v3909_v36 = vadd.f32 %v13792_v29, %v15694_v7  ;;  %4980 = vmatmul.mubr.bf16.gmra.mxu0 %v15937_v16  ;;  %v4264_v19 = vmax.f32 %v3898_v27, 0.0  ;;  %18308 = vst [vmem:[#allocation43_spill] sm:$0xff] %v15973_v8  ;;  %v3818_v29 = vadd.f32 %v15828_v35, %v15694_v7 }
 0x3e3   :  { %v3900_v4 = vpop.f32.mrf.mxu1  ;;  %4989 = vmatprep.mubr.bf16.mxu0 %v18176_v28 }
 0x3e4   :  { %v4267_v56 = vmax.f32 %v3909_v36, 0.0  ;;  %v3901_v38 = vadd.f32 %v3900_v4, %v15694_v7  ;;  %v4245_v4 = vmax.f32 %v3821_v10, 0.0 }
 0x3e5   :  { %v13795_v40 = vpop.f32.mrf.mxu1  ;;  %5593 = vmatmul.mubr.bf16.gmra.mxu1 %v15813_v45 }
 0x3e6   :  { %v15952_v44 = vpack.c.bf16 %v4267_v56, %v4266_v37  ;;  %v4265_v57 = vmax.f32 %v3901_v38, 0.0  ;;  %5602 = vmatprep.mubr.bf16.mxu1 %v18176_v28  ;;  %v3922_v47 = vadd.f32 %v13795_v40, %v15694_v7  ;;  %v4244_v38 = vmax.f32 %v3818_v29, 0.0 }
 0x3e7   :  { %v3913_v58 = vpop.f32.mrf.mxu1 }
 0x3e8   :  { %v15959_v9 = vpack.c.bf16 %v4265_v57, %v4264_v19  ;;  %v3914_v60 = vadd.f32 %v3913_v58, %v15694_v7  ;;  %v4270_v62 = vmax.f32 %v3922_v47, 0.0  ;;  %v15991_v57 = vpack.c.bf16 %v4245_v4, %v4244_v38 }
 0x3e9   :  { %v13796_v48 = vpop.f32.mrf.mxu1 }
 0x3ea   :  { %18307 = vst [vmem:[#allocation42_spill] sm:$0xff] %v15959_v9  ;;  %v3925_v39 = vadd.f32 %v13796_v48, %v15694_v7  ;;  %4990 = vmatmul.mubr.bf16.gmra.mxu0 %v15957_v46  ;;  %v4268_v5 = vmax.f32 %v3914_v60, 0.0  ;;  %18309 = vst [vmem:[#allocation44_spill] sm:$0xff] %v15991_v57 }
 0x3eb   :  { %v3916_v61 = vpop.f32.mrf.mxu1  ;;  %4999 = vmatprep.mubr.bf16.mxu0 %v18176_v28 }
 0x3ec   :  { %v4271_v63 = vmax.f32 %v3925_v39, 0.0  ;;  %v3917_v25 = vadd.f32 %v3916_v61, %v15694_v7 }
 0x3ed   :  { %v13799_v0 = vpop.f32.mrf.mxu1  ;;  %5603 = vmatmul.mubr.bf16.gmra.mxu1 %v15832_v50 }
 0x3ee   :  { %v15970_v55 = vpack.c.bf16 %v4271_v63, %v4270_v62  ;;  %v4269_v6 = vmax.f32 %v3917_v25, 0.0  ;;  %5612 = vmatprep.mubr.bf16.mxu1 %v18176_v28  ;;  %v3938_v17 = vadd.f32 %v13799_v0, %v15694_v7 }
 0x3ef   :  { %v3929_v59 = vpop.f32.mrf.mxu1 }
 0x3f0   :  { %v15977_v13 = vpack.c.bf16 %v4269_v6, %v4268_v5  ;;  %v3930_v32 = vadd.f32 %v3929_v59, %v15694_v7  ;;  %v4274_v34 = vmax.f32 %v3938_v17, 0.0  ;;  %v4442_v5 = vld [vmem:[%s18171_s6 + $0x110] sm:$0xff] }
 0x3f1   :  { %v13800_v21 = vpop.f32.mrf.mxu1  ;;  %v4446_v6 = vld [vmem:[%s18171_s6 + $0x130] sm:$0xff] }
 0x3f2   :  { %v3941_v27 = vadd.f32 %v13800_v21, %v15694_v7  ;;  %5000 = vmatmul.mubr.bf16.gmra.mxu0 %v15973_v8  ;;  %v4272_v40 = vmax.f32 %v3930_v32, 0.0  ;;  %v12676_v17 = vcombine.low %v4442_v5, %v4446_v6  ;;  %v12677_v29 = vcombine.high %v4442_v5, %v4446_v6  ;;  %v4443_v32 = vld [vmem:[%s18171_s6 + $0x118] sm:$0xff] }
 0x3f3   :  { %v3932_v36 = vpop.f32.mrf.mxu1  ;;  %5009 = vmatprep.mubr.bf16.mxu0 %v18176_v28 }
 0x3f4   :  { %v4275_v33 = vmax.f32 %v3941_v27, 0.0  ;;  %v3933_v37 = vadd.f32 %v3932_v36, %v15694_v7  ;;  %v4447_v27 = vld [vmem:[%s18171_s6 + $0x138] sm:$0xff]  ;;  %6189 = vmatprep.subr.bf16.mxu0 %v12677_v29 }
 0x3f5   :  { %v13803_v56 = vpop.f32.mrf.mxu1  ;;  %5613 = vmatmul.mubr.bf16.gmra.mxu1 %v15861_v11  ;;  %6190 = vmatpush1.bf16.msra.mxu0 %v12676_v17 }
 0x3f6   :  { %v15988_v35 = vpack.c.bf16 %v4275_v33, %v4274_v34  ;;  %v4273_v41 = vmax.f32 %v3933_v37, 0.0  ;;  %5622 = vmatprep.mubr.bf16.mxu1 %v18176_v28  ;;  %v3954_v43 = vadd.f32 %v13803_v56, %v15694_v7  ;;  %v12678_v34 = vcombine.low %v4443_v32, %v4447_v27 }
 0x3f7   :  { %v3945_v19 = vpop.f32.mrf.mxu1  ;;  %v12679_v33 = vcombine.high %v4443_v32, %v4447_v27 }
 0x3f8   :  { %v15993_v58 = vpack.c.bf16 %v4273_v41, %v4272_v40  ;;  %v3946_v48 = vadd.f32 %v3945_v19, %v15694_v7  ;;  %v4278_v39 = vmax.f32 %v3954_v43, 0.0 }
 0x3f9   :  { %v13804_v47 = vpop.f32.mrf.mxu1  ;;  %6862 = vmatprep.subr.bf16.mxu1 %v12679_v33 }
 0x3fa   :  { %v3957_v54 = vadd.f32 %v13804_v47, %v15694_v7  ;;  %5010 = vmatmul.mubr.bf16.gmra.mxu0 %v15991_v57  ;;  %v4276_v63 = vmax.f32 %v3946_v48, 0.0  ;;  %6863 = vmatpush1.bf16.msra.mxu1 %v12678_v34 }
 0x3fb   :  { %v3948_v60 = vpop.f32.mrf.mxu1  ;;  %5019 = vmatprep.mubr.bf16.mxu0 %v18176_v28 }
 0x3fc   :  { %v4279_v61 = vmax.f32 %v3957_v54, 0.0  ;;  %v3949_v52 = vadd.f32 %v3948_v60, %v15694_v7 }
 0x3fd   :  { %v13807_v62 = vpop.f32.mrf.mxu1  ;;  %5623 = vmatmul.mubr.bf16.gmra.mxu1 %v15885_v24 }
 0x3fe   :  { %v16002_v25 = vpack.c.bf16 %v4279_v61, %v4278_v39  ;;  %v4277_v0 = vmax.f32 %v3949_v52, 0.0  ;;  %5632 = vmatprep.mubr.bf16.mxu1 %v18176_v28  ;;  %v3970_v10 = vadd.f32 %v13807_v62, %v15694_v7 }
 0x3ff   :  { %v3961_v1 = vpop.f32.mrf.mxu1 }
 0x400   :  { %18310 = vst [vmem:[#allocation45_spill] sm:$0xff] %v16002_v25  ;;  %v16011_v59 = vpack.c.bf16 %v4277_v0, %v4276_v63  ;;  %v3962_v36 = vadd.f32 %v3961_v1, %v15694_v7  ;;  %v4282_v56 = vmax.f32 %v3970_v10, 0.0 }
 0x401   :  { %v13808_v21 = vpop.f32.mrf.mxu1 }
 0x402   :  { %v3973_v4 = vadd.f32 %v13808_v21, %v15694_v7  ;;  %5020 = vmatmul.mubr.bf16.gmra.mxu0 %v15849_v2  ;;  %v4280_v19 = vmax.f32 %v3962_v36, 0.0 }
 0x403   :  { %v3964_v37 = vpop.f32.mrf.mxu1  ;;  %5029 = vmatprep.mubr.bf16.mxu0 %v18176_v28 }
 0x404   :  { %v4283_v38 = vmax.f32 %v3973_v4, 0.0  ;;  %v3965_v40 = vadd.f32 %v3964_v37, %v15694_v7 }
 0x405   :  { %v13811_v41 = vpop.f32.mrf.mxu1  ;;  %5633 = vmatmul.mubr.bf16.gmra.mxu1 %v15901_v31 }
 0x406   :  { %v16026_v43 = vpack.c.bf16 %v4283_v38, %v4282_v56  ;;  %v4281_v47 = vmax.f32 %v3965_v40, 0.0  ;;  %5642 = vmatprep.mubr.bf16.mxu1 %v18176_v28  ;;  %v3986_v60 = vadd.f32 %v13811_v41, %v15694_v7 }
 0x407   :  { %v3977_v48 = vpop.f32.mrf.mxu1 }
 0x408   :  { %v16029_v54 = vpack.c.bf16 %v4281_v47, %v4280_v19  ;;  %v3978_v61 = vadd.f32 %v3977_v48, %v15694_v7  ;;  %v4286_v63 = vmax.f32 %v3986_v60, 0.0 }
 0x409   :  { %v13812_v39 = vpop.f32.mrf.mxu1 }
 0x40a   :  { %18311 = vst [vmem:[#allocation46_spill] sm:$0xff] %v16029_v54  ;;  %v3989_v52 = vadd.f32 %v13812_v39, %v15694_v7  ;;  %5030 = vmatmul.mubr.bf16.gmra.mxu0 %v15887_v23  ;;  %v4284_v6 = vmax.f32 %v3978_v61, 0.0 }
 0x40b   :  { %v3980_v62 = vpop.f32.mrf.mxu1  ;;  %5039 = vmatprep.mubr.bf16.mxu0 %v18176_v28 }
 0x40c   :  { %v4287_v0 = vmax.f32 %v3989_v52, 0.0  ;;  %v3981_v1 = vadd.f32 %v3980_v62, %v15694_v7 }
 0x40d   :  { %v13815_v5 = vpop.f32.mrf.mxu1  ;;  %5643 = vmatmul.mubr.bf16.gmra.mxu1 %v15921_v51 }
 0x40e   :  { %v16038_v10 = vpack.c.bf16 %v4287_v0, %v4286_v63  ;;  %v4285_v17 = vmax.f32 %v3981_v1, 0.0  ;;  %5652 = vmatprep.mubr.bf16.mxu1 %v18176_v28  ;;  %v4002_v32 = vadd.f32 %v13815_v5, %v15694_v7 }
 0x40f   :  { %v3993_v21 = vpop.f32.mrf.mxu1 }
 0x410   :  { %v16041_v29 = vpack.c.bf16 %v4285_v17, %v4284_v6  ;;  %v3994_v36 = vadd.f32 %v3993_v21, %v15694_v7  ;;  %v4290_v33 = vmax.f32 %v4002_v32, 0.0 }
 0x411   :  { %v13816_v27 = vpop.f32.mrf.mxu1 }
 0x412   :  { %v4005_v4 = vadd.f32 %v13816_v27, %v15694_v7  ;;  %5040 = vmatmul.mubr.bf16.gmra.mxu0 %v15880_v20  ;;  %v4288_v40 = vmax.f32 %v3994_v36, 0.0 }
 0x413   :  { %v3996_v34 = vpop.f32.mrf.mxu1  ;;  %5049 = vmatprep.mubr.bf16.mxu0 %v18176_v28 }
 0x414   :  { %v4291_v37 = vmax.f32 %v4005_v4, 0.0  ;;  %v3997_v56 = vadd.f32 %v3996_v34, %v15694_v7 }
 0x415   :  { %v13819_v38 = vpop.f32.mrf.mxu1  ;;  %5653 = vmatmul.mubr.bf16.gmra.mxu1 %v15937_v16 }
 0x416   :  { %v16050_v41 = vpack.c.bf16 %v4291_v37, %v4290_v33  ;;  %v4289_v19 = vmax.f32 %v3997_v56, 0.0  ;;  %5662 = vmatprep.mubr.bf16.mxu1 %v18176_v28  ;;  %v4018_v60 = vadd.f32 %v13819_v38, %v15694_v7 }
 0x417   :  { %v4009_v47 = vpop.f32.mrf.mxu1 }
 0x418   :  { %v16053_v48 = vpack.c.bf16 %v4289_v19, %v4288_v40  ;;  %v4010_v61 = vadd.f32 %v4009_v47, %v15694_v7  ;;  %v4294_v63 = vmax.f32 %v4018_v60, 0.0 }
 0x419   :  { %v13820_v39 = vpop.f32.mrf.mxu1 }
 0x41a   :  { %v4021_v52 = vadd.f32 %v13820_v39, %v15694_v7  ;;  %5050 = vmatmul.mubr.bf16.gmra.mxu0 %v15905_v3  ;;  %v4292_v6 = vmax.f32 %v4010_v61, 0.0 }
 0x41b   :  { %v4012_v62 = vpop.f32.mrf.mxu1  ;;  %5059 = vmatprep.mubr.bf16.mxu0 %v18176_v28 }
 0x41c   :  { %v4295_v0 = vmax.f32 %v4021_v52, 0.0  ;;  %v4013_v1 = vadd.f32 %v4012_v62, %v15694_v7 }
 0x41d   :  { %v13823_v5 = vpop.f32.mrf.mxu1  ;;  %5663 = vmatmul.mubr.bf16.gmra.mxu1 %v15957_v46 }
 0x41e   :  { %v16062_v17 = vpack.c.bf16 %v4295_v0, %v4294_v63  ;;  %v4293_v21 = vmax.f32 %v4013_v1, 0.0  ;;  %5672 = vmatprep.mubr.bf16.mxu1 %v18176_v28  ;;  %v4034_v36 = vadd.f32 %v13823_v5, %v15694_v7 }
 0x41f   :  { %v4025_v32 = vpop.f32.mrf.mxu1 }
 0x420   :  { %v16065_v27 = vpack.c.bf16 %v4293_v21, %v4292_v6  ;;  %v4026_v34 = vadd.f32 %v4025_v32, %v15694_v7  ;;  %v4298_v56 = vmax.f32 %v4034_v36, 0.0 }
 0x421   :  { %v13824_v4 = vpop.f32.mrf.mxu1 }
 0x422   :  { %v4037_v33 = vadd.f32 %v13824_v4, %v15694_v7  ;;  %5060 = vmatmul.mubr.bf16.gmra.mxu0 %v15898_v30  ;;  %v4296_v47 = vmax.f32 %v4026_v34, 0.0 }
 0x423   :  { %v4028_v37 = vpop.f32.mrf.mxu1  ;;  %5069 = vmatprep.mubr.bf16.mxu0 %v18176_v28 }
 0x424   :  { %v4299_v38 = vmax.f32 %v4037_v33, 0.0  ;;  %v4029_v40 = vadd.f32 %v4028_v37, %v15694_v7 }
 0x425   :  { %v13827_v19 = vpop.f32.mrf.mxu1  ;;  %5673 = vmatmul.mubr.bf16.gmra.mxu1 %v15973_v8 }
 0x426   :  { %v16074_v60 = vpack.c.bf16 %v4299_v38, %v4298_v56  ;;  %v4297_v39 = vmax.f32 %v4029_v40, 0.0  ;;  %5682 = vmatprep.mubr.bf16.mxu1 %v18176_v28  ;;  %v4050_v62 = vadd.f32 %v13827_v19, %v15694_v7  ;;  %v16091_v38 = vld [vmem:[#allocation3 + $0x3] ss:$0 sm:$0xff] }
 0x427   :  { %v4041_v61 = vpop.f32.mrf.mxu1 }
 0x428   :  { %v16077_v52 = vpack.c.bf16 %v4297_v39, %v4296_v47  ;;  %v4042_v0 = vadd.f32 %v4041_v61, %v15694_v7  ;;  %v4302_v6 = vmax.f32 %v4050_v62, 0.0 }
 0x429   :  { %v13828_v63 = vpop.f32.mrf.mxu1 }
 0x42a   :  { %v4053_v1 = vadd.f32 %v13828_v63, %v15694_v7  ;;  %5070 = vmatmul.mubr.bf16.gmra.mxu0 %v15923_v53  ;;  %v4300_v4 = vmax.f32 %v4042_v0, 0.0 }
 0x42b   :  { %v4044_v5 = vpop.f32.mrf.mxu1  ;;  %5079 = vmatprep.mubr.bf16.mxu0 %v18176_v28 }
 0x42c   :  { %v4303_v21 = vmax.f32 %v4053_v1, 0.0  ;;  %v4045_v32 = vadd.f32 %v4044_v5, %v15694_v7 }
 0x42d   :  { %v13831_v36 = vpop.f32.mrf.mxu1  ;;  %5683 = vmatmul.mubr.bf16.gmra.mxu1 %v15991_v57 }
 0x42e   :  { %v16086_v34 = vpack.c.bf16 %v4303_v21, %v4302_v6  ;;  %v4301_v33 = vmax.f32 %v4045_v32, 0.0  ;;  %5692 = vmatprep.mubr.bf16.mxu1 %v18176_v28  ;;  %v4066_v40 = vadd.f32 %v16091_v38, %v13831_v36 }
 0x42f   :  { %v4057_v37 = vpop.f32.mrf.mxu1 }
 0x430   :  { %v16089_v56 = vpack.c.bf16 %v4301_v33, %v4300_v4  ;;  %v4058_v47 = vadd.f32 %v16091_v38, %v4057_v37  ;;  %v4306_v61 = vmax.f32 %v4066_v40, 0.0 }
 0x431   :  { %v13832_v19 = vpop.f32.mrf.mxu1 }
 0x432   :  { %v4069_v7 = vadd.f32 %v16091_v38, %v13832_v19  ;;  %5080 = vmatmul.mubr.bf16.gmra.mxu0 %v15916_v12  ;;  %v4304_v1 = vmax.f32 %v4058_v47, 0.0 }
 0x433   :  { %v4060_v39 = vpop.f32.mrf.mxu1  ;;  %5089 = vmatprep.mubr.bf16.mxu0 %v18176_v28 }
 0x434   :  { %v4307_v62 = vmax.f32 %v4069_v7, 0.0  ;;  %v4061_v63 = vadd.f32 %v16091_v38, %v4060_v39 }
 0x435   :  { %v13835_v0 = vpop.f32.mrf.mxu1  ;;  %5693 = vmatmul.mubr.bf16.gmra.mxu1 %v15849_v2 }
 0x436   :  { %v16100_v5 = vpack.c.bf16 %v4307_v62, %v4306_v61  ;;  %v4305_v6 = vmax.f32 %v4061_v63, 0.0  ;;  %5702 = vmatprep.mubr.bf16.mxu1 %v18176_v28  ;;  %v4082_v36 = vadd.f32 %v16091_v38, %v13835_v0  ;;  %v4477_v61 = vlaneseq }
 0x437   :  { %v4073_v21 = vpop.f32.mrf.mxu1 }
 0x438   :  { %v16103_v32 = vpack.c.bf16 %v4305_v6, %v4304_v1  ;;  %v4074_v33 = vadd.f32 %v16091_v38, %v4073_v21  ;;  %v4310_v19 = vmax.f32 %v4082_v36, 0.0  ;;  %v4434_v6 = vld [vmem:[%s18171_s6 + $0xd0] sm:$0xff] }
 0x439   :  { %v13836_v4 = vpop.f32.mrf.mxu1  ;;  %v4438_v21 = vld [vmem:[%s18171_s6 + $0xf0] sm:$0xff] }
 0x43a   :  { %v4085_v37 = vadd.f32 %v16091_v38, %v13836_v4  ;;  %5090 = vmatmul.mubr.bf16.gmra.mxu0 %v15941_v15  ;;  %v4308_v62 = vmax.f32 %v4074_v33, 0.0 }
 0x43b   :  { %v4076_v40 = vpop.f32.mrf.mxu1  ;;  %5099 = vmatprep.mubr.bf16.mxu0 %v18176_v28 }
 0x43c   :  { %v4311_v47 = vmax.f32 %v4085_v37, 0.0  ;;  %v4077_v7 = vadd.f32 %v16091_v38, %v4076_v40  ;;  %v12668_v37 = vcombine.low %v4434_v6, %v4438_v21  ;;  %v16124_v40 = vshrl.u32 %v4477_v61, 7 }
 0x43d   :  { %v13839_v39 = vpop.f32.mrf.mxu1  ;;  %5703 = vmatmul.mubr.bf16.gmra.mxu1 %v15887_v23 }
 0x43e   :  { %v16112_v63 = vpack.c.bf16 %v4311_v47, %v4310_v19  ;;  %v4309_v0 = vmax.f32 %v4077_v7, 0.0  ;;  %5712 = vmatprep.mubr.bf16.mxu1 %v18176_v28  ;;  %v4098_v4 = vadd.f32 %v16091_v38, %v13839_v39  ;;  %18314 = vst [vmem:[#allocation49_spill] sm:$0xff] %v16124_v40  ;;  %v12669_v19 = vcombine.high %v4434_v6, %v4438_v21  ;;  %v4435_v47 = vld [vmem:[%s18171_s6 + $0xd8] sm:$0xff] }
 0x43f   :  { %v4089_v1 = vpop.f32.mrf.mxu1  ;;  %v4439_v7 = vld [vmem:[%s18171_s6 + $0xf8] sm:$0xff]  ;;  %v18315_v6 = vmov 0  }
 0x440   :  { %18312 = vst [vmem:[#allocation47_spill] sm:$0xff] %v16112_v63  ;;  %v16121_v36 = vpack.c.bf16 %v4309_v0, %v4308_v62  ;;  %v4090_v28 = vadd.f32 %v16091_v38, %v4089_v1  ;;  %v4473_v39 = vld [vmem:[#allocation3 + $0x4] ss:$8 sm:$0xf]  ;;  %v12670_v23 = vcombine.low %v4435_v47, %v4439_v7  ;;  %v12671_v61 = vcombine.high %v4435_v47, %v4439_v7 }
 0x441   :  { %v13840_v33 = vpop.f32.mrf.mxu1  ;;  %v4474_v0 = vld [vmem:[#allocation3 + $0x4] ss:$8 sm:$0xf0]  ;;  %6191 = vmatprep.subr.bf16.mxu0 %v12669_v19  ;;  %v4314_v21 = vmax.f32 %v4098_v4, 0.0 }
 0x442   :  { %18313 = vst [vmem:[#allocation48_spill] sm:$0xff] %v16121_v36  ;;  %v4101_v62 = vadd.f32 %v16091_v38, %v13840_v33  ;;  %5100 = vmatmul.mubr.bf16.gmra.mxu0 %v15934_v18  ;;  %6864 = vmatprep.subr.bf16.mxu1 %v12671_v61  ;;  %v16138_v1 = vor.u32 %v4474_v0, %v4473_v39  ;;  %v16141_v33 = vsub.s32 0, %v16124_v40  ;;  %v4312_v16 = vmax.f32 %v4090_v28, 0.0 }
 0x443   :  { %v4092_v2 = vpop.f32.mrf.mxu1  ;;  %5109 = vmatprep.mubr.bf16.mxu0 %v18315_v6  ;;  %6192 = vmatpush1.bf16.msra.mxu0 %v12668_v37 }
 0x444   :  { %v4315_v57 = vmax.f32 %v4101_v62, 0.0  ;;  %v4093_v8 = vadd.f32 %v16091_v38, %v4092_v2  ;;  %18316 = vst [vmem:[#allocation50_spill] sm:$0xff] %v16138_v1  ;;  %18317 = vst [vmem:[#allocation51_spill] sm:$0xff] %v16141_v33  ;;  %6865 = vmatpush1.bf16.msra.mxu1 %v12670_v23  ;;  %v16147_v2 = vsub.s32 1, %v16124_v40  ;;  %v16154_v39 = vrot.slane %v16138_v1, %v16141_v33 }
 0x445   :  { %v13843_v46 = vpop.f32.mrf.mxu1  ;;  %5713 = vmatmul.mubr.bf16.gmra.mxu1 %v15880_v20 }
 0x446   :  { %v16143_v47 = vpack.c.bf16 %v4315_v57, %v4314_v21  ;;  %v4313_v7 = vmax.f32 %v4093_v8, 0.0  ;;  %5722 = vmatprep.mubr.bf16.mxu1 %v18315_v6  ;;  %18319 = vst [vmem:[#allocation53_spill] sm:$0xff] %v16147_v2  ;;  %v4114_v19 = vadd.f32 %v16091_v38, %v13843_v46  ;;  %v16161_v0 = vrot.slane %v16138_v1, %v16147_v2 }
 0x447   :  { %v4105_v4 = vpop.f32.mrf.mxu1 }
 0x448   :  { %18318 = vst [vmem:[#allocation52_spill] sm:$0xff] %v16143_v47  ;;  %v16149_v37 = vpack.c.bf16 %v4313_v7, %v4312_v16  ;;  %v4106_v28 = vadd.f32 %v16091_v38, %v4105_v4  ;;  %v4318_v16 = vmax.f32 %v4114_v19, 0.0 }
 0x449   :  { %v13844_v62 = vpop.f32.mrf.mxu1 }
 0x44a   :  { %18320 = vst [vmem:[#allocation54_spill] sm:$0xff] %v16149_v37  ;;  %v4117_v8 = vadd.f32 %v16091_v38, %v13844_v62  ;;  %v4871_v57 = vpop.f32.mrf.mxu0  ;;  %5110 = vmatmul.mubr.bf16.gmra.mxu0 %v15959_v9  ;;  %v4316_v62 = vmax.f32 %v4106_v28, 0.0 }
 0x44b   :  { %v4108_v23 = vpop.f32.mrf.mxu1  ;;  %5119 = vmatprep.mubr.bf16.mxu0 %v18315_v6  ;;  %v4872_v7 = vadd.f32 %v4871_v57, %v16154_v39 }
 0x44c   :  { %v4319_v46 = vmax.f32 %v4117_v8, 0.0  ;;  %v4109_v61 = vadd.f32 %v16091_v38, %v4108_v23  ;;  %v4873_v21 = vpop.f32.mrf.mxu0 }
 0x44d   :  { %v13847_v4 = vpop.f32.mrf.mxu1  ;;  %5723 = vmatmul.mubr.bf16.gmra.mxu1 %v15905_v3  ;;  %v4874_v2 = vadd.f32 %v4873_v21, %v16161_v0  ;;  %v7529_v24 = vmax.f32 %v4872_v7, 0.0 }
 0x44e   :  { %v16167_v33 = vpack.c.bf16 %v4319_v46, %v4318_v16  ;;  %v4317_v20 = vmax.f32 %v4109_v61, 0.0  ;;  %v4875_v51 = vpop.f32.mrf.mxu0  ;;  %5732 = vmatprep.mubr.bf16.mxu1 %v18315_v6  ;;  %v4130_v23 = vadd.f32 %v16091_v38, %v13847_v4 }
 0x44f   :  { %v4876_v19 = vadd.f32 %v4875_v51, %v16154_v39  ;;  %v4121_v8 = vpop.f32.mrf.mxu1  ;;  %v7530_v21 = vmax.f32 %v4874_v2, 0.0 }
 0x450   :  { %18321 = vst [vmem:[#allocation55_spill] sm:$0xff] %v16167_v33  ;;  %v16172_v31 = vpack.c.bf16 %v4317_v20, %v4316_v62  ;;  %v4877_v57 = vpop.f32.mrf.mxu0  ;;  %v4122_v46 = vadd.f32 %v16091_v38, %v4121_v8  ;;  %v4322_v7 = vmax.f32 %v4130_v23, 0.0 }
 0x451   :  { %v7537_v11 = vmax.f32 %v4876_v19, 0.0  ;;  %v4878_v28 = vadd.f32 %v4877_v57, %v16161_v0  ;;  %v13848_v16 = vpop.f32.mrf.mxu1 }
 0x452   :  { %18322 = vst [vmem:[#allocation56_spill] sm:$0xff] %v16172_v31  ;;  %v4133_v61 = vadd.f32 %v16091_v38, %v13848_v16  ;;  %v4881_v3 = vpop.f32.mrf.mxu0  ;;  %5120 = vmatmul.mubr.bf16.gmra.mxu0 %v15952_v44  ;;  %v4320_v2 = vmax.f32 %v4122_v46, 0.0 }
 0x453   :  { %v8553_v51 = vmax.f32 %v7529_v24, %v7537_v11  ;;  %v7538_v50 = vmax.f32 %v4878_v28, 0.0  ;;  %v4882_v20 = vadd.f32 %v4881_v3, %v16154_v39  ;;  %v4124_v62 = vpop.f32.mrf.mxu1  ;;  %5129 = vmatprep.mubr.bf16.mxu0 %v18315_v6 }
 0x454   :  { %v4323_v4 = vmax.f32 %v4133_v61, 0.0  ;;  %v4125_v19 = vadd.f32 %v16091_v38, %v4124_v62  ;;  %v4883_v57 = vpop.f32.mrf.mxu0 }
 0x455   :  { %v8616_v45 = vmax.f32 %v7530_v21, %v7538_v50  ;;  %v7545_v8 = vmax.f32 %v4882_v20, 0.0  ;;  %v4884_v16 = vadd.f32 %v4883_v57, %v16161_v0  ;;  %v13851_v14 = vpop.f32.mrf.mxu1  ;;  %5733 = vmatmul.mubr.bf16.gmra.mxu1 %v15898_v30 }
 0x456   :  { %v16184_v11 = vpack.c.bf16 %v4323_v4, %v4322_v7  ;;  %v4321_v24 = vmax.f32 %v4125_v19, 0.0  ;;  %v4885_v3 = vpop.f32.mrf.mxu0  ;;  %5742 = vmatprep.mubr.bf16.mxu1 %v18315_v6  ;;  %v4146_v50 = vadd.f32 %v16091_v38, %v13851_v14 }
 0x457   :  { %v8554_v28 = vmax.f32 %v8553_v51, %v7545_v8  ;;  %v7546_v23 = vmax.f32 %v4884_v16, 0.0  ;;  %v4886_v61 = vadd.f32 %v4885_v3, %v16154_v39  ;;  %v4137_v62 = vpop.f32.mrf.mxu1 }
 0x458   :  { %18323 = vst [vmem:[#allocation57_spill] sm:$0xff] %v16184_v11  ;;  %v16188_v49 = vpack.c.bf16 %v4321_v24, %v4320_v2  ;;  %v4887_v21 = vpop.f32.mrf.mxu0  ;;  %v4138_v4 = vadd.f32 %v16091_v38, %v4137_v62  ;;  %v4326_v14 = vmax.f32 %v4146_v50, 0.0 }
 0x459   :  { %v8617_v20 = vmax.f32 %v8616_v45, %v7546_v23  ;;  %v7553_v57 = vmax.f32 %v4886_v61, 0.0  ;;  %v4888_v46 = vadd.f32 %v4887_v21, %v16161_v0  ;;  %v13852_v7 = vpop.f32.mrf.mxu1 }
 0x45a   :  { %18324 = vst [vmem:[#allocation58_spill] sm:$0xff] %v16188_v49  ;;  %v4149_v19 = vadd.f32 %v16091_v38, %v13852_v7  ;;  %v4891_v30 = vpop.f32.mrf.mxu0  ;;  %5130 = vmatmul.mubr.bf16.gmra.mxu0 %v15977_v13  ;;  %v4324_v7 = vmax.f32 %v4138_v4, 0.0 }
 0x45b   :  { %v8555_v51 = vmax.f32 %v8554_v28, %v7553_v57  ;;  %v7554_v8 = vmax.f32 %v4888_v46, 0.0  ;;  %v4892_v16 = vadd.f32 %v4891_v30, %v16154_v39  ;;  %v4140_v2 = vpop.f32.mrf.mxu1  ;;  %5139 = vmatprep.mubr.bf16.mxu0 %v18315_v6 }
 0x45c   :  { %v4327_v45 = vmax.f32 %v4149_v19, 0.0  ;;  %v4141_v24 = vadd.f32 %v16091_v38, %v4140_v2  ;;  %v4893_v3 = vpop.f32.mrf.mxu0 }
 0x45d   :  { %v8618_v23 = vmax.f32 %v8617_v20, %v7554_v8  ;;  %v7561_v61 = vmax.f32 %v4892_v16, 0.0  ;;  %v4894_v62 = vadd.f32 %v4893_v3, %v16161_v0  ;;  %v13855_v21 = vpop.f32.mrf.mxu1  ;;  %5743 = vmatmul.mubr.bf16.gmra.mxu1 %v15923_v53 }
 0x45e   :  { %v16200_v28 = vpack.c.bf16 %v4327_v45, %v4326_v14  ;;  %v4325_v57 = vmax.f32 %v4141_v24, 0.0  ;;  %v4895_v30 = vpop.f32.mrf.mxu0  ;;  %5752 = vmatprep.mubr.bf16.mxu1 %v18315_v6  ;;  %v4162_v20 = vadd.f32 %v16091_v38, %v13855_v21 }
 0x45f   :  { %v8556_v46 = vmax.f32 %v8555_v51, %v7561_v61  ;;  %v7562_v50 = vmax.f32 %v4894_v62, 0.0  ;;  %v4896_v19 = vadd.f32 %v4895_v30, %v16154_v39  ;;  %v4153_v2 = vpop.f32.mrf.mxu1 }
 0x460   :  { %18325 = vst [vmem:[#allocation59_spill] sm:$0xff] %v16200_v28  ;;  %v16204_v26 = vpack.c.bf16 %v4325_v57, %v4324_v7  ;;  %v4897_v8 = vpop.f32.mrf.mxu0  ;;  %v4154_v45 = vadd.f32 %v16091_v38, %v4153_v2  ;;  %v4330_v21 = vmax.f32 %v4162_v20, 0.0 }
 0x461   :  { %v8619_v16 = vmax.f32 %v8618_v23, %v7562_v50  ;;  %v7569_v3 = vmax.f32 %v4896_v19, 0.0  ;;  %v4898_v4 = vadd.f32 %v4897_v8, %v16161_v0  ;;  %v13856_v14 = vpop.f32.mrf.mxu1 }
 0x462   :  { %18326 = vst [vmem:[#allocation60_spill] sm:$0xff] %v16204_v26  ;;  %v4165_v24 = vadd.f32 %v16091_v38, %v13856_v14  ;;  %v4901_v53 = vpop.f32.mrf.mxu0  ;;  %5140 = vmatmul.mubr.bf16.gmra.mxu0 %v15970_v55  ;;  %v4328_v14 = vmax.f32 %v4154_v45, 0.0 }
 0x463   :  { %v8557_v51 = vmax.f32 %v8556_v46, %v7569_v3  ;;  %v7570_v61 = vmax.f32 %v4898_v4, 0.0  ;;  %v4902_v62 = vadd.f32 %v4901_v53, %v16154_v39  ;;  %v4156_v7 = vpop.f32.mrf.mxu1  ;;  %5149 = vmatprep.mubr.bf16.mxu0 %v18315_v6 }
 0x464   :  { %v4331_v23 = vmax.f32 %v4165_v24, 0.0  ;;  %v4157_v57 = vadd.f32 %v16091_v38, %v4156_v7  ;;  %v4903_v30 = vpop.f32.mrf.mxu0 }
 0x465   :  { %v8620_v50 = vmax.f32 %v8619_v16, %v7570_v61  ;;  %v7577_v19 = vmax.f32 %v4902_v62, 0.0  ;;  %v4904_v2 = vadd.f32 %v4903_v30, %v16161_v0  ;;  %v13859_v8 = vpop.f32.mrf.mxu1  ;;  %5753 = vmatmul.mubr.bf16.gmra.mxu1 %v15916_v12 }
 0x466   :  { %v16216_v46 = vpack.c.bf16 %v4331_v23, %v4330_v21  ;;  %v4329_v3 = vmax.f32 %v4157_v57, 0.0  ;;  %v4905_v53 = vpop.f32.mrf.mxu0  ;;  %5762 = vmatprep.mubr.bf16.mxu1 %v18315_v6  ;;  %v4178_v16 = vadd.f32 %v16091_v38, %v13859_v8 }
 0x467   :  { %v8558_v4 = vmax.f32 %v8557_v51, %v7577_v19  ;;  %v7578_v20 = vmax.f32 %v4904_v2, 0.0  ;;  %v4906_v24 = vadd.f32 %v4905_v53, %v16154_v39  ;;  %v4169_v7 = vpop.f32.mrf.mxu1 }
 0x468   :  { %18327 = vst [vmem:[#allocation61_spill] sm:$0xff] %v16216_v46  ;;  %v16220_v22 = vpack.c.bf16 %v4329_v3, %v4328_v14  ;;  %v4907_v61 = vpop.f32.mrf.mxu0  ;;  %v4170_v23 = vadd.f32 %v16091_v38, %v4169_v7  ;;  %v4334_v8 = vmax.f32 %v4178_v16, 0.0 }
 0x469   :  { %v8621_v62 = vmax.f32 %v8620_v50, %v7578_v20  ;;  %v7585_v30 = vmax.f32 %v4906_v24, 0.0  ;;  %v4908_v45 = vadd.f32 %v4907_v61, %v16161_v0  ;;  %v13860_v21 = vpop.f32.mrf.mxu1 }
 0x46a   :  { %18328 = vst [vmem:[#allocation62_spill] sm:$0xff] %v16220_v22  ;;  %v4181_v57 = vadd.f32 %v16091_v38, %v13860_v21  ;;  %v4911_v12 = vpop.f32.mrf.mxu0  ;;  %5150 = vmatmul.mubr.bf16.gmra.mxu0 %v15993_v58  ;;  %v4332_v21 = vmax.f32 %v4170_v23, 0.0 }
 0x46b   :  { %v8559_v51 = vmax.f32 %v8558_v4, %v7585_v30  ;;  %v7586_v19 = vmax.f32 %v4908_v45, 0.0  ;;  %v4912_v2 = vadd.f32 %v4911_v12, %v16154_v39  ;;  %v4172_v14 = vpop.f32.mrf.mxu1  ;;  %5159 = vmatprep.mubr.bf16.mxu0 %v18315_v6 }
 0x46c   :  { %v4335_v50 = vmax.f32 %v4181_v57, 0.0  ;;  %v4173_v3 = vadd.f32 %v16091_v38, %v4172_v14  ;;  %v4913_v53 = vpop.f32.mrf.mxu0 }
 0x46d   :  { %v8622_v20 = vmax.f32 %v8621_v62, %v7586_v19  ;;  %v7593_v24 = vmax.f32 %v4912_v2, 0.0  ;;  %v4914_v7 = vadd.f32 %v4913_v53, %v16161_v0  ;;  %v13863_v61 = vpop.f32.mrf.mxu1  ;;  %5763 = vmatmul.mubr.bf16.gmra.mxu1 %v15941_v15 }
 0x46e   :  { %v16232_v4 = vpack.c.bf16 %v4335_v50, %v4334_v8  ;;  %v4333_v30 = vmax.f32 %v4173_v3, 0.0  ;;  %v4915_v12 = vpop.f32.mrf.mxu0  ;;  %5772 = vmatprep.mubr.bf16.mxu1 %v18315_v6  ;;  %v4194_v62 = vadd.f32 %v16091_v38, %v13863_v61 }
 0x46f   :  { %v8560_v45 = vmax.f32 %v8559_v51, %v7593_v24  ;;  %v7594_v16 = vmax.f32 %v4914_v7, 0.0  ;;  %v4916_v57 = vadd.f32 %v4915_v12, %v16154_v39  ;;  %v4185_v14 = vpop.f32.mrf.mxu1 }
 0x470   :  { %18329 = vst [vmem:[#allocation63_spill] sm:$0xff] %v16232_v4  ;;  %v16236_v42 = vpack.c.bf16 %v4333_v30, %v4332_v21  ;;  %v4917_v19 = vpop.f32.mrf.mxu0  ;;  %v4186_v50 = vadd.f32 %v16091_v38, %v4185_v14  ;;  %v4338_v61 = vmax.f32 %v4194_v62, 0.0 }
 0x471   :  { %v8623_v2 = vmax.f32 %v8622_v20, %v7594_v16  ;;  %v7601_v53 = vmax.f32 %v4916_v57, 0.0  ;;  %v4918_v23 = vadd.f32 %v4917_v19, %v16161_v0  ;;  %v13864_v8 = vpop.f32.mrf.mxu1 }
 0x472   :  { %18330 = vst [vmem:[#allocation64_spill] sm:$0xff] %v16236_v42  ;;  %v4197_v3 = vadd.f32 %v16091_v38, %v13864_v8  ;;  %v4921_v15 = vpop.f32.mrf.mxu0  ;;  %5160 = vmatmul.mubr.bf16.gmra.mxu0 %v15988_v35  ;;  %v4336_v8 = vmax.f32 %v4186_v50, 0.0 }
 0x473   :  { %v8561_v51 = vmax.f32 %v8560_v45, %v7601_v53  ;;  %v7602_v24 = vmax.f32 %v4918_v23, 0.0  ;;  %v4922_v7 = vadd.f32 %v4921_v15, %v16154_v39  ;;  %v4188_v21 = vpop.f32.mrf.mxu1  ;;  %5169 = vmatprep.mubr.bf16.mxu0 %v18315_v6 }
 0x474   :  { %v4339_v20 = vmax.f32 %v4197_v3, 0.0  ;;  %v4189_v30 = vadd.f32 %v16091_v38, %v4188_v21  ;;  %v4923_v12 = vpop.f32.mrf.mxu0 }
 0x475   :  { %v8624_v16 = vmax.f32 %v8623_v2, %v7602_v24  ;;  %v7609_v57 = vmax.f32 %v4922_v7, 0.0  ;;  %v4924_v14 = vadd.f32 %v4923_v12, %v16161_v0  ;;  %v13867_v19 = vpop.f32.mrf.mxu1  ;;  %5773 = vmatmul.mubr.bf16.gmra.mxu1 %v15934_v18  ;;  %v18232_v7 = vsub.s32 2, %v16124_v40 }
 0x476   :  { %v16248_v45 = vpack.c.bf16 %v4339_v20, %v4338_v61  ;;  %v4337_v53 = vmax.f32 %v4189_v30, 0.0  ;;  %v4925_v15 = vpop.f32.mrf.mxu0  ;;  %5782 = vmatprep.mubr.bf16.mxu1 %v18315_v6  ;;  %v4210_v2 = vadd.f32 %v16091_v38, %v13867_v19 }
 0x477   :  { %v8562_v23 = vmax.f32 %v8561_v51, %v7609_v57  ;;  %v7610_v62 = vmax.f32 %v4924_v14, 0.0  ;;  %v4926_v3 = vadd.f32 %v4925_v15, %v16154_v39  ;;  %v4201_v21 = vpop.f32.mrf.mxu1  ;;  %v18231_v14 = vsub.s32 3, %v16124_v40 }
 0x478   :  { %18331 = vst [vmem:[#allocation65_spill] sm:$0xff] %v16248_v45  ;;  %v16252_v4 = vpack.c.bf16 %v4337_v53, %v4336_v8  ;;  %v4927_v24 = vpop.f32.mrf.mxu0  ;;  %v4202_v30 = vadd.f32 %v16091_v38, %v4201_v21  ;;  %v16267_v21 = vrot.slane %v16138_v1, %v18232_v7 }
 0x479   :  { %v8625_v12 = vmax.f32 %v8624_v16, %v7610_v62  ;;  %v7617_v50 = vmax.f32 %v4926_v3, 0.0  ;;  %v4928_v61 = vadd.f32 %v4927_v24, %v16161_v0  ;;  %v13868_v20 = vpop.f32.mrf.mxu1  ;;  %v4342_v16 = vmax.f32 %v4210_v2, 0.0 }
 0x47a   :  { %18332 = vst [vmem:[#allocation66_spill] sm:$0xff] %v16252_v4  ;;  %v4213_v51 = vadd.f32 %v16091_v38, %v13868_v20  ;;  %v4931_v57 = vpop.f32.mrf.mxu0  ;;  %5170 = vmatmul.mubr.bf16.gmra.mxu0 %v16011_v59 }
 0x47b   :  { %v8563_v8 = vmax.f32 %v8562_v23, %v7617_v50  ;;  %v7618_v53 = vmax.f32 %v4928_v61, 0.0  ;;  %v4932_v19 = vadd.f32 %v4931_v57, %v16154_v39  ;;  %v4204_v15 = vpop.f32.mrf.mxu1  ;;  %5179 = vmatprep.mubr.bf16.mxu0 %v18315_v6  ;;  %v4340_v61 = vmax.f32 %v4202_v30, 0.0  ;;  %v4426_v30 = vld [vmem:[%s18171_s6 + $0x90] sm:$0xff] }
 0x47c   :  { %v4343_v62 = vmax.f32 %v4213_v51, 0.0  ;;  %v4205_v3 = vadd.f32 %v16091_v38, %v4204_v15  ;;  %v4933_v24 = vpop.f32.mrf.mxu0  ;;  %v16276_v38 = vrot.slane %v16138_v1, %v18231_v14  ;;  %v4431_v1 = vld [vmem:[%s18171_s6 + $0xb8] sm:$0xff] }
 0x47d   :  { %v8626_v20 = vmax.f32 %v8625_v12, %v7618_v53  ;;  %v7625_v18 = vmax.f32 %v4932_v19, 0.0  ;;  %v4934_v23 = vadd.f32 %v4933_v24, %v16161_v0  ;;  %v5544_v50 = vpop.f32.mrf.mxu1  ;;  %5783 = vmatmul.mubr.bf16.gmra.mxu1 %v15959_v9  ;;  %v4427_v9 = vld [vmem:[%s18171_s6 + $0x98] sm:$0xff] }
 0x47e   :  { %v16271_v57 = vpack.c.bf16 %v4343_v62, %v4342_v16  ;;  %v4341_v2 = vmax.f32 %v4205_v3, 0.0  ;;  %v4935_v51 = vpop.f32.mrf.mxu0  ;;  %5792 = vmatprep.mubr.bf16.mxu1 %v18315_v6  ;;  %v4430_v16 = vld [vmem:[%s18171_s6 + $0xb0] sm:$0xff]  ;;  %v5545_v3 = vadd.f32 %v5544_v50, %v16267_v21 }
 0x47f   :  { %v8564_v15 = vmax.f32 %v8563_v8, %v7625_v18  ;;  %v7626_v12 = vmax.f32 %v4934_v23, 0.0  ;;  %v4936_v53 = vadd.f32 %v4935_v51, %v16154_v39  ;;  %v5546_v19 = vpop.f32.mrf.mxu1  ;;  %v12660_v14 = vcombine.low %v4426_v30, %v4430_v16 }
 0x480   :  { %18333 = vst [vmem:[#allocation67_spill] sm:$0xff] %v16271_v57  ;;  %v16286_v62 = vpack.c.bf16 %v4341_v2, %v4340_v61  ;;  %v4937_v24 = vpop.f32.mrf.mxu0  ;;  %v12661_v51 = vcombine.high %v4426_v30, %v4430_v16  ;;  %v5547_v61 = vadd.f32 %v5546_v19, %v16276_v38  ;;  %v7531_v40 = vmax.f32 %v5545_v3, 0.0 }
 0x481   :  { %v8627_v7 = vmax.f32 %v8626_v20, %v7626_v12  ;;  %v7633_v18 = vmax.f32 %v4936_v53, 0.0  ;;  %v4938_v8 = vadd.f32 %v4937_v24, %v16161_v0  ;;  %v5548_v23 = vpop.f32.mrf.mxu1  ;;  %v12662_v20 = vcombine.low %v4427_v9, %v4431_v1 }
 0x482   :  { %18334 = vst [vmem:[#allocation68_spill] sm:$0xff] %v16286_v62  ;;  %v5549_v50 = vadd.f32 %v5548_v23, %v16267_v21  ;;  %v4941_v2 = vpop.f32.mrf.mxu0  ;;  %5180 = vmatmul.mubr.bf16.gmra.mxu0 %v16002_v25  ;;  %v12663_v12 = vcombine.high %v4427_v9, %v4431_v1  ;;  %6193 = vmatprep.subr.bf16.mxu0 %v12661_v51  ;;  %v7532_v1 = vmax.f32 %v5547_v61, 0.0 }
 0x483   :  { %v8565_v53 = vmax.f32 %v8564_v15, %v7633_v18  ;;  %v7634_v24 = vmax.f32 %v4938_v8, 0.0  ;;  %v4942_v30 = vadd.f32 %v4941_v2, %v16154_v39  ;;  %v5550_v16 = vpop.f32.mrf.mxu1  ;;  %5189 = vmatprep.mubr.bf16.mxu0 %v18315_v6  ;;  %6194 = vmatpush1.bf16.msra.mxu0 %v12660_v14 }
 0x484   :  { %v7539_v57 = vmax.f32 %v5549_v50, 0.0  ;;  %v5551_v62 = vadd.f32 %v5550_v16, %v16276_v38  ;;  %v4943_v19 = vpop.f32.mrf.mxu0  ;;  %6866 = vmatprep.subr.bf16.mxu1 %v12663_v12 }
 0x485   :  { %v8628_v23 = vmax.f32 %v8627_v7, %v7634_v24  ;;  %v7641_v45 = vmax.f32 %v4942_v30, 0.0  ;;  %v4944_v4 = vadd.f32 %v4943_v19, %v16161_v0  ;;  %v5554_v9 = vpop.f32.mrf.mxu1  ;;  %5793 = vmatmul.mubr.bf16.gmra.mxu1 %v15952_v44 }
 0x486   :  { %v8679_v15 = vmax.f32 %v7531_v40, %v7539_v57  ;;  %v7540_v18 = vmax.f32 %v5551_v62, 0.0  ;;  %v5555_v8 = vadd.f32 %v5554_v9, %v16267_v21  ;;  %v4945_v51 = vpop.f32.mrf.mxu0  ;;  %5802 = vmatprep.mubr.bf16.mxu1 %v18315_v6  ;;  %6867 = vmatpush1.bf16.msra.mxu1 %v12662_v20 }
 0x487   :  { %v8566_v3 = vmax.f32 %v8565_v53, %v7641_v45  ;;  %v7642_v50 = vmax.f32 %v4944_v4, 0.0  ;;  %v4946_v14 = vadd.f32 %v4945_v51, %v16154_v39  ;;  %v5556_v7 = vpop.f32.mrf.mxu1 }
 0x488   :  { %v8742_v2 = vmax.f32 %v7532_v1, %v7540_v18  ;;  %v7547_v12 = vmax.f32 %v5555_v8, 0.0  ;;  %v5557_v24 = vadd.f32 %v5556_v7, %v16276_v38  ;;  %v4947_v30 = vpop.f32.mrf.mxu0 }
 0x489   :  { %v8629_v16 = vmax.f32 %v8628_v23, %v7642_v50  ;;  %v7649_v61 = vmax.f32 %v4946_v14, 0.0  ;;  %v4948_v40 = vadd.f32 %v4947_v30, %v16161_v0  ;;  %v5558_v57 = vpop.f32.mrf.mxu1 }
 0x48a   :  { %v8680_v62 = vmax.f32 %v8679_v15, %v7547_v12  ;;  %v7548_v19 = vmax.f32 %v5557_v24, 0.0  ;;  %v5559_v9 = vadd.f32 %v5558_v57, %v16267_v21  ;;  %v4951_v20 = vpop.f32.mrf.mxu0  ;;  %5190 = vmatmul.mubr.bf16.gmra.mxu0 %v16029_v54 }
 0x48b   :  { %v8567_v4 = vmax.f32 %v8566_v3, %v7649_v61  ;;  %v7650_v45 = vmax.f32 %v4948_v40, 0.0  ;;  %v4952_v53 = vadd.f32 %v4951_v20, %v16154_v39  ;;  %v5560_v1 = vpop.f32.mrf.mxu1  ;;  %5199 = vmatprep.mubr.bf16.mxu0 %v18315_v6 }
 0x48c   :  { %v8743_v18 = vmax.f32 %v8742_v2, %v7548_v19  ;;  %v7555_v23 = vmax.f32 %v5559_v9, 0.0  ;;  %v5561_v8 = vadd.f32 %v5560_v1, %v16276_v38  ;;  %v4953_v51 = vpop.f32.mrf.mxu0 }
 0x48d   :  { %v8630_v50 = vmax.f32 %v8629_v16, %v7650_v45  ;;  %v7657_v15 = vmax.f32 %v4952_v53, 0.0  ;;  %v4954_v14 = vadd.f32 %v4953_v51, %v16161_v0  ;;  %v5564_v7 = vpop.f32.mrf.mxu1  ;;  %5803 = vmatmul.mubr.bf16.gmra.mxu1 %v15977_v13 }
 0x48e   :  { %v8681_v12 = vmax.f32 %v8680_v62, %v7555_v23  ;;  %v7556_v3 = vmax.f32 %v5561_v8, 0.0  ;;  %v5565_v24 = vadd.f32 %v5564_v7, %v16267_v21  ;;  %v4955_v30 = vpop.f32.mrf.mxu0  ;;  %5812 = vmatprep.mubr.bf16.mxu1 %v18315_v6 }
 0x48f   :  { %v8568_v61 = vmax.f32 %v8567_v4, %v7657_v15  ;;  %v7658_v2 = vmax.f32 %v4954_v14, 0.0  ;;  %v4956_v40 = vadd.f32 %v4955_v30, %v16154_v39  ;;  %v5566_v57 = vpop.f32.mrf.mxu1 }
 0x490   :  { %v8744_v19 = vmax.f32 %v8743_v18, %v7556_v3  ;;  %v7563_v16 = vmax.f32 %v5565_v24, 0.0  ;;  %v5567_v9 = vadd.f32 %v5566_v57, %v16276_v38  ;;  %v4957_v20 = vpop.f32.mrf.mxu0 }
 0x491   :  { %v8631_v45 = vmax.f32 %v8630_v50, %v7658_v2  ;;  %v7665_v53 = vmax.f32 %v4956_v40, 0.0  ;;  %v4958_v62 = vadd.f32 %v4957_v20, %v16161_v0  ;;  %v5568_v1 = vpop.f32.mrf.mxu1 }
 0x492   :  { %v8682_v23 = vmax.f32 %v8681_v12, %v7563_v16  ;;  %v7564_v8 = vmax.f32 %v5567_v9, 0.0  ;;  %v5569_v51 = vadd.f32 %v5568_v1, %v16267_v21  ;;  %v4961_v7 = vpop.f32.mrf.mxu0  ;;  %5200 = vmatmul.mubr.bf16.gmra.mxu0 %v16026_v43 }
 0x493   :  { %v8569_v4 = vmax.f32 %v8568_v61, %v7665_v53  ;;  %v7666_v15 = vmax.f32 %v4958_v62, 0.0  ;;  %v4962_v18 = vadd.f32 %v4961_v7, %v16154_v39  ;;  %v5570_v14 = vpop.f32.mrf.mxu1  ;;  %5209 = vmatprep.mubr.bf16.mxu0 %v18315_v6 }
 0x494   :  { %v8745_v3 = vmax.f32 %v8744_v19, %v7564_v8  ;;  %v7571_v50 = vmax.f32 %v5569_v51, 0.0  ;;  %v5571_v24 = vadd.f32 %v5570_v14, %v16276_v38  ;;  %v4963_v30 = vpop.f32.mrf.mxu0 }
 0x495   :  { %v8632_v2 = vmax.f32 %v8631_v45, %v7666_v15  ;;  %v7673_v12 = vmax.f32 %v4962_v18, 0.0  ;;  %v4964_v40 = vadd.f32 %v4963_v30, %v16161_v0  ;;  %v5574_v57 = vpop.f32.mrf.mxu1  ;;  %5813 = vmatmul.mubr.bf16.gmra.mxu1 %v15970_v55 }
 0x496   :  { %v8683_v16 = vmax.f32 %v8682_v23, %v7571_v50  ;;  %v7572_v61 = vmax.f32 %v5571_v24, 0.0  ;;  %v5575_v9 = vadd.f32 %v5574_v57, %v16267_v21  ;;  %v4965_v20 = vpop.f32.mrf.mxu0  ;;  %5822 = vmatprep.mubr.bf16.mxu1 %v18315_v6 }
 0x497   :  { %v8570_v53 = vmax.f32 %v8569_v4, %v7673_v12  ;;  %v7674_v19 = vmax.f32 %v4964_v40, 0.0  ;;  %v4966_v62 = vadd.f32 %v4965_v20, %v16154_v39  ;;  %v5576_v1 = vpop.f32.mrf.mxu1 }
 0x498   :  { %v8746_v8 = vmax.f32 %v8745_v3, %v7572_v61  ;;  %v7579_v45 = vmax.f32 %v5575_v9, 0.0  ;;  %v5577_v51 = vadd.f32 %v5576_v1, %v16276_v38  ;;  %v4967_v7 = vpop.f32.mrf.mxu0 }
 0x499   :  { %v8633_v15 = vmax.f32 %v8632_v2, %v7674_v19  ;;  %v7681_v18 = vmax.f32 %v4966_v62, 0.0  ;;  %v4968_v23 = vadd.f32 %v4967_v7, %v16161_v0  ;;  %v5578_v14 = vpop.f32.mrf.mxu1 }
 0x49a   :  { %v8684_v50 = vmax.f32 %v8683_v16, %v7579_v45  ;;  %v7580_v24 = vmax.f32 %v5577_v51, 0.0  ;;  %v5579_v30 = vadd.f32 %v5578_v14, %v16267_v21  ;;  %v4971_v57 = vpop.f32.mrf.mxu0  ;;  %5210 = vmatmul.mubr.bf16.gmra.mxu0 %v16041_v29 }
 0x49b   :  { %v8571_v4 = vmax.f32 %v8570_v53, %v7681_v18  ;;  %v7682_v12 = vmax.f32 %v4968_v23, 0.0  ;;  %v4972_v3 = vadd.f32 %v4971_v57, %v16154_v39  ;;  %v5580_v40 = vpop.f32.mrf.mxu1  ;;  %5219 = vmatprep.mubr.bf16.mxu0 %v18315_v6 }
 0x49c   :  { %v8747_v61 = vmax.f32 %v8746_v8, %v7580_v24  ;;  %v7587_v2 = vmax.f32 %v5579_v30, 0.0  ;;  %v5581_v9 = vadd.f32 %v5580_v40, %v16276_v38  ;;  %v4973_v20 = vpop.f32.mrf.mxu0 }
 0x49d   :  { %v8634_v19 = vmax.f32 %v8633_v15, %v7682_v12  ;;  %v7689_v16 = vmax.f32 %v4972_v3, 0.0  ;;  %v4974_v62 = vadd.f32 %v4973_v20, %v16161_v0  ;;  %v5584_v1 = vpop.f32.mrf.mxu1  ;;  %5823 = vmatmul.mubr.bf16.gmra.mxu1 %v15993_v58 }
 0x49e   :  { %v8685_v45 = vmax.f32 %v8684_v50, %v7587_v2  ;;  %v7588_v53 = vmax.f32 %v5581_v9, 0.0  ;;  %v5585_v51 = vadd.f32 %v5584_v1, %v16267_v21  ;;  %v4975_v7 = vpop.f32.mrf.mxu0  ;;  %5832 = vmatprep.mubr.bf16.mxu1 %v18315_v6 }
 0x49f   :  { %v8572_v18 = vmax.f32 %v8571_v4, %v7689_v16  ;;  %v7690_v8 = vmax.f32 %v4974_v62, 0.0  ;;  %v4976_v23 = vadd.f32 %v4975_v7, %v16154_v39  ;;  %v5586_v14 = vpop.f32.mrf.mxu1 }
 0x4a0   :  { %v8748_v24 = vmax.f32 %v8747_v61, %v7588_v53  ;;  %v7595_v15 = vmax.f32 %v5585_v51, 0.0  ;;  %v5587_v30 = vadd.f32 %v5586_v14, %v16276_v38  ;;  %v4977_v57 = vpop.f32.mrf.mxu0 }
 0x4a1   :  { %v8635_v12 = vmax.f32 %v8634_v19, %v7690_v8  ;;  %v7697_v3 = vmax.f32 %v4976_v23, 0.0  ;;  %v4978_v50 = vadd.f32 %v4977_v57, %v16161_v0  ;;  %v5588_v40 = vpop.f32.mrf.mxu1 }
 0x4a2   :  { %v8686_v2 = vmax.f32 %v8685_v45, %v7595_v15  ;;  %v7596_v9 = vmax.f32 %v5587_v30, 0.0  ;;  %v5589_v20 = vadd.f32 %v5588_v40, %v16267_v21  ;;  %v4981_v1 = vpop.f32.mrf.mxu0  ;;  %5220 = vmatmul.mubr.bf16.gmra.mxu0 %v16038_v10 }
 0x4a3   :  { %v8573_v4 = vmax.f32 %v8572_v18, %v7697_v3  ;;  %v7698_v16 = vmax.f32 %v4978_v50, 0.0  ;;  %v4982_v61 = vadd.f32 %v4981_v1, %v16154_v39  ;;  %v5590_v62 = vpop.f32.mrf.mxu1  ;;  %5229 = vmatprep.mubr.bf16.mxu0 %v18315_v6 }
 0x4a4   :  { %v8749_v53 = vmax.f32 %v8748_v24, %v7596_v9  ;;  %v7603_v19 = vmax.f32 %v5589_v20, 0.0  ;;  %v5591_v51 = vadd.f32 %v5590_v62, %v16276_v38  ;;  %v4983_v7 = vpop.f32.mrf.mxu0 }
 0x4a5   :  { %v8636_v8 = vmax.f32 %v8635_v12, %v7698_v16  ;;  %v7705_v45 = vmax.f32 %v4982_v61, 0.0  ;;  %v4984_v23 = vadd.f32 %v4983_v7, %v16161_v0  ;;  %v5594_v14 = vpop.f32.mrf.mxu1  ;;  %5833 = vmatmul.mubr.bf16.gmra.mxu1 %v15988_v35 }
 0x4a6   :  { %v8687_v15 = vmax.f32 %v8686_v2, %v7603_v19  ;;  %v7604_v18 = vmax.f32 %v5591_v51, 0.0  ;;  %v5595_v30 = vadd.f32 %v5594_v14, %v16267_v21  ;;  %v4985_v57 = vpop.f32.mrf.mxu0  ;;  %5842 = vmatprep.mubr.bf16.mxu1 %v18315_v6 }
 0x4a7   :  { %v8574_v3 = vmax.f32 %v8573_v4, %v7705_v45  ;;  %v7706_v24 = vmax.f32 %v4984_v23, 0.0  ;;  %v4986_v50 = vadd.f32 %v4985_v57, %v16154_v39  ;;  %v5596_v40 = vpop.f32.mrf.mxu1 }
 0x4a8   :  { %v8750_v9 = vmax.f32 %v8749_v53, %v7604_v18  ;;  %v7611_v12 = vmax.f32 %v5595_v30, 0.0  ;;  %v5597_v20 = vadd.f32 %v5596_v40, %v16276_v38  ;;  %v4987_v1 = vpop.f32.mrf.mxu0 }
 0x4a9   :  { %v8637_v16 = vmax.f32 %v8636_v8, %v7706_v24  ;;  %v7713_v61 = vmax.f32 %v4986_v50, 0.0  ;;  %v4988_v2 = vadd.f32 %v4987_v1, %v16161_v0  ;;  %v5598_v62 = vpop.f32.mrf.mxu1 }
 0x4aa   :  { %v8688_v19 = vmax.f32 %v8687_v15, %v7611_v12  ;;  %v7612_v51 = vmax.f32 %v5597_v20, 0.0  ;;  %v5599_v7 = vadd.f32 %v5598_v62, %v16267_v21  ;;  %v4991_v14 = vpop.f32.mrf.mxu0  ;;  %5230 = vmatmul.mubr.bf16.gmra.mxu0 %v16053_v48 }
 0x4ab   :  { %v8575_v4 = vmax.f32 %v8574_v3, %v7713_v61  ;;  %v7714_v45 = vmax.f32 %v4988_v2, 0.0  ;;  %v4992_v53 = vadd.f32 %v4991_v14, %v16154_v39  ;;  %v5600_v23 = vpop.f32.mrf.mxu1  ;;  %5239 = vmatprep.mubr.bf16.mxu0 %v18315_v6 }
 0x4ac   :  { %v8751_v18 = vmax.f32 %v8750_v9, %v7612_v51  ;;  %v7619_v8 = vmax.f32 %v5599_v7, 0.0  ;;  %v5601_v30 = vadd.f32 %v5600_v23, %v16276_v38  ;;  %v4993_v57 = vpop.f32.mrf.mxu0 }
 0x4ad   :  { %v8638_v24 = vmax.f32 %v8637_v16, %v7714_v45  ;;  %v7721_v15 = vmax.f32 %v4992_v53, 0.0  ;;  %v4994_v50 = vadd.f32 %v4993_v57, %v16161_v0  ;;  %v5604_v40 = vpop.f32.mrf.mxu1  ;;  %5843 = vmatmul.mubr.bf16.gmra.mxu1 %v16011_v59 }
 0x4ae   :  { %v8689_v12 = vmax.f32 %v8688_v19, %v7619_v8  ;;  %v7620_v3 = vmax.f32 %v5601_v30, 0.0  ;;  %v5605_v20 = vadd.f32 %v5604_v40, %v16267_v21  ;;  %v4995_v1 = vpop.f32.mrf.mxu0  ;;  %5852 = vmatprep.mubr.bf16.mxu1 %v18315_v6 }
 0x4af   :  { %v8576_v61 = vmax.f32 %v8575_v4, %v7721_v15  ;;  %v7722_v9 = vmax.f32 %v4994_v50, 0.0  ;;  %v4996_v2 = vadd.f32 %v4995_v1, %v16154_v39  ;;  %v5606_v62 = vpop.f32.mrf.mxu1 }
 0x4b0   :  { %v8752_v51 = vmax.f32 %v8751_v18, %v7620_v3  ;;  %v7627_v16 = vmax.f32 %v5605_v20, 0.0  ;;  %v5607_v7 = vadd.f32 %v5606_v62, %v16276_v38  ;;  %v4997_v14 = vpop.f32.mrf.mxu0 }
 0x4b1   :  { %v8639_v45 = vmax.f32 %v8638_v24, %v7722_v9  ;;  %v7729_v53 = vmax.f32 %v4996_v2, 0.0  ;;  %v4998_v19 = vadd.f32 %v4997_v14, %v16161_v0  ;;  %v5608_v23 = vpop.f32.mrf.mxu1 }
 0x4b2   :  { %v8690_v8 = vmax.f32 %v8689_v12, %v7627_v16  ;;  %v7628_v30 = vmax.f32 %v5607_v7, 0.0  ;;  %v5609_v57 = vadd.f32 %v5608_v23, %v16267_v21  ;;  %v5001_v40 = vpop.f32.mrf.mxu0  ;;  %5240 = vmatmul.mubr.bf16.gmra.mxu0 %v16050_v41 }
 0x4b3   :  { %v8577_v4 = vmax.f32 %v8576_v61, %v7729_v53  ;;  %v7730_v15 = vmax.f32 %v4998_v19, 0.0  ;;  %v5002_v18 = vadd.f32 %v5001_v40, %v16154_v39  ;;  %v5610_v50 = vpop.f32.mrf.mxu1  ;;  %5249 = vmatprep.mubr.bf16.mxu0 %v18315_v6 }
 0x4b4   :  { %v8753_v3 = vmax.f32 %v8752_v51, %v7628_v30  ;;  %v7635_v24 = vmax.f32 %v5609_v57, 0.0  ;;  %v5611_v20 = vadd.f32 %v5610_v50, %v16276_v38  ;;  %v5003_v1 = vpop.f32.mrf.mxu0 }
 0x4b5   :  { %v8640_v9 = vmax.f32 %v8639_v45, %v7730_v15  ;;  %v7737_v12 = vmax.f32 %v5002_v18, 0.0  ;;  %v5004_v2 = vadd.f32 %v5003_v1, %v16161_v0  ;;  %v5614_v62 = vpop.f32.mrf.mxu1  ;;  %5853 = vmatmul.mubr.bf16.gmra.mxu1 %v16002_v25 }
 0x4b6   :  { %v8691_v16 = vmax.f32 %v8690_v8, %v7635_v24  ;;  %v7636_v61 = vmax.f32 %v5611_v20, 0.0  ;;  %v5615_v7 = vadd.f32 %v5614_v62, %v16267_v21  ;;  %v5005_v14 = vpop.f32.mrf.mxu0  ;;  %5862 = vmatprep.mubr.bf16.mxu1 %v18315_v6 }
 0x4b7   :  { %v8578_v53 = vmax.f32 %v8577_v4, %v7737_v12  ;;  %v7738_v51 = vmax.f32 %v5004_v2, 0.0  ;;  %v5006_v19 = vadd.f32 %v5005_v14, %v16154_v39  ;;  %v5616_v23 = vpop.f32.mrf.mxu1 }
 0x4b8   :  { %v8754_v30 = vmax.f32 %v8753_v3, %v7636_v61  ;;  %v7643_v45 = vmax.f32 %v5615_v7, 0.0  ;;  %v5617_v57 = vadd.f32 %v5616_v23, %v16276_v38  ;;  %v5007_v40 = vpop.f32.mrf.mxu0 }
 0x4b9   :  { %v8641_v15 = vmax.f32 %v8640_v9, %v7738_v51  ;;  %v7745_v18 = vmax.f32 %v5006_v19, 0.0  ;;  %v5008_v8 = vadd.f32 %v5007_v40, %v16161_v0  ;;  %v5618_v50 = vpop.f32.mrf.mxu1 }
 0x4ba   :  { %v8692_v24 = vmax.f32 %v8691_v16, %v7643_v45  ;;  %v7644_v20 = vmax.f32 %v5617_v57, 0.0  ;;  %v5619_v1 = vadd.f32 %v5618_v50, %v16267_v21  ;;  %v5011_v62 = vpop.f32.mrf.mxu0  ;;  %5250 = vmatmul.mubr.bf16.gmra.mxu0 %v16065_v27 }
 0x4bb   :  { %v8579_v4 = vmax.f32 %v8578_v53, %v7745_v18  ;;  %v7746_v12 = vmax.f32 %v5008_v8, 0.0  ;;  %v5012_v3 = vadd.f32 %v5011_v62, %v16154_v39  ;;  %v5620_v2 = vpop.f32.mrf.mxu1  ;;  %5259 = vmatprep.mubr.bf16.mxu0 %v18315_v6 }
 0x4bc   :  { %v8755_v61 = vmax.f32 %v8754_v30, %v7644_v20  ;;  %v7651_v9 = vmax.f32 %v5619_v1, 0.0  ;;  %v5621_v7 = vadd.f32 %v5620_v2, %v16276_v38  ;;  %v5013_v14 = vpop.f32.mrf.mxu0  ;;  %v4422_v20 = vld [vmem:[%s18171_s6 + $0x70] sm:$0xff] }
 0x4bd   :  { %v8642_v51 = vmax.f32 %v8641_v15, %v7746_v12  ;;  %v7753_v16 = vmax.f32 %v5012_v3, 0.0  ;;  %v5014_v19 = vadd.f32 %v5013_v14, %v16161_v0  ;;  %v5624_v23 = vpop.f32.mrf.mxu1  ;;  %5863 = vmatmul.mubr.bf16.gmra.mxu1 %v16029_v54  ;;  %v4418_v15 = vld [vmem:[%s18171_s6 + $0x50] sm:$0xff] }
 0x4be   :  { %v8693_v45 = vmax.f32 %v8692_v24, %v7651_v9  ;;  %v7652_v53 = vmax.f32 %v5621_v7, 0.0  ;;  %v5625_v57 = vadd.f32 %v5624_v23, %v16267_v21  ;;  %v5015_v40 = vpop.f32.mrf.mxu0  ;;  %5872 = vmatprep.mubr.bf16.mxu1 %v18315_v6  ;;  %v12652_v3 = vcombine.low %v4418_v15, %v4422_v20 }
 0x4bf   :  { %v8580_v18 = vmax.f32 %v8579_v4, %v7753_v16  ;;  %v7754_v30 = vmax.f32 %v5014_v19, 0.0  ;;  %v5016_v8 = vadd.f32 %v5015_v40, %v16154_v39  ;;  %v5626_v50 = vpop.f32.mrf.mxu1  ;;  %v12653_v14 = vcombine.high %v4418_v15, %v4422_v20  ;;  %v4419_v16 = vld [vmem:[%s18171_s6 + $0x58] sm:$0xff] }
 0x4c0   :  { %v8756_v24 = vmax.f32 %v8755_v61, %v7652_v53  ;;  %v7659_v1 = vmax.f32 %v5625_v57, 0.0  ;;  %v5627_v62 = vadd.f32 %v5626_v50, %v16276_v38  ;;  %v5017_v12 = vpop.f32.mrf.mxu0  ;;  %v4423_v19 = vld [vmem:[%s18171_s6 + $0x78] sm:$0xff] }
 0x4c1   :  { %v8643_v2 = vmax.f32 %v8642_v51, %v7754_v30  ;;  %v7761_v4 = vmax.f32 %v5016_v8, 0.0  ;;  %v5018_v9 = vadd.f32 %v5017_v12, %v16161_v0  ;;  %v5628_v7 = vpop.f32.mrf.mxu1  ;;  %v12654_v51 = vcombine.low %v4419_v16, %v4423_v19  ;;  %6195 = vmatprep.subr.bf16.mxu0 %v12653_v14 }
 0x4c2   :  { %v8694_v61 = vmax.f32 %v8693_v45, %v7659_v1  ;;  %v7660_v23 = vmax.f32 %v5627_v62, 0.0  ;;  %v5629_v53 = vadd.f32 %v5628_v7, %v16267_v21  ;;  %v5021_v57 = vpop.f32.mrf.mxu0  ;;  %5260 = vmatmul.mubr.bf16.gmra.mxu0 %v16062_v17  ;;  %v12655_v15 = vcombine.high %v4419_v16, %v4423_v19 }
 0x4c3   :  { %v8581_v40 = vmax.f32 %v8580_v18, %v7761_v4  ;;  %v7762_v30 = vmax.f32 %v5018_v9, 0.0  ;;  %v5022_v8 = vadd.f32 %v5021_v57, %v16154_v39  ;;  %v5630_v50 = vpop.f32.mrf.mxu1  ;;  %5269 = vmatprep.mubr.bf16.mxu0 %v18315_v6  ;;  %6196 = vmatpush1.bf16.msra.mxu0 %v12652_v3 }
 0x4c4   :  { %v8757_v20 = vmax.f32 %v8756_v24, %v7660_v23  ;;  %v7667_v12 = vmax.f32 %v5629_v53, 0.0  ;;  %v5631_v45 = vadd.f32 %v5630_v50, %v16276_v38  ;;  %v5023_v1 = vpop.f32.mrf.mxu0  ;;  %6868 = vmatprep.subr.bf16.mxu1 %v12655_v15 }
 0x4c5   :  { %v8644_v62 = vmax.f32 %v8643_v2, %v7762_v30  ;;  %v7769_v7 = vmax.f32 %v5022_v8, 0.0  ;;  %v5024_v54 = vadd.f32 %v5023_v1, %v16161_v0  ;;  %v5634_v25 = vpop.f32.mrf.mxu1  ;;  %5873 = vmatmul.mubr.bf16.gmra.mxu1 %v16026_v43 }
 0x4c6   :  { %v8695_v18 = vmax.f32 %v8694_v61, %v7667_v12  ;;  %v7668_v4 = vmax.f32 %v5631_v45, 0.0  ;;  %v5635_v9 = vadd.f32 %v5634_v25, %v16267_v21  ;;  %v5025_v14 = vpop.f32.mrf.mxu0  ;;  %5882 = vmatprep.mubr.bf16.mxu1 %v18315_v6  ;;  %6869 = vmatpush1.bf16.msra.mxu1 %v12654_v51 }
 0x4c7   :  { %v8582_v24 = vmax.f32 %v8581_v40, %v7769_v7  ;;  %v7770_v16 = vmax.f32 %v5024_v54, 0.0  ;;  %v5026_v3 = vadd.f32 %v5025_v14, %v16154_v39  ;;  %v5636_v2 = vpop.f32.mrf.mxu1 }
 0x4c8   :  { %v8758_v19 = vmax.f32 %v8757_v20, %v7668_v4  ;;  %v7675_v23 = vmax.f32 %v5635_v9, 0.0  ;;  %v5637_v53 = vadd.f32 %v5636_v2, %v16276_v38  ;;  %v5027_v57 = vpop.f32.mrf.mxu0 }
 0x4c9   :  { %v8645_v30 = vmax.f32 %v8644_v62, %v7770_v16  ;;  %v7777_v8 = vmax.f32 %v5026_v3, 0.0  ;;  %v5028_v61 = vadd.f32 %v5027_v57, %v16161_v0  ;;  %v5638_v50 = vpop.f32.mrf.mxu1 }
 0x4ca   :  { %v8696_v25 = vmax.f32 %v8695_v18, %v7675_v23  ;;  %v7676_v15 = vmax.f32 %v5637_v53, 0.0  ;;  %v5639_v12 = vadd.f32 %v5638_v50, %v16267_v21  ;;  %v5031_v51 = vpop.f32.mrf.mxu0  ;;  %5270 = vmatmul.mubr.bf16.gmra.mxu0 %v16077_v52 }
 0x4cb   :  { %v8583_v54 = vmax.f32 %v8582_v24, %v7777_v8  ;;  %v7778_v40 = vmax.f32 %v5028_v61, 0.0  ;;  %v5032_v20 = vadd.f32 %v5031_v51, %v16154_v39  ;;  %v5640_v45 = vpop.f32.mrf.mxu1  ;;  %5279 = vmatprep.mubr.bf16.mxu0 %v18315_v6 }
 0x4cc   :  { %v8759_v1 = vmax.f32 %v8758_v19, %v7676_v15  ;;  %v7683_v62 = vmax.f32 %v5639_v12, 0.0  ;;  %v5641_v7 = vadd.f32 %v5640_v45, %v16276_v38  ;;  %v5033_v4 = vpop.f32.mrf.mxu0 }
 0x4cd   :  { %v8646_v9 = vmax.f32 %v8645_v30, %v7778_v40  ;;  %v7785_v18 = vmax.f32 %v5032_v20, 0.0  ;;  %v5034_v14 = vadd.f32 %v5033_v4, %v16161_v0  ;;  %v5644_v16 = vpop.f32.mrf.mxu1  ;;  %5883 = vmatmul.mubr.bf16.gmra.mxu1 %v16041_v29 }
 0x4ce   :  { %v8697_v3 = vmax.f32 %v8696_v25, %v7683_v62  ;;  %v7684_v24 = vmax.f32 %v5641_v7, 0.0  ;;  %v5645_v2 = vadd.f32 %v5644_v16, %v16267_v21  ;;  %v5035_v23 = vpop.f32.mrf.mxu0  ;;  %5892 = vmatprep.mubr.bf16.mxu1 %v18315_v6 }
 0x4cf   :  { %v8584_v53 = vmax.f32 %v8583_v54, %v7785_v18  ;;  %v7786_v19 = vmax.f32 %v5034_v14, 0.0  ;;  %v5036_v57 = vadd.f32 %v5035_v23, %v16154_v39  ;;  %v5646_v8 = vpop.f32.mrf.mxu1 }
 0x4d0   :  { %v8760_v61 = vmax.f32 %v8759_v1, %v7684_v24  ;;  %v7691_v30 = vmax.f32 %v5645_v2, 0.0  ;;  %v5647_v50 = vadd.f32 %v5646_v8, %v16276_v38  ;;  %v5037_v15 = vpop.f32.mrf.mxu0 }
 0x4d1   :  { %v8647_v12 = vmax.f32 %v8646_v9, %v7786_v19  ;;  %v7793_v51 = vmax.f32 %v5036_v57, 0.0  ;;  %v5038_v25 = vadd.f32 %v5037_v15, %v16161_v0  ;;  %v5648_v40 = vpop.f32.mrf.mxu1 }
 0x4d2   :  { %v8698_v20 = vmax.f32 %v8697_v3, %v7691_v30  ;;  %v7692_v45 = vmax.f32 %v5647_v50, 0.0  ;;  %v5649_v62 = vadd.f32 %v5648_v40, %v16267_v21  ;;  %v5041_v7 = vpop.f32.mrf.mxu0  ;;  %5280 = vmatmul.mubr.bf16.gmra.mxu0 %v16074_v60 }
 0x4d3   :  { %v8585_v54 = vmax.f32 %v8584_v53, %v7793_v51  ;;  %v7794_v4 = vmax.f32 %v5038_v25, 0.0  ;;  %v5042_v1 = vadd.f32 %v5041_v7, %v16154_v39  ;;  %v5650_v18 = vpop.f32.mrf.mxu1  ;;  %5289 = vmatprep.mubr.bf16.mxu0 %v18315_v6 }
 0x4d4   :  { %v8761_v14 = vmax.f32 %v8760_v61, %v7692_v45  ;;  %v7699_v9 = vmax.f32 %v5649_v62, 0.0  ;;  %v5651_v16 = vadd.f32 %v5650_v18, %v16276_v38  ;;  %v5043_v24 = vpop.f32.mrf.mxu0 }
 0x4d5   :  { %v8648_v2 = vmax.f32 %v8647_v12, %v7794_v4  ;;  %v7801_v3 = vmax.f32 %v5042_v1, 0.0  ;;  %v5044_v23 = vadd.f32 %v5043_v24, %v16161_v0  ;;  %v5654_v19 = vpop.f32.mrf.mxu1  ;;  %5893 = vmatmul.mubr.bf16.gmra.mxu1 %v16038_v10 }
 0x4d6   :  { %v8699_v57 = vmax.f32 %v8698_v20, %v7699_v9  ;;  %v7700_v53 = vmax.f32 %v5651_v16, 0.0  ;;  %v5655_v8 = vadd.f32 %v5654_v19, %v16267_v21  ;;  %v5045_v30 = vpop.f32.mrf.mxu0  ;;  %5902 = vmatprep.mubr.bf16.mxu1 %v18315_v6 }
 0x4d7   :  { %v8586_v50 = vmax.f32 %v8585_v54, %v7801_v3  ;;  %v7802_v61 = vmax.f32 %v5044_v23, 0.0  ;;  %v5046_v15 = vadd.f32 %v5045_v30, %v16154_v39  ;;  %v5656_v51 = vpop.f32.mrf.mxu1 }
 0x4d8   :  { %v8762_v25 = vmax.f32 %v8761_v14, %v7700_v53  ;;  %v7707_v12 = vmax.f32 %v5655_v8, 0.0  ;;  %v5657_v40 = vadd.f32 %v5656_v51, %v16276_v38  ;;  %v5047_v45 = vpop.f32.mrf.mxu0 }
 0x4d9   :  { %v8649_v62 = vmax.f32 %v8648_v2, %v7802_v61  ;;  %v7809_v7 = vmax.f32 %v5046_v15, 0.0  ;;  %v5048_v20 = vadd.f32 %v5047_v45, %v16161_v0  ;;  %v5658_v4 = vpop.f32.mrf.mxu1 }
 0x4da   :  { %v8700_v1 = vmax.f32 %v8699_v57, %v7707_v12  ;;  %v7708_v18 = vmax.f32 %v5657_v40, 0.0  ;;  %v5659_v9 = vadd.f32 %v5658_v4, %v16267_v21  ;;  %v5051_v16 = vpop.f32.mrf.mxu0  ;;  %5290 = vmatmul.mubr.bf16.gmra.mxu0 %v16089_v56 }
 0x4db   :  { %v8587_v54 = vmax.f32 %v8586_v50, %v7809_v7  ;;  %v7810_v24 = vmax.f32 %v5048_v20, 0.0  ;;  %v5052_v14 = vadd.f32 %v5051_v16, %v16154_v39  ;;  %v5660_v3 = vpop.f32.mrf.mxu1  ;;  %5299 = vmatprep.mubr.bf16.mxu0 %v18315_v6 }
 0x4dc   :  { %v8763_v23 = vmax.f32 %v8762_v25, %v7708_v18  ;;  %v7715_v2 = vmax.f32 %v5659_v9, 0.0  ;;  %v5661_v19 = vadd.f32 %v5660_v3, %v16276_v38  ;;  %v5053_v53 = vpop.f32.mrf.mxu0 }
 0x4dd   :  { %v8650_v8 = vmax.f32 %v8649_v62, %v7810_v24  ;;  %v7817_v57 = vmax.f32 %v5052_v14, 0.0  ;;  %v5054_v30 = vadd.f32 %v5053_v53, %v16161_v0  ;;  %v5664_v61 = vpop.f32.mrf.mxu1  ;;  %5903 = vmatmul.mubr.bf16.gmra.mxu1 %v16053_v48 }
 0x4de   :  { %v8701_v15 = vmax.f32 %v8700_v1, %v7715_v2  ;;  %v7716_v50 = vmax.f32 %v5661_v19, 0.0  ;;  %v5665_v51 = vadd.f32 %v5664_v61, %v16267_v21  ;;  %v5055_v12 = vpop.f32.mrf.mxu0  ;;  %5912 = vmatprep.mubr.bf16.mxu1 %v18315_v6 }
 0x4df   :  { %v8588_v40 = vmax.f32 %v8587_v54, %v7817_v57  ;;  %v7818_v25 = vmax.f32 %v5054_v30, 0.0  ;;  %v5056_v45 = vadd.f32 %v5055_v12, %v16154_v39  ;;  %v5666_v7 = vpop.f32.mrf.mxu1 }
 0x4e0   :  { %v8764_v20 = vmax.f32 %v8763_v23, %v7716_v50  ;;  %v7723_v62 = vmax.f32 %v5665_v51, 0.0  ;;  %v5667_v4 = vadd.f32 %v5666_v7, %v16276_v38  ;;  %v5057_v18 = vpop.f32.mrf.mxu0 }
 0x4e1   :  { %v8651_v9 = vmax.f32 %v8650_v8, %v7818_v25  ;;  %v7825_v16 = vmax.f32 %v5056_v45, 0.0  ;;  %v5058_v1 = vadd.f32 %v5057_v18, %v16161_v0  ;;  %v5668_v24 = vpop.f32.mrf.mxu1 }
 0x4e2   :  { %v8702_v14 = vmax.f32 %v8701_v15, %v7723_v62  ;;  %v7724_v3 = vmax.f32 %v5667_v4, 0.0  ;;  %v5669_v2 = vadd.f32 %v5668_v24, %v16267_v21  ;;  %v5061_v19 = vpop.f32.mrf.mxu0  ;;  %5300 = vmatmul.mubr.bf16.gmra.mxu0 %v16086_v34 }
 0x4e3   :  { %v8589_v54 = vmax.f32 %v8588_v40, %v7825_v16  ;;  %v7826_v53 = vmax.f32 %v5058_v1, 0.0  ;;  %v5062_v23 = vadd.f32 %v5061_v19, %v16154_v39  ;;  %v5670_v57 = vpop.f32.mrf.mxu1  ;;  %5309 = vmatprep.mubr.bf16.mxu0 %v18315_v6 }
 0x4e4   :  { %v8765_v30 = vmax.f32 %v8764_v20, %v7724_v3  ;;  %v7731_v8 = vmax.f32 %v5669_v2, 0.0  ;;  %v5671_v61 = vadd.f32 %v5670_v57, %v16276_v38  ;;  %v5063_v50 = vpop.f32.mrf.mxu0 }
 0x4e5   :  { %v8652_v51 = vmax.f32 %v8651_v9, %v7826_v53  ;;  %v7833_v15 = vmax.f32 %v5062_v23, 0.0  ;;  %v5064_v12 = vadd.f32 %v5063_v50, %v16161_v0  ;;  %v5674_v25 = vpop.f32.mrf.mxu1  ;;  %5913 = vmatmul.mubr.bf16.gmra.mxu1 %v16050_v41 }
 0x4e6   :  { %v8703_v45 = vmax.f32 %v8702_v14, %v7731_v8  ;;  %v7732_v40 = vmax.f32 %v5671_v61, 0.0  ;;  %v5675_v7 = vadd.f32 %v5674_v25, %v16267_v21  ;;  %v5065_v62 = vpop.f32.mrf.mxu0  ;;  %5922 = vmatprep.mubr.bf16.mxu1 %v18315_v6 }
 0x4e7   :  { %v8590_v4 = vmax.f32 %v8589_v54, %v7833_v15  ;;  %v7834_v20 = vmax.f32 %v5064_v12, 0.0  ;;  %v5066_v18 = vadd.f32 %v5065_v62, %v16154_v39  ;;  %v5676_v16 = vpop.f32.mrf.mxu1 }
 0x4e8   :  { %v8766_v1 = vmax.f32 %v8765_v30, %v7732_v40  ;;  %v7739_v9 = vmax.f32 %v5675_v7, 0.0  ;;  %v5677_v24 = vadd.f32 %v5676_v16, %v16276_v38  ;;  %v5067_v3 = vpop.f32.mrf.mxu0 }
 0x4e9   :  { %v8653_v2 = vmax.f32 %v8652_v51, %v7834_v20  ;;  %v7841_v19 = vmax.f32 %v5066_v18, 0.0  ;;  %v5068_v14 = vadd.f32 %v5067_v3, %v16161_v0  ;;  %v5678_v53 = vpop.f32.mrf.mxu1 }
 0x4ea   :  { %v8704_v23 = vmax.f32 %v8703_v45, %v7739_v9  ;;  %v7740_v57 = vmax.f32 %v5677_v24, 0.0  ;;  %v5679_v8 = vadd.f32 %v5678_v53, %v16267_v21  ;;  %v5071_v61 = vpop.f32.mrf.mxu0  ;;  %5310 = vmatmul.mubr.bf16.gmra.mxu0 %v16103_v32 }
 0x4eb   :  { %v8591_v54 = vmax.f32 %v8590_v4, %v7841_v19  ;;  %v7842_v50 = vmax.f32 %v5068_v14, 0.0  ;;  %v5072_v30 = vadd.f32 %v5071_v61, %v16154_v39  ;;  %v5680_v15 = vpop.f32.mrf.mxu1  ;;  %5319 = vmatprep.mubr.bf16.mxu0 %v18315_v6 }
 0x4ec   :  { %v8767_v12 = vmax.f32 %v8766_v1, %v7740_v57  ;;  %v7747_v51 = vmax.f32 %v5679_v8, 0.0  ;;  %v5681_v25 = vadd.f32 %v5680_v15, %v16276_v38  ;;  %v5073_v40 = vpop.f32.mrf.mxu0 }
 0x4ed   :  { %v8654_v7 = vmax.f32 %v8653_v2, %v7842_v50  ;;  %v7849_v45 = vmax.f32 %v5072_v30, 0.0  ;;  %v5074_v62 = vadd.f32 %v5073_v40, %v16161_v0  ;;  %v5684_v20 = vpop.f32.mrf.mxu1  ;;  %5923 = vmatmul.mubr.bf16.gmra.mxu1 %v16065_v27 }
 0x4ee   :  { %v8705_v18 = vmax.f32 %v8704_v23, %v7747_v51  ;;  %v7748_v4 = vmax.f32 %v5681_v25, 0.0  ;;  %v5685_v16 = vadd.f32 %v5684_v20, %v16267_v21  ;;  %v5075_v9 = vpop.f32.mrf.mxu0  ;;  %5932 = vmatprep.mubr.bf16.mxu1 %v18315_v6 }
 0x4ef   :  { %v8592_v24 = vmax.f32 %v8591_v54, %v7849_v45  ;;  %v7850_v1 = vmax.f32 %v5074_v62, 0.0  ;;  %v5076_v3 = vadd.f32 %v5075_v9, %v16154_v39  ;;  %v5686_v19 = vpop.f32.mrf.mxu1 }
 0x4f0   :  { %v8768_v14 = vmax.f32 %v8767_v12, %v7748_v4  ;;  %v7755_v2 = vmax.f32 %v5685_v16, 0.0  ;;  %v5687_v53 = vadd.f32 %v5686_v19, %v16276_v38  ;;  %v5077_v57 = vpop.f32.mrf.mxu0 }
 0x4f1   :  { %v8655_v8 = vmax.f32 %v8654_v7, %v7850_v1  ;;  %v7857_v61 = vmax.f32 %v5076_v3, 0.0  ;;  %v5078_v23 = vadd.f32 %v5077_v57, %v16161_v0  ;;  %v5688_v50 = vpop.f32.mrf.mxu1 }
 0x4f2   :  { %v8706_v30 = vmax.f32 %v8705_v18, %v7755_v2  ;;  %v7756_v15 = vmax.f32 %v5687_v53, 0.0  ;;  %v5689_v51 = vadd.f32 %v5688_v50, %v16267_v21  ;;  %v5081_v25 = vpop.f32.mrf.mxu0  ;;  %5320 = vmatmul.mubr.bf16.gmra.mxu0 %v16100_v5 }
 0x4f3   :  { %v8593_v54 = vmax.f32 %v8592_v24, %v7857_v61  ;;  %v7858_v40 = vmax.f32 %v5078_v23, 0.0  ;;  %v5082_v12 = vadd.f32 %v5081_v25, %v16154_v39  ;;  %v5690_v45 = vpop.f32.mrf.mxu1  ;;  %5329 = vmatprep.mubr.bf16.mxu0 %v18315_v6 }
 0x4f4   :  { %v8769_v62 = vmax.f32 %v8768_v14, %v7756_v15  ;;  %v7763_v7 = vmax.f32 %v5689_v51, 0.0  ;;  %v5691_v20 = vadd.f32 %v5690_v45, %v16276_v38  ;;  %v5083_v4 = vpop.f32.mrf.mxu0 }
 0x4f5   :  { %v8656_v16 = vmax.f32 %v8655_v8, %v7858_v40  ;;  %v7865_v18 = vmax.f32 %v5082_v12, 0.0  ;;  %v5084_v9 = vadd.f32 %v5083_v4, %v16161_v0  ;;  %v5694_v1 = vpop.f32.mrf.mxu1  ;;  %5933 = vmatmul.mubr.bf16.gmra.mxu1 %v16062_v17 }
 0x4f6   :  { %v8707_v3 = vmax.f32 %v8706_v30, %v7763_v7  ;;  %v7764_v24 = vmax.f32 %v5691_v20, 0.0  ;;  %v5695_v19 = vadd.f32 %v5694_v1, %v16267_v21  ;;  %v5085_v2 = vpop.f32.mrf.mxu0  ;;  %5942 = vmatprep.mubr.bf16.mxu1 %v18315_v6 }
 0x4f7   :  { %v8594_v53 = vmax.f32 %v8593_v54, %v7865_v18  ;;  %v7866_v14 = vmax.f32 %v5084_v9, 0.0  ;;  %v5086_v57 = vadd.f32 %v5085_v2, %v16154_v39  ;;  %v5696_v61 = vpop.f32.mrf.mxu1 }
 0x4f8   :  { %v8770_v23 = vmax.f32 %v8769_v62, %v7764_v24  ;;  %v7771_v8 = vmax.f32 %v5695_v19, 0.0  ;;  %v5697_v50 = vadd.f32 %v5696_v61, %v16276_v38  ;;  %v5087_v15 = vpop.f32.mrf.mxu0 }
 0x4f9   :  { %v8657_v51 = vmax.f32 %v8656_v16, %v7866_v14  ;;  %v7873_v25 = vmax.f32 %v5086_v57, 0.0  ;;  %v5088_v30 = vadd.f32 %v5087_v15, %v16161_v0  ;;  %v5698_v40 = vpop.f32.mrf.mxu1 }
 0x4fa   :  { %v8708_v12 = vmax.f32 %v8707_v3, %v7771_v8  ;;  %v7772_v45 = vmax.f32 %v5697_v50, 0.0  ;;  %v5699_v7 = vadd.f32 %v5698_v40, %v16267_v21  ;;  %v5091_v20 = vpop.f32.mrf.mxu0  ;;  %5330 = vmatmul.mubr.bf16.gmra.mxu0 %v16121_v36 }
 0x4fb   :  { %v8595_v54 = vmax.f32 %v8594_v53, %v7873_v25  ;;  %v7874_v4 = vmax.f32 %v5088_v30, 0.0  ;;  %v5092_v62 = vadd.f32 %v5091_v20, %v16154_v39  ;;  %v5700_v18 = vpop.f32.mrf.mxu1  ;;  %5339 = vmatprep.mubr.bf16.mxu0 %v18315_v6 }
 0x4fc   :  { %v8771_v9 = vmax.f32 %v8770_v23, %v7772_v45  ;;  %v7779_v16 = vmax.f32 %v5699_v7, 0.0  ;;  %v5701_v1 = vadd.f32 %v5700_v18, %v16276_v38  ;;  %v5093_v24 = vpop.f32.mrf.mxu0 }
 0x4fd   :  { %v8658_v19 = vmax.f32 %v8657_v51, %v7874_v4  ;;  %v7881_v3 = vmax.f32 %v5092_v62, 0.0  ;;  %v5094_v2 = vadd.f32 %v5093_v24, %v16161_v0  ;;  %v5704_v14 = vpop.f32.mrf.mxu1  ;;  %5943 = vmatmul.mubr.bf16.gmra.mxu1 %v16077_v52 }
 0x4fe   :  { %v8709_v57 = vmax.f32 %v8708_v12, %v7779_v16  ;;  %v7780_v53 = vmax.f32 %v5701_v1, 0.0  ;;  %v5705_v61 = vadd.f32 %v5704_v14, %v16267_v21  ;;  %v5095_v8 = vpop.f32.mrf.mxu0  ;;  %5952 = vmatprep.mubr.bf16.mxu1 %v18315_v6 }
 0x4ff   :  { %v8596_v50 = vmax.f32 %v8595_v54, %v7881_v3  ;;  %v7882_v23 = vmax.f32 %v5094_v2, 0.0  ;;  %v5096_v15 = vadd.f32 %v5095_v8, %v16154_v39  ;;  %v5706_v25 = vpop.f32.mrf.mxu1 }
 0x500   :  { %v8772_v30 = vmax.f32 %v8771_v9, %v7780_v53  ;;  %v7787_v51 = vmax.f32 %v5705_v61, 0.0  ;;  %v5707_v40 = vadd.f32 %v5706_v25, %v16276_v38  ;;  %v5097_v45 = vpop.f32.mrf.mxu0  ;;  %v4414_v61 = vld [vmem:[%s18171_s6 + $0x30] sm:$0xff] }
 0x501   :  { %v8659_v7 = vmax.f32 %v8658_v19, %v7882_v23  ;;  %v7889_v20 = vmax.f32 %v5096_v15, 0.0  ;;  %v5098_v12 = vadd.f32 %v5097_v45, %v16161_v0  ;;  %v5708_v4 = vpop.f32.mrf.mxu1 }
 0x502   :  { %v8710_v62 = vmax.f32 %v8709_v57, %v7787_v51  ;;  %v7788_v18 = vmax.f32 %v5707_v40, 0.0  ;;  %v5709_v16 = vadd.f32 %v5708_v4, %v16267_v21  ;;  %v5101_v1 = vpop.f32.mrf.mxu0  ;;  %5340 = vmatmul.mubr.bf16.gmra.mxu0 %v16112_v63  ;;  %v4410_v57 = vld [vmem:[%s18171_s6 + $0x10] sm:$0xff] }
 0x503   :  { %v8597_v54 = vmax.f32 %v8596_v50, %v7889_v20  ;;  %v7890_v24 = vmax.f32 %v5098_v12, 0.0  ;;  %v5102_v9 = vadd.f32 %v5101_v1, %v16154_v39  ;;  %v5710_v3 = vpop.f32.mrf.mxu1  ;;  %5349 = vmatprep.mubr.bf16.mxu0 %v18315_v6  ;;  %v12645_v25 = vcombine.high %v4410_v57, %v4414_v61 }
 0x504   :  { %v8773_v2 = vmax.f32 %v8772_v30, %v7788_v18  ;;  %v7795_v19 = vmax.f32 %v5709_v16, 0.0  ;;  %v5711_v14 = vadd.f32 %v5710_v3, %v16276_v38  ;;  %v5103_v53 = vpop.f32.mrf.mxu0  ;;  %v12644_v20 = vcombine.low %v4410_v57, %v4414_v61  ;;  %v4415_v61 = vld [vmem:[%s18171_s6 + $0x38] sm:$0xff] }
 0x505   :  { %v8660_v8 = vmax.f32 %v8659_v7, %v7890_v24  ;;  %v7897_v50 = vmax.f32 %v5102_v9, 0.0  ;;  %v5104_v23 = vadd.f32 %v5103_v53, %v16161_v0  ;;  %v5714_v15 = vpop.f32.mrf.mxu1  ;;  %5953 = vmatmul.mubr.bf16.gmra.mxu1 %v16074_v60  ;;  %6197 = vmatprep.subr.bf16.mxu0 %v12645_v25 }
 0x506   :  { %v8711_v30 = vmax.f32 %v8710_v62, %v7795_v19  ;;  %v7796_v51 = vmax.f32 %v5711_v14, 0.0  ;;  %v5715_v40 = vadd.f32 %v5714_v15, %v16267_v21  ;;  %v5105_v45 = vpop.f32.mrf.mxu0  ;;  %5962 = vmatprep.mubr.bf16.mxu1 %v18315_v6  ;;  %6198 = vmatpush1.bf16.msra.mxu0 %v12644_v20 }
 0x507   :  { %v8598_v12 = vmax.f32 %v8597_v54, %v7897_v50  ;;  %v7898_v4 = vmax.f32 %v5104_v23, 0.0  ;;  %v5106_v18 = vadd.f32 %v5105_v45, %v16154_v39  ;;  %v5716_v7 = vpop.f32.mrf.mxu1 }
 0x508   :  { %v8774_v16 = vmax.f32 %v8773_v2, %v7796_v51  ;;  %v7803_v1 = vmax.f32 %v5715_v40, 0.0  ;;  %v5717_v24 = vadd.f32 %v5716_v7, %v16276_v38  ;;  %v5107_v9 = vpop.f32.mrf.mxu0  ;;  %v4411_v2 = vld [vmem:[%s18171_s6 + $0x18] sm:$0xff]  ;;  %s14626_s6 = smov [#allocation14]  }
 0x509   :  { %v8661_v62 = vmax.f32 %v8660_v8, %v7898_v4  ;;  %v7905_v3 = vmax.f32 %v5106_v18, 0.0  ;;  %v5108_v19 = vadd.f32 %v5107_v9, %v16161_v0  ;;  %v5718_v14 = vpop.f32.mrf.mxu1  ;;  %v12647_v4 = vcombine.high %v4411_v2, %v4415_v61  ;;  %s12296_s12 = sshll.u32 %s14626_s6, 4  ;;  %s12297_s12 = int_to_ptr.vmem [resolvable:$true] %s12296_s12 }
 0x50a   :  { %v8712_v53 = vmax.f32 %v8711_v30, %v7803_v1  ;;  %v7804_v15 = vmax.f32 %v5717_v24, 0.0  ;;  %v5719_v54 = vadd.f32 %v5718_v14, %v16267_v21  ;;  %v5111_v57 = vpop.f32.mrf.mxu0  ;;  %5350 = vmatmul.mubr.bf16.gmra.mxu0 %v16149_v37  ;;  %v12646_v30 = vcombine.low %v4411_v2, %v4415_v61  ;;  %s14583_s3 = scalar_lea.vmem %s12297_s12, 32  ;;  %p14588_p3 = scmp.lt.s32.totalorder %s12297_s12, %s12297_s12 }
 0x50b   :  { %v8599_v8 = vmax.f32 %v8598_v12, %v7905_v3  ;;  %v7906_v50 = vmax.f32 %v5108_v19, 0.0  ;;  %v5112_v23 = vadd.f32 %v5111_v57, %v16154_v39  ;;  %v5720_v25 = vpop.f32.mrf.mxu1  ;;  %5359 = vmatprep.mubr.bf16.mxu0 %v18315_v6  ;;  %6870 = vmatprep.subr.bf16.mxu1 %v12647_v4  ;;  %p14584_p2 = scmp.ne.s32.totalorder %s12297_s12, %s14583_s3  ;;  %p14589_p4 = scmp.lt.s32.totalorder %s14583_s3, %s14583_s3 }
 0x50c   :  { %v8775_v51 = vmax.f32 %v8774_v16, %v7804_v15  ;;  %v7811_v40 = vmax.f32 %v5719_v54, 0.0  ;;  %v5721_v45 = vadd.f32 %v5720_v25, %v16276_v38  ;;  %v5113_v20 = vpop.f32.mrf.mxu0  ;;  %6871 = vmatpush1.bf16.msra.mxu1 %v12646_v30 }
 0x50d   :  { %v8662_v18 = vmax.f32 %v8661_v62, %v7906_v50  ;;  %v7913_v7 = vmax.f32 %v5112_v23, 0.0  ;;  %v5114_v1 = vadd.f32 %v5113_v20, %v16161_v0  ;;  %v5724_v24 = vpop.f32.mrf.mxu1  ;;  %5963 = vmatmul.mubr.bf16.gmra.mxu1 %v16089_v56  ;;  %p14590_p5 = por %p14589_p4, %p14588_p3 }
 0x50e   :  { %v8713_v12 = vmax.f32 %v8712_v53, %v7811_v40  ;;  %v7812_v9 = vmax.f32 %v5721_v45, 0.0  ;;  %v5725_v3 = vadd.f32 %v5724_v24, %v16267_v21  ;;  %v5115_v19 = vpop.f32.mrf.mxu0  ;;  %5972 = vmatprep.mubr.bf16.mxu1 %v18315_v6 }
 0x50f   :  { %v8600_v16 = vmax.f32 %v8599_v8, %v7913_v7  ;;  %v7914_v14 = vmax.f32 %v5114_v1, 0.0  ;;  %v5116_v15 = vadd.f32 %v5115_v19, %v16154_v39  ;;  %v5726_v54 = vpop.f32.mrf.mxu1  ;;  %p14591_p6 = pnand %p14590_p5, %p14584_p2 }
 0x510   :  { %v8776_v62 = vmax.f32 %v8775_v51, %v7812_v9  ;;  %v7819_v57 = vmax.f32 %v5725_v3, 0.0  ;;  %v5727_v2 = vadd.f32 %v5726_v54, %v16276_v38  ;;  %v5117_v61 = vpop.f32.mrf.mxu0 }
 0x511   :  { %v8663_v50 = vmax.f32 %v8662_v18, %v7914_v14  ;;  %v7921_v53 = vmax.f32 %v5116_v15, 0.0  ;;  %v5118_v23 = vadd.f32 %v5117_v61, %v16161_v0  ;;  %v5728_v25 = vpop.f32.mrf.mxu1 }
 0x512   :  { %v8714_v40 = vmax.f32 %v8713_v12, %v7819_v57  ;;  %v7820_v45 = vmax.f32 %v5727_v2, 0.0  ;;  %v5729_v20 = vadd.f32 %v5728_v25, %v16267_v21  ;;  %v5121_v8 = vpop.f32.mrf.mxu0  ;;  %5360 = vmatmul.mubr.bf16.gmra.mxu0 %v16143_v47 }
 0x513   :  { %v8601_v4 = vmax.f32 %v8600_v16, %v7921_v53  ;;  %v7922_v7 = vmax.f32 %v5118_v23, 0.0  ;;  %v5122_v30 = vadd.f32 %v5121_v8, %v16154_v39  ;;  %v5730_v51 = vpop.f32.mrf.mxu1  ;;  %5369 = vmatprep.mubr.bf16.mxu0 %v18315_v6 }
 0x514   :  { %v8777_v1 = vmax.f32 %v8776_v62, %v7820_v45  ;;  %v7827_v18 = vmax.f32 %v5729_v20, 0.0  ;;  %v5731_v24 = vadd.f32 %v5730_v51, %v16276_v38  ;;  %v5123_v9 = vpop.f32.mrf.mxu0 }
 0x515   :  { %v8664_v3 = vmax.f32 %v8663_v50, %v7922_v7  ;;  %v7929_v12 = vmax.f32 %v5122_v30, 0.0  ;;  %v5124_v19 = vadd.f32 %v5123_v9, %v16161_v0  ;;  %v5734_v14 = vpop.f32.mrf.mxu1  ;;  %5973 = vmatmul.mubr.bf16.gmra.mxu1 %v16086_v34 }
 0x516   :  { %v8715_v15 = vmax.f32 %v8714_v40, %v7827_v18  ;;  %v7828_v16 = vmax.f32 %v5731_v24, 0.0  ;;  %v5735_v54 = vadd.f32 %v5734_v14, %v16267_v21  ;;  %v5125_v57 = vpop.f32.mrf.mxu0  ;;  %5982 = vmatprep.mubr.bf16.mxu1 %v18315_v6 }
 0x517   :  { %v8602_v2 = vmax.f32 %v8601_v4, %v7929_v12  ;;  %v7930_v62 = vmax.f32 %v5124_v19, 0.0  ;;  %v5126_v61 = vadd.f32 %v5125_v57, %v16154_v39  ;;  %v5736_v53 = vpop.f32.mrf.mxu1 }
 0x518   :  { %v8778_v23 = vmax.f32 %v8777_v1, %v7828_v16  ;;  %v7835_v50 = vmax.f32 %v5735_v54, 0.0  ;;  %v5737_v25 = vadd.f32 %v5736_v53, %v16276_v38  ;;  %v5127_v45 = vpop.f32.mrf.mxu0 }
 0x519   :  { %v8665_v20 = vmax.f32 %v8664_v3, %v7930_v62  ;;  %v7937_v8 = vmax.f32 %v5126_v61, 0.0  ;;  %v5128_v40 = vadd.f32 %v5127_v45, %v16161_v0  ;;  %v5738_v7 = vpop.f32.mrf.mxu1 }
 0x51a   :  { %v8716_v30 = vmax.f32 %v8715_v15, %v7835_v50  ;;  %v7836_v51 = vmax.f32 %v5737_v25, 0.0  ;;  %v5739_v18 = vadd.f32 %v5738_v7, %v16267_v21  ;;  %v5131_v24 = vpop.f32.mrf.mxu0  ;;  %5370 = vmatmul.mubr.bf16.gmra.mxu0 %v16172_v31 }
 0x51b   :  { %v8603_v4 = vmax.f32 %v8602_v2, %v7937_v8  ;;  %v7938_v9 = vmax.f32 %v5128_v40, 0.0  ;;  %v5132_v1 = vadd.f32 %v5131_v24, %v16154_v39  ;;  %v5740_v12 = vpop.f32.mrf.mxu1  ;;  %5379 = vmatprep.mubr.bf16.mxu0 %v18315_v6 }
 0x51c   :  { %v8779_v19 = vmax.f32 %v8778_v23, %v7836_v51  ;;  %v7843_v3 = vmax.f32 %v5739_v18, 0.0  ;;  %v5741_v14 = vadd.f32 %v5740_v12, %v16276_v38  ;;  %v5133_v16 = vpop.f32.mrf.mxu0 }
 0x51d   :  { %v8666_v54 = vmax.f32 %v8665_v20, %v7938_v9  ;;  %v7945_v15 = vmax.f32 %v5132_v1, 0.0  ;;  %v5134_v57 = vadd.f32 %v5133_v16, %v16161_v0  ;;  %v5744_v62 = vpop.f32.mrf.mxu1  ;;  %5983 = vmatmul.mubr.bf16.gmra.mxu1 %v16103_v32 }
 0x51e   :  { %v8717_v61 = vmax.f32 %v8716_v30, %v7843_v3  ;;  %v7844_v2 = vmax.f32 %v5741_v14, 0.0  ;;  %v5745_v53 = vadd.f32 %v5744_v62, %v16267_v21  ;;  %v5135_v50 = vpop.f32.mrf.mxu0  ;;  %5992 = vmatprep.mubr.bf16.mxu1 %v18315_v6 }
 0x51f   :  { %v8604_v25 = vmax.f32 %v8603_v4, %v7945_v15  ;;  %v7946_v23 = vmax.f32 %v5134_v57, 0.0  ;;  %v5136_v45 = vadd.f32 %v5135_v50, %v16154_v39  ;;  %v5746_v8 = vpop.f32.mrf.mxu1 }
 0x520   :  { %v8780_v40 = vmax.f32 %v8779_v19, %v7844_v2  ;;  %v7851_v20 = vmax.f32 %v5745_v53, 0.0  ;;  %v5747_v7 = vadd.f32 %v5746_v8, %v16276_v38  ;;  %v5137_v51 = vpop.f32.mrf.mxu0 }
 0x521   :  { %v8667_v18 = vmax.f32 %v8666_v54, %v7946_v23  ;;  %v7953_v24 = vmax.f32 %v5136_v45, 0.0  ;;  %v5138_v30 = vadd.f32 %v5137_v51, %v16161_v0  ;;  %v5748_v9 = vpop.f32.mrf.mxu1 }
 0x522   :  { %v8718_v1 = vmax.f32 %v8717_v61, %v7851_v20  ;;  %v7852_v12 = vmax.f32 %v5747_v7, 0.0  ;;  %v5749_v3 = vadd.f32 %v5748_v9, %v16267_v21  ;;  %v5141_v14 = vpop.f32.mrf.mxu0  ;;  %5380 = vmatmul.mubr.bf16.gmra.mxu0 %v16167_v33 }
 0x523   :  { %v8605_v4 = vmax.f32 %v8604_v25, %v7953_v24  ;;  %v7954_v16 = vmax.f32 %v5138_v30, 0.0  ;;  %v5142_v19 = vadd.f32 %v5141_v14, %v16154_v39  ;;  %v5750_v15 = vpop.f32.mrf.mxu1  ;;  %5389 = vmatprep.mubr.bf16.mxu0 %v18315_v6 }
 0x524   :  { %v8781_v57 = vmax.f32 %v8780_v40, %v7852_v12  ;;  %v7859_v54 = vmax.f32 %v5749_v3, 0.0  ;;  %v5751_v62 = vadd.f32 %v5750_v15, %v16276_v38  ;;  %v5143_v2 = vpop.f32.mrf.mxu0 }
 0x525   :  { %v8668_v53 = vmax.f32 %v8667_v18, %v7954_v16  ;;  %v7961_v61 = vmax.f32 %v5142_v19, 0.0  ;;  %v5144_v50 = vadd.f32 %v5143_v2, %v16161_v0  ;;  %v5754_v23 = vpop.f32.mrf.mxu1  ;;  %5993 = vmatmul.mubr.bf16.gmra.mxu1 %v16100_v5 }
 0x526   :  { %v8719_v45 = vmax.f32 %v8718_v1, %v7859_v54  ;;  %v7860_v25 = vmax.f32 %v5751_v62, 0.0  ;;  %v5755_v8 = vadd.f32 %v5754_v23, %v16267_v21  ;;  %v5145_v20 = vpop.f32.mrf.mxu0  ;;  %6002 = vmatprep.mubr.bf16.mxu1 %v18315_v6 }
 0x527   :  { %v8606_v7 = vmax.f32 %v8605_v4, %v7961_v61  ;;  %v7962_v40 = vmax.f32 %v5144_v50, 0.0  ;;  %v5146_v51 = vadd.f32 %v5145_v20, %v16154_v39  ;;  %v5756_v24 = vpop.f32.mrf.mxu1 }
 0x528   :  { %v8782_v30 = vmax.f32 %v8781_v57, %v7860_v25  ;;  %v7867_v18 = vmax.f32 %v5755_v8, 0.0  ;;  %v5757_v9 = vadd.f32 %v5756_v24, %v16276_v38  ;;  %v5147_v12 = vpop.f32.mrf.mxu0 }
 0x529   :  { %v8669_v3 = vmax.f32 %v8668_v53, %v7962_v40  ;;  %v7969_v14 = vmax.f32 %v5146_v51, 0.0  ;;  %v5148_v1 = vadd.f32 %v5147_v12, %v16161_v0  ;;  %v5758_v16 = vpop.f32.mrf.mxu1 }
 0x52a   :  { %v8720_v19 = vmax.f32 %v8719_v45, %v7867_v18  ;;  %v7868_v15 = vmax.f32 %v5757_v9, 0.0  ;;  %v5759_v54 = vadd.f32 %v5758_v16, %v16267_v21  ;;  %v5151_v62 = vpop.f32.mrf.mxu0  ;;  %5390 = vmatmul.mubr.bf16.gmra.mxu0 %v16188_v49 }
 0x52b   :  { %v8607_v4 = vmax.f32 %v8606_v7, %v7969_v14  ;;  %v7970_v2 = vmax.f32 %v5148_v1, 0.0  ;;  %v5152_v57 = vadd.f32 %v5151_v62, %v16154_v39  ;;  %v5760_v61 = vpop.f32.mrf.mxu1  ;;  %5399 = vmatprep.mubr.bf16.mxu0 %v18315_v6 }
 0x52c   :  { %v8783_v50 = vmax.f32 %v8782_v30, %v7868_v15  ;;  %v7875_v53 = vmax.f32 %v5759_v54, 0.0  ;;  %v5761_v23 = vadd.f32 %v5760_v61, %v16276_v38  ;;  %v5153_v25 = vpop.f32.mrf.mxu0 }
 0x52d   :  { %v8670_v8 = vmax.f32 %v8669_v3, %v7970_v2  ;;  %v7977_v45 = vmax.f32 %v5152_v57, 0.0  ;;  %v5154_v20 = vadd.f32 %v5153_v25, %v16161_v0  ;;  %v5764_v40 = vpop.f32.mrf.mxu1  ;;  %6003 = vmatmul.mubr.bf16.gmra.mxu1 %v16121_v36 }
 0x52e   :  { %v8721_v51 = vmax.f32 %v8720_v19, %v7875_v53  ;;  %v7876_v7 = vmax.f32 %v5761_v23, 0.0  ;;  %v5765_v24 = vadd.f32 %v5764_v40, %v16267_v21  ;;  %v5155_v18 = vpop.f32.mrf.mxu0  ;;  %6012 = vmatprep.mubr.bf16.mxu1 %v18315_v6 }
 0x52f   :  { %v8608_v9 = vmax.f32 %v8607_v4, %v7977_v45  ;;  %v7978_v30 = vmax.f32 %v5154_v20, 0.0  ;;  %v5156_v12 = vadd.f32 %v5155_v18, %v16154_v39  ;;  %v5766_v14 = vpop.f32.mrf.mxu1 }
 0x530   :  { %v8784_v1 = vmax.f32 %v8783_v50, %v7876_v7  ;;  %v7883_v3 = vmax.f32 %v5765_v24, 0.0  ;;  %v5767_v16 = vadd.f32 %v5766_v14, %v16276_v38  ;;  %v5157_v15 = vpop.f32.mrf.mxu0 }
 0x531   :  { %v8671_v54 = vmax.f32 %v8670_v8, %v7978_v30  ;;  %v7985_v62 = vmax.f32 %v5156_v12, 0.0  ;;  %v5158_v19 = vadd.f32 %v5157_v15, %v16161_v0  ;;  %v5768_v2 = vpop.f32.mrf.mxu1 }
 0x532   :  { %v8722_v57 = vmax.f32 %v8721_v51, %v7883_v3  ;;  %v7884_v61 = vmax.f32 %v5767_v16, 0.0  ;;  %v5769_v53 = vadd.f32 %v5768_v2, %v16267_v21  ;;  %v5161_v23 = vpop.f32.mrf.mxu0  ;;  %5400 = vmatmul.mubr.bf16.gmra.mxu0 %v16184_v11 }
 0x533   :  { %v8609_v4 = vmax.f32 %v8608_v9, %v7985_v62  ;;  %v7986_v25 = vmax.f32 %v5158_v19, 0.0  ;;  %v5162_v50 = vadd.f32 %v5161_v23, %v16154_v39  ;;  %v5770_v45 = vpop.f32.mrf.mxu1  ;;  %5409 = vmatprep.mubr.bf16.mxu0 %v18315_v6 }
 0x534   :  { %v8785_v20 = vmax.f32 %v8784_v1, %v7884_v61  ;;  %v7891_v8 = vmax.f32 %v5769_v53, 0.0  ;;  %v5771_v40 = vadd.f32 %v5770_v45, %v16276_v38  ;;  %v5163_v7 = vpop.f32.mrf.mxu0 }
 0x535   :  { %v8672_v24 = vmax.f32 %v8671_v54, %v7986_v25  ;;  %v7993_v51 = vmax.f32 %v5162_v50, 0.0  ;;  %v5164_v18 = vadd.f32 %v5163_v7, %v16161_v0  ;;  %v5774_v30 = vpop.f32.mrf.mxu1  ;;  %6013 = vmatmul.mubr.bf16.gmra.mxu1 %v16112_v63 }
 0x536   :  { %v8723_v12 = vmax.f32 %v8722_v57, %v7891_v8  ;;  %v7892_v9 = vmax.f32 %v5771_v40, 0.0  ;;  %v5775_v14 = vadd.f32 %v5774_v30, %v16267_v21  ;;  %v5165_v3 = vpop.f32.mrf.mxu0  ;;  %6022 = vmatprep.mubr.bf16.mxu1 %v18315_v6 }
 0x537   :  { %v8610_v16 = vmax.f32 %v8609_v4, %v7993_v51  ;;  %v7994_v1 = vmax.f32 %v5164_v18, 0.0  ;;  %v5166_v15 = vadd.f32 %v5165_v3, %v16154_v39  ;;  %v5776_v62 = vpop.f32.mrf.mxu1 }
 0x538   :  { %v8786_v19 = vmax.f32 %v8785_v20, %v7892_v9  ;;  %v7899_v54 = vmax.f32 %v5775_v14, 0.0  ;;  %v5777_v2 = vadd.f32 %v5776_v62, %v16276_v38  ;;  %v5167_v61 = vpop.f32.mrf.mxu0 }
 0x539   :  { %v8673_v53 = vmax.f32 %v8672_v24, %v7994_v1  ;;  %v8001_v23 = vmax.f32 %v5166_v15, 0.0  ;;  %v5168_v57 = vadd.f32 %v5167_v61, %v16161_v0  ;;  %v5778_v25 = vpop.f32.mrf.mxu1 }
 0x53a   :  { %v8724_v50 = vmax.f32 %v8723_v12, %v7899_v54  ;;  %v7900_v45 = vmax.f32 %v5777_v2, 0.0  ;;  %v5779_v8 = vadd.f32 %v5778_v25, %v16267_v21  ;;  %v5171_v40 = vpop.f32.mrf.mxu0  ;;  %5410 = vmatmul.mubr.bf16.gmra.mxu0 %v16204_v26 }
 0x53b   :  { %v8611_v4 = vmax.f32 %v8610_v16, %v8001_v23  ;;  %v8002_v7 = vmax.f32 %v5168_v57, 0.0  ;;  %v5172_v20 = vadd.f32 %v5171_v40, %v16154_v39  ;;  %v5780_v51 = vpop.f32.mrf.mxu1  ;;  %5419 = vmatprep.mubr.bf16.mxu0 %v18315_v6 }
 0x53c   :  { %v8787_v18 = vmax.f32 %v8786_v19, %v7900_v45  ;;  %v7907_v24 = vmax.f32 %v5779_v8, 0.0  ;;  %v5781_v30 = vadd.f32 %v5780_v51, %v16276_v38  ;;  %v5173_v9 = vpop.f32.mrf.mxu0 }
 0x53d   :  { %v8674_v14 = vmax.f32 %v8673_v53, %v8002_v7  ;;  %v8009_v12 = vmax.f32 %v5172_v20, 0.0  ;;  %v5174_v3 = vadd.f32 %v5173_v9, %v16161_v0  ;;  %v5784_v1 = vpop.f32.mrf.mxu1  ;;  %6023 = vmatmul.mubr.bf16.gmra.mxu1 %v16149_v37 }
 0x53e   :  { %v8725_v15 = vmax.f32 %v8724_v50, %v7907_v24  ;;  %v7908_v16 = vmax.f32 %v5781_v30, 0.0  ;;  %v5785_v62 = vadd.f32 %v5784_v1, %v16267_v21  ;;  %v5175_v54 = vpop.f32.mrf.mxu0  ;;  %6032 = vmatprep.mubr.bf16.mxu1 %v18315_v6 }
 0x53f   :  { %v8612_v2 = vmax.f32 %v8611_v4, %v8009_v12  ;;  %v8010_v19 = vmax.f32 %v5174_v3, 0.0  ;;  %v5176_v61 = vadd.f32 %v5175_v54, %v16154_v39  ;;  %v5786_v23 = vpop.f32.mrf.mxu1 }
 0x540   :  { %v8788_v57 = vmax.f32 %v8787_v18, %v7908_v16  ;;  %v7915_v53 = vmax.f32 %v5785_v62, 0.0  ;;  %v5787_v25 = vadd.f32 %v5786_v23, %v16276_v38  ;;  %v5177_v45 = vpop.f32.mrf.mxu0 }
 0x541   :  { %v8675_v8 = vmax.f32 %v8674_v14, %v8010_v19  ;;  %v8017_v40 = vmax.f32 %v5176_v61, 0.0  ;;  %v5178_v50 = vadd.f32 %v5177_v45, %v16161_v0  ;;  %v5788_v7 = vpop.f32.mrf.mxu1 }
 0x542   :  { %v8726_v20 = vmax.f32 %v8725_v15, %v7915_v53  ;;  %v7916_v51 = vmax.f32 %v5787_v25, 0.0  ;;  %v5789_v24 = vadd.f32 %v5788_v7, %v16267_v21  ;;  %v5181_v30 = vpop.f32.mrf.mxu0  ;;  %5420 = vmatmul.mubr.bf16.gmra.mxu0 %v16200_v28 }
 0x543   :  { %v8613_v4 = vmax.f32 %v8612_v2, %v8017_v40  ;;  %v8018_v9 = vmax.f32 %v5178_v50, 0.0  ;;  %v5182_v18 = vadd.f32 %v5181_v30, %v16154_v39  ;;  %v5790_v12 = vpop.f32.mrf.mxu1  ;;  %5429 = vmatprep.mubr.bf16.mxu0 %v18315_v6 }
 0x544   :  { %v8789_v3 = vmax.f32 %v8788_v57, %v7916_v51  ;;  %v7923_v14 = vmax.f32 %v5789_v24, 0.0  ;;  %v5791_v1 = vadd.f32 %v5790_v12, %v16276_v38  ;;  %v5183_v16 = vpop.f32.mrf.mxu0 }
 0x545   :  { %v8676_v62 = vmax.f32 %v8675_v8, %v8018_v9  ;;  %v8025_v15 = vmax.f32 %v5182_v18, 0.0  ;;  %v5184_v54 = vadd.f32 %v5183_v16, %v16161_v0  ;;  %v5794_v19 = vpop.f32.mrf.mxu1  ;;  %6033 = vmatmul.mubr.bf16.gmra.mxu1 %v16143_v47 }
 0x546   :  { %v8727_v61 = vmax.f32 %v8726_v20, %v7923_v14  ;;  %v7924_v2 = vmax.f32 %v5791_v1, 0.0  ;;  %v5795_v23 = vadd.f32 %v5794_v19, %v16267_v21  ;;  %v5185_v53 = vpop.f32.mrf.mxu0  ;;  %6042 = vmatprep.mubr.bf16.mxu1 %v18315_v6 }
 0x547   :  { %v8614_v25 = vmax.f32 %v8613_v4, %v8025_v15  ;;  %v8026_v57 = vmax.f32 %v5184_v54, 0.0  ;;  %v5186_v45 = vadd.f32 %v5185_v53, %v16154_v39  ;;  %v5796_v40 = vpop.f32.mrf.mxu1 }
 0x548   :  { %v8790_v50 = vmax.f32 %v8789_v3, %v7924_v2  ;;  %v7931_v8 = vmax.f32 %v5795_v23, 0.0  ;;  %v5797_v7 = vadd.f32 %v5796_v40, %v16276_v38  ;;  %v5187_v51 = vpop.f32.mrf.mxu0 }
 0x549   :  { %v8677_v24 = vmax.f32 %v8676_v62, %v8026_v57  ;;  %v8033_v30 = vmax.f32 %v5186_v45, 0.0  ;;  %v5188_v20 = vadd.f32 %v5187_v51, %v16161_v0  ;;  %v5798_v9 = vpop.f32.mrf.mxu1 }
 0x54a   :  { %v8728_v18 = vmax.f32 %v8727_v61, %v7931_v8  ;;  %v7932_v12 = vmax.f32 %v5797_v7, 0.0  ;;  %v5799_v14 = vadd.f32 %v5798_v9, %v16267_v21  ;;  %v5191_v1 = vpop.f32.mrf.mxu0  ;;  %5430 = vmatmul.mubr.bf16.gmra.mxu0 %v16220_v22 }
 0x54b   :  { %v16623_v4 = vmax.f32 %v8614_v25, %v8033_v30  ;;  %v8034_v16 = vmax.f32 %v5188_v20, 0.0  ;;  %v5800_v3 = vpop.f32.mrf.mxu1  ;;  %5439 = vmatprep.mubr.bf16.mxu0 %v18315_v6  ;;  %v5192_v61 = vadd.f32 %v5191_v1, %v16154_v39 }
 0x54c   :  { %v8791_v15 = vmax.f32 %v8790_v50, %v7932_v12  ;;  %v7939_v54 = vmax.f32 %v5799_v14, 0.0  ;;  %v5801_v62 = vadd.f32 %v5800_v3, %v16276_v38  ;;  %v5193_v19 = vpop.f32.mrf.mxu0 }
 0x54d   :  { %v16627_v2 = vmax.f32 %v8677_v24, %v8034_v16  ;;  %v5804_v23 = vpop.f32.mrf.mxu1  ;;  %6043 = vmatmul.mubr.bf16.gmra.mxu1 %v16172_v31  ;;  %v5194_v40 = vadd.f32 %v5193_v19, %v16161_v0  ;;  %v8041_v20 = vmax.f32 %v5192_v61, 0.0 }
 0x54e   :  { %v8729_v53 = vmax.f32 %v8728_v18, %v7939_v54  ;;  %v7940_v57 = vmax.f32 %v5801_v62, 0.0  ;;  %v5805_v25 = vadd.f32 %v5804_v23, %v16267_v21  ;;  %v5195_v45 = vpop.f32.mrf.mxu0  ;;  %6052 = vmatprep.mubr.bf16.mxu1 %v18315_v6 }
 0x54f   :  { %v5196_v50 = vadd.f32 %v5195_v45, %v16154_v39  ;;  %v5806_v8 = vpop.f32.mrf.mxu1  ;;  %v8042_v54 = vmax.f32 %v5194_v40, 0.0 }
 0x550   :  { %v8792_v7 = vmax.f32 %v8791_v15, %v7940_v57  ;;  %v7947_v51 = vmax.f32 %v5805_v25, 0.0  ;;  %v5807_v24 = vadd.f32 %v5806_v8, %v16276_v38  ;;  %v5197_v30 = vpop.f32.mrf.mxu0 }
 0x551   :  { %v8049_v9 = vmax.f32 %v5196_v50, 0.0  ;;  %v5198_v18 = vadd.f32 %v5197_v30, %v16161_v0  ;;  %v5808_v12 = vpop.f32.mrf.mxu1 }
 0x552   :  { %v8730_v14 = vmax.f32 %v8729_v53, %v7947_v51  ;;  %v7948_v1 = vmax.f32 %v5807_v24, 0.0  ;;  %v5809_v16 = vadd.f32 %v5808_v12, %v16267_v21  ;;  %v5201_v3 = vpop.f32.mrf.mxu0  ;;  %5440 = vmatmul.mubr.bf16.gmra.mxu0 %v16216_v46 }
 0x553   :  { %v9081_v62 = vmax.f32 %v8041_v20, %v8049_v9  ;;  %v8050_v19 = vmax.f32 %v5198_v18, 0.0  ;;  %v5810_v15 = vpop.f32.mrf.mxu1  ;;  %5449 = vmatprep.mubr.bf16.mxu0 %v18315_v6  ;;  %v5202_v61 = vadd.f32 %v5201_v3, %v16154_v39 }
 0x554   :  { %v8793_v23 = vmax.f32 %v8792_v7, %v7948_v1  ;;  %v7955_v57 = vmax.f32 %v5809_v16, 0.0  ;;  %v5811_v25 = vadd.f32 %v5810_v15, %v16276_v38  ;;  %v5203_v45 = vpop.f32.mrf.mxu0 }
 0x555   :  { %v9144_v53 = vmax.f32 %v8042_v54, %v8050_v19  ;;  %v5204_v50 = vadd.f32 %v5203_v45, %v16161_v0  ;;  %v5814_v8 = vpop.f32.mrf.mxu1  ;;  %6053 = vmatmul.mubr.bf16.gmra.mxu1 %v16167_v33  ;;  %v8057_v40 = vmax.f32 %v5202_v61, 0.0 }
 0x556   :  { %v8731_v51 = vmax.f32 %v8730_v14, %v7955_v57  ;;  %v7956_v24 = vmax.f32 %v5811_v25, 0.0  ;;  %v5815_v30 = vadd.f32 %v5814_v8, %v16267_v21  ;;  %v5205_v20 = vpop.f32.mrf.mxu0  ;;  %6062 = vmatprep.mubr.bf16.mxu1 %v18315_v6 }
 0x557   :  { %v8058_v7 = vmax.f32 %v5204_v50, 0.0  ;;  %v5206_v9 = vadd.f32 %v5205_v20, %v16154_v39  ;;  %v5816_v18 = vpop.f32.mrf.mxu1  ;;  %v9082_v12 = vmax.f32 %v9081_v62, %v8057_v40 }
 0x558   :  { %v8794_v1 = vmax.f32 %v8793_v23, %v7956_v24  ;;  %v7963_v16 = vmax.f32 %v5815_v30, 0.0  ;;  %v5817_v3 = vadd.f32 %v5816_v18, %v16276_v38  ;;  %v5207_v54 = vpop.f32.mrf.mxu0 }
 0x559   :  { %v9145_v19 = vmax.f32 %v9144_v53, %v8058_v7  ;;  %v8065_v15 = vmax.f32 %v5206_v9, 0.0  ;;  %v5208_v14 = vadd.f32 %v5207_v54, %v16161_v0  ;;  %v5818_v57 = vpop.f32.mrf.mxu1 }
 0x55a   :  { %v8732_v61 = vmax.f32 %v8731_v51, %v7963_v16  ;;  %v7964_v25 = vmax.f32 %v5817_v3, 0.0  ;;  %v5819_v45 = vadd.f32 %v5818_v57, %v16267_v21  ;;  %v5211_v8 = vpop.f32.mrf.mxu0  ;;  %5450 = vmatmul.mubr.bf16.gmra.mxu0 %v16236_v42 }
 0x55b   :  { %v9083_v50 = vmax.f32 %v9082_v12, %v8065_v15  ;;  %v8066_v20 = vmax.f32 %v5208_v14, 0.0  ;;  %v5212_v62 = vadd.f32 %v5211_v8, %v16154_v39  ;;  %v5820_v23 = vpop.f32.mrf.mxu1  ;;  %5459 = vmatprep.mubr.bf16.mxu0 %v18315_v6 }
 0x55c   :  { %v8795_v40 = vmax.f32 %v8794_v1, %v7964_v25  ;;  %v7971_v53 = vmax.f32 %v5819_v45, 0.0  ;;  %v5821_v24 = vadd.f32 %v5820_v23, %v16276_v38  ;;  %v5213_v30 = vpop.f32.mrf.mxu0 }
 0x55d   :  { %v9146_v7 = vmax.f32 %v9145_v19, %v8066_v20  ;;  %v8073_v51 = vmax.f32 %v5212_v62, 0.0  ;;  %v5214_v9 = vadd.f32 %v5213_v30, %v16161_v0  ;;  %v5824_v18 = vpop.f32.mrf.mxu1  ;;  %6063 = vmatmul.mubr.bf16.gmra.mxu1 %v16188_v49 }
 0x55e   :  { %v8733_v16 = vmax.f32 %v8732_v61, %v7971_v53  ;;  %v7972_v12 = vmax.f32 %v5821_v24, 0.0  ;;  %v5825_v3 = vadd.f32 %v5824_v18, %v16267_v21  ;;  %v5215_v54 = vpop.f32.mrf.mxu0  ;;  %6072 = vmatprep.mubr.bf16.mxu1 %v18315_v6 }
 0x55f   :  { %v9084_v15 = vmax.f32 %v9083_v50, %v8073_v51  ;;  %v8074_v1 = vmax.f32 %v5214_v9, 0.0  ;;  %v5216_v14 = vadd.f32 %v5215_v54, %v16154_v39  ;;  %v5826_v57 = vpop.f32.mrf.mxu1  ;;  %v18335_v50 = vld [vmem:[#allocation63_spill] sm:$0xff] }
 0x560   :  { %v8796_v25 = vmax.f32 %v8795_v40, %v7972_v12  ;;  %v7979_v19 = vmax.f32 %v5825_v3, 0.0  ;;  %v5827_v45 = vadd.f32 %v5826_v57, %v16276_v38  ;;  %v5217_v8 = vpop.f32.mrf.mxu0 }
 0x561   :  { %v9147_v20 = vmax.f32 %v9146_v7, %v8074_v1  ;;  %v8081_v62 = vmax.f32 %v5216_v14, 0.0  ;;  %v5218_v61 = vadd.f32 %v5217_v8, %v16161_v0  ;;  %v5828_v23 = vpop.f32.mrf.mxu1 }
 0x562   :  { %v8734_v53 = vmax.f32 %v8733_v16, %v7979_v19  ;;  %v7980_v24 = vmax.f32 %v5827_v45, 0.0  ;;  %v5829_v30 = vadd.f32 %v5828_v23, %v16267_v21  ;;  %v5221_v18 = vpop.f32.mrf.mxu0  ;;  %5460 = vmatmul.mubr.bf16.gmra.mxu0 %v18335_v50 }
 0x563   :  { %v9085_v51 = vmax.f32 %v9084_v15, %v8081_v62  ;;  %v8082_v9 = vmax.f32 %v5218_v61, 0.0  ;;  %v5222_v40 = vadd.f32 %v5221_v18, %v16154_v39  ;;  %v5830_v12 = vpop.f32.mrf.mxu1  ;;  %5469 = vmatprep.mubr.bf16.mxu0 %v18315_v6 }
 0x564   :  { %v8797_v3 = vmax.f32 %v8796_v25, %v7980_v24  ;;  %v7987_v7 = vmax.f32 %v5829_v30, 0.0  ;;  %v5831_v54 = vadd.f32 %v5830_v12, %v16276_v38  ;;  %v5223_v1 = vpop.f32.mrf.mxu0 }
 0x565   :  { %v9148_v14 = vmax.f32 %v9147_v20, %v8082_v9  ;;  %v8089_v16 = vmax.f32 %v5222_v40, 0.0  ;;  %v5224_v57 = vadd.f32 %v5223_v1, %v16161_v0  ;;  %v5834_v19 = vpop.f32.mrf.mxu1  ;;  %6073 = vmatmul.mubr.bf16.gmra.mxu1 %v16184_v11 }
 0x566   :  { %v8735_v45 = vmax.f32 %v8734_v53, %v7987_v7  ;;  %v7988_v15 = vmax.f32 %v5831_v54, 0.0  ;;  %v5835_v8 = vadd.f32 %v5834_v19, %v16267_v21  ;;  %v5225_v62 = vpop.f32.mrf.mxu0  ;;  %6082 = vmatprep.mubr.bf16.mxu1 %v18315_v6 }
 0x567   :  { %v9086_v61 = vmax.f32 %v9085_v51, %v8089_v16  ;;  %v8090_v25 = vmax.f32 %v5224_v57, 0.0  ;;  %v5226_v23 = vadd.f32 %v5225_v62, %v16154_v39  ;;  %v5836_v24 = vpop.f32.mrf.mxu1  ;;  %v18336_v51 = vld [vmem:[#allocation66_spill] sm:$0xff] }
 0x568   :  { %v8798_v30 = vmax.f32 %v8797_v3, %v7988_v15  ;;  %v7995_v20 = vmax.f32 %v5835_v8, 0.0  ;;  %v5837_v18 = vadd.f32 %v5836_v24, %v16276_v38  ;;  %v5227_v9 = vpop.f32.mrf.mxu0 }
 0x569   :  { %v9149_v40 = vmax.f32 %v9148_v14, %v8090_v25  ;;  %v8097_v12 = vmax.f32 %v5226_v23, 0.0  ;;  %v5228_v53 = vadd.f32 %v5227_v9, %v16161_v0  ;;  %v5838_v7 = vpop.f32.mrf.mxu1 }
 0x56a   :  { %v8736_v54 = vmax.f32 %v8735_v45, %v7995_v20  ;;  %v7996_v1 = vmax.f32 %v5837_v18, 0.0  ;;  %v5839_v19 = vadd.f32 %v5838_v7, %v16267_v21  ;;  %v5231_v11 = vpop.f32.mrf.mxu0  ;;  %5470 = vmatmul.mubr.bf16.gmra.mxu0 %v18336_v51 }
 0x56b   :  { %v9087_v16 = vmax.f32 %v9086_v61, %v8097_v12  ;;  %v8098_v57 = vmax.f32 %v5228_v53, 0.0  ;;  %v5232_v3 = vadd.f32 %v5231_v11, %v16154_v39  ;;  %v5840_v15 = vpop.f32.mrf.mxu1  ;;  %5479 = vmatprep.mubr.bf16.mxu0 %v18315_v6 }
 0x56c   :  { %v8799_v8 = vmax.f32 %v8798_v30, %v7996_v1  ;;  %v8003_v14 = vmax.f32 %v5839_v19, 0.0  ;;  %v5841_v62 = vadd.f32 %v5840_v15, %v16276_v38  ;;  %v5233_v25 = vpop.f32.mrf.mxu0 }
 0x56d   :  { %v9150_v23 = vmax.f32 %v9149_v40, %v8098_v57  ;;  %v8105_v45 = vmax.f32 %v5232_v3, 0.0  ;;  %v5234_v24 = vadd.f32 %v5233_v25, %v16161_v0  ;;  %v5844_v20 = vpop.f32.mrf.mxu1  ;;  %6083 = vmatmul.mubr.bf16.gmra.mxu1 %v16204_v26 }
 0x56e   :  { %v8737_v18 = vmax.f32 %v8736_v54, %v8003_v14  ;;  %v8004_v61 = vmax.f32 %v5841_v62, 0.0  ;;  %v5845_v9 = vadd.f32 %v5844_v20, %v16267_v21  ;;  %v5235_v11 = vpop.f32.mrf.mxu0  ;;  %6092 = vmatprep.mubr.bf16.mxu1 %v18315_v6 }
 0x56f   :  { %v9088_v12 = vmax.f32 %v9087_v16, %v8105_v45  ;;  %v8106_v30 = vmax.f32 %v5234_v24, 0.0  ;;  %v5236_v53 = vadd.f32 %v5235_v11, %v16154_v39  ;;  %v5846_v7 = vpop.f32.mrf.mxu1  ;;  %v18337_v16 = vld [vmem:[#allocation65_spill] sm:$0xff] }
 0x570   :  { %v8800_v1 = vmax.f32 %v8799_v8, %v8004_v61  ;;  %v8011_v40 = vmax.f32 %v5845_v9, 0.0  ;;  %v5847_v19 = vadd.f32 %v5846_v7, %v16276_v38  ;;  %v5237_v57 = vpop.f32.mrf.mxu0 }
 0x571   :  { %v9151_v3 = vmax.f32 %v9150_v23, %v8106_v30  ;;  %v8113_v15 = vmax.f32 %v5236_v53, 0.0  ;;  %v5238_v54 = vadd.f32 %v5237_v57, %v16161_v0  ;;  %v5848_v14 = vpop.f32.mrf.mxu1 }
 0x572   :  { %v8738_v62 = vmax.f32 %v8737_v18, %v8011_v40  ;;  %v8012_v25 = vmax.f32 %v5847_v19, 0.0  ;;  %v5849_v20 = vadd.f32 %v5848_v14, %v16267_v21  ;;  %v5241_v26 = vpop.f32.mrf.mxu0  ;;  %5480 = vmatmul.mubr.bf16.gmra.mxu0 %v18337_v16 }
 0x573   :  { %v9089_v45 = vmax.f32 %v9088_v12, %v8113_v15  ;;  %v8114_v24 = vmax.f32 %v5238_v54, 0.0  ;;  %v5242_v8 = vadd.f32 %v5241_v26, %v16154_v39  ;;  %v5850_v61 = vpop.f32.mrf.mxu1  ;;  %5489 = vmatprep.mubr.bf16.mxu0 %v18315_v6 }
 0x574   :  { %v8801_v9 = vmax.f32 %v8800_v1, %v8012_v25  ;;  %v8019_v23 = vmax.f32 %v5849_v20, 0.0  ;;  %v5851_v11 = vadd.f32 %v5850_v61, %v16276_v38  ;;  %v5243_v30 = vpop.f32.mrf.mxu0 }
 0x575   :  { %v9152_v53 = vmax.f32 %v9151_v3, %v8114_v24  ;;  %v8121_v18 = vmax.f32 %v5242_v8, 0.0  ;;  %v5244_v7 = vadd.f32 %v5243_v30, %v16161_v0  ;;  %v5854_v40 = vpop.f32.mrf.mxu1  ;;  %6093 = vmatmul.mubr.bf16.gmra.mxu1 %v16200_v28 }
 0x576   :  { %v8739_v19 = vmax.f32 %v8738_v62, %v8019_v23  ;;  %v8020_v12 = vmax.f32 %v5851_v11, 0.0  ;;  %v5855_v57 = vadd.f32 %v5854_v40, %v16267_v21  ;;  %v5245_v26 = vpop.f32.mrf.mxu0  ;;  %6102 = vmatprep.mubr.bf16.mxu1 %v18315_v6 }
 0x577   :  { %v9090_v15 = vmax.f32 %v9089_v45, %v8121_v18  ;;  %v8122_v1 = vmax.f32 %v5244_v7, 0.0  ;;  %v5246_v54 = vadd.f32 %v5245_v26, %v16154_v39  ;;  %v5856_v14 = vpop.f32.mrf.mxu1  ;;  %v18338_v45 = vld [vmem:[#allocation68_spill] sm:$0xff] }
 0x578   :  { %v8802_v25 = vmax.f32 %v8801_v9, %v8020_v12  ;;  %v8027_v3 = vmax.f32 %v5855_v57, 0.0  ;;  %v5857_v20 = vadd.f32 %v5856_v14, %v16276_v38  ;;  %v5247_v24 = vpop.f32.mrf.mxu0 }
 0x579   :  { %v9153_v8 = vmax.f32 %v9152_v53, %v8122_v1  ;;  %v8129_v61 = vmax.f32 %v5246_v54, 0.0  ;;  %v5248_v62 = vadd.f32 %v5247_v24, %v16161_v0  ;;  %v5858_v23 = vpop.f32.mrf.mxu1 }
 0x57a   :  { %v8740_v11 = vmax.f32 %v8739_v19, %v8027_v3  ;;  %v8028_v30 = vmax.f32 %v5857_v20, 0.0  ;;  %v5859_v40 = vadd.f32 %v5858_v23, %v16267_v21  ;;  %v5251_v28 = vpop.f32.mrf.mxu0  ;;  %5490 = vmatmul.mubr.bf16.gmra.mxu0 %v18338_v45 }
 0x57b   :  { %v9091_v18 = vmax.f32 %v9090_v15, %v8129_v61  ;;  %v8130_v7 = vmax.f32 %v5248_v62, 0.0  ;;  %v5252_v9 = vadd.f32 %v5251_v28, %v16154_v39  ;;  %v5860_v12 = vpop.f32.mrf.mxu1  ;;  %5499 = vmatprep.mubr.bf16.mxu0 %v18315_v6 }
 0x57c   :  { %v8803_v57 = vmax.f32 %v8802_v25, %v8028_v30  ;;  %v8035_v53 = vmax.f32 %v5859_v40, 0.0  ;;  %v5861_v26 = vadd.f32 %v5860_v12, %v16276_v38  ;;  %v5253_v1 = vpop.f32.mrf.mxu0 }
 0x57d   :  { %v9154_v54 = vmax.f32 %v9153_v8, %v8130_v7  ;;  %v8137_v19 = vmax.f32 %v5252_v9, 0.0  ;;  %v5254_v14 = vadd.f32 %v5253_v1, %v16161_v0  ;;  %v5864_v3 = vpop.f32.mrf.mxu1  ;;  %6103 = vmatmul.mubr.bf16.gmra.mxu1 %v16220_v22 }
 0x57e   :  { %v16704_v20 = vmax.f32 %v8740_v11, %v8035_v53  ;;  %v8036_v15 = vmax.f32 %v5861_v26, 0.0  ;;  %v5255_v24 = vpop.f32.mrf.mxu0  ;;  %6112 = vmatprep.mubr.bf16.mxu1 %v18315_v6  ;;  %v5865_v8 = vadd.f32 %v5864_v3, %v16267_v21 }
 0x57f   :  { %v9092_v28 = vmax.f32 %v9091_v18, %v8137_v19  ;;  %v8138_v61 = vmax.f32 %v5254_v14, 0.0  ;;  %v5256_v25 = vadd.f32 %v5255_v24, %v16154_v39  ;;  %v5866_v62 = vpop.f32.mrf.mxu1  ;;  %v18339_v18 = vld [vmem:[#allocation67_spill] sm:$0xff] }
 0x580   :  { %v16708_v23 = vmax.f32 %v8803_v57, %v8036_v15  ;;  %v5257_v30 = vpop.f32.mrf.mxu0  ;;  %v5867_v12 = vadd.f32 %v5866_v62, %v16276_v38  ;;  %v8043_v3 = vmax.f32 %v5865_v8, 0.0 }
 0x581   :  { %v9155_v40 = vmax.f32 %v9154_v54, %v8138_v61  ;;  %v8145_v7 = vmax.f32 %v5256_v25, 0.0  ;;  %v5258_v9 = vadd.f32 %v5257_v30, %v16161_v0  ;;  %v5868_v11 = vpop.f32.mrf.mxu1 }
 0x582   :  { %v5869_v53 = vadd.f32 %v5868_v11, %v16267_v21  ;;  %v5261_v26 = vpop.f32.mrf.mxu0  ;;  %5500 = vmatmul.mubr.bf16.gmra.mxu0 %v18339_v18  ;;  %v8044_v11 = vmax.f32 %v5867_v12, 0.0 }
 0x583   :  { %v9093_v1 = vmax.f32 %v9092_v28, %v8145_v7  ;;  %v8146_v19 = vmax.f32 %v5258_v9, 0.0  ;;  %v5262_v57 = vadd.f32 %v5261_v26, %v16154_v39  ;;  %v5870_v14 = vpop.f32.mrf.mxu1  ;;  %6215 = vmatprep.mubr.bf16.mxu0 %v18315_v6 }
 0x584   :  { %v8051_v54 = vmax.f32 %v5869_v53, 0.0  ;;  %v5871_v15 = vadd.f32 %v5870_v14, %v16276_v38  ;;  %v5263_v24 = vpop.f32.mrf.mxu0 }
 0x585   :  { %v9156_v61 = vmax.f32 %v9155_v40, %v8146_v19  ;;  %v8153_v25 = vmax.f32 %v5262_v57, 0.0  ;;  %v5264_v62 = vadd.f32 %v5263_v24, %v16161_v0  ;;  %v5874_v30 = vpop.f32.mrf.mxu1  ;;  %6113 = vmatmul.mubr.bf16.gmra.mxu1 %v16216_v46 }
 0x586   :  { %v9207_v28 = vmax.f32 %v8043_v3, %v8051_v54  ;;  %v8052_v7 = vmax.f32 %v5871_v15, 0.0  ;;  %v5265_v9 = vpop.f32.mrf.mxu0  ;;  %6122 = vmatprep.mubr.bf16.mxu1 %v18315_v6  ;;  %v5875_v8 = vadd.f32 %v5874_v30, %v16267_v21 }
 0x587   :  { %v9094_v26 = vmax.f32 %v9093_v1, %v8153_v25  ;;  %v8154_v22 = vmax.f32 %v5264_v62, 0.0  ;;  %v5266_v53 = vadd.f32 %v5265_v9, %v16154_v39  ;;  %v5876_v14 = vpop.f32.mrf.mxu1  ;;  %v18340_v25 = vld [vmem:[#allocation20_spill] sm:$0xff] }
 0x588   :  { %v9270_v40 = vmax.f32 %v8044_v11, %v8052_v7  ;;  %v5877_v19 = vadd.f32 %v5876_v14, %v16276_v38  ;;  %v5267_v57 = vpop.f32.mrf.mxu0  ;;  %v8059_v49 = vmax.f32 %v5875_v8, 0.0 }
 0x589   :  { %v9157_v24 = vmax.f32 %v9156_v61, %v8154_v22  ;;  %v8161_v46 = vmax.f32 %v5266_v53, 0.0  ;;  %v5268_v12 = vadd.f32 %v5267_v57, %v16161_v0  ;;  %v5878_v3 = vpop.f32.mrf.mxu1 }
 0x58a   :  { %v8060_v54 = vmax.f32 %v5877_v19, 0.0  ;;  %v5879_v15 = vadd.f32 %v5878_v3, %v16267_v21  ;;  %v5271_v1 = vpop.f32.mrf.mxu0  ;;  %6216 = vmatmul.mubr.bf16.vlgmr.msra.gmra.mxu0 %v18340_v25  ;;  %v9208_v62 = vmax.f32 %v9207_v28, %v8059_v49 }
 0x58b   :  { %v9095_v30 = vmax.f32 %v9094_v26, %v8161_v46  ;;  %v8162_v9 = vmax.f32 %v5268_v12, 0.0  ;;  %v5272_v11 = vadd.f32 %v5271_v1, %v16154_v39  ;;  %v5880_v7 = vpop.f32.mrf.mxu1  ;;  %6225 = vmatprep.mubr.bf16.mxu0 %v18315_v6 }
 0x58c   :  { %v9271_v22 = vmax.f32 %v9270_v40, %v8060_v54  ;;  %v8067_v61 = vmax.f32 %v5879_v15, 0.0  ;;  %v5881_v8 = vadd.f32 %v5880_v7, %v16276_v38  ;;  %v5273_v53 = vpop.f32.mrf.mxu0 }
 0x58d   :  { %v9158_v14 = vmax.f32 %v9157_v24, %v8162_v9  ;;  %v8169_v19 = vmax.f32 %v5272_v11, 0.0  ;;  %v5274_v57 = vadd.f32 %v5273_v53, %v16161_v0  ;;  %v5884_v3 = vpop.f32.mrf.mxu1  ;;  %6123 = vmatmul.mubr.bf16.gmra.mxu1 %v16236_v42 }
 0x58e   :  { %v9209_v49 = vmax.f32 %v9208_v62, %v8067_v61  ;;  %v8068_v46 = vmax.f32 %v5881_v8, 0.0  ;;  %v5885_v28 = vadd.f32 %v5884_v3, %v16267_v21  ;;  %v5275_v26 = vpop.f32.mrf.mxu0  ;;  %6132 = vmatprep.mubr.bf16.mxu1 %v18315_v6 }
 0x58f   :  { %v9096_v12 = vmax.f32 %v9095_v30, %v8169_v19  ;;  %v8170_v40 = vmax.f32 %v5274_v57, 0.0  ;;  %v5276_v54 = vadd.f32 %v5275_v26, %v16154_v39  ;;  %v5886_v15 = vpop.f32.mrf.mxu1  ;;  %v18341_v30 = vld [vmem:[#allocation21_spill] sm:$0xff] }
 0x590   :  { %v9272_v1 = vmax.f32 %v9271_v22, %v8068_v46  ;;  %v8075_v24 = vmax.f32 %v5885_v28, 0.0  ;;  %v5887_v9 = vadd.f32 %v5886_v15, %v16276_v38  ;;  %v5277_v11 = vpop.f32.mrf.mxu0 }
 0x591   :  { %v9159_v7 = vmax.f32 %v9158_v14, %v8170_v40  ;;  %v8177_v53 = vmax.f32 %v5276_v54, 0.0  ;;  %v5278_v62 = vadd.f32 %v5277_v11, %v16161_v0  ;;  %v5888_v61 = vpop.f32.mrf.mxu1 }
 0x592   :  { %v9210_v8 = vmax.f32 %v9209_v49, %v8075_v24  ;;  %v8076_v3 = vmax.f32 %v5887_v9, 0.0  ;;  %v5889_v42 = vadd.f32 %v5888_v61, %v16267_v21  ;;  %v5281_v33 = vpop.f32.mrf.mxu0  ;;  %6226 = vmatmul.mubr.bf16.gmra.mxu0 %v18341_v30 }
 0x593   :  { %v9097_v19 = vmax.f32 %v9096_v12, %v8177_v53  ;;  %v8178_v57 = vmax.f32 %v5278_v62, 0.0  ;;  %v5282_v22 = vadd.f32 %v5281_v33, %v16154_v39  ;;  %v5890_v46 = vpop.f32.mrf.mxu1  ;;  %6235 = vmatprep.mubr.bf16.mxu0 %v18315_v6 }
 0x594   :  { %v9273_v28 = vmax.f32 %v9272_v1, %v8076_v3  ;;  %v8083_v14 = vmax.f32 %v5889_v42, 0.0  ;;  %v5891_v26 = vadd.f32 %v5890_v46, %v16276_v38  ;;  %v5283_v40 = vpop.f32.mrf.mxu0 }
 0x595   :  { %v9160_v54 = vmax.f32 %v9159_v7, %v8178_v57  ;;  %v8185_v49 = vmax.f32 %v5282_v22, 0.0  ;;  %v5284_v15 = vadd.f32 %v5283_v40, %v16161_v0  ;;  %v5894_v24 = vpop.f32.mrf.mxu1  ;;  %6133 = vmatmul.mubr.bf16.gmra.mxu1 %v18335_v50 }
 0x596   :  { %v9211_v9 = vmax.f32 %v9210_v8, %v8083_v14  ;;  %v8084_v12 = vmax.f32 %v5891_v26, 0.0  ;;  %v5895_v11 = vadd.f32 %v5894_v24, %v16267_v21  ;;  %v5285_v33 = vpop.f32.mrf.mxu0  ;;  %6142 = vmatprep.mubr.bf16.mxu1 %v18315_v6 }
 0x597   :  { %v9098_v53 = vmax.f32 %v9097_v19, %v8185_v49  ;;  %v8186_v1 = vmax.f32 %v5284_v15, 0.0  ;;  %v5286_v42 = vadd.f32 %v5285_v33, %v16154_v39  ;;  %v5896_v62 = vpop.f32.mrf.mxu1  ;;  %v18342_v19 = vld [vmem:[#allocation22_spill] sm:$0xff] }
 0x598   :  { %v9274_v61 = vmax.f32 %v9273_v28, %v8084_v12  ;;  %v8091_v7 = vmax.f32 %v5895_v11, 0.0  ;;  %v5897_v3 = vadd.f32 %v5896_v62, %v16276_v38  ;;  %v5287_v57 = vpop.f32.mrf.mxu0 }
 0x599   :  { %v9161_v22 = vmax.f32 %v9160_v54, %v8186_v1  ;;  %v8193_v46 = vmax.f32 %v5286_v42, 0.0  ;;  %v5288_v8 = vadd.f32 %v5287_v57, %v16161_v0  ;;  %v5898_v14 = vpop.f32.mrf.mxu1 }
 0x59a   :  { %v9212_v26 = vmax.f32 %v9211_v9, %v8091_v7  ;;  %v8092_v40 = vmax.f32 %v5897_v3, 0.0  ;;  %v5899_v24 = vadd.f32 %v5898_v14, %v16267_v21  ;;  %v5291_v50 = vpop.f32.mrf.mxu0  ;;  %6236 = vmatmul.mubr.bf16.gmra.mxu0 %v18342_v19 }
 0x59b   :  { %v9099_v49 = vmax.f32 %v9098_v53, %v8193_v46  ;;  %v8194_v15 = vmax.f32 %v5288_v8, 0.0  ;;  %v5292_v28 = vadd.f32 %v5291_v50, %v16154_v39  ;;  %v5900_v12 = vpop.f32.mrf.mxu1  ;;  %6245 = vmatprep.mubr.bf16.mxu0 %v18315_v6 }
 0x59c   :  { %v9275_v11 = vmax.f32 %v9274_v61, %v8092_v40  ;;  %v8099_v54 = vmax.f32 %v5899_v24, 0.0  ;;  %v5901_v33 = vadd.f32 %v5900_v12, %v16276_v38  ;;  %v5293_v1 = vpop.f32.mrf.mxu0 }
 0x59d   :  { %v9162_v42 = vmax.f32 %v9161_v22, %v8194_v15  ;;  %v8201_v9 = vmax.f32 %v5292_v28, 0.0  ;;  %v5294_v62 = vadd.f32 %v5293_v1, %v16161_v0  ;;  %v5904_v7 = vpop.f32.mrf.mxu1  ;;  %6143 = vmatmul.mubr.bf16.gmra.mxu1 %v18336_v51 }
 0x59e   :  { %v9213_v3 = vmax.f32 %v9212_v26, %v8099_v54  ;;  %v8100_v53 = vmax.f32 %v5901_v33, 0.0  ;;  %v5905_v57 = vadd.f32 %v5904_v7, %v16267_v21  ;;  %v5295_v50 = vpop.f32.mrf.mxu0  ;;  %6152 = vmatprep.mubr.bf16.mxu1 %v18315_v6 }
 0x59f   :  { %v9100_v46 = vmax.f32 %v9099_v49, %v8201_v9  ;;  %v8202_v61 = vmax.f32 %v5294_v62, 0.0  ;;  %v5296_v8 = vadd.f32 %v5295_v50, %v16154_v39  ;;  %v5906_v14 = vpop.f32.mrf.mxu1  ;;  %v18343_v49 = vld [vmem:[#allocation23_spill] sm:$0xff] }
 0x5a0   :  { %v9276_v40 = vmax.f32 %v9275_v11, %v8100_v53  ;;  %v8107_v22 = vmax.f32 %v5905_v57, 0.0  ;;  %v5907_v24 = vadd.f32 %v5906_v14, %v16276_v38  ;;  %v5297_v15 = vpop.f32.mrf.mxu0 }
 0x5a1   :  { %v9163_v28 = vmax.f32 %v9162_v42, %v8202_v61  ;;  %v8209_v12 = vmax.f32 %v5296_v8, 0.0  ;;  %v5298_v26 = vadd.f32 %v5297_v15, %v16161_v0  ;;  %v5908_v54 = vpop.f32.mrf.mxu1 }
 0x5a2   :  { %v9214_v33 = vmax.f32 %v9213_v3, %v8107_v22  ;;  %v8108_v1 = vmax.f32 %v5907_v24, 0.0  ;;  %v5909_v7 = vadd.f32 %v5908_v54, %v16267_v21  ;;  %v5301_v51 = vpop.f32.mrf.mxu0  ;;  %6246 = vmatmul.mubr.bf16.gmra.mxu0 %v18343_v49 }
 0x5a3   :  { %v9101_v9 = vmax.f32 %v9100_v46, %v8209_v12  ;;  %v8210_v62 = vmax.f32 %v5298_v26, 0.0  ;;  %v5302_v11 = vadd.f32 %v5301_v51, %v16154_v39  ;;  %v5910_v53 = vpop.f32.mrf.mxu1  ;;  %6255 = vmatprep.mubr.bf16.mxu0 %v18315_v6 }
 0x5a4   :  { %v9277_v57 = vmax.f32 %v9276_v40, %v8108_v1  ;;  %v8115_v42 = vmax.f32 %v5909_v7, 0.0  ;;  %v5911_v50 = vadd.f32 %v5910_v53, %v16276_v38  ;;  %v5303_v61 = vpop.f32.mrf.mxu0 }
 0x5a5   :  { %v9164_v8 = vmax.f32 %v9163_v28, %v8210_v62  ;;  %v8217_v3 = vmax.f32 %v5302_v11, 0.0  ;;  %v5304_v14 = vadd.f32 %v5303_v61, %v16161_v0  ;;  %v5914_v22 = vpop.f32.mrf.mxu1  ;;  %6153 = vmatmul.mubr.bf16.gmra.mxu1 %v18337_v16 }
 0x5a6   :  { %v9215_v24 = vmax.f32 %v9214_v33, %v8115_v42  ;;  %v8116_v46 = vmax.f32 %v5911_v50, 0.0  ;;  %v5915_v15 = vadd.f32 %v5914_v22, %v16267_v21  ;;  %v5305_v51 = vpop.f32.mrf.mxu0  ;;  %6162 = vmatprep.mubr.bf16.mxu1 %v18315_v6 }
 0x5a7   :  { %v9102_v12 = vmax.f32 %v9101_v9, %v8217_v3  ;;  %v8218_v40 = vmax.f32 %v5304_v14, 0.0  ;;  %v5306_v26 = vadd.f32 %v5305_v51, %v16154_v39  ;;  %v5916_v54 = vpop.f32.mrf.mxu1  ;;  %v18344_v9 = vld [vmem:[#allocation24_spill] sm:$0xff] }
 0x5a8   :  { %v9278_v1 = vmax.f32 %v9277_v57, %v8116_v46  ;;  %v8123_v28 = vmax.f32 %v5915_v15, 0.0  ;;  %v5917_v7 = vadd.f32 %v5916_v54, %v16276_v38  ;;  %v5307_v62 = vpop.f32.mrf.mxu0 }
 0x5a9   :  { %v9165_v11 = vmax.f32 %v9164_v8, %v8218_v40  ;;  %v8225_v53 = vmax.f32 %v5306_v26, 0.0  ;;  %v5308_v33 = vadd.f32 %v5307_v62, %v16161_v0  ;;  %v5918_v42 = vpop.f32.mrf.mxu1 }
 0x5aa   :  { %v9216_v50 = vmax.f32 %v9215_v24, %v8123_v28  ;;  %v8124_v61 = vmax.f32 %v5917_v7, 0.0  ;;  %v5919_v22 = vadd.f32 %v5918_v42, %v16267_v21  ;;  %v5311_v16 = vpop.f32.mrf.mxu0  ;;  %6256 = vmatmul.mubr.bf16.gmra.mxu0 %v18344_v9 }
 0x5ab   :  { %v9103_v3 = vmax.f32 %v9102_v12, %v8225_v53  ;;  %v8226_v14 = vmax.f32 %v5308_v33, 0.0  ;;  %v5312_v57 = vadd.f32 %v5311_v16, %v16154_v39  ;;  %v5920_v46 = vpop.f32.mrf.mxu1  ;;  %6265 = vmatprep.mubr.bf16.mxu0 %v18315_v6 }
 0x5ac   :  { %v9279_v15 = vmax.f32 %v9278_v1, %v8124_v61  ;;  %v8131_v8 = vmax.f32 %v5919_v22, 0.0  ;;  %v5921_v51 = vadd.f32 %v5920_v46, %v16276_v38  ;;  %v5313_v40 = vpop.f32.mrf.mxu0 }
 0x5ad   :  { %v9166_v26 = vmax.f32 %v9165_v11, %v8226_v14  ;;  %v8233_v24 = vmax.f32 %v5312_v57, 0.0  ;;  %v5314_v54 = vadd.f32 %v5313_v40, %v16161_v0  ;;  %v5924_v28 = vpop.f32.mrf.mxu1  ;;  %6163 = vmatmul.mubr.bf16.gmra.mxu1 %v18338_v45 }
 0x5ae   :  { %v9217_v7 = vmax.f32 %v9216_v50, %v8131_v8  ;;  %v8132_v12 = vmax.f32 %v5921_v51, 0.0  ;;  %v5925_v62 = vadd.f32 %v5924_v28, %v16267_v21  ;;  %v5315_v16 = vpop.f32.mrf.mxu0  ;;  %6172 = vmatprep.mubr.bf16.mxu1 %v18315_v6 }
 0x5af   :  { %v9104_v53 = vmax.f32 %v9103_v3, %v8233_v24  ;;  %v8234_v1 = vmax.f32 %v5314_v54, 0.0  ;;  %v5316_v33 = vadd.f32 %v5315_v16, %v16154_v39  ;;  %v5926_v42 = vpop.f32.mrf.mxu1  ;;  %v18345_v3 = vld [vmem:[#allocation25_spill] sm:$0xff] }
 0x5b0   :  { %v9280_v61 = vmax.f32 %v9279_v15, %v8132_v12  ;;  %v8139_v11 = vmax.f32 %v5925_v62, 0.0  ;;  %v5927_v22 = vadd.f32 %v5926_v42, %v16276_v38  ;;  %v5317_v14 = vpop.f32.mrf.mxu0 }
 0x5b1   :  { %v9167_v57 = vmax.f32 %v9166_v26, %v8234_v1  ;;  %v8241_v46 = vmax.f32 %v5316_v33, 0.0  ;;  %v5318_v50 = vadd.f32 %v5317_v14, %v16161_v0  ;;  %v5928_v8 = vpop.f32.mrf.mxu1 }
 0x5b2   :  { %v9218_v51 = vmax.f32 %v9217_v7, %v8139_v11  ;;  %v8140_v40 = vmax.f32 %v5927_v22, 0.0  ;;  %v5929_v28 = vadd.f32 %v5928_v8, %v16267_v21  ;;  %v5321_v45 = vpop.f32.mrf.mxu0  ;;  %6266 = vmatmul.mubr.bf16.gmra.mxu0 %v18345_v3 }
 0x5b3   :  { %v9105_v24 = vmax.f32 %v9104_v53, %v8241_v46  ;;  %v8242_v54 = vmax.f32 %v5318_v50, 0.0  ;;  %v5322_v15 = vadd.f32 %v5321_v45, %v16154_v39  ;;  %v5930_v12 = vpop.f32.mrf.mxu1  ;;  %6275 = vmatprep.mubr.bf16.mxu0 %v18315_v6 }
 0x5b4   :  { %v9281_v62 = vmax.f32 %v9280_v61, %v8140_v40  ;;  %v8147_v26 = vmax.f32 %v5929_v28, 0.0  ;;  %v5931_v16 = vadd.f32 %v5930_v12, %v16276_v38  ;;  %v5323_v1 = vpop.f32.mrf.mxu0 }
 0x5b5   :  { %v9168_v33 = vmax.f32 %v9167_v57, %v8242_v54  ;;  %v8249_v7 = vmax.f32 %v5322_v15, 0.0  ;;  %v5324_v42 = vadd.f32 %v5323_v1, %v16161_v0  ;;  %v5934_v11 = vpop.f32.mrf.mxu1  ;;  %6173 = vmatmul.mubr.bf16.gmra.mxu1 %v18339_v18 }
 0x5b6   :  { %v9219_v22 = vmax.f32 %v9218_v51, %v8147_v26  ;;  %v8148_v53 = vmax.f32 %v5931_v16, 0.0  ;;  %v5935_v14 = vadd.f32 %v5934_v11, %v16267_v21  ;;  %v5325_v45 = vpop.f32.mrf.mxu0  ;;  %6888 = vmatprep.mubr.bf16.mxu1 %v18315_v6 }
 0x5b7   :  { %v9106_v46 = vmax.f32 %v9105_v24, %v8249_v7  ;;  %v8250_v61 = vmax.f32 %v5324_v42, 0.0  ;;  %v5326_v50 = vadd.f32 %v5325_v45, %v16154_v39  ;;  %v5936_v8 = vpop.f32.mrf.mxu1  ;;  %v18346_v24 = vld [vmem:[#allocation26_spill] sm:$0xff] }
 0x5b8   :  { %v9282_v40 = vmax.f32 %v9281_v62, %v8148_v53  ;;  %v8155_v57 = vmax.f32 %v5935_v14, 0.0  ;;  %v5937_v28 = vadd.f32 %v5936_v8, %v16276_v38  ;;  %v5327_v54 = vpop.f32.mrf.mxu0 }
 0x5b9   :  { %v9169_v15 = vmax.f32 %v9168_v33, %v8250_v61  ;;  %v8257_v12 = vmax.f32 %v5326_v50, 0.0  ;;  %v5328_v51 = vadd.f32 %v5327_v54, %v16161_v0  ;;  %v5938_v26 = vpop.f32.mrf.mxu1 }
 0x5ba   :  { %v9220_v16 = vmax.f32 %v9219_v22, %v8155_v57  ;;  %v8156_v1 = vmax.f32 %v5937_v28, 0.0  ;;  %v5939_v11 = vadd.f32 %v5938_v26, %v16267_v21  ;;  %v5331_v18 = vpop.f32.mrf.mxu0  ;;  %6276 = vmatmul.mubr.bf16.gmra.mxu0 %v18346_v24 }
 0x5bb   :  { %v9107_v7 = vmax.f32 %v9106_v46, %v8257_v12  ;;  %v8258_v42 = vmax.f32 %v5328_v51, 0.0  ;;  %v5332_v62 = vadd.f32 %v5331_v18, %v16154_v39  ;;  %v5940_v53 = vpop.f32.mrf.mxu1  ;;  %6285 = vmatprep.mubr.bf16.mxu0 %v18315_v6 }
 0x5bc   :  { %v9283_v14 = vmax.f32 %v9282_v40, %v8156_v1  ;;  %v8163_v33 = vmax.f32 %v5939_v11, 0.0  ;;  %v5941_v45 = vadd.f32 %v5940_v53, %v16276_v38  ;;  %v5333_v61 = vpop.f32.mrf.mxu0 }
 0x5bd   :  { %v9170_v50 = vmax.f32 %v9169_v15, %v8258_v42  ;;  %v8265_v22 = vmax.f32 %v5332_v62, 0.0  ;;  %v5334_v8 = vadd.f32 %v5333_v61, %v16161_v0  ;;  %v5944_v57 = vpop.f32.mrf.mxu1  ;;  %6889 = vmatmul.mubr.bf16.vlgmr.msra.gmra.mxu1 %v18340_v25 }
 0x5be   :  { %v9221_v28 = vmax.f32 %v9220_v16, %v8163_v33  ;;  %v8164_v46 = vmax.f32 %v5941_v45, 0.0  ;;  %v5945_v54 = vadd.f32 %v5944_v57, %v16267_v21  ;;  %v5335_v18 = vpop.f32.mrf.mxu0  ;;  %6898 = vmatprep.mubr.bf16.mxu1 %v18315_v6 }
 0x5bf   :  { %v9108_v12 = vmax.f32 %v9107_v7, %v8265_v22  ;;  %v8266_v40 = vmax.f32 %v5334_v8, 0.0  ;;  %v5336_v51 = vadd.f32 %v5335_v18, %v16154_v39  ;;  %v5946_v26 = vpop.f32.mrf.mxu1  ;;  %v18347_v7 = vld [vmem:[#allocation28_spill] sm:$0xff] }
 0x5c0   :  { %v9284_v1 = vmax.f32 %v9283_v14, %v8164_v46  ;;  %v8171_v15 = vmax.f32 %v5945_v54, 0.0  ;;  %v5947_v11 = vadd.f32 %v5946_v26, %v16276_v38  ;;  %v5337_v42 = vpop.f32.mrf.mxu0 }
 0x5c1   :  { %v9171_v62 = vmax.f32 %v9170_v50, %v8266_v40  ;;  %v8273_v53 = vmax.f32 %v5336_v51, 0.0  ;;  %v5338_v25 = vadd.f32 %v5337_v42, %v16161_v0  ;;  %v5948_v16 = vpop.f32.mrf.mxu1 }
 0x5c2   :  { %v9222_v33 = vmax.f32 %v9221_v28, %v8171_v15  ;;  %v8172_v45 = vmax.f32 %v5947_v11, 0.0  ;;  %v5949_v61 = vadd.f32 %v5948_v16, %v16267_v21  ;;  %v5341_v57 = vpop.f32.mrf.mxu0  ;;  %6286 = vmatmul.mubr.bf16.gmra.mxu0 %v18347_v7 }
 0x5c3   :  { %v9109_v22 = vmax.f32 %v9108_v12, %v8273_v53  ;;  %v8274_v8 = vmax.f32 %v5338_v25, 0.0  ;;  %v5342_v14 = vadd.f32 %v5341_v57, %v16154_v39  ;;  %v5950_v46 = vpop.f32.mrf.mxu1  ;;  %6295 = vmatprep.mubr.bf16.mxu0 %v18315_v6 }
 0x5c4   :  { %v9285_v54 = vmax.f32 %v9284_v1, %v8172_v45  ;;  %v8179_v50 = vmax.f32 %v5949_v61, 0.0  ;;  %v5951_v18 = vadd.f32 %v5950_v46, %v16276_v38  ;;  %v5343_v40 = vpop.f32.mrf.mxu0 }
 0x5c5   :  { %v9172_v51 = vmax.f32 %v9171_v62, %v8274_v8  ;;  %v8281_v28 = vmax.f32 %v5342_v14, 0.0  ;;  %v5344_v26 = vadd.f32 %v5343_v40, %v16161_v0  ;;  %v5954_v15 = vpop.f32.mrf.mxu1  ;;  %6899 = vmatmul.mubr.bf16.gmra.mxu1 %v18341_v30 }
 0x5c6   :  { %v9223_v11 = vmax.f32 %v9222_v33, %v8179_v50  ;;  %v8180_v12 = vmax.f32 %v5951_v18, 0.0  ;;  %v5955_v42 = vadd.f32 %v5954_v15, %v16267_v21  ;;  %v5345_v53 = vpop.f32.mrf.mxu0  ;;  %6908 = vmatprep.mubr.bf16.mxu1 %v18315_v6 }
 0x5c7   :  { %v9110_v25 = vmax.f32 %v9109_v22, %v8281_v28  ;;  %v8282_v1 = vmax.f32 %v5344_v26, 0.0  ;;  %v5346_v16 = vadd.f32 %v5345_v53, %v16154_v39  ;;  %v5956_v45 = vpop.f32.mrf.mxu1  ;;  %v18348_v22 = vld [vmem:[#allocation30_spill] sm:$0xff] }
 0x5c8   :  { %v9286_v61 = vmax.f32 %v9285_v54, %v8180_v12  ;;  %v8187_v62 = vmax.f32 %v5955_v42, 0.0  ;;  %v5957_v57 = vadd.f32 %v5956_v45, %v16276_v38  ;;  %v5347_v8 = vpop.f32.mrf.mxu0 }
 0x5c9   :  { %v9173_v14 = vmax.f32 %v9172_v51, %v8282_v1  ;;  %v8289_v46 = vmax.f32 %v5346_v16, 0.0  ;;  %v5348_v30 = vadd.f32 %v5347_v8, %v16161_v0  ;;  %v5958_v33 = vpop.f32.mrf.mxu1 }
 0x5ca   :  { %v9224_v50 = vmax.f32 %v9223_v11, %v8187_v62  ;;  %v8188_v18 = vmax.f32 %v5957_v57, 0.0  ;;  %v5959_v40 = vadd.f32 %v5958_v33, %v16267_v21  ;;  %v5351_v15 = vpop.f32.mrf.mxu0  ;;  %6296 = vmatmul.mubr.bf16.gmra.mxu0 %v18348_v22 }
 0x5cb   :  { %v9111_v28 = vmax.f32 %v9110_v25, %v8289_v46  ;;  %v8290_v26 = vmax.f32 %v5348_v30, 0.0  ;;  %v5352_v54 = vadd.f32 %v5351_v15, %v16154_v39  ;;  %v5960_v12 = vpop.f32.mrf.mxu1  ;;  %6305 = vmatprep.mubr.bf16.mxu0 %v18315_v6 }
 0x5cc   :  { %v9287_v42 = vmax.f32 %v9286_v61, %v8188_v18  ;;  %v8195_v51 = vmax.f32 %v5959_v40, 0.0  ;;  %v5961_v53 = vadd.f32 %v5960_v12, %v16276_v38  ;;  %v5353_v1 = vpop.f32.mrf.mxu0 }
 0x5cd   :  { %v9174_v16 = vmax.f32 %v9173_v14, %v8290_v26  ;;  %v8297_v11 = vmax.f32 %v5352_v54, 0.0  ;;  %v5354_v45 = vadd.f32 %v5353_v1, %v16161_v0  ;;  %v5964_v62 = vpop.f32.mrf.mxu1  ;;  %6909 = vmatmul.mubr.bf16.gmra.mxu1 %v18342_v19 }
 0x5ce   :  { %v9225_v57 = vmax.f32 %v9224_v50, %v8195_v51  ;;  %v8196_v25 = vmax.f32 %v5961_v53, 0.0  ;;  %v5965_v8 = vadd.f32 %v5964_v62, %v16267_v21  ;;  %v5355_v46 = vpop.f32.mrf.mxu0  ;;  %6918 = vmatprep.mubr.bf16.mxu1 %v18315_v6 }
 0x5cf   :  { %v9112_v30 = vmax.f32 %v9111_v28, %v8297_v11  ;;  %v8298_v61 = vmax.f32 %v5354_v45, 0.0  ;;  %v5356_v33 = vadd.f32 %v5355_v46, %v16154_v39  ;;  %v5966_v18 = vpop.f32.mrf.mxu1  ;;  %v18349_v28 = vld [vmem:[#allocation33_spill] sm:$0xff] }
 0x5d0   :  { %v9288_v40 = vmax.f32 %v9287_v42, %v8196_v25  ;;  %v8203_v14 = vmax.f32 %v5965_v8, 0.0  ;;  %v5967_v15 = vadd.f32 %v5966_v18, %v16276_v38  ;;  %v5357_v26 = vpop.f32.mrf.mxu0 }
 0x5d1   :  { %v9175_v54 = vmax.f32 %v9174_v16, %v8298_v61  ;;  %v8305_v12 = vmax.f32 %v5356_v33, 0.0  ;;  %v5358_v19 = vadd.f32 %v5357_v26, %v16161_v0  ;;  %v5968_v50 = vpop.f32.mrf.mxu1 }
 0x5d2   :  { %v9226_v51 = vmax.f32 %v9225_v57, %v8203_v14  ;;  %v8204_v53 = vmax.f32 %v5967_v15, 0.0  ;;  %v5969_v1 = vadd.f32 %v5968_v50, %v16267_v21  ;;  %v5361_v62 = vpop.f32.mrf.mxu0  ;;  %6306 = vmatmul.mubr.bf16.gmra.mxu0 %v18349_v28 }
 0x5d3   :  { %v9113_v11 = vmax.f32 %v9112_v30, %v8305_v12  ;;  %v8306_v45 = vmax.f32 %v5358_v19, 0.0  ;;  %v5362_v42 = vadd.f32 %v5361_v62, %v16154_v39  ;;  %v5970_v25 = vpop.f32.mrf.mxu1  ;;  %6315 = vmatprep.mubr.bf16.mxu0 %v18315_v6 }
 0x5d4   :  { %v9289_v8 = vmax.f32 %v9288_v40, %v8204_v53  ;;  %v8211_v16 = vmax.f32 %v5969_v1, 0.0  ;;  %v5971_v46 = vadd.f32 %v5970_v25, %v16276_v38  ;;  %v5363_v61 = vpop.f32.mrf.mxu0 }
 0x5d5   :  { %v9176_v33 = vmax.f32 %v9175_v54, %v8306_v45  ;;  %v8313_v57 = vmax.f32 %v5362_v42, 0.0  ;;  %v5364_v18 = vadd.f32 %v5363_v61, %v16161_v0  ;;  %v5974_v14 = vpop.f32.mrf.mxu1  ;;  %6919 = vmatmul.mubr.bf16.gmra.mxu1 %v18343_v49 }
 0x5d6   :  { %v9227_v15 = vmax.f32 %v9226_v51, %v8211_v16  ;;  %v8212_v30 = vmax.f32 %v5971_v46, 0.0  ;;  %v5975_v26 = vadd.f32 %v5974_v14, %v16267_v21  ;;  %v5365_v12 = vpop.f32.mrf.mxu0  ;;  %6928 = vmatprep.mubr.bf16.mxu1 %v18315_v6 }
 0x5d7   :  { %v9114_v19 = vmax.f32 %v9113_v11, %v8313_v57  ;;  %v8314_v40 = vmax.f32 %v5364_v18, 0.0  ;;  %v5366_v50 = vadd.f32 %v5365_v12, %v16154_v39  ;;  %v5976_v53 = vpop.f32.mrf.mxu1  ;;  %v18350_v11 = vld [vmem:[#allocation36_spill] sm:$0xff] }
 0x5d8   :  { %v9290_v1 = vmax.f32 %v9289_v8, %v8212_v30  ;;  %v8219_v54 = vmax.f32 %v5975_v26, 0.0  ;;  %v5977_v62 = vadd.f32 %v5976_v53, %v16276_v38  ;;  %v5367_v45 = vpop.f32.mrf.mxu0  ;;  %v13963_v57 = vld [vmem:[#allocation9 + $0xe0] ss:$16 sps:$4 sm:$0xff]   ;;  %v13965_v18 = vld [vmem:[#allocation9 + $0xe4] ss:$16 sps:$4 sm:$0xff]  }
 0x5d9   :  { %v9177_v42 = vmax.f32 %v9176_v33, %v8314_v40  ;;  %v8321_v25 = vmax.f32 %v5366_v50, 0.0  ;;  %v5368_v49 = vadd.f32 %v5367_v45, %v16161_v0  ;;  %v5978_v51 = vpop.f32.mrf.mxu1  ;;  %v13966_v33 = vld [vmem:[#allocation9 + $0x2e0] ss:$16 sps:$4 sm:$0xff]   ;;  %v13968_v40 = vld [vmem:[#allocation9 + $0x2e4] ss:$16 sps:$4 sm:$0xff]   ;;  %11301 = vmatprep.subr.bf16.mxu0 %v13965_v18 }
 0x5da   :  { %v9228_v16 = vmax.f32 %v9227_v15, %v8219_v54  ;;  %v8220_v46 = vmax.f32 %v5977_v62, 0.0  ;;  %v5979_v61 = vadd.f32 %v5978_v51, %v16267_v21  ;;  %v5371_v14 = vpop.f32.mrf.mxu0  ;;  %6316 = vmatmul.mubr.bf16.gmra.mxu0 %v18350_v11  ;;  %11342 = vmatprep.subr.bf16.mxu1 %v13968_v40 }
 0x5db   :  { %v9115_v12 = vmax.f32 %v9114_v19, %v8321_v25  ;;  %v8322_v8 = vmax.f32 %v5368_v49, 0.0  ;;  %v5372_v30 = vadd.f32 %v5371_v14, %v16154_v39  ;;  %v5980_v26 = vpop.f32.mrf.mxu1  ;;  %6325 = vmatprep.mubr.bf16.mxu0 %v18315_v6  ;;  %11302 = vmatpush1.bf16.msra.mxu0 %v13963_v57 }
 0x5dc   :  { %v9291_v50 = vmax.f32 %v9290_v1, %v8220_v46  ;;  %v8227_v53 = vmax.f32 %v5979_v61, 0.0  ;;  %v5981_v15 = vadd.f32 %v5980_v26, %v16276_v38  ;;  %v5373_v54 = vpop.f32.mrf.mxu0  ;;  %11343 = vmatpush1.bf16.msra.mxu1 %v13966_v33 }
 0x5dd   :  { %v9178_v62 = vmax.f32 %v9177_v42, %v8322_v8  ;;  %v8329_v45 = vmax.f32 %v5372_v30, 0.0  ;;  %v5374_v51 = vadd.f32 %v5373_v54, %v16161_v0  ;;  %v5984_v31 = vpop.f32.mrf.mxu1  ;;  %6929 = vmatmul.mubr.bf16.gmra.mxu1 %v18344_v9  ;;  %v18351_v54 = vld [vmem:[#allocation39_spill] sm:$0xff] }
 0x5de   :  { %v9229_v19 = vmax.f32 %v9228_v16, %v8227_v53  ;;  %v8228_v25 = vmax.f32 %v5981_v15, 0.0  ;;  %v5985_v49 = vadd.f32 %v5984_v31, %v16267_v21  ;;  %v5375_v14 = vpop.f32.mrf.mxu0  ;;  %6938 = vmatprep.mubr.bf16.mxu1 %v18315_v6 }
 0x5df   :  { %v9116_v1 = vmax.f32 %v9115_v12, %v8329_v45  ;;  %v8330_v46 = vmax.f32 %v5374_v51, 0.0  ;;  %v5376_v61 = vadd.f32 %v5375_v14, %v16154_v39  ;;  %v5986_v42 = vpop.f32.mrf.mxu1 }
 0x5e0   :  { %v9292_v18 = vmax.f32 %v9291_v50, %v8228_v25  ;;  %v8235_v8 = vmax.f32 %v5985_v49, 0.0  ;;  %v5987_v30 = vadd.f32 %v5986_v42, %v16276_v38  ;;  %v5377_v9 = vpop.f32.mrf.mxu0 }
 0x5e1   :  { %v9179_v57 = vmax.f32 %v9178_v62, %v8330_v46  ;;  %v8337_v16 = vmax.f32 %v5376_v61, 0.0  ;;  %v5378_v26 = vadd.f32 %v5377_v9, %v16161_v0  ;;  %v5988_v31 = vpop.f32.mrf.mxu1 }
 0x5e2   :  { %v9230_v53 = vmax.f32 %v9229_v19, %v8235_v8  ;;  %v8236_v15 = vmax.f32 %v5987_v30, 0.0  ;;  %v5989_v40 = vadd.f32 %v5988_v31, %v16267_v21  ;;  %v5381_v12 = vpop.f32.mrf.mxu0  ;;  %6326 = vmatmul.mubr.bf16.gmra.mxu0 %v18351_v54 }
 0x5e3   :  { %v9117_v45 = vmax.f32 %v9116_v1, %v8337_v16  ;;  %v8338_v51 = vmax.f32 %v5378_v26, 0.0  ;;  %v5382_v33 = vadd.f32 %v5381_v12, %v16154_v39  ;;  %v5990_v50 = vpop.f32.mrf.mxu1  ;;  %6335 = vmatprep.mubr.bf16.mxu0 %v18315_v6 }
 0x5e4   :  { %v9293_v25 = vmax.f32 %v9292_v18, %v8236_v15  ;;  %v8243_v62 = vmax.f32 %v5989_v40, 0.0  ;;  %v5991_v49 = vadd.f32 %v5990_v50, %v16276_v38  ;;  %v5383_v14 = vpop.f32.mrf.mxu0 }
 0x5e5   :  { %v9180_v46 = vmax.f32 %v9179_v57, %v8338_v51  ;;  %v8345_v19 = vmax.f32 %v5382_v33, 0.0  ;;  %v5384_v61 = vadd.f32 %v5383_v14, %v16161_v0  ;;  %v5994_v42 = vpop.f32.mrf.mxu1  ;;  %6939 = vmatmul.mubr.bf16.gmra.mxu1 %v18345_v3 }
 0x5e6   :  { %v9231_v8 = vmax.f32 %v9230_v53, %v8243_v62  ;;  %v8244_v1 = vmax.f32 %v5991_v49, 0.0  ;;  %v5995_v30 = vadd.f32 %v5994_v42, %v16267_v21  ;;  %v5385_v9 = vpop.f32.mrf.mxu0  ;;  %6948 = vmatprep.mubr.bf16.mxu1 %v18315_v6 }
 0x5e7   :  { %v9118_v16 = vmax.f32 %v9117_v45, %v8345_v19  ;;  %v8346_v18 = vmax.f32 %v5384_v61, 0.0  ;;  %v5386_v26 = vadd.f32 %v5385_v9, %v16154_v39  ;;  %v5996_v31 = vpop.f32.mrf.mxu1  ;;  %v18352_v45 = vld [vmem:[#allocation41_spill] sm:$0xff] }
 0x5e8   :  { %v9294_v15 = vmax.f32 %v9293_v25, %v8244_v1  ;;  %v8251_v57 = vmax.f32 %v5995_v30, 0.0  ;;  %v5997_v40 = vadd.f32 %v5996_v31, %v16276_v38  ;;  %v5387_v12 = vpop.f32.mrf.mxu0 }
 0x5e9   :  { %v9181_v51 = vmax.f32 %v9180_v46, %v8346_v18  ;;  %v8353_v33 = vmax.f32 %v5386_v26, 0.0  ;;  %v5388_v3 = vadd.f32 %v5387_v12, %v16161_v0  ;;  %v5998_v53 = vpop.f32.mrf.mxu1 }
 0x5ea   :  { %v9232_v50 = vmax.f32 %v9231_v8, %v8251_v57  ;;  %v8252_v62 = vmax.f32 %v5997_v40, 0.0  ;;  %v5999_v49 = vadd.f32 %v5998_v53, %v16267_v21  ;;  %v5391_v14 = vpop.f32.mrf.mxu0  ;;  %6336 = vmatmul.mubr.bf16.gmra.mxu0 %v18352_v45 }
 0x5eb   :  { %v9119_v19 = vmax.f32 %v9118_v16, %v8353_v33  ;;  %v8354_v61 = vmax.f32 %v5388_v3, 0.0  ;;  %v5392_v25 = vadd.f32 %v5391_v14, %v16154_v39  ;;  %v6000_v42 = vpop.f32.mrf.mxu1  ;;  %6345 = vmatprep.mubr.bf16.mxu0 %v18315_v6 }
 0x5ec   :  { %v9295_v1 = vmax.f32 %v9294_v15, %v8252_v62  ;;  %v8259_v46 = vmax.f32 %v5999_v49, 0.0  ;;  %v6001_v30 = vadd.f32 %v6000_v42, %v16276_v38  ;;  %v5393_v9 = vpop.f32.mrf.mxu0 }
 0x5ed   :  { %v9182_v18 = vmax.f32 %v9181_v51, %v8354_v61  ;;  %v8361_v8 = vmax.f32 %v5392_v25, 0.0  ;;  %v5394_v26 = vadd.f32 %v5393_v9, %v16161_v0  ;;  %v6004_v31 = vpop.f32.mrf.mxu1  ;;  %6949 = vmatmul.mubr.bf16.gmra.mxu1 %v18346_v24 }
 0x5ee   :  { %v9233_v57 = vmax.f32 %v9232_v50, %v8259_v46  ;;  %v8260_v16 = vmax.f32 %v6001_v30, 0.0  ;;  %v6005_v40 = vadd.f32 %v6004_v31, %v16267_v21  ;;  %v5395_v12 = vpop.f32.mrf.mxu0  ;;  %6958 = vmatprep.mubr.bf16.mxu1 %v18315_v6 }
 0x5ef   :  { %v9120_v33 = vmax.f32 %v9119_v19, %v8361_v8  ;;  %v8362_v15 = vmax.f32 %v5394_v26, 0.0  ;;  %v5396_v3 = vadd.f32 %v5395_v12, %v16154_v39  ;;  %v6006_v53 = vpop.f32.mrf.mxu1  ;;  %v18353_v19 = vld [vmem:[#allocation43_spill] sm:$0xff] }
 0x5f0   :  { %v9296_v62 = vmax.f32 %v9295_v1, %v8260_v16  ;;  %v8267_v51 = vmax.f32 %v6005_v40, 0.0  ;;  %v6007_v49 = vadd.f32 %v6006_v53, %v16276_v38  ;;  %v5397_v14 = vpop.f32.mrf.mxu0 }
 0x5f1   :  { %v9183_v61 = vmax.f32 %v9182_v18, %v8362_v15  ;;  %v8369_v25 = vmax.f32 %v5396_v3, 0.0  ;;  %v5398_v24 = vadd.f32 %v5397_v14, %v16161_v0  ;;  %v6008_v50 = vpop.f32.mrf.mxu1  ;;  %v13969_v15 = vld [vmem:[#allocation9 + $0xc0] ss:$16 sps:$4 sm:$0xff]  }
 0x5f2   :  { %v9234_v42 = vmax.f32 %v9233_v57, %v8267_v51  ;;  %v8268_v46 = vmax.f32 %v6007_v49, 0.0  ;;  %v6009_v30 = vadd.f32 %v6008_v50, %v16267_v21  ;;  %v5401_v9 = vpop.f32.mrf.mxu0  ;;  %6346 = vmatmul.mubr.bf16.gmra.mxu0 %v18353_v19  ;;  %v13971_v57 = vld [vmem:[#allocation9 + $0xc4] ss:$16 sps:$4 sm:$0xff]  }
 0x5f3   :  { %v9121_v8 = vmax.f32 %v9120_v33, %v8369_v25  ;;  %v8370_v26 = vmax.f32 %v5398_v24, 0.0  ;;  %v5402_v1 = vadd.f32 %v5401_v9, %v16154_v39  ;;  %v6010_v31 = vpop.f32.mrf.mxu1  ;;  %6355 = vmatprep.mubr.bf16.mxu0 %v18315_v6  ;;  %11303 = vmatprep.subr.bf16.mxu0 %v13971_v57  ;;  %v13974_v50 = vld [vmem:[#allocation9 + $0x2c4] ss:$16 sps:$4 sm:$0xff]  }
 0x5f4   :  { %v9297_v16 = vmax.f32 %v9296_v62, %v8268_v46  ;;  %v8275_v18 = vmax.f32 %v6009_v30, 0.0  ;;  %v6011_v40 = vadd.f32 %v6010_v31, %v16276_v38  ;;  %v5403_v12 = vpop.f32.mrf.mxu0  ;;  %v13972_v62 = vld [vmem:[#allocation9 + $0x2c0] ss:$16 sps:$4 sm:$0xff]   ;;  %11304 = vmatpush1.bf16.msra.mxu0 %v13969_v15  ;;  %11344 = vmatprep.subr.bf16.mxu1 %v13974_v50 }
 0x5f5   :  { %v9184_v3 = vmax.f32 %v9183_v61, %v8370_v26  ;;  %v8377_v53 = vmax.f32 %v5402_v1, 0.0  ;;  %v5404_v51 = vadd.f32 %v5403_v12, %v16161_v0  ;;  %v6014_v49 = vpop.f32.mrf.mxu1  ;;  %6959 = vmatmul.mubr.bf16.gmra.mxu1 %v18347_v7 }
 0x5f6   :  { %v9235_v33 = vmax.f32 %v9234_v42, %v8275_v18  ;;  %v8276_v14 = vmax.f32 %v6011_v40, 0.0  ;;  %v6015_v25 = vadd.f32 %v6014_v49, %v16267_v21  ;;  %v5405_v24 = vpop.f32.mrf.mxu0  ;;  %6968 = vmatprep.mubr.bf16.mxu1 %v18315_v6  ;;  %11345 = vmatpush1.bf16.msra.mxu1 %v13972_v62 }
 0x5f7   :  { %v9122_v46 = vmax.f32 %v9121_v8, %v8377_v53  ;;  %v8378_v30 = vmax.f32 %v5404_v51, 0.0  ;;  %v5406_v61 = vadd.f32 %v5405_v24, %v16154_v39  ;;  %v6016_v9 = vpop.f32.mrf.mxu1  ;;  %v18354_v51 = vld [vmem:[#allocation44_spill] sm:$0xff] }
 0x5f8   :  { %v9298_v26 = vmax.f32 %v9297_v16, %v8276_v14  ;;  %v8283_v1 = vmax.f32 %v6015_v25, 0.0  ;;  %v6017_v7 = vadd.f32 %v6016_v9, %v16276_v38  ;;  %v5407_v42 = vpop.f32.mrf.mxu0 }
 0x5f9   :  { %v9185_v31 = vmax.f32 %v9184_v3, %v8378_v30  ;;  %v8385_v18 = vmax.f32 %v5406_v61, 0.0  ;;  %v5408_v40 = vadd.f32 %v5407_v42, %v16161_v0  ;;  %v6018_v12 = vpop.f32.mrf.mxu1 }
 0x5fa   :  { %v9236_v57 = vmax.f32 %v9235_v33, %v8283_v1  ;;  %v8284_v49 = vmax.f32 %v6017_v7, 0.0  ;;  %v6019_v8 = vadd.f32 %v6018_v12, %v16267_v21  ;;  %v5411_v53 = vpop.f32.mrf.mxu0  ;;  %6356 = vmatmul.mubr.bf16.gmra.mxu0 %v18354_v51 }
 0x5fb   :  { %v9123_v15 = vmax.f32 %v9122_v46, %v8385_v18  ;;  %v8386_v16 = vmax.f32 %v5408_v40, 0.0  ;;  %v5412_v14 = vadd.f32 %v5411_v53, %v16154_v39  ;;  %v6020_v25 = vpop.f32.mrf.mxu1  ;;  %6365 = vmatprep.mubr.bf16.mxu0 %v18315_v6 }
 0x5fc   :  { %v9299_v3 = vmax.f32 %v9298_v26, %v8284_v49  ;;  %v8291_v24 = vmax.f32 %v6019_v8, 0.0  ;;  %v6021_v50 = vadd.f32 %v6020_v25, %v16276_v38  ;;  %v5413_v30 = vpop.f32.mrf.mxu0 }
 0x5fd   :  { %v9186_v62 = vmax.f32 %v9185_v31, %v8386_v16  ;;  %v8393_v33 = vmax.f32 %v5412_v14, 0.0  ;;  %v5414_v61 = vadd.f32 %v5413_v30, %v16161_v0  ;;  %v6024_v9 = vpop.f32.mrf.mxu1  ;;  %6969 = vmatmul.mubr.bf16.gmra.mxu1 %v18348_v22 }
 0x5fe   :  { %v9237_v1 = vmax.f32 %v9236_v57, %v8291_v24  ;;  %v8292_v46 = vmax.f32 %v6021_v50, 0.0  ;;  %v6025_v7 = vadd.f32 %v6024_v9, %v16267_v21  ;;  %v5415_v42 = vpop.f32.mrf.mxu0  ;;  %6978 = vmatprep.mubr.bf16.mxu1 %v18315_v6 }
 0x5ff   :  { %v9124_v18 = vmax.f32 %v9123_v15, %v8393_v33  ;;  %v8394_v26 = vmax.f32 %v5414_v61, 0.0  ;;  %v5416_v40 = vadd.f32 %v5415_v42, %v16154_v39  ;;  %v6026_v12 = vpop.f32.mrf.mxu1  ;;  %v18355_v15 = vld [vmem:[#allocation27_spill] sm:$0xff] }
 0x600   :  { %v9300_v49 = vmax.f32 %v9299_v3, %v8292_v46  ;;  %v8299_v31 = vmax.f32 %v6025_v7, 0.0  ;;  %v6027_v8 = vadd.f32 %v6026_v12, %v16276_v38  ;;  %v5417_v53 = vpop.f32.mrf.mxu0 }
 0x601   :  { %v9187_v16 = vmax.f32 %v9186_v62, %v8394_v26  ;;  %v8401_v14 = vmax.f32 %v5416_v40, 0.0  ;;  %v5418_v22 = vadd.f32 %v5417_v53, %v16161_v0  ;;  %v6028_v57 = vpop.f32.mrf.mxu1 }
 0x602   :  { %v9238_v25 = vmax.f32 %v9237_v1, %v8299_v31  ;;  %v8300_v24 = vmax.f32 %v6027_v8, 0.0  ;;  %v6029_v50 = vadd.f32 %v6028_v57, %v16267_v21  ;;  %v5421_v30 = vpop.f32.mrf.mxu0  ;;  %6366 = vmatmul.mubr.bf16.gmra.mxu0 %v18355_v15 }
 0x603   :  { %v9125_v33 = vmax.f32 %v9124_v18, %v8401_v14  ;;  %v8402_v61 = vmax.f32 %v5418_v22, 0.0  ;;  %v5422_v3 = vadd.f32 %v5421_v30, %v16154_v39  ;;  %v6030_v9 = vpop.f32.mrf.mxu1  ;;  %6375 = vmatprep.mubr.bf16.mxu0 %v18315_v6 }
 0x604   :  { %v9301_v46 = vmax.f32 %v9300_v49, %v8300_v24  ;;  %v8307_v62 = vmax.f32 %v6029_v50, 0.0  ;;  %v6031_v7 = vadd.f32 %v6030_v9, %v16276_v38  ;;  %v5423_v42 = vpop.f32.mrf.mxu0 }
 0x605   :  { %v9188_v26 = vmax.f32 %v9187_v16, %v8402_v61  ;;  %v8409_v1 = vmax.f32 %v5422_v3, 0.0  ;;  %v5424_v40 = vadd.f32 %v5423_v42, %v16161_v0  ;;  %v6034_v12 = vpop.f32.mrf.mxu1  ;;  %6979 = vmatmul.mubr.bf16.gmra.mxu1 %v18349_v28 }
 0x606   :  { %v9239_v31 = vmax.f32 %v9238_v25, %v8307_v62  ;;  %v8308_v18 = vmax.f32 %v6031_v7, 0.0  ;;  %v6035_v8 = vadd.f32 %v6034_v12, %v16267_v21  ;;  %v5425_v53 = vpop.f32.mrf.mxu0  ;;  %6988 = vmatprep.mubr.bf16.mxu1 %v18315_v6 }
 0x607   :  { %v9126_v14 = vmax.f32 %v9125_v33, %v8409_v1  ;;  %v8410_v49 = vmax.f32 %v5424_v40, 0.0  ;;  %v5426_v22 = vadd.f32 %v5425_v53, %v16154_v39  ;;  %v6036_v57 = vpop.f32.mrf.mxu1  ;;  %v18356_v33 = vld [vmem:[#allocation31_spill] sm:$0xff] }
 0x608   :  { %v9302_v24 = vmax.f32 %v9301_v46, %v8308_v18  ;;  %v8315_v16 = vmax.f32 %v6035_v8, 0.0  ;;  %v6037_v50 = vadd.f32 %v6036_v57, %v16276_v38  ;;  %v5427_v30 = vpop.f32.mrf.mxu0 }
 0x609   :  { %v9189_v61 = vmax.f32 %v9188_v26, %v8410_v49  ;;  %v8417_v3 = vmax.f32 %v5426_v22, 0.0  ;;  %v5428_v28 = vadd.f32 %v5427_v30, %v16161_v0  ;;  %v6038_v25 = vpop.f32.mrf.mxu1 }
 0x60a   :  { %v9240_v9 = vmax.f32 %v9239_v31, %v8315_v16  ;;  %v8316_v62 = vmax.f32 %v6037_v50, 0.0  ;;  %v6039_v7 = vadd.f32 %v6038_v25, %v16267_v21  ;;  %v5431_v42 = vpop.f32.mrf.mxu0  ;;  %6376 = vmatmul.mubr.bf16.gmra.mxu0 %v18356_v33 }
 0x60b   :  { %v9127_v1 = vmax.f32 %v9126_v14, %v8417_v3  ;;  %v8418_v40 = vmax.f32 %v5428_v28, 0.0  ;;  %v5432_v46 = vadd.f32 %v5431_v42, %v16154_v39  ;;  %v6040_v12 = vpop.f32.mrf.mxu1  ;;  %6385 = vmatprep.mubr.bf16.mxu0 %v18315_v6 }
 0x60c   :  { %v9303_v18 = vmax.f32 %v9302_v24, %v8316_v62  ;;  %v8323_v26 = vmax.f32 %v6039_v7, 0.0  ;;  %v6041_v8 = vadd.f32 %v6040_v12, %v16276_v38  ;;  %v5433_v53 = vpop.f32.mrf.mxu0 }
 0x60d   :  { %v9190_v49 = vmax.f32 %v9189_v61, %v8418_v40  ;;  %v8425_v31 = vmax.f32 %v5432_v46, 0.0  ;;  %v5434_v22 = vadd.f32 %v5433_v53, %v16161_v0  ;;  %v6044_v57 = vpop.f32.mrf.mxu1  ;;  %6989 = vmatmul.mubr.bf16.gmra.mxu1 %v18350_v11 }
 0x60e   :  { %v9241_v16 = vmax.f32 %v9240_v9, %v8323_v26  ;;  %v8324_v14 = vmax.f32 %v6041_v8, 0.0  ;;  %v6045_v50 = vadd.f32 %v6044_v57, %v16267_v21  ;;  %v5435_v30 = vpop.f32.mrf.mxu0  ;;  %6998 = vmatprep.mubr.bf16.mxu1 %v18315_v6 }
 0x60f   :  { %v9128_v3 = vmax.f32 %v9127_v1, %v8425_v31  ;;  %v8426_v24 = vmax.f32 %v5434_v22, 0.0  ;;  %v5436_v28 = vadd.f32 %v5435_v30, %v16154_v39  ;;  %v6046_v25 = vpop.f32.mrf.mxu1  ;;  %v18357_v1 = vld [vmem:[#allocation29_spill] sm:$0xff] }
 0x610   :  { %v9304_v62 = vmax.f32 %v9303_v18, %v8324_v14  ;;  %v8331_v61 = vmax.f32 %v6045_v50, 0.0  ;;  %v6047_v7 = vadd.f32 %v6046_v25, %v16276_v38  ;;  %v5437_v42 = vpop.f32.mrf.mxu0 }
 0x611   :  { %v9191_v40 = vmax.f32 %v9190_v49, %v8426_v24  ;;  %v8433_v46 = vmax.f32 %v5436_v28, 0.0  ;;  %v5438_v11 = vadd.f32 %v5437_v42, %v16161_v0  ;;  %v6048_v9 = vpop.f32.mrf.mxu1  ;;  %v13975_v24 = vld [vmem:[#allocation9 + $0xa0] ss:$16 sps:$4 sm:$0xff]  }
 0x612   :  { %v9242_v12 = vmax.f32 %v9241_v16, %v8331_v61  ;;  %v8332_v26 = vmax.f32 %v6047_v7, 0.0  ;;  %v6049_v8 = vadd.f32 %v6048_v9, %v16267_v21  ;;  %v5441_v53 = vpop.f32.mrf.mxu0  ;;  %6386 = vmatmul.mubr.bf16.gmra.mxu0 %v18357_v1  ;;  %v13977_v16 = vld [vmem:[#allocation9 + $0xa4] ss:$16 sps:$4 sm:$0xff]  }
 0x613   :  { %v9129_v31 = vmax.f32 %v9128_v3, %v8433_v46  ;;  %v8434_v22 = vmax.f32 %v5438_v11, 0.0  ;;  %v5442_v18 = vadd.f32 %v5441_v53, %v16154_v39  ;;  %v6050_v57 = vpop.f32.mrf.mxu1  ;;  %6395 = vmatprep.mubr.bf16.mxu0 %v18315_v6  ;;  %11305 = vmatprep.subr.bf16.mxu0 %v13977_v16  ;;  %v13980_v9 = vld [vmem:[#allocation9 + $0x2a4] ss:$16 sps:$4 sm:$0xff]  }
 0x614   :  { %v9305_v14 = vmax.f32 %v9304_v62, %v8332_v26  ;;  %v8339_v49 = vmax.f32 %v6049_v8, 0.0  ;;  %v6051_v50 = vadd.f32 %v6050_v57, %v16276_v38  ;;  %v5443_v30 = vpop.f32.mrf.mxu0  ;;  %v13978_v62 = vld [vmem:[#allocation9 + $0x2a0] ss:$16 sps:$4 sm:$0xff]   ;;  %11306 = vmatpush1.bf16.msra.mxu0 %v13975_v24  ;;  %11346 = vmatprep.subr.bf16.mxu1 %v13980_v9 }
 0x615   :  { %v9192_v28 = vmax.f32 %v9191_v40, %v8434_v22  ;;  %v8441_v25 = vmax.f32 %v5442_v18, 0.0  ;;  %v5444_v61 = vadd.f32 %v5443_v30, %v16161_v0  ;;  %v6054_v7 = vpop.f32.mrf.mxu1  ;;  %6999 = vmatmul.mubr.bf16.gmra.mxu1 %v18351_v54 }
 0x616   :  { %v9243_v3 = vmax.f32 %v9242_v12, %v8339_v49  ;;  %v8340_v42 = vmax.f32 %v6051_v50, 0.0  ;;  %v6055_v46 = vadd.f32 %v6054_v7, %v16267_v21  ;;  %v5445_v11 = vpop.f32.mrf.mxu0  ;;  %7008 = vmatprep.mubr.bf16.mxu1 %v18315_v6  ;;  %11347 = vmatpush1.bf16.msra.mxu1 %v13978_v62 }
 0x617   :  { %v9130_v26 = vmax.f32 %v9129_v31, %v8441_v25  ;;  %v8442_v8 = vmax.f32 %v5444_v61, 0.0  ;;  %v5446_v40 = vadd.f32 %v5445_v11, %v16154_v39  ;;  %v6056_v53 = vpop.f32.mrf.mxu1  ;;  %v18358_v61 = vld [vmem:[#allocation34_spill] sm:$0xff] }
 0x618   :  { %v9306_v22 = vmax.f32 %v9305_v14, %v8340_v42  ;;  %v8347_v18 = vmax.f32 %v6055_v46, 0.0  ;;  %v6057_v54 = vadd.f32 %v6056_v53, %v16276_v38  ;;  %v5447_v12 = vpop.f32.mrf.mxu0 }
 0x619   :  { %v9193_v57 = vmax.f32 %v9192_v28, %v8442_v8  ;;  %v8449_v49 = vmax.f32 %v5446_v40, 0.0  ;;  %v5448_v50 = vadd.f32 %v5447_v12, %v16161_v0  ;;  %v6058_v30 = vpop.f32.mrf.mxu1 }
 0x61a   :  { %v9244_v16 = vmax.f32 %v9243_v3, %v8347_v18  ;;  %v8348_v7 = vmax.f32 %v6057_v54, 0.0  ;;  %v6059_v31 = vadd.f32 %v6058_v30, %v16267_v21  ;;  %v5451_v25 = vpop.f32.mrf.mxu0  ;;  %6396 = vmatmul.mubr.bf16.gmra.mxu0 %v18358_v61 }
 0x61b   :  { %v9131_v24 = vmax.f32 %v9130_v26, %v8449_v49  ;;  %v8450_v14 = vmax.f32 %v5448_v50, 0.0  ;;  %v5452_v42 = vadd.f32 %v5451_v25, %v16154_v39  ;;  %v6060_v46 = vpop.f32.mrf.mxu1  ;;  %6405 = vmatprep.mubr.bf16.mxu0 %v18315_v6 }
 0x61c   :  { %v9307_v28 = vmax.f32 %v9306_v22, %v8348_v7  ;;  %v8355_v11 = vmax.f32 %v6059_v31, 0.0  ;;  %v6061_v9 = vadd.f32 %v6060_v46, %v16276_v38  ;;  %v5453_v8 = vpop.f32.mrf.mxu0 }
 0x61d   :  { %v9194_v62 = vmax.f32 %v9193_v57, %v8450_v14  ;;  %v8457_v3 = vmax.f32 %v5452_v42, 0.0  ;;  %v5454_v40 = vadd.f32 %v5453_v8, %v16161_v0  ;;  %v6064_v53 = vpop.f32.mrf.mxu1  ;;  %7009 = vmatmul.mubr.bf16.gmra.mxu1 %v18352_v45 }
 0x61e   :  { %v9245_v18 = vmax.f32 %v9244_v16, %v8355_v11  ;;  %v8356_v26 = vmax.f32 %v6061_v9, 0.0  ;;  %v6065_v54 = vadd.f32 %v6064_v53, %v16267_v21  ;;  %v5455_v12 = vpop.f32.mrf.mxu0  ;;  %7018 = vmatprep.mubr.bf16.mxu1 %v18315_v6 }
 0x61f   :  { %v9132_v49 = vmax.f32 %v9131_v24, %v8457_v3  ;;  %v8458_v22 = vmax.f32 %v5454_v40, 0.0  ;;  %v5456_v50 = vadd.f32 %v5455_v12, %v16154_v39  ;;  %v6066_v30 = vpop.f32.mrf.mxu1  ;;  %v18359_v24 = vld [vmem:[#allocation32_spill] sm:$0xff] }
 0x620   :  { %v9308_v7 = vmax.f32 %v9307_v28, %v8356_v26  ;;  %v8363_v57 = vmax.f32 %v6065_v54, 0.0  ;;  %v6067_v31 = vadd.f32 %v6066_v30, %v16276_v38  ;;  %v5457_v25 = vpop.f32.mrf.mxu0 }
 0x621   :  { %v9195_v14 = vmax.f32 %v9194_v62, %v8458_v22  ;;  %v8465_v42 = vmax.f32 %v5456_v50, 0.0  ;;  %v5458_v45 = vadd.f32 %v5457_v25, %v16161_v0  ;;  %v6068_v16 = vpop.f32.mrf.mxu1 }
 0x622   :  { %v9246_v46 = vmax.f32 %v9245_v18, %v8363_v57  ;;  %v8364_v11 = vmax.f32 %v6067_v31, 0.0  ;;  %v6069_v9 = vadd.f32 %v6068_v16, %v16267_v21  ;;  %v5461_v8 = vpop.f32.mrf.mxu0  ;;  %6406 = vmatmul.mubr.bf16.gmra.mxu0 %v18359_v24 }
 0x623   :  { %v9133_v3 = vmax.f32 %v9132_v49, %v8465_v42  ;;  %v8466_v40 = vmax.f32 %v5458_v45, 0.0  ;;  %v5462_v28 = vadd.f32 %v5461_v8, %v16154_v39  ;;  %v6070_v53 = vpop.f32.mrf.mxu1  ;;  %6415 = vmatprep.mubr.bf16.mxu0 %v18315_v6 }
 0x624   :  { %v9309_v26 = vmax.f32 %v9308_v7, %v8364_v11  ;;  %v8371_v62 = vmax.f32 %v6069_v9, 0.0  ;;  %v6071_v54 = vadd.f32 %v6070_v53, %v16276_v38  ;;  %v5463_v12 = vpop.f32.mrf.mxu0 }
 0x625   :  { %v9196_v22 = vmax.f32 %v9195_v14, %v8466_v40  ;;  %v8473_v18 = vmax.f32 %v5462_v28, 0.0  ;;  %v5464_v50 = vadd.f32 %v5463_v12, %v16161_v0  ;;  %v6074_v30 = vpop.f32.mrf.mxu1  ;;  %7019 = vmatmul.mubr.bf16.gmra.mxu1 %v18353_v19 }
 0x626   :  { %v9247_v57 = vmax.f32 %v9246_v46, %v8371_v62  ;;  %v8372_v49 = vmax.f32 %v6071_v54, 0.0  ;;  %v6075_v31 = vadd.f32 %v6074_v30, %v16267_v21  ;;  %v5465_v25 = vpop.f32.mrf.mxu0  ;;  %7028 = vmatprep.mubr.bf16.mxu1 %v18315_v6 }
 0x627   :  { %v9134_v42 = vmax.f32 %v9133_v3, %v8473_v18  ;;  %v8474_v7 = vmax.f32 %v5464_v50, 0.0  ;;  %v5466_v45 = vadd.f32 %v5465_v25, %v16154_v39  ;;  %v6076_v16 = vpop.f32.mrf.mxu1  ;;  %v18360_v3 = vld [vmem:[#allocation37_spill] sm:$0xff] }
 0x628   :  { %v9310_v11 = vmax.f32 %v9309_v26, %v8372_v49  ;;  %v8379_v14 = vmax.f32 %v6075_v31, 0.0  ;;  %v6077_v9 = vadd.f32 %v6076_v16, %v16276_v38  ;;  %v5467_v8 = vpop.f32.mrf.mxu0 }
 0x629   :  { %v9197_v40 = vmax.f32 %v9196_v22, %v8474_v7  ;;  %v8481_v28 = vmax.f32 %v5466_v45, 0.0  ;;  %v5468_v19 = vadd.f32 %v5467_v8, %v16161_v0  ;;  %v6078_v46 = vpop.f32.mrf.mxu1 }
 0x62a   :  { %v9248_v53 = vmax.f32 %v9247_v57, %v8379_v14  ;;  %v8380_v62 = vmax.f32 %v6077_v9, 0.0  ;;  %v6079_v54 = vadd.f32 %v6078_v46, %v16267_v21  ;;  %v5471_v12 = vpop.f32.mrf.mxu0  ;;  %6416 = vmatmul.mubr.bf16.gmra.mxu0 %v18360_v3 }
 0x62b   :  { %v9135_v18 = vmax.f32 %v9134_v42, %v8481_v28  ;;  %v8482_v50 = vmax.f32 %v5468_v19, 0.0  ;;  %v5472_v26 = vadd.f32 %v5471_v12, %v16154_v39  ;;  %v6080_v30 = vpop.f32.mrf.mxu1  ;;  %6425 = vmatprep.mubr.bf16.mxu0 %v18315_v6 }
 0x62c   :  { %v9311_v49 = vmax.f32 %v9310_v11, %v8380_v62  ;;  %v8387_v22 = vmax.f32 %v6079_v54, 0.0  ;;  %v6081_v31 = vadd.f32 %v6080_v30, %v16276_v38  ;;  %v5473_v25 = vpop.f32.mrf.mxu0 }
 0x62d   :  { %v9198_v7 = vmax.f32 %v9197_v40, %v8482_v50  ;;  %v8489_v57 = vmax.f32 %v5472_v26, 0.0  ;;  %v5474_v45 = vadd.f32 %v5473_v25, %v16161_v0  ;;  %v6084_v16 = vpop.f32.mrf.mxu1  ;;  %7029 = vmatmul.mubr.bf16.gmra.mxu1 %v18354_v51 }
 0x62e   :  { %v9249_v14 = vmax.f32 %v9248_v53, %v8387_v22  ;;  %v8388_v42 = vmax.f32 %v6081_v31, 0.0  ;;  %v6085_v9 = vadd.f32 %v6084_v16, %v16267_v21  ;;  %v5475_v8 = vpop.f32.mrf.mxu0  ;;  %7038 = vmatprep.mubr.bf16.mxu1 %v18315_v6 }
 0x62f   :  { %v9136_v28 = vmax.f32 %v9135_v18, %v8489_v57  ;;  %v8490_v11 = vmax.f32 %v5474_v45, 0.0  ;;  %v5476_v19 = vadd.f32 %v5475_v8, %v16154_v39  ;;  %v6086_v46 = vpop.f32.mrf.mxu1  ;;  %v18361_v18 = vld [vmem:[#allocation35_spill] sm:$0xff] }
 0x630   :  { %v9312_v62 = vmax.f32 %v9311_v49, %v8388_v42  ;;  %v8395_v40 = vmax.f32 %v6085_v9, 0.0  ;;  %v6087_v54 = vadd.f32 %v6086_v46, %v16276_v38  ;;  %v5477_v12 = vpop.f32.mrf.mxu0 }
 0x631   :  { %v9199_v50 = vmax.f32 %v9198_v7, %v8490_v11  ;;  %v8497_v26 = vmax.f32 %v5476_v19, 0.0  ;;  %v5478_v51 = vadd.f32 %v5477_v12, %v16161_v0  ;;  %v6088_v53 = vpop.f32.mrf.mxu1  ;;  %v13981_v11 = vld [vmem:[#allocation9 + $0x80] ss:$16 sps:$4 sm:$0xff]  }
 0x632   :  { %v9250_v30 = vmax.f32 %v9249_v14, %v8395_v40  ;;  %v8396_v22 = vmax.f32 %v6087_v54, 0.0  ;;  %v6089_v31 = vadd.f32 %v6088_v53, %v16267_v21  ;;  %v5481_v25 = vpop.f32.mrf.mxu0  ;;  %6426 = vmatmul.mubr.bf16.gmra.mxu0 %v18361_v18  ;;  %v13983_v14 = vld [vmem:[#allocation9 + $0x84] ss:$16 sps:$4 sm:$0xff]  }
 0x633   :  { %v9137_v57 = vmax.f32 %v9136_v28, %v8497_v26  ;;  %v8498_v45 = vmax.f32 %v5478_v51, 0.0  ;;  %v5482_v49 = vadd.f32 %v5481_v25, %v16154_v39  ;;  %v6090_v16 = vpop.f32.mrf.mxu1  ;;  %6435 = vmatprep.mubr.bf16.mxu0 %v18315_v6  ;;  %11307 = vmatprep.subr.bf16.mxu0 %v13983_v14  ;;  %v13986_v53 = vld [vmem:[#allocation9 + $0x284] ss:$16 sps:$4 sm:$0xff]  }
 0x634   :  { %v9313_v42 = vmax.f32 %v9312_v62, %v8396_v22  ;;  %v8403_v7 = vmax.f32 %v6089_v31, 0.0  ;;  %v6091_v9 = vadd.f32 %v6090_v16, %v16276_v38  ;;  %v5483_v8 = vpop.f32.mrf.mxu0  ;;  %v13984_v62 = vld [vmem:[#allocation9 + $0x280] ss:$16 sps:$4 sm:$0xff]   ;;  %v9621_v22 = vrot.slane %v16623_v4, 4  ;;  %11308 = vmatpush1.bf16.msra.mxu0 %v13981_v11  ;;  %11348 = vmatprep.subr.bf16.mxu1 %v13986_v53 }
 0x635   :  { %v9200_v19 = vmax.f32 %v9199_v50, %v8498_v45  ;;  %v8505_v46 = vmax.f32 %v5482_v49, 0.0  ;;  %v5484_v40 = vadd.f32 %v5483_v8, %v16161_v0  ;;  %v6094_v54 = vpop.f32.mrf.mxu1  ;;  %7039 = vmatmul.mubr.bf16.gmra.mxu1 %v18355_v15 }
 0x636   :  { %v9251_v28 = vmax.f32 %v9250_v30, %v8403_v7  ;;  %v8404_v12 = vmax.f32 %v6091_v9, 0.0  ;;  %v6095_v26 = vadd.f32 %v6094_v54, %v16267_v21  ;;  %v5485_v51 = vpop.f32.mrf.mxu0  ;;  %7048 = vmatprep.mubr.bf16.mxu1 %v18315_v6  ;;  %11349 = vmatpush1.bf16.msra.mxu1 %v13984_v62 }
 0x637   :  { %v9138_v31 = vmax.f32 %v9137_v57, %v8505_v46  ;;  %v8506_v50 = vmax.f32 %v5484_v40, 0.0  ;;  %v5486_v25 = vadd.f32 %v5485_v51, %v16154_v39  ;;  %v6096_v45 = vpop.f32.mrf.mxu1  ;;  %v18362_v40 = vld [vmem:[#allocation40_spill] sm:$0xff] }
 0x638   :  { %v9314_v49 = vmax.f32 %v9313_v42, %v8404_v12  ;;  %v8411_v15 = vmax.f32 %v6095_v26, 0.0  ;;  %v6097_v30 = vadd.f32 %v6096_v45, %v16276_v38  ;;  %v5487_v16 = vpop.f32.mrf.mxu0  ;;  %v9622_v42 = vmax.f32 %v16623_v4, %v9621_v22 }
 0x639   :  { %v9201_v7 = vmax.f32 %v9200_v19, %v8506_v50  ;;  %v8513_v9 = vmax.f32 %v5486_v25, 0.0  ;;  %v5488_v8 = vadd.f32 %v5487_v16, %v16161_v0  ;;  %v6098_v14 = vpop.f32.mrf.mxu1  ;;  %v9627_v50 = vrot.slane %v16627_v2, 4 }
 0x63a   :  { %v9252_v54 = vmax.f32 %v9251_v28, %v8411_v15  ;;  %v8412_v47 = vmax.f32 %v6097_v30, 0.0  ;;  %v6099_v57 = vadd.f32 %v6098_v14, %v16267_v21  ;;  %v5491_v46 = vpop.f32.mrf.mxu0  ;;  %6436 = vmatmul.mubr.bf16.gmra.mxu0 %v18362_v40 }
 0x63b   :  { %v9139_v11 = vmax.f32 %v9138_v31, %v8513_v9  ;;  %v8514_v12 = vmax.f32 %v5488_v8, 0.0  ;;  %v5492_v26 = vadd.f32 %v5491_v46, %v16154_v39  ;;  %v6100_v51 = vpop.f32.mrf.mxu1  ;;  %6445 = vmatprep.mubr.bf16.mxu0 %v18315_v6 }
 0x63c   :  { %v9315_v19 = vmax.f32 %v9314_v49, %v8412_v47  ;;  %v8419_v53 = vmax.f32 %v6099_v57, 0.0  ;;  %v6101_v62 = vadd.f32 %v6100_v51, %v16276_v38  ;;  %v5493_v28 = vpop.f32.mrf.mxu0  ;;  %v9623_v47 = vrot.slane %v9622_v42, 2 }
 0x63d   :  { %v9202_v25 = vmax.f32 %v9201_v7, %v8514_v12  ;;  %v8521_v45 = vmax.f32 %v5492_v26, 0.0  ;;  %v5494_v15 = vadd.f32 %v5493_v28, %v16161_v0  ;;  %v6104_v30 = vpop.f32.mrf.mxu1  ;;  %7049 = vmatmul.mubr.bf16.gmra.mxu1 %v18356_v33  ;;  %v9628_v33 = vmax.f32 %v16627_v2, %v9627_v50 }
 0x63e   :  { %v9253_v4 = vmax.f32 %v9252_v54, %v8419_v53  ;;  %v8420_v22 = vmax.f32 %v6101_v62, 0.0  ;;  %v6105_v31 = vadd.f32 %v6104_v30, %v16267_v21  ;;  %v5495_v16 = vpop.f32.mrf.mxu0  ;;  %7058 = vmatprep.mubr.bf16.mxu1 %v18315_v6  ;;  %v9624_v30 = vmax.f32 %v9622_v42, %v9623_v47 }
 0x63f   :  { %v9140_v49 = vmax.f32 %v9139_v11, %v8521_v45  ;;  %v8522_v9 = vmax.f32 %v5494_v15, 0.0  ;;  %v5496_v8 = vadd.f32 %v5495_v16, %v16154_v39  ;;  %v6106_v14 = vpop.f32.mrf.mxu1  ;;  %v18363_v15 = vld [vmem:[#allocation38_spill] sm:$0xff] }
 0x640   :  { %v9316_v7 = vmax.f32 %v9315_v19, %v8420_v22  ;;  %v8427_v57 = vmax.f32 %v6105_v31, 0.0  ;;  %v6107_v46 = vadd.f32 %v6106_v14, %v16276_v38  ;;  %v5497_v12 = vpop.f32.mrf.mxu0  ;;  %v9629_v14 = vrot.slane %v9628_v33, 2 }
 0x641   :  { %v9203_v54 = vmax.f32 %v9202_v25, %v8522_v9  ;;  %v8529_v26 = vmax.f32 %v5496_v8, 0.0  ;;  %v5498_v51 = vadd.f32 %v5497_v12, %v16161_v0  ;;  %v6108_v53 = vpop.f32.mrf.mxu1 }
 0x642   :  { %v9254_v62 = vmax.f32 %v9253_v4, %v8427_v57  ;;  %v8428_v28 = vmax.f32 %v6107_v46, 0.0  ;;  %v6109_v11 = vadd.f32 %v6108_v53, %v16267_v21  ;;  %v5501_v45 = vpop.f32.mrf.mxu0  ;;  %6446 = vmatmul.mubr.bf16.gmra.mxu0 %v18363_v15  ;;  %v18364_v4 = vld [vmem:[#allocation49_spill] sm:$0xff]  ;;  %v9625_v53 = vrot.slane %v9624_v30, 1 }
 0x643   :  { %v9141_v19 = vmax.f32 %v9140_v49, %v8529_v26  ;;  %v8530_v22 = vmax.f32 %v5498_v51, 0.0  ;;  %v5502_v31 = vadd.f32 %v5501_v45, %v16154_v39  ;;  %v6110_v16 = vpop.f32.mrf.mxu1  ;;  %6455 = vmatprep.mubr.bf16.mxu0 %v18315_v6  ;;  %v4495_v8 = vsub.s32 4, %v18364_v4 }
 0x644   :  { %v9317_v2 = vmax.f32 %v9316_v7, %v8428_v28  ;;  %v8435_v50 = vmax.f32 %v6109_v11, 0.0  ;;  %v6111_v25 = vadd.f32 %v6110_v16, %v16276_v38  ;;  %v5503_v9 = vpop.f32.mrf.mxu0  ;;  %v4499_v7 = vsub.s32 5, %v18364_v4 }
 0x645   :  { %v9204_v57 = vmax.f32 %v9203_v54, %v8530_v22  ;;  %v8537_v46 = vmax.f32 %v5502_v31, 0.0  ;;  %v5504_v12 = vadd.f32 %v5503_v9, %v16161_v0  ;;  %v6114_v42 = vpop.f32.mrf.mxu1  ;;  %7059 = vmatmul.mubr.bf16.gmra.mxu1 %v18357_v1 }
 0x646   :  { %v9255_v47 = vmax.f32 %v9254_v62, %v8435_v50  ;;  %v8436_v49 = vmax.f32 %v6111_v25, 0.0  ;;  %v6115_v26 = vadd.f32 %v6114_v42, %v16267_v21  ;;  %v5505_v51 = vpop.f32.mrf.mxu0  ;;  %7068 = vmatprep.mubr.bf16.mxu1 %v18315_v6  ;;  %v18365_v62 = vld [vmem:[#allocation50_spill] sm:$0xff]  ;;  %v17021_v25 = vmax.f32 %v9628_v33, %v9629_v14 }
 0x647   :  { %v9142_v28 = vmax.f32 %v9141_v19, %v8537_v46  ;;  %v8538_v11 = vmax.f32 %v5504_v12, 0.0  ;;  %v5506_v54 = vadd.f32 %v5505_v51, %v16154_v39  ;;  %v6116_v45 = vpop.f32.mrf.mxu1  ;;  %v17019_v50 = vrot.slane %v18365_v62, %v4495_v8 }
 0x648   :  { %v9318_v22 = vmax.f32 %v9317_v2, %v8436_v49  ;;  %v8443_v31 = vmax.f32 %v6115_v26, 0.0  ;;  %v6117_v16 = vadd.f32 %v6116_v45, %v16276_v38  ;;  %v5507_v1 = vpop.f32.mrf.mxu0  ;;  %v18366_v2 = vld [vmem:[#allocation42_spill] sm:$0xff]  ;;  %v17027_v49 = vrot.slane %v18365_v62, %v4499_v7 }
 0x649   :  { %v9205_v9 = vmax.f32 %v9204_v57, %v8538_v11  ;;  %v8545_v42 = vmax.f32 %v5506_v54, 0.0  ;;  %v5508_v37 = vadd.f32 %v5507_v1, %v16161_v0  ;;  %v6118_v63 = vpop.f32.mrf.mxu1  ;;  %v17032_v11 = vmax.f32 %v9624_v30, %v9625_v53 }
 0x64a   :  { %v9256_v19 = vmax.f32 %v9255_v47, %v8443_v31  ;;  %v8444_v46 = vmax.f32 %v6117_v16, 0.0  ;;  %v6119_v39 = vadd.f32 %v6118_v63, %v16267_v21  ;;  %v6217_v12 = vpop.f32.mrf.mxu0  ;;  %6456 = vmatmul.mubr.bf16.gmra.mxu0 %v18366_v2 }
 0x64b   :  { %v9143_v26 = vmax.f32 %v9142_v28, %v8545_v42  ;;  %v8546_v8 = vmax.f32 %v5508_v37, 0.0  ;;  %v6120_v51 = vpop.f32.mrf.mxu1  ;;  %6465 = vmatprep.mubr.bf16.mxu0 %v18315_v6  ;;  %v6218_v0 = vadd.f32 %v6217_v12, %v17019_v50 }
 0x64c   :  { %v9319_v33 = vmax.f32 %v9318_v22, %v8444_v46  ;;  %v8451_v14 = vmax.f32 %v6119_v39, 0.0  ;;  %v6121_v57 = vadd.f32 %v6120_v51, %v16276_v38  ;;  %v6219_v47 = vpop.f32.mrf.mxu0 }
 0x64d   :  { %v9677_v54 = vrot.slane %v9143_v26, 4  ;;  %v9206_v45 = vmax.f32 %v9205_v9, %v8546_v8  ;;  %v6124_v7 = vpop.f32.mrf.mxu1  ;;  %7069 = vmatmul.mubr.bf16.gmra.mxu1 %v18358_v61  ;;  %v6220_v31 = vadd.f32 %v6219_v47, %v17027_v49  ;;  %v7533_v46 = vmax.f32 %v6218_v0, 0.0 }
 0x64e   :  { %v9257_v37 = vmax.f32 %v9256_v19, %v8451_v14  ;;  %v8452_v28 = vmax.f32 %v6121_v57, 0.0  ;;  %v6125_v22 = vadd.f32 %v6124_v7, %v16267_v21  ;;  %v6221_v16 = vpop.f32.mrf.mxu0  ;;  %7078 = vmatprep.mubr.bf16.mxu1 %v18315_v6 }
 0x64f   :  { %v9678_v1 = vmax.f32 %v9143_v26, %v9677_v54  ;;  %v9683_v30 = vrot.slane %v9206_v45, 4  ;;  %v6222_v53 = vadd.f32 %v6221_v16, %v17019_v50  ;;  %v6126_v42 = vpop.f32.mrf.mxu1  ;;  %v7534_v47 = vmax.f32 %v6220_v31, 0.0 }
 0x650   :  { %v9320_v9 = vmax.f32 %v9319_v33, %v8452_v28  ;;  %v8459_v39 = vmax.f32 %v6125_v22, 0.0  ;;  %v6127_v61 = vadd.f32 %v6126_v42, %v16276_v38  ;;  %v6223_v19 = vpop.f32.mrf.mxu0  ;;  %v13987_v42 = vld [vmem:[#allocation9 + $0x60] ss:$16 sps:$4 sm:$0xff]  }
 0x651   :  { %v9679_v12 = vrot.slane %v9678_v1, 2  ;;  %v9684_v8 = vmax.f32 %v9206_v45, %v9683_v30  ;;  %v7541_v51 = vmax.f32 %v6222_v53, 0.0  ;;  %v6224_v14 = vadd.f32 %v6223_v19, %v17027_v49  ;;  %v6128_v57 = vpop.f32.mrf.mxu1 }
 0x652   :  { %v9258_v7 = vmax.f32 %v9257_v37, %v8459_v39  ;;  %v8460_v26 = vmax.f32 %v6127_v61, 0.0  ;;  %v6129_v54 = vadd.f32 %v6128_v57, %v16267_v21  ;;  %v6227_v63 = vpop.f32.mrf.mxu0  ;;  %6466 = vmatmul.mubr.bf16.gmra.mxu0 %v15952_v44  ;;  %v13989_v39 = vld [vmem:[#allocation9 + $0x64] ss:$16 sps:$4 sm:$0xff]  }
 0x653   :  { %v9680_v0 = vmax.f32 %v9678_v1, %v9679_v12  ;;  %v9685_v33 = vrot.slane %v9684_v8, 2  ;;  %v8805_v28 = vmax.f32 %v7533_v46, %v7541_v51  ;;  %v7542_v22 = vmax.f32 %v6224_v14, 0.0  ;;  %v6130_v16 = vpop.f32.mrf.mxu1  ;;  %6475 = vmatprep.mubr.bf16.mxu0 %v18315_v6  ;;  %11309 = vmatprep.subr.bf16.mxu0 %v13989_v39 }
 0x654   :  { %v9321_v45 = vmax.f32 %v9320_v9, %v8460_v26  ;;  %v8467_v30 = vmax.f32 %v6129_v54, 0.0  ;;  %v6228_v53 = vadd.f32 %v6227_v63, %v17019_v50  ;;  %v6131_v31 = vadd.f32 %v6130_v16, %v16276_v38  ;;  %v6229_v37 = vpop.f32.mrf.mxu0  ;;  %v13990_v63 = vld [vmem:[#allocation9 + $0x260] ss:$16 sps:$4 sm:$0xff]   ;;  %v13992_v54 = vld [vmem:[#allocation9 + $0x264] ss:$16 sps:$4 sm:$0xff]   ;;  %11310 = vmatpush1.bf16.msra.mxu0 %v13987_v42 }
 0x655   :  { %v9681_v61 = vrot.slane %v9680_v0, 1  ;;  %v9686_v19 = vmax.f32 %v9684_v8, %v9685_v33  ;;  %v8868_v57 = vmax.f32 %v7534_v47, %v7542_v22  ;;  %v6230_v1 = vadd.f32 %v6229_v37, %v17027_v49  ;;  %v6134_v12 = vpop.f32.mrf.mxu1  ;;  %7079 = vmatmul.mubr.bf16.gmra.mxu1 %v18359_v24  ;;  %11350 = vmatprep.subr.bf16.mxu1 %v13992_v54 }
 0x656   :  { %v9259_v46 = vmax.f32 %v9258_v7, %v8467_v30  ;;  %v7549_v51 = vmax.f32 %v6228_v53, 0.0  ;;  %v8468_v14 = vmax.f32 %v6131_v31, 0.0  ;;  %v6135_v9 = vadd.f32 %v6134_v12, %v16267_v21  ;;  %v6231_v26 = vpop.f32.mrf.mxu0  ;;  %7088 = vmatprep.mubr.bf16.mxu1 %v18315_v6  ;;  %11351 = vmatpush1.bf16.msra.mxu1 %v13990_v63 }
 0x657   :  { %v9682_v16 = vmax.f32 %v9680_v0, %v9681_v61  ;;  %v9687_v36 = vrot.slane %v9686_v19, 1  ;;  %v7550_v8 = vmax.f32 %v6230_v1, 0.0  ;;  %v6232_v47 = vadd.f32 %v6231_v26, %v17019_v50  ;;  %v6136_v33 = vpop.f32.mrf.mxu1 }
 0x658   :  { %v8806_v22 = vmax.f32 %v8805_v28, %v7549_v51  ;;  %v9322_v24 = vmax.f32 %v9321_v45, %v8468_v14  ;;  %v8475_v7 = vmax.f32 %v6135_v9, 0.0  ;;  %v6137_v30 = vadd.f32 %v6136_v33, %v16276_v38  ;;  %v6233_v53 = vpop.f32.mrf.mxu0 }
 0x659   :  { %v17055_v31 = vsel %vm9725_vm3, %v17032_v11, %v9682_v16  ;;  %v8869_v37 = vmax.f32 %v8868_v57, %v7550_v8  ;;  %v7557_v39 = vmax.f32 %v6232_v47, 0.0  ;;  %v6234_v0 = vadd.f32 %v6233_v53, %v17027_v49  ;;  %v6138_v61 = vpop.f32.mrf.mxu1 }
 0x65a   :  { %v9260_v1 = vmax.f32 %v9259_v46, %v8475_v7  ;;  %v8476_v12 = vmax.f32 %v6137_v30, 0.0  ;;  %v6139_v28 = vadd.f32 %v6138_v61, %v16267_v21  ;;  %v6237_v45 = vpop.f32.mrf.mxu0  ;;  %6476 = vmatmul.mubr.bf16.gmra.mxu0 %v15977_v13  ;;  %v18367_v42 = vrot.slane %v17021_v25, 1 }
 0x65b   :  { %v8807_v14 = vmax.f32 %v8806_v22, %v7557_v39  ;;  %v7558_v11 = vmax.f32 %v6234_v0, 0.0  ;;  %v6238_v57 = vadd.f32 %v6237_v45, %v17019_v50  ;;  %v6140_v9 = vpop.f32.mrf.mxu1  ;;  %6485 = vmatprep.mubr.bf16.mxu0 %v18315_v6  ;;  %v9688_v26 = vmax.f32 %v9686_v19, %v9687_v36 }
 0x65c   :  { %v9632_v51 = vmax.f32 %v17021_v25, %v18367_v42  ;;  %v9323_v63 = vmax.f32 %v9322_v24, %v8476_v12  ;;  %v8483_v46 = vmax.f32 %v6139_v28, 0.0  ;;  %v6141_v54 = vadd.f32 %v6140_v9, %v16276_v38  ;;  %v6239_v16 = vpop.f32.mrf.mxu0 }
 0x65d   :  { %v8870_v8 = vmax.f32 %v8869_v37, %v7558_v11  ;;  %v7565_v47 = vmax.f32 %v6238_v57, 0.0  ;;  %v6240_v33 = vadd.f32 %v6239_v16, %v17027_v49  ;;  %v6144_v7 = vpop.f32.mrf.mxu1  ;;  %7089 = vmatmul.mubr.bf16.gmra.mxu1 %v18360_v3 }
 0x65e   :  { %v17069_v25 = vsel %vm9725_vm3, %v9632_v51, %v9688_v26  ;;  %v9261_v22 = vmax.f32 %v9260_v1, %v8483_v46  ;;  %v8484_v30 = vmax.f32 %v6141_v54, 0.0  ;;  %v6145_v53 = vadd.f32 %v6144_v7, %v16267_v21  ;;  %v6241_v36 = vpop.f32.mrf.mxu0  ;;  %7098 = vmatprep.mubr.bf16.mxu1 %v18315_v6 }
 0x65f   :  { %v8808_v19 = vmax.f32 %v8807_v14, %v7565_v47  ;;  %v7566_v24 = vmax.f32 %v6240_v33, 0.0  ;;  %v6242_v37 = vadd.f32 %v6241_v36, %v17019_v50  ;;  %v6146_v39 = vpop.f32.mrf.mxu1 }
 0x660   :  { %v9324_v0 = vmax.f32 %v9323_v63, %v8484_v30  ;;  %v8491_v61 = vmax.f32 %v6145_v53, 0.0  ;;  %v6147_v12 = vadd.f32 %v6146_v39, %v16276_v38  ;;  %v6243_v3 = vpop.f32.mrf.mxu0 }
 0x661   :  { %v8871_v28 = vmax.f32 %v8870_v8, %v7566_v24  ;;  %v7573_v45 = vmax.f32 %v6242_v37, 0.0  ;;  %v6244_v1 = vadd.f32 %v6243_v3, %v17027_v49  ;;  %v6148_v42 = vpop.f32.mrf.mxu1 }
 0x662   :  { %v9262_v51 = vmax.f32 %v9261_v22, %v8491_v61  ;;  %v8492_v11 = vmax.f32 %v6147_v12, 0.0  ;;  %v6149_v57 = vadd.f32 %v6148_v42, %v16267_v21  ;;  %v6247_v9 = vpop.f32.mrf.mxu0  ;;  %6486 = vmatmul.mubr.bf16.gmra.mxu0 %v15970_v55 }
 0x663   :  { %v8809_v14 = vmax.f32 %v8808_v19, %v7573_v45  ;;  %v7574_v26 = vmax.f32 %v6244_v1, 0.0  ;;  %v6248_v63 = vadd.f32 %v6247_v9, %v17019_v50  ;;  %v6150_v46 = vpop.f32.mrf.mxu1  ;;  %6495 = vmatprep.mubr.bf16.mxu0 %v18315_v6 }
 0x664   :  { %v9325_v54 = vmax.f32 %v9324_v0, %v8492_v11  ;;  %v8499_v16 = vmax.f32 %v6149_v57, 0.0  ;;  %v6151_v8 = vadd.f32 %v6150_v46, %v16276_v38  ;;  %v6249_v47 = vpop.f32.mrf.mxu0 }
 0x665   :  { %v8872_v33 = vmax.f32 %v8871_v28, %v7574_v26  ;;  %v7581_v7 = vmax.f32 %v6248_v63, 0.0  ;;  %v6250_v22 = vadd.f32 %v6249_v47, %v17027_v49  ;;  %v6154_v30 = vpop.f32.mrf.mxu1  ;;  %7099 = vmatmul.mubr.bf16.gmra.mxu1 %v18361_v18 }
 0x666   :  { %v9263_v53 = vmax.f32 %v9262_v51, %v8499_v16  ;;  %v8500_v36 = vmax.f32 %v6151_v8, 0.0  ;;  %v6155_v19 = vadd.f32 %v6154_v30, %v16267_v21  ;;  %v6251_v24 = vpop.f32.mrf.mxu0  ;;  %7108 = vmatprep.mubr.bf16.mxu1 %v18315_v6  ;;  %v9633_v16 = vrot.slane %v16704_v20, 4 }
 0x667   :  { %v8810_v37 = vmax.f32 %v8809_v14, %v7581_v7  ;;  %v7582_v39 = vmax.f32 %v6250_v22, 0.0  ;;  %v6252_v0 = vadd.f32 %v6251_v24, %v17019_v50  ;;  %v6156_v61 = vpop.f32.mrf.mxu1 }
 0x668   :  { %v9326_v12 = vmax.f32 %v9325_v54, %v8500_v36  ;;  %v8507_v3 = vmax.f32 %v6155_v19, 0.0  ;;  %v6157_v28 = vadd.f32 %v6156_v61, %v16276_v38  ;;  %v6253_v45 = vpop.f32.mrf.mxu0 }
 0x669   :  { %v8873_v1 = vmax.f32 %v8872_v33, %v7582_v39  ;;  %v7589_v42 = vmax.f32 %v6252_v0, 0.0  ;;  %v6254_v18 = vadd.f32 %v6253_v45, %v17027_v49  ;;  %v6158_v51 = vpop.f32.mrf.mxu1 }
 0x66a   :  { %v9264_v11 = vmax.f32 %v9263_v53, %v8507_v3  ;;  %v8508_v57 = vmax.f32 %v6157_v28, 0.0  ;;  %v6159_v9 = vadd.f32 %v6158_v51, %v16267_v21  ;;  %v6257_v26 = vpop.f32.mrf.mxu0  ;;  %6496 = vmatmul.mubr.bf16.gmra.mxu0 %v15993_v58  ;;  %v9634_v28 = vmax.f32 %v16704_v20, %v9633_v16 }
 0x66b   :  { %v8811_v14 = vmax.f32 %v8810_v37, %v7589_v42  ;;  %v7590_v63 = vmax.f32 %v6254_v18, 0.0  ;;  %v6258_v46 = vadd.f32 %v6257_v26, %v17019_v50  ;;  %v6160_v54 = vpop.f32.mrf.mxu1  ;;  %6505 = vmatprep.mubr.bf16.mxu0 %v18315_v6 }
 0x66c   :  { %v9327_v8 = vmax.f32 %v9326_v12, %v8508_v57  ;;  %v8515_v47 = vmax.f32 %v6159_v9, 0.0  ;;  %v6161_v33 = vadd.f32 %v6160_v54, %v16276_v38  ;;  %v6259_v7 = vpop.f32.mrf.mxu0  ;;  %v9639_v9 = vrot.slane %v16708_v23, 4 }
 0x66d   :  { %v8874_v22 = vmax.f32 %v8873_v1, %v7590_v63  ;;  %v7597_v30 = vmax.f32 %v6258_v46, 0.0  ;;  %v6260_v53 = vadd.f32 %v6259_v7, %v17027_v49  ;;  %v6164_v36 = vpop.f32.mrf.mxu1  ;;  %7109 = vmatmul.mubr.bf16.gmra.mxu1 %v18362_v40 }
 0x66e   :  { %v9265_v19 = vmax.f32 %v9264_v11, %v8515_v47  ;;  %v8516_v24 = vmax.f32 %v6161_v33, 0.0  ;;  %v6165_v37 = vadd.f32 %v6164_v36, %v16267_v21  ;;  %v6261_v39 = vpop.f32.mrf.mxu0  ;;  %7118 = vmatprep.mubr.bf16.mxu1 %v18315_v6  ;;  %v9635_v47 = vrot.slane %v9634_v28, 2  ;;  %v13995_v36 = vld [vmem:[#allocation9 + $0x44] ss:$16 sps:$4 sm:$0xff]  }
 0x66f   :  { %v8812_v0 = vmax.f32 %v8811_v14, %v7597_v30  ;;  %v7598_v61 = vmax.f32 %v6260_v53, 0.0  ;;  %v6262_v12 = vadd.f32 %v6261_v39, %v17019_v50  ;;  %v6166_v3 = vpop.f32.mrf.mxu1  ;;  %v13993_v53 = vld [vmem:[#allocation9 + $0x40] ss:$16 sps:$4 sm:$0xff]   ;;  %11311 = vmatprep.subr.bf16.mxu0 %v13995_v36 }
 0x670   :  { %v9328_v45 = vmax.f32 %v9327_v8, %v8516_v24  ;;  %v8523_v1 = vmax.f32 %v6165_v37, 0.0  ;;  %v6167_v42 = vadd.f32 %v6166_v3, %v16276_v38  ;;  %v6263_v18 = vpop.f32.mrf.mxu0  ;;  %11312 = vmatpush1.bf16.msra.mxu0 %v13993_v53 }
 0x671   :  { %v8875_v40 = vmax.f32 %v8874_v22, %v7598_v61  ;;  %v7605_v51 = vmax.f32 %v6262_v12, 0.0  ;;  %v6264_v11 = vadd.f32 %v6263_v18, %v17027_v49  ;;  %v6168_v57 = vpop.f32.mrf.mxu1 }
 0x672   :  { %v9266_v26 = vmax.f32 %v9265_v19, %v8523_v1  ;;  %v8524_v14 = vmax.f32 %v6167_v42, 0.0  ;;  %v6169_v63 = vadd.f32 %v6168_v57, %v16267_v21  ;;  %v6267_v46 = vpop.f32.mrf.mxu0  ;;  %6506 = vmatmul.mubr.bf16.gmra.mxu0 %v15988_v35  ;;  %v13996_v1 = vld [vmem:[#allocation9 + $0x240] ss:$16 sps:$4 sm:$0xff]   ;;  %v13998_v42 = vld [vmem:[#allocation9 + $0x244] ss:$16 sps:$4 sm:$0xff]   ;;  %v4503_v57 = vsub.s32 6, %v18364_v4 }
 0x673   :  { %v8813_v20 = vmax.f32 %v8812_v0, %v7605_v51  ;;  %v7606_v54 = vmax.f32 %v6264_v11, 0.0  ;;  %v6268_v16 = vadd.f32 %v6267_v46, %v17019_v50  ;;  %v6170_v8 = vpop.f32.mrf.mxu1  ;;  %6515 = vmatprep.mubr.bf16.mxu0 %v18315_v6  ;;  %v9640_v0 = vmax.f32 %v16708_v23, %v9639_v9  ;;  %11352 = vmatprep.subr.bf16.mxu1 %v13998_v42 }
 0x674   :  { %v9329_v33 = vmax.f32 %v9328_v45, %v8524_v14  ;;  %v8531_v7 = vmax.f32 %v6169_v63, 0.0  ;;  %v6171_v22 = vadd.f32 %v6170_v8, %v16276_v38  ;;  %v6269_v30 = vpop.f32.mrf.mxu0  ;;  %11353 = vmatpush1.bf16.msra.mxu1 %v13996_v1 }
 0x675   :  { %v8876_v19 = vmax.f32 %v8875_v40, %v7606_v54  ;;  %v7613_v24 = vmax.f32 %v6268_v16, 0.0  ;;  %v6270_v37 = vadd.f32 %v6269_v30, %v17027_v49  ;;  %v6174_v39 = vpop.f32.mrf.mxu1  ;;  %7119 = vmatmul.mubr.bf16.gmra.mxu1 %v18363_v15  ;;  %v9636_v15 = vmax.f32 %v9634_v28, %v9635_v47 }
 0x676   :  { %v9267_v61 = vmax.f32 %v9266_v26, %v8531_v7  ;;  %v8532_v12 = vmax.f32 %v6171_v22, 0.0  ;;  %v6175_v3 = vadd.f32 %v6174_v39, %v16267_v21  ;;  %v6271_v45 = vpop.f32.mrf.mxu0  ;;  %7128 = vmatprep.mubr.bf16.mxu1 %v18315_v6  ;;  %v9641_v8 = vrot.slane %v9640_v0, 2 }
 0x677   :  { %v8814_v18 = vmax.f32 %v8813_v20, %v7613_v24  ;;  %v7614_v40 = vmax.f32 %v6270_v37, 0.0  ;;  %v6272_v51 = vadd.f32 %v6271_v45, %v17019_v50  ;;  %v6176_v11 = vpop.f32.mrf.mxu1  ;;  %v4507_v20 = vsub.s32 7, %v18364_v4 }
 0x678   :  { %v9330_v23 = vmax.f32 %v9329_v33, %v8532_v12  ;;  %v8539_v9 = vmax.f32 %v6175_v3, 0.0  ;;  %v6177_v26 = vadd.f32 %v6176_v11, %v16276_v38  ;;  %v6273_v14 = vpop.f32.mrf.mxu0  ;;  %v9637_v24 = vrot.slane %v9636_v15, 1 }
 0x679   :  { %v8877_v63 = vmax.f32 %v8876_v19, %v7614_v40  ;;  %v7621_v46 = vmax.f32 %v6272_v51, 0.0  ;;  %v6274_v54 = vadd.f32 %v6273_v14, %v17027_v49  ;;  %v6178_v16 = vpop.f32.mrf.mxu1  ;;  %v17122_v19 = vrot.slane %v18365_v62, %v4503_v57 }
 0x67a   :  { %v9268_v7 = vmax.f32 %v9267_v61, %v8539_v9  ;;  %v8540_v22 = vmax.f32 %v6177_v26, 0.0  ;;  %v6179_v30 = vadd.f32 %v6178_v16, %v16267_v21  ;;  %v6277_v28 = vpop.f32.mrf.mxu0  ;;  %6516 = vmatmul.mubr.bf16.gmra.mxu0 %v16011_v59  ;;  %v17129_v42 = vrot.slane %v18365_v62, %v4507_v20 }
 0x67b   :  { %v8815_v47 = vmax.f32 %v8814_v18, %v7621_v46  ;;  %v7622_v33 = vmax.f32 %v6274_v54, 0.0  ;;  %v6278_v53 = vadd.f32 %v6277_v28, %v17019_v50  ;;  %v6180_v36 = vpop.f32.mrf.mxu1  ;;  %6525 = vmatprep.mubr.bf16.mxu0 %v18315_v6  ;;  %v17131_v18 = vmax.f32 %v9640_v0, %v9641_v8 }
 0x67c   :  { %v9331_v37 = vmax.f32 %v9330_v23, %v8540_v22  ;;  %v8547_v39 = vmax.f32 %v6179_v30, 0.0  ;;  %v6181_v61 = vadd.f32 %v6180_v36, %v16276_v38  ;;  %v6279_v12 = vpop.f32.mrf.mxu0  ;;  %v17136_v14 = vmax.f32 %v9636_v15, %v9637_v24 }
 0x67d   :  { %v8878_v21 = vmax.f32 %v8877_v63, %v7622_v33  ;;  %v7629_v3 = vmax.f32 %v6278_v53, 0.0  ;;  %v6280_v45 = vadd.f32 %v6279_v12, %v17027_v49  ;;  %v6890_v1 = vpop.f32.mrf.mxu1  ;;  %7129 = vmatmul.mubr.bf16.gmra.mxu1 %v18366_v2  ;;  %v9643_v8 = vrot.slane %v17131_v18, 1 }
 0x67e   :  { %v9269_v40 = vmax.f32 %v9268_v7, %v8547_v39  ;;  %v8548_v51 = vmax.f32 %v6181_v61, 0.0  ;;  %v6281_v11 = vpop.f32.mrf.mxu0  ;;  %7138 = vmatprep.mubr.bf16.mxu1 %v18315_v6  ;;  %v6891_v23 = vadd.f32 %v6890_v1, %v17122_v19 }
 0x67f   :  { %v8816_v57 = vmax.f32 %v8815_v47, %v7629_v3  ;;  %v7630_v38 = vmax.f32 %v6280_v45, 0.0  ;;  %v6282_v9 = vadd.f32 %v6281_v11, %v17019_v50  ;;  %v6892_v26 = vpop.f32.mrf.mxu1  ;;  %v18368_v47 = vld [vmem:[#allocation45_spill] sm:$0xff] }
 0x680   :  { %v9689_v2 = vrot.slane %v9269_v40, 4  ;;  %v9332_v63 = vmax.f32 %v9331_v37, %v8548_v51  ;;  %v6283_v62 = vpop.f32.mrf.mxu0  ;;  %v6893_v54 = vadd.f32 %v6892_v26, %v17129_v42  ;;  %v7535_v15 = vmax.f32 %v6891_v23, 0.0 }
 0x681   :  { %v8879_v46 = vmax.f32 %v8878_v21, %v7630_v38  ;;  %v7637_v0 = vmax.f32 %v6282_v9, 0.0  ;;  %v6284_v16 = vadd.f32 %v6283_v62, %v17027_v49  ;;  %v6894_v20 = vpop.f32.mrf.mxu1 }
 0x682   :  { %v9690_v7 = vmax.f32 %v9269_v40, %v9689_v2  ;;  %v9695_v22 = vrot.slane %v9332_v63, 4  ;;  %v6895_v30 = vadd.f32 %v6894_v20, %v17122_v19  ;;  %v6287_v28 = vpop.f32.mrf.mxu0  ;;  %6526 = vmatmul.mubr.bf16.gmra.mxu0 %v18368_v47  ;;  %v7536_v3 = vmax.f32 %v6893_v54, 0.0 }
 0x683   :  { %v8817_v33 = vmax.f32 %v8816_v57, %v7637_v0  ;;  %v7638_v53 = vmax.f32 %v6284_v16, 0.0  ;;  %v6288_v36 = vadd.f32 %v6287_v28, %v17019_v50  ;;  %v6896_v24 = vpop.f32.mrf.mxu1  ;;  %6535 = vmatprep.mubr.bf16.mxu0 %v18315_v6 }
 0x684   :  { %v9691_v37 = vrot.slane %v9690_v7, 2  ;;  %v9696_v39 = vmax.f32 %v9332_v63, %v9695_v22  ;;  %v7543_v61 = vmax.f32 %v6895_v30, 0.0  ;;  %v6897_v12 = vadd.f32 %v6896_v24, %v17129_v42  ;;  %v6289_v21 = vpop.f32.mrf.mxu0 }
 0x685   :  { %v8880_v45 = vmax.f32 %v8879_v46, %v7638_v53  ;;  %v7645_v1 = vmax.f32 %v6288_v36, 0.0  ;;  %v6290_v40 = vadd.f32 %v6289_v21, %v17027_v49  ;;  %v6900_v51 = vpop.f32.mrf.mxu1  ;;  %7139 = vmatmul.mubr.bf16.gmra.mxu1 %v15952_v44 }
 0x686   :  { %v9692_v11 = vmax.f32 %v9690_v7, %v9691_v37  ;;  %v9697_v57 = vrot.slane %v9696_v39, 2  ;;  %v8931_v38 = vmax.f32 %v7535_v15, %v7543_v61  ;;  %v7544_v23 = vmax.f32 %v6897_v12, 0.0  ;;  %v6291_v9 = vpop.f32.mrf.mxu0  ;;  %7148 = vmatprep.mubr.bf16.mxu1 %v18315_v6  ;;  %v18369_v61 = vld [vmem:[#allocation46_spill] sm:$0xff] }
 0x687   :  { %v8818_v26 = vmax.f32 %v8817_v33, %v7645_v1  ;;  %v7646_v2 = vmax.f32 %v6290_v40, 0.0  ;;  %v6901_v63 = vadd.f32 %v6900_v51, %v17122_v19  ;;  %v6292_v62 = vadd.f32 %v6291_v9, %v17019_v50  ;;  %v6902_v46 = vpop.f32.mrf.mxu1 }
 0x688   :  { %v9693_v0 = vrot.slane %v9692_v11, 1  ;;  %v9698_v54 = vmax.f32 %v9696_v39, %v9697_v57  ;;  %v8994_v16 = vmax.f32 %v7536_v3, %v7544_v23  ;;  %v6903_v20 = vadd.f32 %v6902_v46, %v17129_v42  ;;  %v6293_v44 = vpop.f32.mrf.mxu0 }
 0x689   :  { %v8881_v7 = vmax.f32 %v8880_v45, %v7646_v2  ;;  %v7551_v22 = vmax.f32 %v6901_v63, 0.0  ;;  %v7653_v30 = vmax.f32 %v6292_v62, 0.0  ;;  %v6294_v28 = vadd.f32 %v6293_v44, %v17027_v49  ;;  %v6904_v15 = vpop.f32.mrf.mxu1 }
 0x68a   :  { %v9694_v53 = vmax.f32 %v9692_v11, %v9693_v0  ;;  %v9699_v33 = vrot.slane %v9698_v54, 1  ;;  %v7552_v36 = vmax.f32 %v6903_v20, 0.0  ;;  %v6905_v24 = vadd.f32 %v6904_v15, %v17122_v19  ;;  %v6297_v37 = vpop.f32.mrf.mxu0  ;;  %6536 = vmatmul.mubr.bf16.gmra.mxu0 %v18369_v61 }
 0x68b   :  { %v8932_v12 = vmax.f32 %v8931_v38, %v7551_v22  ;;  %v8819_v39 = vmax.f32 %v8818_v26, %v7653_v30  ;;  %v7654_v21 = vmax.f32 %v6294_v28, 0.0  ;;  %v6298_v3 = vadd.f32 %v6297_v37, %v17019_v50  ;;  %v6906_v1 = vpop.f32.mrf.mxu1  ;;  %6545 = vmatprep.mubr.bf16.mxu0 %v18315_v6 }
 0x68c   :  { %v17159_v45 = vsel %vm9725_vm3, %v17136_v14, %v9694_v53  ;;  %v8995_v40 = vmax.f32 %v8994_v16, %v7552_v36  ;;  %v7559_v51 = vmax.f32 %v6905_v24, 0.0  ;;  %v6907_v11 = vadd.f32 %v6906_v1, %v17129_v42  ;;  %v6299_v57 = vpop.f32.mrf.mxu0 }
 0x68d   :  { %v8882_v23 = vmax.f32 %v8881_v7, %v7654_v21  ;;  %v7661_v9 = vmax.f32 %v6298_v3, 0.0  ;;  %v6300_v38 = vadd.f32 %v6299_v57, %v17027_v49  ;;  %v6910_v26 = vpop.f32.mrf.mxu1  ;;  %7149 = vmatmul.mubr.bf16.gmra.mxu1 %v15977_v13  ;;  %v9644_v2 = vmax.f32 %v17131_v18, %v9643_v8  ;;  %v13999_v57 = vld [vmem:[#allocation9 + $0x20] ss:$16 sps:$4 sm:$0xff]  }
 0x68e   :  { %v8933_v63 = vmax.f32 %v8932_v12, %v7559_v51  ;;  %v7560_v62 = vmax.f32 %v6907_v11, 0.0  ;;  %v6911_v14 = vadd.f32 %v6910_v26, %v17122_v19  ;;  %v6301_v46 = vpop.f32.mrf.mxu0  ;;  %7158 = vmatprep.mubr.bf16.mxu1 %v18315_v6  ;;  %v9700_v0 = vmax.f32 %v9698_v54, %v9699_v33 }
 0x68f   :  { %v8820_v16 = vmax.f32 %v8819_v39, %v7661_v9  ;;  %v7662_v20 = vmax.f32 %v6300_v38, 0.0  ;;  %v6302_v44 = vadd.f32 %v6301_v46, %v17019_v50  ;;  %v6912_v7 = vpop.f32.mrf.mxu1 }
 0x690   :  { %v8996_v22 = vmax.f32 %v8995_v40, %v7560_v62  ;;  %v7567_v30 = vmax.f32 %v6911_v14, 0.0  ;;  %v6913_v13 = vadd.f32 %v6912_v7, %v17129_v42  ;;  %v6303_v28 = vpop.f32.mrf.mxu0  ;;  %v17172_v18 = vsel %vm9725_vm3, %v9644_v2, %v9700_v0  ;;  %v14002_v0 = vld [vmem:[#allocation9 + $0x220] ss:$16 sps:$4 sm:$0xff]  }
 0x691   :  { %v8883_v8 = vmax.f32 %v8882_v23, %v7662_v20  ;;  %v7669_v15 = vmax.f32 %v6302_v44, 0.0  ;;  %v6304_v53 = vadd.f32 %v6303_v28, %v17027_v49  ;;  %v6914_v36 = vpop.f32.mrf.mxu1  ;;  %v14001_v23 = vld [vmem:[#allocation9 + $0x24] ss:$16 sps:$4 sm:$0xff]  }
 0x692   :  { %v8934_v24 = vmax.f32 %v8933_v63, %v7567_v30  ;;  %v7568_v54 = vmax.f32 %v6913_v13, 0.0  ;;  %v6915_v33 = vadd.f32 %v6914_v36, %v17122_v19  ;;  %v6307_v37 = vpop.f32.mrf.mxu0  ;;  %6546 = vmatmul.mubr.bf16.gmra.mxu0 %v16026_v43  ;;  %11313 = vmatprep.subr.bf16.mxu0 %v14001_v23 }
 0x693   :  { %v8821_v12 = vmax.f32 %v8820_v16, %v7669_v15  ;;  %v7670_v39 = vmax.f32 %v6304_v53, 0.0  ;;  %v6308_v21 = vadd.f32 %v6307_v37, %v17019_v50  ;;  %v6916_v3 = vpop.f32.mrf.mxu1  ;;  %6555 = vmatprep.mubr.bf16.mxu0 %v18315_v6  ;;  %v14004_v16 = vld [vmem:[#allocation9 + $0x224] ss:$16 sps:$4 sm:$0xff]   ;;  %11314 = vmatpush1.bf16.msra.mxu0 %v13999_v57 }
 0x694   :  { %v8997_v1 = vmax.f32 %v8996_v22, %v7568_v54  ;;  %v7575_v40 = vmax.f32 %v6915_v33, 0.0  ;;  %v6917_v51 = vadd.f32 %v6916_v3, %v17129_v42  ;;  %v6309_v11 = vpop.f32.mrf.mxu0  ;;  %11354 = vmatprep.subr.bf16.mxu1 %v14004_v16 }
 0x695   :  { %v8884_v9 = vmax.f32 %v8883_v8, %v7670_v39  ;;  %v7677_v38 = vmax.f32 %v6308_v21, 0.0  ;;  %v6310_v26 = vadd.f32 %v6309_v11, %v17027_v49  ;;  %v6920_v2 = vpop.f32.mrf.mxu1  ;;  %7159 = vmatmul.mubr.bf16.gmra.mxu1 %v15970_v55 }
 0x696   :  { %v8935_v63 = vmax.f32 %v8934_v24, %v7575_v40  ;;  %v7576_v62 = vmax.f32 %v6917_v51, 0.0  ;;  %v6921_v14 = vadd.f32 %v6920_v2, %v17122_v19  ;;  %v6311_v46 = vpop.f32.mrf.mxu0  ;;  %7168 = vmatprep.mubr.bf16.mxu1 %v18315_v6  ;;  %11355 = vmatpush1.bf16.msra.mxu1 %v14002_v0 }
 0x697   :  { %v8822_v20 = vmax.f32 %v8821_v12, %v7677_v38  ;;  %v7678_v44 = vmax.f32 %v6310_v26, 0.0  ;;  %v6312_v7 = vadd.f32 %v6311_v46, %v17019_v50  ;;  %v6922_v22 = vpop.f32.mrf.mxu1 }
 0x698   :  { %v8998_v30 = vmax.f32 %v8997_v1, %v7576_v62  ;;  %v7583_v13 = vmax.f32 %v6921_v14, 0.0  ;;  %v6923_v55 = vadd.f32 %v6922_v22, %v17129_v42  ;;  %v6313_v28 = vpop.f32.mrf.mxu0 }
 0x699   :  { %v8885_v8 = vmax.f32 %v8884_v9, %v7678_v44  ;;  %v7685_v15 = vmax.f32 %v6312_v7, 0.0  ;;  %v6314_v53 = vadd.f32 %v6313_v28, %v17027_v49  ;;  %v6924_v36 = vpop.f32.mrf.mxu1 }
 0x69a   :  { %v8936_v24 = vmax.f32 %v8935_v63, %v7583_v13  ;;  %v7584_v54 = vmax.f32 %v6923_v55, 0.0  ;;  %v6925_v33 = vadd.f32 %v6924_v36, %v17122_v19  ;;  %v6317_v37 = vpop.f32.mrf.mxu0  ;;  %6556 = vmatmul.mubr.bf16.gmra.mxu0 %v16041_v29 }
 0x69b   :  { %v8823_v12 = vmax.f32 %v8822_v20, %v7685_v15  ;;  %v7686_v39 = vmax.f32 %v6314_v53, 0.0  ;;  %v6318_v21 = vadd.f32 %v6317_v37, %v17019_v50  ;;  %v6926_v3 = vpop.f32.mrf.mxu1  ;;  %6565 = vmatprep.mubr.bf16.mxu0 %v18315_v6 }
 0x69c   :  { %v8999_v1 = vmax.f32 %v8998_v30, %v7584_v54  ;;  %v7591_v40 = vmax.f32 %v6925_v33, 0.0  ;;  %v6927_v51 = vadd.f32 %v6926_v3, %v17129_v42  ;;  %v6319_v11 = vpop.f32.mrf.mxu0 }
 0x69d   :  { %v8886_v57 = vmax.f32 %v8885_v8, %v7686_v39  ;;  %v7693_v23 = vmax.f32 %v6318_v21, 0.0  ;;  %v6320_v9 = vadd.f32 %v6319_v11, %v17027_v49  ;;  %v6930_v38 = vpop.f32.mrf.mxu1  ;;  %7169 = vmatmul.mubr.bf16.gmra.mxu1 %v15993_v58 }
 0x69e   :  { %v8937_v26 = vmax.f32 %v8936_v24, %v7591_v40  ;;  %v7592_v2 = vmax.f32 %v6927_v51, 0.0  ;;  %v6931_v63 = vadd.f32 %v6930_v38, %v17122_v19  ;;  %v6321_v62 = vpop.f32.mrf.mxu0  ;;  %7178 = vmatprep.mubr.bf16.mxu1 %v18315_v6 }
 0x69f   :  { %v8824_v14 = vmax.f32 %v8823_v12, %v7693_v23  ;;  %v7694_v46 = vmax.f32 %v6320_v9, 0.0  ;;  %v6322_v0 = vadd.f32 %v6321_v62, %v17019_v50  ;;  %v6932_v16 = vpop.f32.mrf.mxu1 }
 0x6a0   :  { %v9000_v20 = vmax.f32 %v8999_v1, %v7592_v2  ;;  %v7599_v44 = vmax.f32 %v6931_v63, 0.0  ;;  %v6933_v7 = vadd.f32 %v6932_v16, %v17129_v42  ;;  %v6323_v22 = vpop.f32.mrf.mxu0 }
 0x6a1   :  { %v8887_v30 = vmax.f32 %v8886_v57, %v7694_v46  ;;  %v7701_v13 = vmax.f32 %v6322_v0, 0.0  ;;  %v6324_v58 = vadd.f32 %v6323_v22, %v17027_v49  ;;  %v6934_v55 = vpop.f32.mrf.mxu1 }
 0x6a2   :  { %v8938_v28 = vmax.f32 %v8937_v26, %v7599_v44  ;;  %v7600_v8 = vmax.f32 %v6933_v7, 0.0  ;;  %v6935_v15 = vadd.f32 %v6934_v55, %v17122_v19  ;;  %v6327_v53 = vpop.f32.mrf.mxu0  ;;  %6566 = vmatmul.mubr.bf16.gmra.mxu0 %v16038_v10 }
 0x6a3   :  { %v8825_v36 = vmax.f32 %v8824_v14, %v7701_v13  ;;  %v7702_v24 = vmax.f32 %v6324_v58, 0.0  ;;  %v6328_v54 = vadd.f32 %v6327_v53, %v17019_v50  ;;  %v6936_v33 = vpop.f32.mrf.mxu1  ;;  %6575 = vmatprep.mubr.bf16.mxu0 %v18315_v6 }
 0x6a4   :  { %v9001_v37 = vmax.f32 %v9000_v20, %v7600_v8  ;;  %v7607_v12 = vmax.f32 %v6935_v15, 0.0  ;;  %v6937_v39 = vadd.f32 %v6936_v33, %v17129_v42  ;;  %v6329_v21 = vpop.f32.mrf.mxu0 }
 0x6a5   :  { %v8888_v3 = vmax.f32 %v8887_v30, %v7702_v24  ;;  %v7709_v1 = vmax.f32 %v6328_v54, 0.0  ;;  %v6330_v40 = vadd.f32 %v6329_v21, %v17027_v49  ;;  %v6940_v51 = vpop.f32.mrf.mxu1  ;;  %7179 = vmatmul.mubr.bf16.gmra.mxu1 %v15988_v35 }
 0x6a6   :  { %v8939_v11 = vmax.f32 %v8938_v28, %v7607_v12  ;;  %v7608_v57 = vmax.f32 %v6937_v39, 0.0  ;;  %v6941_v23 = vadd.f32 %v6940_v51, %v17122_v19  ;;  %v6331_v9 = vpop.f32.mrf.mxu0  ;;  %7188 = vmatprep.mubr.bf16.mxu1 %v18315_v6 }
 0x6a7   :  { %v8826_v38 = vmax.f32 %v8825_v36, %v7709_v1  ;;  %v7710_v26 = vmax.f32 %v6330_v40, 0.0  ;;  %v6332_v2 = vadd.f32 %v6331_v9, %v17019_v50  ;;  %v6942_v63 = vpop.f32.mrf.mxu1 }
 0x6a8   :  { %v9002_v62 = vmax.f32 %v9001_v37, %v7608_v57  ;;  %v7615_v14 = vmax.f32 %v6941_v23, 0.0  ;;  %v6943_v46 = vadd.f32 %v6942_v63, %v17129_v42  ;;  %v6333_v0 = vpop.f32.mrf.mxu0 }
 0x6a9   :  { %v8889_v16 = vmax.f32 %v8888_v3, %v7710_v26  ;;  %v7717_v20 = vmax.f32 %v6332_v2, 0.0  ;;  %v6334_v35 = vadd.f32 %v6333_v0, %v17027_v49  ;;  %v6944_v44 = vpop.f32.mrf.mxu1 }
 0x6aa   :  { %v8940_v7 = vmax.f32 %v8939_v11, %v7615_v14  ;;  %v7616_v22 = vmax.f32 %v6943_v46, 0.0  ;;  %v6945_v30 = vadd.f32 %v6944_v44, %v17122_v19  ;;  %v6337_v13 = vpop.f32.mrf.mxu0  ;;  %6576 = vmatmul.mubr.bf16.gmra.mxu0 %v16053_v48 }
 0x6ab   :  { %v8827_v58 = vmax.f32 %v8826_v38, %v7717_v20  ;;  %v7718_v55 = vmax.f32 %v6334_v35, 0.0  ;;  %v6338_v28 = vadd.f32 %v6337_v13, %v17019_v50  ;;  %v6946_v8 = vpop.f32.mrf.mxu1  ;;  %6585 = vmatprep.mubr.bf16.mxu0 %v18315_v6 }
 0x6ac   :  { %v9003_v15 = vmax.f32 %v9002_v62, %v7616_v22  ;;  %v7623_v53 = vmax.f32 %v6945_v30, 0.0  ;;  %v6947_v36 = vadd.f32 %v6946_v8, %v17129_v42  ;;  %v6339_v24 = vpop.f32.mrf.mxu0 }
 0x6ad   :  { %v8890_v54 = vmax.f32 %v8889_v16, %v7718_v55  ;;  %v7725_v33 = vmax.f32 %v6338_v28, 0.0  ;;  %v6340_v37 = vadd.f32 %v6339_v24, %v17027_v49  ;;  %v6950_v12 = vpop.f32.mrf.mxu1  ;;  %7189 = vmatmul.mubr.bf16.gmra.mxu1 %v16011_v59  ;;  %v14005_v55 = vld [vmem:[#allocation9] ss:$16 sps:$4 sm:$0xff]   ;;  %v14007_v28 = vld [vmem:[#allocation9 + $0x4] ss:$16 sps:$4 sm:$0xff]  }
 0x6ae   :  { %v8941_v39 = vmax.f32 %v8940_v7, %v7623_v53  ;;  %v7624_v21 = vmax.f32 %v6947_v36, 0.0  ;;  %v6951_v3 = vadd.f32 %v6950_v12, %v17122_v19  ;;  %v6341_v1 = vpop.f32.mrf.mxu0  ;;  %7198 = vmatprep.mubr.bf16.mxu1 %v18315_v6  ;;  %11315 = vmatprep.subr.bf16.mxu0 %v14007_v28  ;;  %v14008_v12 = vld [vmem:[#allocation9 + $0x200] ss:$16 sps:$4 sm:$0xff]  }
 0x6af   :  { %v8828_v40 = vmax.f32 %v8827_v58, %v7725_v33  ;;  %v7726_v51 = vmax.f32 %v6340_v37, 0.0  ;;  %v6342_v11 = vadd.f32 %v6341_v1, %v17019_v50  ;;  %v6952_v57 = vpop.f32.mrf.mxu1  ;;  %11316 = vmatpush1.bf16.msra.mxu0 %v14005_v55 }
 0x6b0   :  { %v9004_v23 = vmax.f32 %v9003_v15, %v7624_v21  ;;  %v7631_v9 = vmax.f32 %v6951_v3, 0.0  ;;  %v6953_v38 = vadd.f32 %v6952_v57, %v17129_v42  ;;  %v6343_v26 = vpop.f32.mrf.mxu0 }
 0x6b1   :  { %v8891_v2 = vmax.f32 %v8890_v54, %v7726_v51  ;;  %v7733_v63 = vmax.f32 %v6342_v11, 0.0  ;;  %v6344_v59 = vadd.f32 %v6343_v26, %v17027_v49  ;;  %v6954_v62 = vpop.f32.mrf.mxu1 }
 0x6b2   :  { %v8942_v14 = vmax.f32 %v8941_v39, %v7631_v9  ;;  %v7632_v46 = vmax.f32 %v6953_v38, 0.0  ;;  %v6955_v0 = vadd.f32 %v6954_v62, %v17122_v19  ;;  %v6347_v16 = vpop.f32.mrf.mxu0  ;;  %6586 = vmatmul.mubr.bf16.gmra.mxu0 %v16050_v41  ;;  %v14010_v39 = vld [vmem:[#allocation9 + $0x204] ss:$16 sps:$4 sm:$0xff]  }
 0x6b3   :  { %v8829_v20 = vmax.f32 %v8828_v40, %v7733_v63  ;;  %v7734_v35 = vmax.f32 %v6344_v59, 0.0  ;;  %v6348_v44 = vadd.f32 %v6347_v16, %v17019_v50  ;;  %v6956_v7 = vpop.f32.mrf.mxu1  ;;  %6595 = vmatprep.mubr.bf16.mxu0 %v18315_v6  ;;  %11356 = vmatprep.subr.bf16.mxu1 %v14010_v39 }
 0x6b4   :  { %v9005_v22 = vmax.f32 %v9004_v23, %v7632_v46  ;;  %v7639_v30 = vmax.f32 %v6955_v0, 0.0  ;;  %v6957_v13 = vadd.f32 %v6956_v7, %v17129_v42  ;;  %v6349_v58 = vpop.f32.mrf.mxu0  ;;  %11357 = vmatpush1.bf16.msra.mxu1 %v14008_v12 }
 0x6b5   :  { %v8892_v8 = vmax.f32 %v8891_v2, %v7734_v35  ;;  %v7741_v15 = vmax.f32 %v6348_v44, 0.0  ;;  %v6350_v53 = vadd.f32 %v6349_v58, %v17027_v49  ;;  %v6960_v36 = vpop.f32.mrf.mxu1  ;;  %7199 = vmatmul.mubr.bf16.gmra.mxu1 %v18368_v47 }
 0x6b6   :  { %v8943_v24 = vmax.f32 %v8942_v14, %v7639_v30  ;;  %v7640_v54 = vmax.f32 %v6957_v13, 0.0  ;;  %v6961_v33 = vadd.f32 %v6960_v36, %v17122_v19  ;;  %v6351_v37 = vpop.f32.mrf.mxu0  ;;  %7208 = vmatprep.mubr.bf16.mxu1 %v18315_v6 }
 0x6b7   :  { %v8830_v21 = vmax.f32 %v8829_v20, %v7741_v15  ;;  %v7742_v3 = vmax.f32 %v6350_v53, 0.0  ;;  %v6352_v1 = vadd.f32 %v6351_v37, %v17019_v50  ;;  %v6962_v40 = vpop.f32.mrf.mxu1 }
 0x6b8   :  { %v9006_v51 = vmax.f32 %v9005_v22, %v7640_v54  ;;  %v7647_v11 = vmax.f32 %v6961_v33, 0.0  ;;  %v6963_v47 = vadd.f32 %v6962_v40, %v17129_v42  ;;  %v6353_v57 = vpop.f32.mrf.mxu0 }
 0x6b9   :  { %v8893_v23 = vmax.f32 %v8892_v8, %v7742_v3  ;;  %v7749_v9 = vmax.f32 %v6352_v1, 0.0  ;;  %v6354_v38 = vadd.f32 %v6353_v57, %v17027_v49  ;;  %v6964_v26 = vpop.f32.mrf.mxu1 }
 0x6ba   :  { %v8944_v2 = vmax.f32 %v8943_v24, %v7647_v11  ;;  %v7648_v63 = vmax.f32 %v6963_v47, 0.0  ;;  %v6965_v59 = vadd.f32 %v6964_v26, %v17122_v19  ;;  %v6357_v62 = vpop.f32.mrf.mxu0  ;;  %6596 = vmatmul.mubr.bf16.gmra.mxu0 %v16065_v27 }
 0x6bb   :  { %v8831_v14 = vmax.f32 %v8830_v21, %v7749_v9  ;;  %v7750_v46 = vmax.f32 %v6354_v38, 0.0  ;;  %v6358_v0 = vadd.f32 %v6357_v62, %v17019_v50  ;;  %v6966_v16 = vpop.f32.mrf.mxu1  ;;  %6605 = vmatprep.mubr.bf16.mxu0 %v18315_v6 }
 0x6bc   :  { %v9007_v20 = vmax.f32 %v9006_v51, %v7648_v63  ;;  %v7655_v35 = vmax.f32 %v6965_v59, 0.0  ;;  %v6967_v44 = vadd.f32 %v6966_v16, %v17129_v42  ;;  %v6359_v7 = vpop.f32.mrf.mxu0 }
 0x6bd   :  { %v8894_v22 = vmax.f32 %v8893_v23, %v7750_v46  ;;  %v7757_v30 = vmax.f32 %v6358_v0, 0.0  ;;  %v6360_v13 = vadd.f32 %v6359_v7, %v17027_v49  ;;  %v6970_v58 = vpop.f32.mrf.mxu1  ;;  %7209 = vmatmul.mubr.bf16.gmra.mxu1 %v18369_v61 }
 0x6be   :  { %v8945_v55 = vmax.f32 %v8944_v2, %v7655_v35  ;;  %v7656_v28 = vmax.f32 %v6967_v44, 0.0  ;;  %v6971_v8 = vadd.f32 %v6970_v58, %v17122_v19  ;;  %v6361_v15 = vpop.f32.mrf.mxu0  ;;  %7218 = vmatprep.mubr.bf16.mxu1 %v18315_v6 }
 0x6bf   :  { %v8832_v53 = vmax.f32 %v8831_v14, %v7757_v30  ;;  %v7758_v36 = vmax.f32 %v6360_v13, 0.0  ;;  %v6362_v24 = vadd.f32 %v6361_v15, %v17019_v50  ;;  %v6972_v54 = vpop.f32.mrf.mxu1 }
 0x6c0   :  { %v9008_v33 = vmax.f32 %v9007_v20, %v7656_v28  ;;  %v7663_v37 = vmax.f32 %v6971_v8, 0.0  ;;  %v6973_v12 = vadd.f32 %v6972_v54, %v17129_v42  ;;  %v6363_v39 = vpop.f32.mrf.mxu0 }
 0x6c1   :  { %v8895_v21 = vmax.f32 %v8894_v22, %v7758_v36  ;;  %v7765_v3 = vmax.f32 %v6362_v24, 0.0  ;;  %v6364_v61 = vadd.f32 %v6363_v39, %v17027_v49  ;;  %v6974_v1 = vpop.f32.mrf.mxu1 }
 0x6c2   :  { %v8946_v40 = vmax.f32 %v8945_v55, %v7663_v37  ;;  %v7664_v51 = vmax.f32 %v6973_v12, 0.0  ;;  %v6975_v11 = vadd.f32 %v6974_v1, %v17122_v19  ;;  %v6367_v47 = vpop.f32.mrf.mxu0  ;;  %6606 = vmatmul.mubr.bf16.gmra.mxu0 %v16062_v17 }
 0x6c3   :  { %v8833_v57 = vmax.f32 %v8832_v53, %v7765_v3  ;;  %v7766_v23 = vmax.f32 %v6364_v61, 0.0  ;;  %v6368_v9 = vadd.f32 %v6367_v47, %v17019_v50  ;;  %v6976_v38 = vpop.f32.mrf.mxu1  ;;  %6615 = vmatprep.mubr.bf16.mxu0 %v18315_v6 }
 0x6c4   :  { %v9009_v26 = vmax.f32 %v9008_v33, %v7664_v51  ;;  %v7671_v2 = vmax.f32 %v6975_v11, 0.0  ;;  %v6977_v63 = vadd.f32 %v6976_v38, %v17129_v42  ;;  %v6369_v59 = vpop.f32.mrf.mxu0 }
 0x6c5   :  { %v8896_v62 = vmax.f32 %v8895_v21, %v7766_v23  ;;  %v7773_v14 = vmax.f32 %v6368_v9, 0.0  ;;  %v6370_v46 = vadd.f32 %v6369_v59, %v17027_v49  ;;  %v6980_v0 = vpop.f32.mrf.mxu1  ;;  %7219 = vmatmul.mubr.bf16.gmra.mxu1 %v16026_v43 }
 0x6c6   :  { %v8947_v16 = vmax.f32 %v8946_v40, %v7671_v2  ;;  %v7672_v20 = vmax.f32 %v6977_v63, 0.0  ;;  %v6981_v35 = vadd.f32 %v6980_v0, %v17122_v19  ;;  %v6371_v44 = vpop.f32.mrf.mxu0  ;;  %7228 = vmatprep.mubr.bf16.mxu1 %v18315_v6 }
 0x6c7   :  { %v8834_v7 = vmax.f32 %v8833_v57, %v7773_v14  ;;  %v7774_v22 = vmax.f32 %v6370_v46, 0.0  ;;  %v6372_v30 = vadd.f32 %v6371_v44, %v17019_v50  ;;  %v6982_v13 = vpop.f32.mrf.mxu1 }
 0x6c8   :  { %v9010_v58 = vmax.f32 %v9009_v26, %v7672_v20  ;;  %v7679_v55 = vmax.f32 %v6981_v35, 0.0  ;;  %v6983_v28 = vadd.f32 %v6982_v13, %v17129_v42  ;;  %v6373_v8 = vpop.f32.mrf.mxu0 }
 0x6c9   :  { %v8897_v15 = vmax.f32 %v8896_v62, %v7774_v22  ;;  %v7781_v53 = vmax.f32 %v6372_v30, 0.0  ;;  %v6374_v43 = vadd.f32 %v6373_v8, %v17027_v49  ;;  %v6984_v36 = vpop.f32.mrf.mxu1 }
 0x6ca   :  { %v8948_v24 = vmax.f32 %v8947_v16, %v7679_v55  ;;  %v7680_v54 = vmax.f32 %v6983_v28, 0.0  ;;  %v6985_v33 = vadd.f32 %v6984_v36, %v17122_v19  ;;  %v6377_v37 = vpop.f32.mrf.mxu0  ;;  %6616 = vmatmul.mubr.bf16.gmra.mxu0 %v16077_v52 }
 0x6cb   :  { %v8835_v12 = vmax.f32 %v8834_v7, %v7781_v53  ;;  %v7782_v39 = vmax.f32 %v6374_v43, 0.0  ;;  %v6378_v21 = vadd.f32 %v6377_v37, %v17019_v50  ;;  %v6986_v3 = vpop.f32.mrf.mxu1  ;;  %6625 = vmatprep.mubr.bf16.mxu0 %v18315_v6 }
 0x6cc   :  { %v9011_v61 = vmax.f32 %v9010_v58, %v7680_v54  ;;  %v7687_v1 = vmax.f32 %v6985_v33, 0.0  ;;  %v6987_v40 = vadd.f32 %v6986_v3, %v17129_v42  ;;  %v6379_v51 = vpop.f32.mrf.mxu0 }
 0x6cd   :  { %v8898_v11 = vmax.f32 %v8897_v15, %v7782_v39  ;;  %v7789_v47 = vmax.f32 %v6378_v21, 0.0  ;;  %v6380_v57 = vadd.f32 %v6379_v51, %v17027_v49  ;;  %v6990_v23 = vpop.f32.mrf.mxu1  ;;  %7229 = vmatmul.mubr.bf16.gmra.mxu1 %v16041_v29 }
 0x6ce   :  { %v8949_v9 = vmax.f32 %v8948_v24, %v7687_v1  ;;  %v7688_v38 = vmax.f32 %v6987_v40, 0.0  ;;  %v6991_v26 = vadd.f32 %v6990_v23, %v17122_v19  ;;  %v6381_v2 = vpop.f32.mrf.mxu0  ;;  %7238 = vmatprep.mubr.bf16.mxu1 %v18315_v6 }
 0x6cf   :  { %v8836_v63 = vmax.f32 %v8835_v12, %v7789_v47  ;;  %v7790_v59 = vmax.f32 %v6380_v57, 0.0  ;;  %v6382_v62 = vadd.f32 %v6381_v2, %v17019_v50  ;;  %v6992_v14 = vpop.f32.mrf.mxu1  ;;  %v14011_v47 = vld [vmem:[#allocation9 + $0x1e0] ss:$16 sps:$4 sm:$0xff]   ;;  %v14013_v57 = vld [vmem:[#allocation9 + $0x1e4] ss:$16 sps:$4 sm:$0xff]  }
 0x6d0   :  { %v9012_v46 = vmax.f32 %v9011_v61, %v7688_v38  ;;  %v7695_v0 = vmax.f32 %v6991_v26, 0.0  ;;  %v6993_v16 = vadd.f32 %v6992_v14, %v17129_v42  ;;  %v6383_v20 = vpop.f32.mrf.mxu0  ;;  %v14016_v2 = vld [vmem:[#allocation9 + $0x3e4] ss:$16 sps:$4 sm:$0xff]   ;;  %11317 = vmatprep.subr.bf16.mxu0 %v14013_v57 }
 0x6d1   :  { %v8899_v35 = vmax.f32 %v8898_v11, %v7790_v59  ;;  %v7797_v44 = vmax.f32 %v6382_v62, 0.0  ;;  %v6384_v29 = vadd.f32 %v6383_v20, %v17027_v49  ;;  %v6994_v7 = vpop.f32.mrf.mxu1  ;;  %11358 = vmatprep.subr.bf16.mxu1 %v14016_v2  ;;  %11318 = vmatpush2.bf16.msra.mxu0 %v14011_v47 }
 0x6d2   :  { %v8950_v22 = vmax.f32 %v8949_v9, %v7695_v0  ;;  %v7696_v30 = vmax.f32 %v6993_v16, 0.0  ;;  %v6995_v13 = vadd.f32 %v6994_v7, %v17122_v19  ;;  %v6387_v58 = vpop.f32.mrf.mxu0  ;;  %6626 = vmatmul.mubr.bf16.gmra.mxu0 %v16074_v60 }
 0x6d3   :  { %v8837_v55 = vmax.f32 %v8836_v63, %v7797_v44  ;;  %v7798_v28 = vmax.f32 %v6384_v29, 0.0  ;;  %v6388_v8 = vadd.f32 %v6387_v58, %v17019_v50  ;;  %v6996_v15 = vpop.f32.mrf.mxu1  ;;  %6635 = vmatprep.mubr.bf16.mxu0 %v18315_v6 }
 0x6d4   :  { %v9013_v53 = vmax.f32 %v9012_v46, %v7696_v30  ;;  %v7703_v43 = vmax.f32 %v6995_v13, 0.0  ;;  %v6997_v36 = vadd.f32 %v6996_v15, %v17129_v42  ;;  %v6389_v24 = vpop.f32.mrf.mxu0 }
 0x6d5   :  { %v8900_v54 = vmax.f32 %v8899_v35, %v7798_v28  ;;  %v7805_v33 = vmax.f32 %v6388_v8, 0.0  ;;  %v6390_v37 = vadd.f32 %v6389_v24, %v17027_v49  ;;  %v7000_v12 = vpop.f32.mrf.mxu1  ;;  %7239 = vmatmul.mubr.bf16.gmra.mxu1 %v16038_v10  ;;  %v14014_v10 = vld [vmem:[#allocation9 + $0x3e0] ss:$16 sps:$4 sm:$0xff]  }
 0x6d6   :  { %v8951_v39 = vmax.f32 %v8950_v22, %v7703_v43  ;;  %v7704_v21 = vmax.f32 %v6997_v36, 0.0  ;;  %v7001_v3 = vadd.f32 %v7000_v12, %v17122_v19  ;;  %v6391_v61 = vpop.f32.mrf.mxu0  ;;  %7248 = vmatprep.mubr.bf16.mxu1 %v18315_v6  ;;  %11359 = vmatpush2.bf16.msra.mxu1 %v14014_v10 }
 0x6d7   :  { %v8838_v1 = vmax.f32 %v8837_v55, %v7805_v33  ;;  %v7806_v40 = vmax.f32 %v6390_v37, 0.0  ;;  %v6392_v51 = vadd.f32 %v6391_v61, %v17019_v50  ;;  %v7002_v11 = vpop.f32.mrf.mxu1 }
 0x6d8   :  { %v9014_v23 = vmax.f32 %v9013_v53, %v7704_v21  ;;  %v7711_v9 = vmax.f32 %v7001_v3, 0.0  ;;  %v7003_v38 = vadd.f32 %v7002_v11, %v17129_v42  ;;  %v6393_v26 = vpop.f32.mrf.mxu0 }
 0x6d9   :  { %v8901_v63 = vmax.f32 %v8900_v54, %v7806_v40  ;;  %v7813_v59 = vmax.f32 %v6392_v51, 0.0  ;;  %v6394_v62 = vadd.f32 %v6393_v26, %v17027_v49  ;;  %v7004_v14 = vpop.f32.mrf.mxu1 }
 0x6da   :  { %v8952_v46 = vmax.f32 %v8951_v39, %v7711_v9  ;;  %v7712_v0 = vmax.f32 %v7003_v38, 0.0  ;;  %v7005_v16 = vadd.f32 %v7004_v14, %v17122_v19  ;;  %v6397_v20 = vpop.f32.mrf.mxu0  ;;  %6636 = vmatmul.mubr.bf16.gmra.mxu0 %v16089_v56 }
 0x6db   :  { %v8839_v35 = vmax.f32 %v8838_v1, %v7813_v59  ;;  %v7814_v44 = vmax.f32 %v6394_v62, 0.0  ;;  %v6398_v29 = vadd.f32 %v6397_v20, %v17019_v50  ;;  %v7006_v7 = vpop.f32.mrf.mxu1  ;;  %6645 = vmatprep.mubr.bf16.mxu0 %v18315_v6 }
 0x6dc   :  { %v9015_v22 = vmax.f32 %v9014_v23, %v7712_v0  ;;  %v7719_v30 = vmax.f32 %v7005_v16, 0.0  ;;  %v7007_v13 = vadd.f32 %v7006_v7, %v17129_v42  ;;  %v6399_v58 = vpop.f32.mrf.mxu0 }
 0x6dd   :  { %v8902_v55 = vmax.f32 %v8901_v63, %v7814_v44  ;;  %v7821_v28 = vmax.f32 %v6398_v29, 0.0  ;;  %v6400_v8 = vadd.f32 %v6399_v58, %v17027_v49  ;;  %v7010_v15 = vpop.f32.mrf.mxu1  ;;  %7249 = vmatmul.mubr.bf16.gmra.mxu1 %v16053_v48 }
 0x6de   :  { %v8953_v53 = vmax.f32 %v8952_v46, %v7719_v30  ;;  %v7720_v43 = vmax.f32 %v7007_v13, 0.0  ;;  %v7011_v36 = vadd.f32 %v7010_v15, %v17122_v19  ;;  %v6401_v24 = vpop.f32.mrf.mxu0  ;;  %7258 = vmatprep.mubr.bf16.mxu1 %v18315_v6 }
 0x6df   :  { %v8840_v54 = vmax.f32 %v8839_v35, %v7821_v28  ;;  %v7822_v33 = vmax.f32 %v6400_v8, 0.0  ;;  %v6402_v37 = vadd.f32 %v6401_v24, %v17019_v50  ;;  %v7012_v12 = vpop.f32.mrf.mxu1 }
 0x6e0   :  { %v9016_v39 = vmax.f32 %v9015_v22, %v7720_v43  ;;  %v7727_v21 = vmax.f32 %v7011_v36, 0.0  ;;  %v7013_v3 = vadd.f32 %v7012_v12, %v17129_v42  ;;  %v6403_v61 = vpop.f32.mrf.mxu0 }
 0x6e1   :  { %v8903_v1 = vmax.f32 %v8902_v55, %v7822_v33  ;;  %v7829_v40 = vmax.f32 %v6402_v37, 0.0  ;;  %v6404_v48 = vadd.f32 %v6403_v61, %v17027_v49  ;;  %v7014_v51 = vpop.f32.mrf.mxu1 }
 0x6e2   :  { %v8954_v11 = vmax.f32 %v8953_v53, %v7727_v21  ;;  %v7728_v47 = vmax.f32 %v7013_v3, 0.0  ;;  %v7015_v57 = vadd.f32 %v7014_v51, %v17122_v19  ;;  %v6407_v23 = vpop.f32.mrf.mxu0  ;;  %6646 = vmatmul.mubr.bf16.gmra.mxu0 %v16086_v34 }
 0x6e3   :  { %v8841_v9 = vmax.f32 %v8840_v54, %v7829_v40  ;;  %v7830_v38 = vmax.f32 %v6404_v48, 0.0  ;;  %v6408_v26 = vadd.f32 %v6407_v23, %v17019_v50  ;;  %v7016_v10 = vpop.f32.mrf.mxu1  ;;  %6655 = vmatprep.mubr.bf16.mxu0 %v18315_v6 }
 0x6e4   :  { %v9017_v2 = vmax.f32 %v9016_v39, %v7728_v47  ;;  %v7735_v63 = vmax.f32 %v7015_v57, 0.0  ;;  %v7017_v59 = vadd.f32 %v7016_v10, %v17129_v42  ;;  %v6409_v62 = vpop.f32.mrf.mxu0  ;;  %v14019_v57 = vld [vmem:[#allocation9 + $0x1c4] ss:$16 sps:$4 sm:$0xff]   ;;  %v14017_v10 = vld [vmem:[#allocation9 + $0x1c0] ss:$16 sps:$4 sm:$0xff]  }
 0x6e5   :  { %v8904_v14 = vmax.f32 %v8903_v1, %v7830_v38  ;;  %v7837_v46 = vmax.f32 %v6408_v26, 0.0  ;;  %v6410_v0 = vadd.f32 %v6409_v62, %v17027_v49  ;;  %v7020_v16 = vpop.f32.mrf.mxu1  ;;  %7259 = vmatmul.mubr.bf16.gmra.mxu1 %v16050_v41  ;;  %11319 = vmatprep.subr.bf16.mxu0 %v14019_v57  ;;  %v14026_v57 = vld [vmem:[#allocation9 + $0x180] ss:$16 sps:$4 sm:$0xff]  }
 0x6e6   :  { %v8955_v20 = vmax.f32 %v8954_v11, %v7735_v63  ;;  %v7736_v35 = vmax.f32 %v7017_v59, 0.0  ;;  %v7021_v44 = vadd.f32 %v7020_v16, %v17122_v19  ;;  %v6411_v29 = vpop.f32.mrf.mxu0  ;;  %7268 = vmatprep.mubr.bf16.mxu1 %v18315_v6  ;;  %11320 = vmatpush2.bf16.msra.mxu0 %v14017_v10 }
 0x6e7   :  { %v8842_v7 = vmax.f32 %v8841_v9, %v7837_v46  ;;  %v7838_v22 = vmax.f32 %v6410_v0, 0.0  ;;  %v6412_v30 = vadd.f32 %v6411_v29, %v17019_v50  ;;  %v7022_v13 = vpop.f32.mrf.mxu1  ;;  %v14025_v29 = vld [vmem:[#allocation9 + $0x1a4] ss:$16 sps:$4 sm:$0xff]  }
 0x6e8   :  { %v9018_v58 = vmax.f32 %v9017_v2, %v7736_v35  ;;  %v7743_v55 = vmax.f32 %v7021_v44, 0.0  ;;  %v7023_v28 = vadd.f32 %v7022_v13, %v17129_v42  ;;  %v6413_v8 = vpop.f32.mrf.mxu0  ;;  %11321 = vmatprep.subr.bf16.mxu0 %v14025_v29 }
 0x6e9   :  { %v8905_v15 = vmax.f32 %v8904_v14, %v7838_v22  ;;  %v7845_v53 = vmax.f32 %v6412_v30, 0.0  ;;  %v6414_v41 = vadd.f32 %v6413_v8, %v17027_v49  ;;  %v7024_v43 = vpop.f32.mrf.mxu1 }
 0x6ea   :  { %v8956_v36 = vmax.f32 %v8955_v20, %v7743_v55  ;;  %v7744_v24 = vmax.f32 %v7023_v28, 0.0  ;;  %v7025_v54 = vadd.f32 %v7024_v43, %v17122_v19  ;;  %v6417_v33 = vpop.f32.mrf.mxu0  ;;  %6656 = vmatmul.mubr.bf16.gmra.mxu0 %v16103_v32 }
 0x6eb   :  { %v8843_v37 = vmax.f32 %v8842_v7, %v7845_v53  ;;  %v7846_v12 = vmax.f32 %v6414_v41, 0.0  ;;  %v6418_v39 = vadd.f32 %v6417_v33, %v17019_v50  ;;  %v7026_v21 = vpop.f32.mrf.mxu1  ;;  %6665 = vmatprep.mubr.bf16.mxu0 %v18315_v6 }
 0x6ec   :  { %v9019_v3 = vmax.f32 %v9018_v58, %v7744_v24  ;;  %v7751_v61 = vmax.f32 %v7025_v54, 0.0  ;;  %v7027_v1 = vadd.f32 %v7026_v21, %v17129_v42  ;;  %v6419_v40 = vpop.f32.mrf.mxu0  ;;  %v14023_v58 = vld [vmem:[#allocation9 + $0x1a0] ss:$16 sps:$4 sm:$0xff]  }
 0x6ed   :  { %v8906_v48 = vmax.f32 %v8905_v15, %v7846_v12  ;;  %v7853_v51 = vmax.f32 %v6418_v39, 0.0  ;;  %v6420_v11 = vadd.f32 %v6419_v40, %v17027_v49  ;;  %v7030_v47 = vpop.f32.mrf.mxu1  ;;  %7269 = vmatmul.mubr.bf16.gmra.mxu1 %v16065_v27  ;;  %11322 = vmatpush2.bf16.msra.mxu0 %v14023_v58  ;;  %v14028_v12 = vld [vmem:[#allocation9 + $0x184] ss:$16 sps:$4 sm:$0xff]  }
 0x6ee   :  { %v8957_v23 = vmax.f32 %v8956_v36, %v7751_v61  ;;  %v7752_v9 = vmax.f32 %v7027_v1, 0.0  ;;  %v7031_v38 = vadd.f32 %v7030_v47, %v17122_v19  ;;  %v6421_v26 = vpop.f32.mrf.mxu0  ;;  %7278 = vmatprep.mubr.bf16.mxu1 %v18315_v6  ;;  %v14020_v1 = vld [vmem:[#allocation9 + $0x3c0] ss:$16 sps:$4 sm:$0xff]   ;;  %v14022_v40 = vld [vmem:[#allocation9 + $0x3c4] ss:$16 sps:$4 sm:$0xff]   ;;  %11323 = vmatprep.subr.bf16.mxu0 %v14028_v12 }
 0x6ef   :  { %v8844_v2 = vmax.f32 %v8843_v37, %v7853_v51  ;;  %v7854_v63 = vmax.f32 %v6420_v11, 0.0  ;;  %v6422_v59 = vadd.f32 %v6421_v26, %v17019_v50  ;;  %v7032_v62 = vpop.f32.mrf.mxu1  ;;  %11360 = vmatprep.subr.bf16.mxu1 %v14022_v40 }
 0x6f0   :  { %v9020_v14 = vmax.f32 %v9019_v3, %v7752_v9  ;;  %v7759_v46 = vmax.f32 %v7031_v38, 0.0  ;;  %v7033_v0 = vadd.f32 %v7032_v62, %v17129_v42  ;;  %v6423_v27 = vpop.f32.mrf.mxu0  ;;  %11361 = vmatpush2.bf16.msra.mxu1 %v14020_v1 }
 0x6f1   :  { %v8907_v16 = vmax.f32 %v8906_v48, %v7854_v63  ;;  %v7861_v20 = vmax.f32 %v6422_v59, 0.0  ;;  %v6424_v35 = vadd.f32 %v6423_v27, %v17027_v49  ;;  %v7034_v44 = vpop.f32.mrf.mxu1  ;;  %11324 = vmatpush2.bf16.msra.mxu0 %v14026_v57  ;;  %v14031_v59 = vld [vmem:[#allocation9 + $0x164] ss:$16 sps:$4 sm:$0xff]  }
 0x6f2   :  { %v8958_v7 = vmax.f32 %v8957_v23, %v7759_v46  ;;  %v7760_v22 = vmax.f32 %v7033_v0, 0.0  ;;  %v7035_v30 = vadd.f32 %v7034_v44, %v17122_v19  ;;  %v6427_v13 = vpop.f32.mrf.mxu0  ;;  %6666 = vmatmul.mubr.bf16.gmra.mxu0 %v16100_v5  ;;  %v18370_v27 = vld [vmem:[#allocation48_spill] sm:$0xff]  ;;  %11325 = vmatprep.subr.bf16.mxu0 %v14031_v59 }
 0x6f3   :  { %v8845_v55 = vmax.f32 %v8844_v2, %v7861_v20  ;;  %v7862_v28 = vmax.f32 %v6424_v35, 0.0  ;;  %v6428_v8 = vadd.f32 %v6427_v13, %v17019_v50  ;;  %v7036_v15 = vpop.f32.mrf.mxu1  ;;  %6675 = vmatprep.mubr.bf16.mxu0 %v18315_v6 }
 0x6f4   :  { %v9021_v53 = vmax.f32 %v9020_v14, %v7760_v22  ;;  %v7767_v41 = vmax.f32 %v7035_v30, 0.0  ;;  %v7037_v43 = vadd.f32 %v7036_v15, %v17129_v42  ;;  %v6429_v36 = vpop.f32.mrf.mxu0  ;;  %v14034_v15 = vld [vmem:[#allocation9 + $0x144] ss:$16 sps:$4 sm:$0xff]  }
 0x6f5   :  { %v8908_v24 = vmax.f32 %v8907_v16, %v7862_v28  ;;  %v7869_v54 = vmax.f32 %v6428_v8, 0.0  ;;  %v6430_v33 = vadd.f32 %v6429_v36, %v17027_v49  ;;  %v7040_v37 = vpop.f32.mrf.mxu1  ;;  %7279 = vmatmul.mubr.bf16.gmra.mxu1 %v16062_v17  ;;  %v14029_v16 = vld [vmem:[#allocation9 + $0x160] ss:$16 sps:$4 sm:$0xff]  }
 0x6f6   :  { %v8959_v39 = vmax.f32 %v8958_v7, %v7767_v41  ;;  %v7768_v21 = vmax.f32 %v7037_v43, 0.0  ;;  %v7041_v3 = vadd.f32 %v7040_v37, %v17122_v19  ;;  %v6431_v61 = vpop.f32.mrf.mxu0  ;;  %7288 = vmatprep.mubr.bf16.mxu1 %v18315_v6  ;;  %11326 = vmatpush2.bf16.msra.mxu0 %v14029_v16 }
 0x6f7   :  { %v8846_v48 = vmax.f32 %v8845_v55, %v7869_v54  ;;  %v7870_v51 = vmax.f32 %v6430_v33, 0.0  ;;  %v6432_v11 = vadd.f32 %v6431_v61, %v17019_v50  ;;  %v7042_v47 = vpop.f32.mrf.mxu1  ;;  %11327 = vmatprep.subr.bf16.mxu0 %v14034_v15 }
 0x6f8   :  { %v9022_v23 = vmax.f32 %v9021_v53, %v7768_v21  ;;  %v7775_v9 = vmax.f32 %v7041_v3, 0.0  ;;  %v7043_v17 = vadd.f32 %v7042_v47, %v17129_v42  ;;  %v6433_v38 = vpop.f32.mrf.mxu0 }
 0x6f9   :  { %v8909_v26 = vmax.f32 %v8908_v24, %v7870_v51  ;;  %v7877_v10 = vmax.f32 %v6432_v11, 0.0  ;;  %v6434_v2 = vadd.f32 %v6433_v38, %v17027_v49  ;;  %v7044_v63 = vpop.f32.mrf.mxu1  ;;  %v14032_v24 = vld [vmem:[#allocation9 + $0x140] ss:$16 sps:$4 sm:$0xff]   ;;  %v14037_v51 = vld [vmem:[#allocation9 + $0x124] ss:$16 sps:$4 sm:$0xff]  }
 0x6fa   :  { %v8960_v62 = vmax.f32 %v8959_v39, %v7775_v9  ;;  %v7776_v14 = vmax.f32 %v7043_v17, 0.0  ;;  %v7045_v46 = vadd.f32 %v7044_v63, %v17122_v19  ;;  %v6437_v0 = vpop.f32.mrf.mxu0  ;;  %6676 = vmatmul.mubr.bf16.gmra.mxu0 %v18370_v27  ;;  %v18371_v9 = vld [vmem:[#allocation47_spill] sm:$0xff] }
 0x6fb   :  { %v8847_v20 = vmax.f32 %v8846_v48, %v7877_v10  ;;  %v7878_v35 = vmax.f32 %v6434_v2, 0.0  ;;  %v6438_v44 = vadd.f32 %v6437_v0, %v17019_v50  ;;  %v7046_v29 = vpop.f32.mrf.mxu1  ;;  %6685 = vmatprep.mubr.bf16.mxu0 %v18315_v6  ;;  %11328 = vmatpush2.bf16.msra.mxu0 %v14032_v24  ;;  %v14035_v17 = vld [vmem:[#allocation9 + $0x120] ss:$16 sps:$4 sm:$0xff]  }
 0x6fc   :  { %v9023_v7 = vmax.f32 %v9022_v23, %v7776_v14  ;;  %v7783_v22 = vmax.f32 %v7045_v46, 0.0  ;;  %v7047_v30 = vadd.f32 %v7046_v29, %v17129_v42  ;;  %v6439_v13 = vpop.f32.mrf.mxu0  ;;  %11329 = vmatprep.subr.bf16.mxu0 %v14037_v51 }
 0x6fd   :  { %v8910_v58 = vmax.f32 %v8909_v26, %v7878_v35  ;;  %v7885_v55 = vmax.f32 %v6438_v44, 0.0  ;;  %v6440_v28 = vadd.f32 %v6439_v13, %v17027_v49  ;;  %v7050_v8 = vpop.f32.mrf.mxu1  ;;  %7289 = vmatmul.mubr.bf16.gmra.mxu1 %v16077_v52 }
 0x6fe   :  { %v8961_v53 = vmax.f32 %v8960_v62, %v7783_v22  ;;  %v7784_v41 = vmax.f32 %v7047_v30, 0.0  ;;  %v7051_v43 = vadd.f32 %v7050_v8, %v17122_v19  ;;  %v6441_v36 = vpop.f32.mrf.mxu0  ;;  %7298 = vmatprep.mubr.bf16.mxu1 %v18315_v6  ;;  %v14040_v22 = vld [vmem:[#allocation9 + $0x104] ss:$16 sps:$4 sm:$0xff]  }
 0x6ff   :  { %v8848_v54 = vmax.f32 %v8847_v20, %v7885_v55  ;;  %v7886_v33 = vmax.f32 %v6440_v28, 0.0  ;;  %v6442_v37 = vadd.f32 %v6441_v36, %v17019_v50  ;;  %v7052_v12 = vpop.f32.mrf.mxu1  ;;  %11330 = vmatpush2.bf16.msra.mxu0 %v14035_v17  ;;  %v14038_v28 = vld [vmem:[#allocation9 + $0x100] ss:$16 sps:$4 sm:$0xff]  }
 0x700   :  { %v9024_v39 = vmax.f32 %v9023_v7, %v7784_v41  ;;  %v7791_v21 = vmax.f32 %v7051_v43, 0.0  ;;  %v7053_v52 = vadd.f32 %v7052_v12, %v17129_v42  ;;  %v6443_v3 = vpop.f32.mrf.mxu0  ;;  %11331 = vmatprep.subr.bf16.mxu0 %v14040_v22 }
 0x701   :  { %v8911_v61 = vmax.f32 %v8910_v58, %v7886_v33  ;;  %v7893_v1 = vmax.f32 %v6442_v37, 0.0  ;;  %v6444_v40 = vadd.f32 %v6443_v3, %v17027_v49  ;;  %v7054_v48 = vpop.f32.mrf.mxu1 }
 0x702   :  { %v8962_v11 = vmax.f32 %v8961_v53, %v7791_v21  ;;  %v7792_v47 = vmax.f32 %v7053_v52, 0.0  ;;  %v7055_v57 = vadd.f32 %v7054_v48, %v17122_v19  ;;  %v6447_v23 = vpop.f32.mrf.mxu0  ;;  %6686 = vmatmul.mubr.bf16.gmra.mxu0 %v18371_v9 }
 0x703   :  { %v8849_v38 = vmax.f32 %v8848_v54, %v7893_v1  ;;  %v7894_v26 = vmax.f32 %v6444_v40, 0.0  ;;  %v6448_v10 = vadd.f32 %v6447_v23, %v17019_v50  ;;  %v7056_v2 = vpop.f32.mrf.mxu1  ;;  %6695 = vmatprep.mubr.bf16.mxu0 %v18315_v6  ;;  %11332 = vmatpush2.bf16.msra.mxu0 %v14038_v28 }
 0x704   :  { %v9025_v63 = vmax.f32 %v9024_v39, %v7792_v47  ;;  %v7799_v59 = vmax.f32 %v7055_v57, 0.0  ;;  %v7057_v62 = vadd.f32 %v7056_v2, %v17129_v42  ;;  %v6449_v14 = vpop.f32.mrf.mxu0  ;;  %v18372_v39 = vld [vmem:[#allocation54_spill] sm:$0xff] }
 0x705   :  { %v8912_v46 = vmax.f32 %v8911_v61, %v7894_v26  ;;  %v7901_v0 = vmax.f32 %v6448_v10, 0.0  ;;  %v6450_v16 = vadd.f32 %v6449_v14, %v17027_v49  ;;  %v7060_v20 = vpop.f32.mrf.mxu1  ;;  %7299 = vmatmul.mubr.bf16.gmra.mxu1 %v16074_v60 }
 0x706   :  { %v8963_v35 = vmax.f32 %v8962_v11, %v7799_v59  ;;  %v7800_v44 = vmax.f32 %v7057_v62, 0.0  ;;  %v7061_v29 = vadd.f32 %v7060_v20, %v17122_v19  ;;  %v6451_v7 = vpop.f32.mrf.mxu0  ;;  %7308 = vmatprep.mubr.bf16.mxu1 %v18315_v6 }
 0x707   :  { %v8850_v30 = vmax.f32 %v8849_v38, %v7901_v0  ;;  %v7902_v13 = vmax.f32 %v6450_v16, 0.0  ;;  %v6452_v58 = vadd.f32 %v6451_v7, %v17019_v50  ;;  %v7062_v55 = vpop.f32.mrf.mxu1 }
 0x708   :  { %v9026_v8 = vmax.f32 %v9025_v63, %v7800_v44  ;;  %v7807_v15 = vmax.f32 %v7061_v29, 0.0  ;;  %v7063_v53 = vadd.f32 %v7062_v55, %v17129_v42  ;;  %v6453_v60 = vpop.f32.mrf.mxu0 }
 0x709   :  { %v8913_v41 = vmax.f32 %v8912_v46, %v7902_v13  ;;  %v7909_v43 = vmax.f32 %v6452_v58, 0.0  ;;  %v6454_v36 = vadd.f32 %v6453_v60, %v17027_v49  ;;  %v7064_v24 = vpop.f32.mrf.mxu1  ;;  %v18373_v13 = vld [vmem:[#allocation52_spill] sm:$0xff] }
 0x70a   :  { %v8964_v54 = vmax.f32 %v8963_v35, %v7807_v15  ;;  %v7808_v33 = vmax.f32 %v7063_v53, 0.0  ;;  %v7065_v37 = vadd.f32 %v7064_v24, %v17122_v19  ;;  %v6457_v12 = vpop.f32.mrf.mxu0  ;;  %6696 = vmatmul.mubr.bf16.gmra.mxu0 %v18372_v39 }
 0x70b   :  { %v8851_v21 = vmax.f32 %v8850_v30, %v7909_v43  ;;  %v7910_v52 = vmax.f32 %v6454_v36, 0.0  ;;  %v6458_v3 = vadd.f32 %v6457_v12, %v17019_v50  ;;  %v7066_v61 = vpop.f32.mrf.mxu1  ;;  %6705 = vmatprep.mubr.bf16.mxu0 %v18315_v6 }
 0x70c   :  { %v9027_v1 = vmax.f32 %v9026_v8, %v7808_v33  ;;  %v7815_v40 = vmax.f32 %v7065_v37, 0.0  ;;  %v7067_v48 = vadd.f32 %v7066_v61, %v17129_v42  ;;  %v6459_v51 = vpop.f32.mrf.mxu0 }
 0x70d   :  { %v8914_v11 = vmax.f32 %v8913_v41, %v7910_v52  ;;  %v7917_v47 = vmax.f32 %v6458_v3, 0.0  ;;  %v6460_v57 = vadd.f32 %v6459_v51, %v17027_v49  ;;  %v7070_v23 = vpop.f32.mrf.mxu1  ;;  %7309 = vmatmul.mubr.bf16.gmra.mxu1 %v16089_v56  ;;  %v14041_v52 = vld [vmem:[#allocation9 + $0x3a0] ss:$16 sps:$4 sm:$0xff]   ;;  %v14043_v3 = vld [vmem:[#allocation9 + $0x3a4] ss:$16 sps:$4 sm:$0xff]  }
 0x70e   :  { %v8965_v17 = vmax.f32 %v8964_v54, %v7815_v40  ;;  %v7816_v38 = vmax.f32 %v7067_v48, 0.0  ;;  %v7071_v26 = vadd.f32 %v7070_v23, %v17122_v19  ;;  %v6461_v10 = vpop.f32.mrf.mxu0  ;;  %7318 = vmatprep.mubr.bf16.mxu1 %v18315_v6  ;;  %11362 = vmatprep.subr.bf16.mxu1 %v14043_v3 }
 0x70f   :  { %v8852_v2 = vmax.f32 %v8851_v21, %v7917_v47  ;;  %v7918_v63 = vmax.f32 %v6460_v57, 0.0  ;;  %v6462_v59 = vadd.f32 %v6461_v10, %v17019_v50  ;;  %v7072_v62 = vpop.f32.mrf.mxu1  ;;  %11363 = vmatpush2.bf16.msra.mxu1 %v14041_v52 }
 0x710   :  { %v9028_v14 = vmax.f32 %v9027_v1, %v7816_v38  ;;  %v7823_v46 = vmax.f32 %v7071_v26, 0.0  ;;  %v7073_v0 = vadd.f32 %v7072_v62, %v17129_v42  ;;  %v6463_v16 = vpop.f32.mrf.mxu0 }
 0x711   :  { %v8915_v20 = vmax.f32 %v8914_v11, %v7918_v63  ;;  %v7925_v35 = vmax.f32 %v6462_v59, 0.0  ;;  %v6464_v56 = vadd.f32 %v6463_v16, %v17027_v49  ;;  %v7074_v44 = vpop.f32.mrf.mxu1  ;;  %v18374_v59 = vld [vmem:[#allocation56_spill] sm:$0xff] }
 0x712   :  { %v8966_v29 = vmax.f32 %v8965_v17, %v7823_v46  ;;  %v7824_v7 = vmax.f32 %v7073_v0, 0.0  ;;  %v7075_v22 = vadd.f32 %v7074_v44, %v17122_v19  ;;  %v6467_v30 = vpop.f32.mrf.mxu0  ;;  %6706 = vmatmul.mubr.bf16.gmra.mxu0 %v18373_v13 }
 0x713   :  { %v8853_v58 = vmax.f32 %v8852_v2, %v7925_v35  ;;  %v7926_v55 = vmax.f32 %v6464_v56, 0.0  ;;  %v6468_v28 = vadd.f32 %v6467_v30, %v17019_v50  ;;  %v7076_v8 = vpop.f32.mrf.mxu1  ;;  %6715 = vmatprep.mubr.bf16.mxu0 %v18315_v6 }
 0x714   :  { %v9029_v15 = vmax.f32 %v9028_v14, %v7824_v7  ;;  %v7831_v53 = vmax.f32 %v7075_v22, 0.0  ;;  %v7077_v60 = vadd.f32 %v7076_v8, %v17129_v42  ;;  %v6469_v41 = vpop.f32.mrf.mxu0 }
 0x715   :  { %v8916_v43 = vmax.f32 %v8915_v20, %v7926_v55  ;;  %v7933_v36 = vmax.f32 %v6468_v28, 0.0  ;;  %v6470_v24 = vadd.f32 %v6469_v41, %v17027_v49  ;;  %v7080_v54 = vpop.f32.mrf.mxu1  ;;  %7319 = vmatmul.mubr.bf16.gmra.mxu1 %v16086_v34 }
 0x716   :  { %v8967_v33 = vmax.f32 %v8966_v29, %v7831_v53  ;;  %v7832_v37 = vmax.f32 %v7077_v60, 0.0  ;;  %v7081_v12 = vadd.f32 %v7080_v54, %v17122_v19  ;;  %v6471_v21 = vpop.f32.mrf.mxu0  ;;  %7328 = vmatprep.mubr.bf16.mxu1 %v18315_v6 }
 0x717   :  { %v8854_v61 = vmax.f32 %v8853_v58, %v7933_v36  ;;  %v7934_v1 = vmax.f32 %v6470_v24, 0.0  ;;  %v6472_v40 = vadd.f32 %v6471_v21, %v17019_v50  ;;  %v7082_v48 = vpop.f32.mrf.mxu1 }
 0x718   :  { %v9030_v51 = vmax.f32 %v9029_v15, %v7832_v37  ;;  %v7839_v11 = vmax.f32 %v7081_v12, 0.0  ;;  %v7083_v47 = vadd.f32 %v7082_v48, %v17129_v42  ;;  %v6473_v57 = vpop.f32.mrf.mxu0 }
 0x719   :  { %v8917_v34 = vmax.f32 %v8916_v43, %v7934_v1  ;;  %v7941_v23 = vmax.f32 %v6472_v40, 0.0  ;;  %v6474_v17 = vadd.f32 %v6473_v57, %v17027_v49  ;;  %v7084_v38 = vpop.f32.mrf.mxu1 }
 0x71a   :  { %v8968_v26 = vmax.f32 %v8967_v33, %v7839_v11  ;;  %v7840_v10 = vmax.f32 %v7083_v47, 0.0  ;;  %v7085_v2 = vadd.f32 %v7084_v38, %v17122_v19  ;;  %v6477_v63 = vpop.f32.mrf.mxu0  ;;  %6716 = vmatmul.mubr.bf16.gmra.mxu0 %v18374_v59 }
 0x71b   :  { %v8855_v62 = vmax.f32 %v8854_v61, %v7941_v23  ;;  %v7942_v14 = vmax.f32 %v6474_v17, 0.0  ;;  %v6478_v46 = vadd.f32 %v6477_v63, %v17019_v50  ;;  %v7086_v0 = vpop.f32.mrf.mxu1  ;;  %6725 = vmatprep.mubr.bf16.mxu0 %v18315_v6  ;;  %v18375_v61 = vld [vmem:[#allocation55_spill] sm:$0xff] }
 0x71c   :  { %v9031_v16 = vmax.f32 %v9030_v51, %v7840_v10  ;;  %v7847_v20 = vmax.f32 %v7085_v2, 0.0  ;;  %v7087_v35 = vadd.f32 %v7086_v0, %v17129_v42  ;;  %v6479_v56 = vpop.f32.mrf.mxu0 }
 0x71d   :  { %v8918_v44 = vmax.f32 %v8917_v34, %v7942_v14  ;;  %v7949_v29 = vmax.f32 %v6478_v46, 0.0  ;;  %v6480_v7 = vadd.f32 %v6479_v56, %v17027_v49  ;;  %v7090_v22 = vpop.f32.mrf.mxu1  ;;  %7329 = vmatmul.mubr.bf16.gmra.mxu1 %v16103_v32 }
 0x71e   :  { %v8969_v30 = vmax.f32 %v8968_v26, %v7847_v20  ;;  %v7848_v58 = vmax.f32 %v7087_v35, 0.0  ;;  %v7091_v55 = vadd.f32 %v7090_v22, %v17122_v19  ;;  %v6481_v28 = vpop.f32.mrf.mxu0  ;;  %7338 = vmatprep.mubr.bf16.mxu1 %v18315_v6 }
 0x71f   :  { %v8856_v8 = vmax.f32 %v8855_v62, %v7949_v29  ;;  %v7950_v15 = vmax.f32 %v6480_v7, 0.0  ;;  %v6482_v53 = vadd.f32 %v6481_v28, %v17019_v50  ;;  %v7092_v60 = vpop.f32.mrf.mxu1 }
 0x720   :  { %v9032_v41 = vmax.f32 %v9031_v16, %v7848_v58  ;;  %v7855_v43 = vmax.f32 %v7091_v55, 0.0  ;;  %v7093_v36 = vadd.f32 %v7092_v60, %v17129_v42  ;;  %v6483_v24 = vpop.f32.mrf.mxu0 }
 0x721   :  { %v8919_v54 = vmax.f32 %v8918_v44, %v7950_v15  ;;  %v7957_v33 = vmax.f32 %v6482_v53, 0.0  ;;  %v6484_v32 = vadd.f32 %v6483_v24, %v17027_v49  ;;  %v7094_v37 = vpop.f32.mrf.mxu1  ;;  %v18376_v15 = vld [vmem:[#allocation58_spill] sm:$0xff] }
 0x722   :  { %v8970_v12 = vmax.f32 %v8969_v30, %v7855_v43  ;;  %v7856_v21 = vmax.f32 %v7093_v36, 0.0  ;;  %v7095_v52 = vadd.f32 %v7094_v37, %v17122_v19  ;;  %v6487_v3 = vpop.f32.mrf.mxu0  ;;  %6726 = vmatmul.mubr.bf16.gmra.mxu0 %v18375_v61  ;;  %v14046_v30 = vld [vmem:[#allocation9 + $0x384] ss:$16 sps:$4 sm:$0xff]   ;;  %v14044_v53 = vld [vmem:[#allocation9 + $0x380] ss:$16 sps:$4 sm:$0xff]  }
 0x723   :  { %v8857_v1 = vmax.f32 %v8856_v8, %v7957_v33  ;;  %v7958_v40 = vmax.f32 %v6484_v32, 0.0  ;;  %v6488_v48 = vadd.f32 %v6487_v3, %v17019_v50  ;;  %v7096_v51 = vpop.f32.mrf.mxu1  ;;  %6735 = vmatprep.mubr.bf16.mxu0 %v18315_v6  ;;  %11364 = vmatprep.subr.bf16.mxu1 %v14046_v30  ;;  %v14049_v3 = vld [vmem:[#allocation9 + $0x364] ss:$16 sps:$4 sm:$0xff]  }
 0x724   :  { %v9033_v11 = vmax.f32 %v9032_v41, %v7856_v21  ;;  %v7863_v47 = vmax.f32 %v7095_v52, 0.0  ;;  %v7097_v57 = vadd.f32 %v7096_v51, %v17129_v42  ;;  %v6489_v34 = vpop.f32.mrf.mxu0  ;;  %11365 = vmatpush2.bf16.msra.mxu1 %v14044_v53 }
 0x725   :  { %v8920_v23 = vmax.f32 %v8919_v54, %v7958_v40  ;;  %v7965_v17 = vmax.f32 %v6488_v48, 0.0  ;;  %v6490_v38 = vadd.f32 %v6489_v34, %v17027_v49  ;;  %v7100_v26 = vpop.f32.mrf.mxu1  ;;  %7339 = vmatmul.mubr.bf16.gmra.mxu1 %v16100_v5  ;;  %11366 = vmatprep.subr.bf16.mxu1 %v14049_v3 }
 0x726   :  { %v8971_v10 = vmax.f32 %v8970_v12, %v7863_v47  ;;  %v7864_v2 = vmax.f32 %v7097_v57, 0.0  ;;  %v7101_v63 = vadd.f32 %v7100_v26, %v17122_v19  ;;  %v6491_v62 = vpop.f32.mrf.mxu0  ;;  %7348 = vmatprep.mubr.bf16.mxu1 %v18315_v6 }
 0x727   :  { %v8858_v14 = vmax.f32 %v8857_v1, %v7965_v17  ;;  %v7966_v46 = vmax.f32 %v6490_v38, 0.0  ;;  %v6492_v0 = vadd.f32 %v6491_v62, %v17019_v50  ;;  %v7102_v16 = vpop.f32.mrf.mxu1 }
 0x728   :  { %v9034_v20 = vmax.f32 %v9033_v11, %v7864_v2  ;;  %v7871_v35 = vmax.f32 %v7101_v63, 0.0  ;;  %v7103_v56 = vadd.f32 %v7102_v16, %v17129_v42  ;;  %v6493_v44 = vpop.f32.mrf.mxu0  ;;  %v14047_v11 = vld [vmem:[#allocation9 + $0x360] ss:$16 sps:$4 sm:$0xff]  }
 0x729   :  { %v8921_v29 = vmax.f32 %v8920_v23, %v7966_v46  ;;  %v7973_v7 = vmax.f32 %v6492_v0, 0.0  ;;  %v6494_v5 = vadd.f32 %v6493_v44, %v17027_v49  ;;  %v7104_v22 = vpop.f32.mrf.mxu1  ;;  %11367 = vmatpush2.bf16.msra.mxu1 %v14047_v11 }
 0x72a   :  { %v8972_v58 = vmax.f32 %v8971_v10, %v7871_v35  ;;  %v7872_v55 = vmax.f32 %v7103_v56, 0.0  ;;  %v7105_v28 = vadd.f32 %v7104_v22, %v17122_v19  ;;  %v6497_v8 = vpop.f32.mrf.mxu0  ;;  %6736 = vmatmul.mubr.bf16.gmra.mxu0 %v18376_v15  ;;  %v18377_v35 = vld [vmem:[#allocation57_spill] sm:$0xff] }
 0x72b   :  { %v8859_v60 = vmax.f32 %v8858_v14, %v7973_v7  ;;  %v7974_v41 = vmax.f32 %v6494_v5, 0.0  ;;  %v6498_v43 = vadd.f32 %v6497_v8, %v17019_v50  ;;  %v7106_v36 = vpop.f32.mrf.mxu1  ;;  %6745 = vmatprep.mubr.bf16.mxu0 %v18315_v6  ;;  %v14052_v14 = vld [vmem:[#allocation9 + $0x344] ss:$16 sps:$4 sm:$0xff]   ;;  %v14050_v56 = vld [vmem:[#allocation9 + $0x340] ss:$16 sps:$4 sm:$0xff]  }
 0x72c   :  { %v9035_v24 = vmax.f32 %v9034_v20, %v7872_v55  ;;  %v7879_v54 = vmax.f32 %v7105_v28, 0.0  ;;  %v7107_v33 = vadd.f32 %v7106_v36, %v17129_v42  ;;  %v6499_v32 = vpop.f32.mrf.mxu0  ;;  %11368 = vmatprep.subr.bf16.mxu1 %v14052_v14 }
 0x72d   :  { %v8922_v37 = vmax.f32 %v8921_v29, %v7974_v41  ;;  %v7981_v12 = vmax.f32 %v6498_v43, 0.0  ;;  %v6500_v21 = vadd.f32 %v6499_v32, %v17027_v49  ;;  %v7110_v52 = vpop.f32.mrf.mxu1  ;;  %7349 = vmatmul.mubr.bf16.gmra.mxu1 %v18370_v27  ;;  %v14055_v41 = vld [vmem:[#allocation9 + $0x324] ss:$16 sps:$4 sm:$0xff]  }
 0x72e   :  { %v8973_v1 = vmax.f32 %v8972_v58, %v7879_v54  ;;  %v7880_v40 = vmax.f32 %v7107_v33, 0.0  ;;  %v7111_v48 = vadd.f32 %v7110_v52, %v17122_v19  ;;  %v6501_v51 = vpop.f32.mrf.mxu0  ;;  %7358 = vmatprep.mubr.bf16.mxu1 %v18315_v6  ;;  %11369 = vmatpush2.bf16.msra.mxu1 %v14050_v56  ;;  %v14053_v33 = vld [vmem:[#allocation9 + $0x320] ss:$16 sps:$4 sm:$0xff]  }
 0x72f   :  { %v8860_v47 = vmax.f32 %v8859_v60, %v7981_v12  ;;  %v7982_v57 = vmax.f32 %v6500_v21, 0.0  ;;  %v6502_v34 = vadd.f32 %v6501_v51, %v17019_v50  ;;  %v7112_v23 = vpop.f32.mrf.mxu1  ;;  %11370 = vmatprep.subr.bf16.mxu1 %v14055_v41 }
 0x730   :  { %v9036_v17 = vmax.f32 %v9035_v24, %v7880_v40  ;;  %v7887_v38 = vmax.f32 %v7111_v48, 0.0  ;;  %v7113_v26 = vadd.f32 %v7112_v23, %v17129_v42  ;;  %v6503_v27 = vpop.f32.mrf.mxu0 }
 0x731   :  { %v8923_v10 = vmax.f32 %v8922_v37, %v7982_v57  ;;  %v7989_v2 = vmax.f32 %v6502_v34, 0.0  ;;  %v6504_v63 = vadd.f32 %v6503_v27, %v17027_v49  ;;  %v7114_v62 = vpop.f32.mrf.mxu1 }
 0x732   :  { %v8974_v46 = vmax.f32 %v8973_v1, %v7887_v38  ;;  %v7888_v0 = vmax.f32 %v7113_v26, 0.0  ;;  %v7115_v16 = vadd.f32 %v7114_v62, %v17122_v19  ;;  %v6507_v20 = vpop.f32.mrf.mxu0  ;;  %6746 = vmatmul.mubr.bf16.gmra.mxu0 %v18377_v35  ;;  %11371 = vmatpush2.bf16.msra.mxu1 %v14053_v33  ;;  %v18378_v38 = vld [vmem:[#allocation60_spill] sm:$0xff] }
 0x733   :  { %v8861_v44 = vmax.f32 %v8860_v47, %v7989_v2  ;;  %v7990_v29 = vmax.f32 %v6504_v63, 0.0  ;;  %v6508_v7 = vadd.f32 %v6507_v20, %v17019_v50  ;;  %v7116_v5 = vpop.f32.mrf.mxu1  ;;  %6755 = vmatprep.mubr.bf16.mxu0 %v18315_v6  ;;  %v14058_v47 = vld [vmem:[#allocation9 + $0x304] ss:$16 sps:$4 sm:$0xff]   ;;  %v14056_v26 = vld [vmem:[#allocation9 + $0x300] ss:$16 sps:$4 sm:$0xff]  }
 0x734   :  { %v9037_v22 = vmax.f32 %v9036_v17, %v7888_v0  ;;  %v7895_v30 = vmax.f32 %v7115_v16, 0.0  ;;  %v7117_v58 = vadd.f32 %v7116_v5, %v17129_v42  ;;  %v6509_v55 = vpop.f32.mrf.mxu0  ;;  %11372 = vmatprep.subr.bf16.mxu1 %v14058_v47 }
 0x735   :  { %v8924_v28 = vmax.f32 %v8923_v10, %v7990_v29  ;;  %v7997_v8 = vmax.f32 %v6508_v7, 0.0  ;;  %v6510_v53 = vadd.f32 %v6509_v55, %v17027_v49  ;;  %v7120_v60 = vpop.f32.mrf.mxu1  ;;  %7359 = vmatmul.mubr.bf16.gmra.mxu1 %v18371_v9 }
 0x736   :  { %v8975_v43 = vmax.f32 %v8974_v46, %v7895_v30  ;;  %v7896_v36 = vmax.f32 %v7117_v58, 0.0  ;;  %v7121_v24 = vadd.f32 %v7120_v60, %v17122_v19  ;;  %v6511_v54 = vpop.f32.mrf.mxu0  ;;  %7368 = vmatprep.mubr.bf16.mxu1 %v18315_v6  ;;  %11373 = vmatpush2.bf16.msra.mxu1 %v14056_v26 }
 0x737   :  { %v8862_v32 = vmax.f32 %v8861_v44, %v7997_v8  ;;  %v7998_v37 = vmax.f32 %v6510_v53, 0.0  ;;  %v6512_v12 = vadd.f32 %v6511_v54, %v17019_v50  ;;  %v7122_v21 = vpop.f32.mrf.mxu1 }
 0x738   :  { %v9038_v52 = vmax.f32 %v9037_v22, %v7896_v36  ;;  %v7903_v3 = vmax.f32 %v7121_v24, 0.0  ;;  %v7123_v1 = vadd.f32 %v7122_v21, %v17129_v42  ;;  %v6513_v9 = vpop.f32.mrf.mxu0 }
 0x739   :  { %v8925_v40 = vmax.f32 %v8924_v28, %v7998_v37  ;;  %v8005_v48 = vmax.f32 %v6512_v12, 0.0  ;;  %v6514_v51 = vadd.f32 %v6513_v9, %v17027_v49  ;;  %v7124_v11 = vpop.f32.mrf.mxu1  ;;  %v18379_v12 = vld [vmem:[#allocation59_spill] sm:$0xff] }
 0x73a   :  { %v8976_v57 = vmax.f32 %v8975_v43, %v7903_v3  ;;  %v7904_v34 = vmax.f32 %v7123_v1, 0.0  ;;  %v7125_v23 = vadd.f32 %v7124_v11, %v17122_v19  ;;  %v6517_v17 = vpop.f32.mrf.mxu0  ;;  %6756 = vmatmul.mubr.bf16.gmra.mxu0 %v18378_v38 }
 0x73b   :  { %v8863_v27 = vmax.f32 %v8862_v32, %v8005_v48  ;;  %v8006_v10 = vmax.f32 %v6514_v51, 0.0  ;;  %v6518_v2 = vadd.f32 %v6517_v17, %v17019_v50  ;;  %v7126_v63 = vpop.f32.mrf.mxu1  ;;  %6765 = vmatprep.mubr.bf16.mxu0 %v18315_v6 }
 0x73c   :  { %v9039_v62 = vmax.f32 %v9038_v52, %v7904_v34  ;;  %v7911_v14 = vmax.f32 %v7125_v23, 0.0  ;;  %v7127_v46 = vadd.f32 %v7126_v63, %v17129_v42  ;;  %v6519_v0 = vpop.f32.mrf.mxu0 }
 0x73d   :  { %v8926_v16 = vmax.f32 %v8925_v40, %v8006_v10  ;;  %v8013_v20 = vmax.f32 %v6518_v2, 0.0  ;;  %v6520_v56 = vadd.f32 %v6519_v0, %v17027_v49  ;;  %v7130_v44 = vpop.f32.mrf.mxu1  ;;  %7369 = vmatmul.mubr.bf16.gmra.mxu1 %v18372_v39 }
 0x73e   :  { %v8977_v29 = vmax.f32 %v8976_v57, %v7911_v14  ;;  %v7912_v7 = vmax.f32 %v7127_v46, 0.0  ;;  %v7131_v5 = vadd.f32 %v7130_v44, %v17122_v19  ;;  %v6521_v22 = vpop.f32.mrf.mxu0  ;;  %7378 = vmatprep.mubr.bf16.mxu1 %v18315_v6 }
 0x73f   :  { %v8864_v30 = vmax.f32 %v8863_v27, %v8013_v20  ;;  %v8014_v58 = vmax.f32 %v6520_v56, 0.0  ;;  %v6522_v55 = vadd.f32 %v6521_v22, %v17019_v50  ;;  %v7132_v28 = vpop.f32.mrf.mxu1 }
 0x740   :  { %v9040_v8 = vmax.f32 %v9039_v62, %v7912_v7  ;;  %v7919_v53 = vmax.f32 %v7131_v5, 0.0  ;;  %v7133_v60 = vadd.f32 %v7132_v28, %v17129_v42  ;;  %v6523_v41 = vpop.f32.mrf.mxu0 }
 0x741   :  { %v8927_v43 = vmax.f32 %v8926_v16, %v8014_v58  ;;  %v8021_v36 = vmax.f32 %v6522_v55, 0.0  ;;  %v6524_v39 = vadd.f32 %v6523_v41, %v17027_v49  ;;  %v7134_v24 = vpop.f32.mrf.mxu1 }
 0x742   :  { %v8978_v54 = vmax.f32 %v8977_v29, %v7919_v53  ;;  %v7920_v33 = vmax.f32 %v7133_v60, 0.0  ;;  %v7135_v32 = vadd.f32 %v7134_v24, %v17122_v19  ;;  %v6527_v37 = vpop.f32.mrf.mxu0  ;;  %6766 = vmatmul.mubr.bf16.gmra.mxu0 %v18379_v12 }
 0x743   :  { %v8865_v21 = vmax.f32 %v8864_v30, %v8021_v36  ;;  %v8022_v52 = vmax.f32 %v6524_v39, 0.0  ;;  %v6528_v3 = vadd.f32 %v6527_v37, %v17019_v50  ;;  %v7136_v1 = vpop.f32.mrf.mxu1  ;;  %6775 = vmatprep.mubr.bf16.mxu0 %v18315_v6  ;;  %v18380_v30 = vld [vmem:[#allocation62_spill] sm:$0xff] }
 0x744   :  { %v9041_v9 = vmax.f32 %v9040_v8, %v7920_v33  ;;  %v7927_v40 = vmax.f32 %v7135_v32, 0.0  ;;  %v7137_v48 = vadd.f32 %v7136_v1, %v17129_v42  ;;  %v6529_v51 = vpop.f32.mrf.mxu0 }
 0x745   :  { %v8928_v11 = vmax.f32 %v8927_v43, %v8022_v52  ;;  %v8029_v47 = vmax.f32 %v6528_v3, 0.0  ;;  %v6530_v57 = vadd.f32 %v6529_v51, %v17027_v49  ;;  %v7140_v34 = vpop.f32.mrf.mxu1  ;;  %7379 = vmatmul.mubr.bf16.gmra.mxu1 %v18373_v13 }
 0x746   :  { %v8979_v23 = vmax.f32 %v8978_v54, %v7927_v40  ;;  %v7928_v17 = vmax.f32 %v7137_v48, 0.0  ;;  %v7141_v26 = vadd.f32 %v7140_v34, %v17122_v19  ;;  %v6531_v27 = vpop.f32.mrf.mxu0  ;;  %7388 = vmatprep.mubr.bf16.mxu1 %v18315_v6 }
 0x747   :  { %v8866_v10 = vmax.f32 %v8865_v21, %v8029_v47  ;;  %v8030_v2 = vmax.f32 %v6530_v57, 0.0  ;;  %v6532_v63 = vadd.f32 %v6531_v27, %v17019_v50  ;;  %v7142_v62 = vpop.f32.mrf.mxu1 }
 0x748   :  { %v9042_v14 = vmax.f32 %v9041_v9, %v7928_v17  ;;  %v7935_v46 = vmax.f32 %v7141_v26, 0.0  ;;  %v7143_v0 = vadd.f32 %v7142_v62, %v17129_v42  ;;  %v6533_v16 = vpop.f32.mrf.mxu0  ;;  %v18381_v17 = vld [vmem:[#allocation61_spill] sm:$0xff] }
 0x749   :  { %v8929_v20 = vmax.f32 %v8928_v11, %v8030_v2  ;;  %v8037_v56 = vmax.f32 %v6532_v63, 0.0  ;;  %v6534_v13 = vadd.f32 %v6533_v16, %v17027_v49  ;;  %v7144_v44 = vpop.f32.mrf.mxu1 }
 0x74a   :  { %v8980_v29 = vmax.f32 %v8979_v23, %v7935_v46  ;;  %v7936_v7 = vmax.f32 %v7143_v0, 0.0  ;;  %v7145_v5 = vadd.f32 %v7144_v44, %v17122_v19  ;;  %v6537_v22 = vpop.f32.mrf.mxu0  ;;  %6776 = vmatmul.mubr.bf16.gmra.mxu0 %v18380_v30 }
 0x74b   :  { %v17453_v58 = vmax.f32 %v8866_v10, %v8037_v56  ;;  %v8038_v55 = vmax.f32 %v6534_v13, 0.0  ;;  %v7146_v28 = vpop.f32.mrf.mxu1  ;;  %6785 = vmatprep.mubr.bf16.mxu0 %v18315_v6  ;;  %v6538_v36 = vadd.f32 %v6537_v22, %v17019_v50 }
 0x74c   :  { %v9043_v8 = vmax.f32 %v9042_v14, %v7936_v7  ;;  %v7943_v53 = vmax.f32 %v7145_v5, 0.0  ;;  %v7147_v60 = vadd.f32 %v7146_v28, %v17129_v42  ;;  %v6539_v41 = vpop.f32.mrf.mxu0 }
 0x74d   :  { %v17457_v43 = vmax.f32 %v8929_v20, %v8038_v55  ;;  %v7150_v39 = vpop.f32.mrf.mxu1  ;;  %7389 = vmatmul.mubr.bf16.gmra.mxu1 %v18374_v59  ;;  %v6540_v37 = vadd.f32 %v6539_v41, %v17027_v49  ;;  %v8045_v48 = vmax.f32 %v6538_v36, 0.0 }
 0x74e   :  { %v8981_v24 = vmax.f32 %v8980_v29, %v7943_v53  ;;  %v7944_v54 = vmax.f32 %v7147_v60, 0.0  ;;  %v7151_v33 = vadd.f32 %v7150_v39, %v17122_v19  ;;  %v6541_v32 = vpop.f32.mrf.mxu0  ;;  %7398 = vmatprep.mubr.bf16.mxu1 %v18315_v6 }
 0x74f   :  { %v6542_v21 = vadd.f32 %v6541_v32, %v17019_v50  ;;  %v7152_v52 = vpop.f32.mrf.mxu1  ;;  %v8046_v26 = vmax.f32 %v6540_v37, 0.0 }
 0x750   :  { %v9044_v3 = vmax.f32 %v9043_v8, %v7944_v54  ;;  %v7951_v1 = vmax.f32 %v7151_v33, 0.0  ;;  %v7153_v9 = vadd.f32 %v7152_v52, %v17129_v42  ;;  %v6543_v40 = vpop.f32.mrf.mxu0  ;;  %v18382_v52 = vld [vmem:[#allocation64_spill] sm:$0xff] }
 0x751   :  { %v8053_v51 = vmax.f32 %v6542_v21, 0.0  ;;  %v6544_v59 = vadd.f32 %v6543_v40, %v17027_v49  ;;  %v7154_v11 = vpop.f32.mrf.mxu1 }
 0x752   :  { %v8982_v47 = vmax.f32 %v8981_v24, %v7951_v1  ;;  %v7952_v57 = vmax.f32 %v7153_v9, 0.0  ;;  %v7155_v34 = vadd.f32 %v7154_v11, %v17122_v19  ;;  %v6547_v23 = vpop.f32.mrf.mxu0  ;;  %6786 = vmatmul.mubr.bf16.gmra.mxu0 %v18381_v17 }
 0x753   :  { %v9333_v27 = vmax.f32 %v8045_v48, %v8053_v51  ;;  %v8054_v10 = vmax.f32 %v6544_v59, 0.0  ;;  %v7156_v2 = vpop.f32.mrf.mxu1  ;;  %6795 = vmatprep.mubr.bf16.mxu0 %v18315_v6  ;;  %v6548_v14 = vadd.f32 %v6547_v23, %v17019_v50 }
 0x754   :  { %v9045_v63 = vmax.f32 %v9044_v3, %v7952_v57  ;;  %v7959_v62 = vmax.f32 %v7155_v34, 0.0  ;;  %v7157_v46 = vadd.f32 %v7156_v2, %v17129_v42  ;;  %v6549_v0 = vpop.f32.mrf.mxu0 }
 0x755   :  { %v9396_v16 = vmax.f32 %v8046_v26, %v8054_v10  ;;  %v6550_v20 = vadd.f32 %v6549_v0, %v17027_v49  ;;  %v7160_v56 = vpop.f32.mrf.mxu1  ;;  %7399 = vmatmul.mubr.bf16.gmra.mxu1 %v18375_v61  ;;  %v8061_v44 = vmax.f32 %v6548_v14, 0.0 }
 0x756   :  { %v8983_v13 = vmax.f32 %v8982_v47, %v7959_v62  ;;  %v7960_v29 = vmax.f32 %v7157_v46, 0.0  ;;  %v7161_v7 = vadd.f32 %v7160_v56, %v17122_v19  ;;  %v6551_v5 = vpop.f32.mrf.mxu0  ;;  %7408 = vmatprep.mubr.bf16.mxu1 %v18315_v6 }
 0x757   :  { %v8062_v22 = vmax.f32 %v6550_v20, 0.0  ;;  %v6552_v55 = vadd.f32 %v6551_v5, %v17019_v50  ;;  %v7162_v28 = vpop.f32.mrf.mxu1  ;;  %v9334_v8 = vmax.f32 %v9333_v27, %v8061_v44 }
 0x758   :  { %v9046_v53 = vmax.f32 %v9045_v63, %v7960_v29  ;;  %v7967_v60 = vmax.f32 %v7161_v7, 0.0  ;;  %v7163_v41 = vadd.f32 %v7162_v28, %v17129_v42  ;;  %v6553_v36 = vpop.f32.mrf.mxu0  ;;  %v18383_v28 = vld [vmem:[#allocation63_spill] sm:$0xff] }
 0x759   :  { %v9397_v39 = vmax.f32 %v9396_v16, %v8062_v22  ;;  %v8069_v61 = vmax.f32 %v6552_v55, 0.0  ;;  %v6554_v24 = vadd.f32 %v6553_v36, %v17027_v49  ;;  %v7164_v54 = vpop.f32.mrf.mxu1 }
 0x75a   :  { %v8984_v33 = vmax.f32 %v8983_v13, %v7967_v60  ;;  %v7968_v32 = vmax.f32 %v7163_v41, 0.0  ;;  %v7165_v37 = vadd.f32 %v7164_v54, %v17122_v19  ;;  %v6557_v21 = vpop.f32.mrf.mxu0  ;;  %6796 = vmatmul.mubr.bf16.gmra.mxu0 %v18382_v52 }
 0x75b   :  { %v9335_v3 = vmax.f32 %v9334_v8, %v8069_v61  ;;  %v8070_v1 = vmax.f32 %v6554_v24, 0.0  ;;  %v6558_v9 = vadd.f32 %v6557_v21, %v17019_v50  ;;  %v7166_v40 = vpop.f32.mrf.mxu1  ;;  %6805 = vmatprep.mubr.bf16.mxu0 %v18315_v6 }
 0x75c   :  { %v9047_v48 = vmax.f32 %v9046_v53, %v7968_v32  ;;  %v7975_v51 = vmax.f32 %v7165_v37, 0.0  ;;  %v7167_v59 = vadd.f32 %v7166_v40, %v17129_v42  ;;  %v6559_v11 = vpop.f32.mrf.mxu0 }
 0x75d   :  { %v9398_v47 = vmax.f32 %v9397_v39, %v8070_v1  ;;  %v8077_v57 = vmax.f32 %v6558_v9, 0.0  ;;  %v6560_v34 = vadd.f32 %v6559_v11, %v17027_v49  ;;  %v7170_v23 = vpop.f32.mrf.mxu1  ;;  %7409 = vmatmul.mubr.bf16.gmra.mxu1 %v18376_v15 }
 0x75e   :  { %v8985_v26 = vmax.f32 %v8984_v33, %v7975_v51  ;;  %v7976_v27 = vmax.f32 %v7167_v59, 0.0  ;;  %v7171_v10 = vadd.f32 %v7170_v23, %v17122_v19  ;;  %v6561_v2 = vpop.f32.mrf.mxu0  ;;  %7418 = vmatprep.mubr.bf16.mxu1 %v18315_v6 }
 0x75f   :  { %v9336_v63 = vmax.f32 %v9335_v3, %v8077_v57  ;;  %v8078_v62 = vmax.f32 %v6560_v34, 0.0  ;;  %v6562_v14 = vadd.f32 %v6561_v2, %v17019_v50  ;;  %v7172_v46 = vpop.f32.mrf.mxu1 }
 0x760   :  { %v9048_v0 = vmax.f32 %v9047_v48, %v7976_v27  ;;  %v7983_v16 = vmax.f32 %v7171_v10, 0.0  ;;  %v7173_v20 = vadd.f32 %v7172_v46, %v17129_v42  ;;  %v6563_v56 = vpop.f32.mrf.mxu0 }
 0x761   :  { %v9399_v13 = vmax.f32 %v9398_v47, %v8078_v62  ;;  %v8085_v44 = vmax.f32 %v6562_v14, 0.0  ;;  %v6564_v15 = vadd.f32 %v6563_v56, %v17027_v49  ;;  %v7174_v29 = vpop.f32.mrf.mxu1  ;;  %v18384_v14 = vld [vmem:[#allocation66_spill] sm:$0xff] }
 0x762   :  { %v8986_v7 = vmax.f32 %v8985_v26, %v7983_v16  ;;  %v7984_v5 = vmax.f32 %v7173_v20, 0.0  ;;  %v7175_v22 = vadd.f32 %v7174_v29, %v17122_v19  ;;  %v6567_v55 = vpop.f32.mrf.mxu0  ;;  %6806 = vmatmul.mubr.bf16.gmra.mxu0 %v18383_v28 }
 0x763   :  { %v9337_v8 = vmax.f32 %v9336_v63, %v8085_v44  ;;  %v8086_v53 = vmax.f32 %v6564_v15, 0.0  ;;  %v6568_v60 = vadd.f32 %v6567_v55, %v17019_v50  ;;  %v7176_v41 = vpop.f32.mrf.mxu1  ;;  %6815 = vmatprep.mubr.bf16.mxu0 %v18315_v6 }
 0x764   :  { %v9049_v36 = vmax.f32 %v9048_v0, %v7984_v5  ;;  %v7991_v39 = vmax.f32 %v7175_v22, 0.0  ;;  %v7177_v61 = vadd.f32 %v7176_v41, %v17129_v42  ;;  %v6569_v24 = vpop.f32.mrf.mxu0 }
 0x765   :  { %v9400_v54 = vmax.f32 %v9399_v13, %v8086_v53  ;;  %v8093_v33 = vmax.f32 %v6568_v60, 0.0  ;;  %v6570_v32 = vadd.f32 %v6569_v24, %v17027_v49  ;;  %v7180_v37 = vpop.f32.mrf.mxu1  ;;  %7419 = vmatmul.mubr.bf16.gmra.mxu1 %v18377_v35 }
 0x766   :  { %v8987_v21 = vmax.f32 %v8986_v7, %v7991_v39  ;;  %v7992_v3 = vmax.f32 %v7177_v61, 0.0  ;;  %v7181_v1 = vadd.f32 %v7180_v37, %v17122_v19  ;;  %v6571_v9 = vpop.f32.mrf.mxu0  ;;  %7428 = vmatprep.mubr.bf16.mxu1 %v18315_v6 }
 0x767   :  { %v9338_v40 = vmax.f32 %v9337_v8, %v8093_v33  ;;  %v8094_v48 = vmax.f32 %v6570_v32, 0.0  ;;  %v6572_v51 = vadd.f32 %v6571_v9, %v17019_v50  ;;  %v7182_v59 = vpop.f32.mrf.mxu1 }
 0x768   :  { %v9050_v11 = vmax.f32 %v9049_v36, %v7992_v3  ;;  %v7999_v47 = vmax.f32 %v7181_v1, 0.0  ;;  %v7183_v57 = vadd.f32 %v7182_v59, %v17129_v42  ;;  %v6573_v34 = vpop.f32.mrf.mxu0 }
 0x769   :  { %v9401_v23 = vmax.f32 %v9400_v54, %v8094_v48  ;;  %v8101_v26 = vmax.f32 %v6572_v51, 0.0  ;;  %v6574_v35 = vadd.f32 %v6573_v34, %v17027_v49  ;;  %v7184_v27 = vpop.f32.mrf.mxu1  ;;  %v18385_v51 = vld [vmem:[#allocation65_spill] sm:$0xff] }
 0x76a   :  { %v8988_v10 = vmax.f32 %v8987_v21, %v7999_v47  ;;  %v8000_v2 = vmax.f32 %v7183_v57, 0.0  ;;  %v7185_v63 = vadd.f32 %v7184_v27, %v17122_v19  ;;  %v6577_v62 = vpop.f32.mrf.mxu0  ;;  %6816 = vmatmul.mubr.bf16.gmra.mxu0 %v18384_v14 }
 0x76b   :  { %v9339_v46 = vmax.f32 %v9338_v40, %v8101_v26  ;;  %v8102_v0 = vmax.f32 %v6574_v35, 0.0  ;;  %v6578_v16 = vadd.f32 %v6577_v62, %v17019_v50  ;;  %v7186_v20 = vpop.f32.mrf.mxu1  ;;  %6825 = vmatprep.mubr.bf16.mxu0 %v18315_v6 }
 0x76c   :  { %v9051_v56 = vmax.f32 %v9050_v11, %v8000_v2  ;;  %v8007_v13 = vmax.f32 %v7185_v63, 0.0  ;;  %v7187_v44 = vadd.f32 %v7186_v20, %v17129_v42  ;;  %v6579_v15 = vpop.f32.mrf.mxu0 }
 0x76d   :  { %v9402_v29 = vmax.f32 %v9401_v23, %v8102_v0  ;;  %v8109_v7 = vmax.f32 %v6578_v16, 0.0  ;;  %v6580_v5 = vadd.f32 %v6579_v15, %v17027_v49  ;;  %v7190_v22 = vpop.f32.mrf.mxu1  ;;  %7429 = vmatmul.mubr.bf16.gmra.mxu1 %v18378_v38 }
 0x76e   :  { %v8989_v55 = vmax.f32 %v8988_v10, %v8007_v13  ;;  %v8008_v8 = vmax.f32 %v7187_v44, 0.0  ;;  %v7191_v53 = vadd.f32 %v7190_v22, %v17122_v19  ;;  %v6581_v60 = vpop.f32.mrf.mxu0  ;;  %7438 = vmatprep.mubr.bf16.mxu1 %v18315_v6 }
 0x76f   :  { %v9340_v41 = vmax.f32 %v9339_v46, %v8109_v7  ;;  %v8110_v36 = vmax.f32 %v6580_v5, 0.0  ;;  %v6582_v39 = vadd.f32 %v6581_v60, %v17019_v50  ;;  %v7192_v61 = vpop.f32.mrf.mxu1 }
 0x770   :  { %v9052_v24 = vmax.f32 %v9051_v56, %v8008_v8  ;;  %v8015_v54 = vmax.f32 %v7191_v53, 0.0  ;;  %v7193_v33 = vadd.f32 %v7192_v61, %v17129_v42  ;;  %v6583_v32 = vpop.f32.mrf.mxu0 }
 0x771   :  { %v9403_v37 = vmax.f32 %v9402_v29, %v8110_v36  ;;  %v8117_v21 = vmax.f32 %v6582_v39, 0.0  ;;  %v6584_v38 = vadd.f32 %v6583_v32, %v17027_v49  ;;  %v7194_v3 = vpop.f32.mrf.mxu1  ;;  %v18386_v39 = vld [vmem:[#allocation68_spill] sm:$0xff] }
 0x772   :  { %v8990_v1 = vmax.f32 %v8989_v55, %v8015_v54  ;;  %v8016_v9 = vmax.f32 %v7193_v33, 0.0  ;;  %v7195_v40 = vadd.f32 %v7194_v3, %v17122_v19  ;;  %v6587_v48 = vpop.f32.mrf.mxu0  ;;  %6826 = vmatmul.mubr.bf16.gmra.mxu0 %v18385_v51 }
 0x773   :  { %v9341_v59 = vmax.f32 %v9340_v41, %v8117_v21  ;;  %v8118_v11 = vmax.f32 %v6584_v38, 0.0  ;;  %v6588_v47 = vadd.f32 %v6587_v48, %v17019_v50  ;;  %v7196_v57 = vpop.f32.mrf.mxu1  ;;  %6835 = vmatprep.mubr.bf16.mxu0 %v18315_v6 }
 0x774   :  { %v9053_v34 = vmax.f32 %v9052_v24, %v8016_v9  ;;  %v8023_v23 = vmax.f32 %v7195_v40, 0.0  ;;  %v7197_v26 = vadd.f32 %v7196_v57, %v17129_v42  ;;  %v6589_v35 = vpop.f32.mrf.mxu0 }
 0x775   :  { %v9404_v27 = vmax.f32 %v9403_v37, %v8118_v11  ;;  %v8125_v10 = vmax.f32 %v6588_v47, 0.0  ;;  %v6590_v2 = vadd.f32 %v6589_v35, %v17027_v49  ;;  %v7200_v63 = vpop.f32.mrf.mxu1  ;;  %7439 = vmatmul.mubr.bf16.gmra.mxu1 %v18379_v12 }
 0x776   :  { %v8991_v62 = vmax.f32 %v8990_v1, %v8023_v23  ;;  %v8024_v46 = vmax.f32 %v7197_v26, 0.0  ;;  %v7201_v0 = vadd.f32 %v7200_v63, %v17122_v19  ;;  %v6591_v16 = vpop.f32.mrf.mxu0  ;;  %7448 = vmatprep.mubr.bf16.mxu1 %v18315_v6 }
 0x777   :  { %v9342_v20 = vmax.f32 %v9341_v59, %v8125_v10  ;;  %v8126_v56 = vmax.f32 %v6590_v2, 0.0  ;;  %v6592_v13 = vadd.f32 %v6591_v16, %v17019_v50  ;;  %v7202_v44 = vpop.f32.mrf.mxu1 }
 0x778   :  { %v9054_v15 = vmax.f32 %v9053_v34, %v8024_v46  ;;  %v8031_v29 = vmax.f32 %v7201_v0, 0.0  ;;  %v7203_v7 = vadd.f32 %v7202_v44, %v17129_v42  ;;  %v6593_v5 = vpop.f32.mrf.mxu0 }
 0x779   :  { %v9405_v22 = vmax.f32 %v9404_v27, %v8126_v56  ;;  %v8133_v55 = vmax.f32 %v6592_v13, 0.0  ;;  %v6594_v12 = vadd.f32 %v6593_v5, %v17027_v49  ;;  %v7204_v8 = vpop.f32.mrf.mxu1 }
 0x77a   :  { %v8992_v53 = vmax.f32 %v8991_v62, %v8031_v29  ;;  %v8032_v60 = vmax.f32 %v7203_v7, 0.0  ;;  %v7205_v41 = vadd.f32 %v7204_v8, %v17122_v19  ;;  %v6597_v36 = vpop.f32.mrf.mxu0  ;;  %6836 = vmatmul.mubr.bf16.gmra.mxu0 %v18386_v39  ;;  %v17544_v62 = vpack.c.bf16 %v17069_v25, %v17069_v25 }
 0x77b   :  { %v9343_v61 = vmax.f32 %v9342_v20, %v8133_v55  ;;  %v8134_v24 = vmax.f32 %v6594_v12, 0.0  ;;  %v6598_v54 = vadd.f32 %v6597_v36, %v17019_v50  ;;  %v7206_v33 = vpop.f32.mrf.mxu1  ;;  %6845 = vmatprep.mubr.bf16.mxu0 %v18315_v6  ;;  %v18390_v20 = vld [vmem:[#allocation67_spill] sm:$0xff] }
 0x77c   :  { %v9055_v32 = vmax.f32 %v9054_v15, %v8032_v60  ;;  %v8039_v37 = vmax.f32 %v7205_v41, 0.0  ;;  %v7207_v21 = vadd.f32 %v7206_v33, %v17129_v42  ;;  %v6599_v38 = vpop.f32.mrf.mxu0  ;;  %18389 = vst [vmem:[#allocation22_spill] sm:$0xff] %v17544_v62 }
 0x77d   :  { %v8141_v3 = vmax.f32 %v6598_v54, 0.0  ;;  %v6600_v1 = vadd.f32 %v6599_v38, %v17027_v49  ;;  %v7210_v9 = vpop.f32.mrf.mxu1  ;;  %7449 = vmatmul.mubr.bf16.gmra.mxu1 %v18380_v30  ;;  %v9406_v11 = vmax.f32 %v9405_v22, %v8134_v24 }
 0x77e   :  { %v17534_v40 = vmax.f32 %v8992_v53, %v8039_v37  ;;  %v8040_v48 = vmax.f32 %v7207_v21, 0.0  ;;  %v6601_v59 = vpop.f32.mrf.mxu0  ;;  %7458 = vmatprep.mubr.bf16.mxu1 %v18315_v6  ;;  %v7211_v35 = vadd.f32 %v7210_v9, %v17122_v19  ;;  %v17559_v37 = vpack.c.bf16 %v17055_v31, %v17055_v31 }
 0x77f   :  { %v9344_v47 = vmax.f32 %v9343_v61, %v8141_v3  ;;  %v8142_v57 = vmax.f32 %v6600_v1, 0.0  ;;  %v6602_v34 = vadd.f32 %v6601_v59, %v17019_v50  ;;  %v7212_v23 = vpop.f32.mrf.mxu1 }
 0x780   :  { %18387 = vst [vmem:[#allocation20_spill] sm:$0xff] %v17534_v40  ;;  %v17538_v26 = vmax.f32 %v9055_v32, %v8040_v48  ;;  %v6603_v27 = vpop.f32.mrf.mxu0  ;;  %v7213_v46 = vadd.f32 %v7212_v23, %v17129_v42  ;;  %v8047_v29 = vmax.f32 %v7211_v35, 0.0  ;;  %18391 = vst [vmem:[#allocation23_spill] sm:$0xff] %v17559_v37 }
 0x781   :  { %v9407_v10 = vmax.f32 %v9406_v11, %v8142_v57  ;;  %v8149_v2 = vmax.f32 %v6602_v34, 0.0  ;;  %v6604_v30 = vadd.f32 %v6603_v27, %v17027_v49  ;;  %v7214_v63 = vpop.f32.mrf.mxu1 }
 0x782   :  { %18388 = vst [vmem:[#allocation21_spill] sm:$0xff] %v17538_v26  ;;  %v7215_v0 = vadd.f32 %v7214_v63, %v17122_v19  ;;  %v6607_v16 = vpop.f32.mrf.mxu0  ;;  %6846 = vmatmul.mubr.bf16.gmra.mxu0 %v18390_v20  ;;  %v8048_v8 = vmax.f32 %v7213_v46, 0.0 }
 0x783   :  { %v9345_v56 = vmax.f32 %v9344_v47, %v8149_v2  ;;  %v8150_v13 = vmax.f32 %v6604_v30, 0.0  ;;  %v6608_v44 = vadd.f32 %v6607_v16, %v17019_v50  ;;  %v7216_v15 = vpop.f32.mrf.mxu1  ;;  %11333 = vmatprep.mubr.bf16.mxu0 %v17544_v62 }
 0x784   :  { %v8055_v7 = vmax.f32 %v7215_v0, 0.0  ;;  %v7217_v5 = vadd.f32 %v7216_v15, %v17129_v42  ;;  %v6609_v25 = vpop.f32.mrf.mxu0 }
 0x785   :  { %v8157_v22 = vmax.f32 %v6608_v44, 0.0  ;;  %v6610_v55 = vadd.f32 %v6609_v25, %v17027_v49  ;;  %v7220_v12 = vpop.f32.mrf.mxu1  ;;  %7459 = vmatmul.mubr.bf16.gmra.mxu1 %v18381_v17  ;;  %v9408_v53 = vmax.f32 %v9407_v10, %v8150_v13 }
 0x786   :  { %v9459_v60 = vmax.f32 %v8047_v29, %v8055_v7  ;;  %v8056_v41 = vmax.f32 %v7217_v5, 0.0  ;;  %v6611_v36 = vpop.f32.mrf.mxu0  ;;  %7468 = vmatprep.mubr.bf16.mxu1 %v18315_v6  ;;  %v7221_v54 = vadd.f32 %v7220_v12, %v17122_v19 }
 0x787   :  { %v9346_v61 = vmax.f32 %v9345_v56, %v8157_v22  ;;  %v8158_v24 = vmax.f32 %v6610_v55, 0.0  ;;  %v6612_v33 = vadd.f32 %v6611_v36, %v17019_v50  ;;  %v7222_v32 = vpop.f32.mrf.mxu1 }
 0x788   :  { %v9522_v21 = vmax.f32 %v8048_v8, %v8056_v41  ;;  %v7223_v17 = vadd.f32 %v7222_v32, %v17129_v42  ;;  %v6613_v38 = vpop.f32.mrf.mxu0  ;;  %v8063_v1 = vmax.f32 %v7221_v54, 0.0 }
 0x789   :  { %v9409_v3 = vmax.f32 %v9408_v53, %v8158_v24  ;;  %v8165_v9 = vmax.f32 %v6612_v33, 0.0  ;;  %v6614_v48 = vadd.f32 %v6613_v38, %v17027_v49  ;;  %v7224_v59 = vpop.f32.mrf.mxu1 }
 0x78a   :  { %v8064_v11 = vmax.f32 %v7223_v17, 0.0  ;;  %v7225_v47 = vadd.f32 %v7224_v59, %v17122_v19  ;;  %v6617_v57 = vpop.f32.mrf.mxu0  ;;  %11334 = vmatmul.mubr.bf16.vlgmr.msra.gmra.mxu0 %v17559_v37  ;;  %v9460_v34 = vmax.f32 %v9459_v60, %v8063_v1 }
 0x78b   :  { %v9347_v23 = vmax.f32 %v9346_v61, %v8165_v9  ;;  %v8166_v31 = vmax.f32 %v6614_v48, 0.0  ;;  %v6618_v35 = vadd.f32 %v6617_v57, %v17019_v50  ;;  %v7226_v27 = vpop.f32.mrf.mxu1 }
 0x78c   :  { %v9523_v10 = vmax.f32 %v9522_v21, %v8064_v11  ;;  %v8071_v2 = vmax.f32 %v7225_v47, 0.0  ;;  %v7227_v30 = vadd.f32 %v7226_v27, %v17129_v42  ;;  %v6619_v63 = vpop.f32.mrf.mxu0 }
 0x78d   :  { %v8173_v46 = vmax.f32 %v6618_v35, 0.0  ;;  %v6620_v0 = vadd.f32 %v6619_v63, %v17027_v49  ;;  %v7230_v16 = vpop.f32.mrf.mxu1  ;;  %7469 = vmatmul.mubr.bf16.gmra.mxu1 %v18382_v52  ;;  %v9410_v29 = vmax.f32 %v9409_v3, %v8166_v31 }
 0x78e   :  { %v9461_v56 = vmax.f32 %v9460_v34, %v8071_v2  ;;  %v8072_v13 = vmax.f32 %v7227_v30, 0.0  ;;  %v7231_v44 = vadd.f32 %v7230_v16, %v17122_v19  ;;  %v6621_v15 = vpop.f32.mrf.mxu0  ;;  %7478 = vmatprep.mubr.bf16.mxu1 %v18315_v6 }
 0x78f   :  { %v9348_v7 = vmax.f32 %v9347_v23, %v8173_v46  ;;  %v8174_v5 = vmax.f32 %v6620_v0, 0.0  ;;  %v6622_v25 = vadd.f32 %v6621_v15, %v17019_v50  ;;  %v7232_v22 = vpop.f32.mrf.mxu1 }
 0x790   :  { %v9524_v55 = vmax.f32 %v9523_v10, %v8072_v13  ;;  %v8079_v12 = vmax.f32 %v7231_v44, 0.0  ;;  %v7233_v8 = vadd.f32 %v7232_v22, %v17129_v42  ;;  %v6623_v53 = vpop.f32.mrf.mxu0 }
 0x791   :  { %v9411_v60 = vmax.f32 %v9410_v29, %v8174_v5  ;;  %v8181_v52 = vmax.f32 %v6622_v25, 0.0  ;;  %v6624_v41 = vadd.f32 %v6623_v53, %v17027_v49  ;;  %v7234_v36 = vpop.f32.mrf.mxu1 }
 0x792   :  { %v9462_v61 = vmax.f32 %v9461_v56, %v8079_v12  ;;  %v8080_v24 = vmax.f32 %v7233_v8, 0.0  ;;  %v7235_v54 = vadd.f32 %v7234_v36, %v17122_v19  ;;  %v6627_v33 = vpop.f32.mrf.mxu0 }
 0x793   :  { %v9349_v32 = vmax.f32 %v9348_v7, %v8181_v52  ;;  %v8182_v21 = vmax.f32 %v6624_v41, 0.0  ;;  %v6628_v17 = vadd.f32 %v6627_v33, %v17019_v50  ;;  %v7236_v38 = vpop.f32.mrf.mxu1 }
 0x794   :  { %v9525_v3 = vmax.f32 %v9524_v55, %v8080_v24  ;;  %v8087_v1 = vmax.f32 %v7235_v54, 0.0  ;;  %v7237_v9 = vadd.f32 %v7236_v38, %v17129_v42  ;;  %v6629_v48 = vpop.f32.mrf.mxu0 }
 0x795   :  { %v8189_v59 = vmax.f32 %v6628_v17, 0.0  ;;  %v6630_v11 = vadd.f32 %v6629_v48, %v17027_v49  ;;  %v7240_v47 = vpop.f32.mrf.mxu1  ;;  %7479 = vmatmul.mubr.bf16.gmra.mxu1 %v18383_v28  ;;  %v9412_v35 = vmax.f32 %v9411_v60, %v8182_v21  ;;  %v14061_v21 = vld [vmem:[#allocation9 + $0x4e4] ss:$16 sps:$4 sm:$0xff]   ;;  %v14059_v48 = vld [vmem:[#allocation9 + $0x4e0] ss:$16 sps:$4 sm:$0xff]  }
 0x796   :  { %v9463_v57 = vmax.f32 %v9462_v61, %v8087_v1  ;;  %v8088_v34 = vmax.f32 %v7237_v9, 0.0  ;;  %v7241_v23 = vadd.f32 %v7240_v47, %v17122_v19  ;;  %v6631_v31 = vpop.f32.mrf.mxu0  ;;  %7488 = vmatprep.mubr.bf16.mxu1 %v18315_v6  ;;  %11383 = vmatprep.subr.bf16.mxu0 %v14061_v21 }
 0x797   :  { %v9350_v27 = vmax.f32 %v9349_v32, %v8189_v59  ;;  %v8190_v10 = vmax.f32 %v6630_v11, 0.0  ;;  %v6632_v2 = vadd.f32 %v6631_v31, %v17019_v50  ;;  %v7242_v30 = vpop.f32.mrf.mxu1  ;;  %11384 = vmatpush1.bf16.msra.mxu0 %v14059_v48 }
 0x798   :  { %v9526_v63 = vmax.f32 %v9525_v3, %v8088_v34  ;;  %v8095_v46 = vmax.f32 %v7241_v23, 0.0  ;;  %v7243_v0 = vadd.f32 %v7242_v30, %v17129_v42  ;;  %v6633_v16 = vpop.f32.mrf.mxu0  ;;  %v14064_v30 = vld [vmem:[#allocation9 + $0x4c4] ss:$16 sps:$4 sm:$0xff]  }
 0x799   :  { %v9413_v56 = vmax.f32 %v9412_v35, %v8190_v10  ;;  %v8197_v28 = vmax.f32 %v6632_v2, 0.0  ;;  %v6634_v13 = vadd.f32 %v6633_v16, %v17027_v49  ;;  %v7244_v44 = vpop.f32.mrf.mxu1  ;;  %11385 = vmatprep.subr.bf16.mxu0 %v14064_v30 }
 0x79a   :  { %v9464_v15 = vmax.f32 %v9463_v57, %v8095_v46  ;;  %v8096_v29 = vmax.f32 %v7243_v0, 0.0  ;;  %v7245_v7 = vadd.f32 %v7244_v44, %v17122_v19  ;;  %v6637_v5 = vpop.f32.mrf.mxu0 }
 0x79b   :  { %v9351_v25 = vmax.f32 %v9350_v27, %v8197_v28  ;;  %v8198_v22 = vmax.f32 %v6634_v13, 0.0  ;;  %v6638_v55 = vadd.f32 %v6637_v5, %v17019_v50  ;;  %v7246_v12 = vpop.f32.mrf.mxu1 }
 0x79c   :  { %v9527_v8 = vmax.f32 %v9526_v63, %v8096_v29  ;;  %v8103_v53 = vmax.f32 %v7245_v7, 0.0  ;;  %v7247_v60 = vadd.f32 %v7246_v12, %v17129_v42  ;;  %v6639_v52 = vpop.f32.mrf.mxu0 }
 0x79d   :  { %v8205_v41 = vmax.f32 %v6638_v55, 0.0  ;;  %v6640_v36 = vadd.f32 %v6639_v52, %v17027_v49  ;;  %v7250_v61 = vpop.f32.mrf.mxu1  ;;  %7489 = vmatmul.mubr.bf16.gmra.mxu1 %v18384_v14  ;;  %v9414_v17 = vmax.f32 %v9413_v56, %v8198_v22  ;;  %v14062_v56 = vld [vmem:[#allocation9 + $0x4c0] ss:$16 sps:$4 sm:$0xff]  }
 0x79e   :  { %v9465_v24 = vmax.f32 %v9464_v15, %v8103_v53  ;;  %v8104_v54 = vmax.f32 %v7247_v60, 0.0  ;;  %v7251_v33 = vadd.f32 %v7250_v61, %v17122_v19  ;;  %v6641_v32 = vpop.f32.mrf.mxu0  ;;  %7498 = vmatprep.mubr.bf16.mxu1 %v18315_v6  ;;  %11386 = vmatpush1.bf16.msra.mxu0 %v14062_v56  ;;  %v14067_v53 = vld [vmem:[#allocation9 + $0x4a4] ss:$16 sps:$4 sm:$0xff]   ;;  %v14065_v61 = vld [vmem:[#allocation9 + $0x4a0] ss:$16 sps:$4 sm:$0xff]  }
 0x79f   :  { %v9352_v38 = vmax.f32 %v9351_v25, %v8205_v41  ;;  %v8206_v3 = vmax.f32 %v6640_v36, 0.0  ;;  %v6642_v1 = vadd.f32 %v6641_v32, %v17019_v50  ;;  %v7252_v9 = vpop.f32.mrf.mxu1  ;;  %11387 = vmatprep.subr.bf16.mxu0 %v14067_v53 }
 0x7a0   :  { %v9528_v59 = vmax.f32 %v9527_v8, %v8104_v54  ;;  %v8111_v11 = vmax.f32 %v7251_v33, 0.0  ;;  %v7253_v47 = vadd.f32 %v7252_v9, %v17129_v42  ;;  %v6643_v14 = vpop.f32.mrf.mxu0 }
 0x7a1   :  { %v9415_v57 = vmax.f32 %v9414_v17, %v8206_v3  ;;  %v8213_v34 = vmax.f32 %v6642_v1, 0.0  ;;  %v6644_v23 = vadd.f32 %v6643_v14, %v17027_v49  ;;  %v7254_v31 = vpop.f32.mrf.mxu1 }
 0x7a2   :  { %v9466_v35 = vmax.f32 %v9465_v24, %v8111_v11  ;;  %v8112_v27 = vmax.f32 %v7253_v47, 0.0  ;;  %v7255_v10 = vadd.f32 %v7254_v31, %v17122_v19  ;;  %v6647_v2 = vpop.f32.mrf.mxu0  ;;  %11388 = vmatpush1.bf16.msra.mxu0 %v14065_v61 }
 0x7a3   :  { %v9353_v63 = vmax.f32 %v9352_v38, %v8213_v34  ;;  %v8214_v46 = vmax.f32 %v6644_v23, 0.0  ;;  %v6648_v0 = vadd.f32 %v6647_v2, %v17019_v50  ;;  %v7256_v16 = vpop.f32.mrf.mxu1  ;;  %v14068_v34 = vld [vmem:[#allocation9 + $0x480] ss:$16 sps:$4 sm:$0xff]  }
 0x7a4   :  { %v9529_v28 = vmax.f32 %v9528_v59, %v8112_v27  ;;  %v8119_v13 = vmax.f32 %v7255_v10, 0.0  ;;  %v7257_v44 = vadd.f32 %v7256_v16, %v17129_v42  ;;  %v6649_v15 = vpop.f32.mrf.mxu0  ;;  %v14070_v59 = vld [vmem:[#allocation9 + $0x484] ss:$16 sps:$4 sm:$0xff]  }
 0x7a5   :  { %v9416_v29 = vmax.f32 %v9415_v57, %v8214_v46  ;;  %v8221_v7 = vmax.f32 %v6648_v0, 0.0  ;;  %v6650_v5 = vadd.f32 %v6649_v15, %v17027_v49  ;;  %v7260_v25 = vpop.f32.mrf.mxu1  ;;  %7499 = vmatmul.mubr.bf16.gmra.mxu1 %v18385_v51  ;;  %11389 = vmatprep.subr.bf16.mxu0 %v14070_v59 }
 0x7a6   :  { %v9467_v22 = vmax.f32 %v9466_v35, %v8119_v13  ;;  %v8120_v55 = vmax.f32 %v7257_v44, 0.0  ;;  %v7261_v12 = vadd.f32 %v7260_v25, %v17122_v19  ;;  %v6651_v8 = vpop.f32.mrf.mxu0  ;;  %7508 = vmatprep.mubr.bf16.mxu1 %v18315_v6  ;;  %11390 = vmatpush1.bf16.msra.mxu0 %v14068_v34  ;;  %v14079_v34 = vld [vmem:[#allocation9 + $0x424] ss:$16 sps:$4 sm:$0xff]  }
 0x7a7   :  { %v9354_v60 = vmax.f32 %v9353_v63, %v8221_v7  ;;  %v8222_v52 = vmax.f32 %v6650_v5, 0.0  ;;  %v6652_v41 = vadd.f32 %v6651_v8, %v17019_v50  ;;  %v7262_v36 = vpop.f32.mrf.mxu1  ;;  %v14071_v7 = vld [vmem:[#allocation9 + $0x460] ss:$16 sps:$4 sm:$0xff]  }
 0x7a8   :  { %v9530_v24 = vmax.f32 %v9529_v28, %v8120_v55  ;;  %v8127_v54 = vmax.f32 %v7261_v12, 0.0  ;;  %v7263_v33 = vadd.f32 %v7262_v36, %v17129_v42  ;;  %v6653_v51 = vpop.f32.mrf.mxu0  ;;  %v14073_v28 = vld [vmem:[#allocation9 + $0x464] ss:$16 sps:$4 sm:$0xff]  }
 0x7a9   :  { %v9417_v32 = vmax.f32 %v9416_v29, %v8222_v52  ;;  %v8229_v21 = vmax.f32 %v6652_v41, 0.0  ;;  %v6654_v17 = vadd.f32 %v6653_v51, %v17027_v49  ;;  %v7264_v38 = vpop.f32.mrf.mxu1  ;;  %11391 = vmatprep.subr.bf16.mxu0 %v14073_v28  ;;  %v14076_v36 = vld [vmem:[#allocation9 + $0x444] ss:$16 sps:$4 sm:$0xff]   ;;  %v14074_v51 = vld [vmem:[#allocation9 + $0x440] ss:$16 sps:$4 sm:$0xff]  }
 0x7aa   :  { %v9468_v3 = vmax.f32 %v9467_v22, %v8127_v54  ;;  %v8128_v1 = vmax.f32 %v7263_v33, 0.0  ;;  %v7265_v9 = vadd.f32 %v7264_v38, %v17122_v19  ;;  %v6657_v48 = vpop.f32.mrf.mxu0  ;;  %11392 = vmatpush1.bf16.msra.mxu0 %v14071_v7 }
 0x7ab   :  { %v9355_v11 = vmax.f32 %v9354_v60, %v8229_v21  ;;  %v8230_v47 = vmax.f32 %v6654_v17, 0.0  ;;  %v6658_v14 = vadd.f32 %v6657_v48, %v17019_v50  ;;  %v7266_v57 = vpop.f32.mrf.mxu1  ;;  %11393 = vmatprep.subr.bf16.mxu0 %v14076_v36 }
 0x7ac   :  { %v9531_v23 = vmax.f32 %v9530_v24, %v8128_v1  ;;  %v8135_v31 = vmax.f32 %v7265_v9, 0.0  ;;  %v7267_v35 = vadd.f32 %v7266_v57, %v17129_v42  ;;  %v6659_v27 = vpop.f32.mrf.mxu0 }
 0x7ad   :  { %v9418_v10 = vmax.f32 %v9417_v32, %v8230_v47  ;;  %v8237_v2 = vmax.f32 %v6658_v14, 0.0  ;;  %v6660_v30 = vadd.f32 %v6659_v27, %v17027_v49  ;;  %v7270_v63 = vpop.f32.mrf.mxu1  ;;  %7509 = vmatmul.mubr.bf16.gmra.mxu1 %v18386_v39  ;;  %v14077_v27 = vld [vmem:[#allocation9 + $0x420] ss:$16 sps:$4 sm:$0xff]  }
 0x7ae   :  { %v9469_v46 = vmax.f32 %v9468_v3, %v8135_v31  ;;  %v8136_v0 = vmax.f32 %v7267_v35, 0.0  ;;  %v7271_v16 = vadd.f32 %v7270_v63, %v17122_v19  ;;  %v6661_v56 = vpop.f32.mrf.mxu0  ;;  %7518 = vmatprep.mubr.bf16.mxu1 %v18315_v6  ;;  %v17619_v3 = vpack.c.bf16 %v17172_v18, %v17172_v18  ;;  %11394 = vmatpush1.bf16.msra.mxu0 %v14074_v51 }
 0x7af   :  { %v9356_v13 = vmax.f32 %v9355_v11, %v8237_v2  ;;  %v8238_v44 = vmax.f32 %v6660_v30, 0.0  ;;  %v6662_v15 = vadd.f32 %v6661_v56, %v17019_v50  ;;  %v7272_v29 = vpop.f32.mrf.mxu1  ;;  %11395 = vmatprep.subr.bf16.mxu0 %v14079_v34 }
 0x7b0   :  { %v8143_v5 = vmax.f32 %v7271_v16, 0.0  ;;  %v7273_v25 = vadd.f32 %v7272_v29, %v17129_v42  ;;  %v6663_v22 = vpop.f32.mrf.mxu0  ;;  %v9532_v53 = vmax.f32 %v9531_v23, %v8136_v0  ;;  %18392 = vst [vmem:[#allocation24_spill] sm:$0xff] %v17619_v3  ;;  %v17631_v29 = vpack.c.bf16 %v17159_v45, %v17159_v45 }
 0x7b1   :  { %v9419_v39 = vmax.f32 %v9418_v10, %v8238_v44  ;;  %v8245_v55 = vmax.f32 %v6662_v15, 0.0  ;;  %v6664_v12 = vadd.f32 %v6663_v22, %v17027_v49  ;;  %v7274_v8 = vpop.f32.mrf.mxu1  ;;  %v14082_v15 = vld [vmem:[#allocation9 + $0x404] ss:$16 sps:$4 sm:$0xff]  }
 0x7b2   :  { %v9470_v6 = vmax.f32 %v9469_v46, %v8143_v5  ;;  %v8144_v60 = vmax.f32 %v7273_v25, 0.0  ;;  %v7275_v52 = vadd.f32 %v7274_v8, %v17122_v19  ;;  %v6667_v41 = vpop.f32.mrf.mxu0  ;;  %11396 = vmatpush1.bf16.msra.mxu0 %v14077_v27  ;;  %18393 = vst [vmem:[#allocation25_spill] sm:$0xff] %v17631_v29 }
 0x7b3   :  { %v9357_v61 = vmax.f32 %v9356_v13, %v8245_v55  ;;  %v8246_v24 = vmax.f32 %v6664_v12, 0.0  ;;  %v6668_v54 = vadd.f32 %v6667_v41, %v17019_v50  ;;  %v7276_v33 = vpop.f32.mrf.mxu1  ;;  %11397 = vmatprep.subr.bf16.mxu0 %v14082_v15 }
 0x7b4   :  { %v9533_v32 = vmax.f32 %v9532_v53, %v8144_v60  ;;  %v8151_v21 = vmax.f32 %v7275_v52, 0.0  ;;  %v7277_v17 = vadd.f32 %v7276_v33, %v17129_v42  ;;  %v6669_v38 = vpop.f32.mrf.mxu0 }
 0x7b5   :  { %v9420_v1 = vmax.f32 %v9419_v39, %v8246_v24  ;;  %v8253_v9 = vmax.f32 %v6668_v54, 0.0  ;;  %v6670_v48 = vadd.f32 %v6669_v38, %v17027_v49  ;;  %v7280_v59 = vpop.f32.mrf.mxu1  ;;  %7519 = vmatmul.mubr.bf16.gmra.mxu1 %v18390_v20  ;;  %v14080_v39 = vld [vmem:[#allocation9 + $0x400] ss:$16 sps:$4 sm:$0xff]   ;;  %v14085_v54 = vld [vmem:[#allocation9 + $0x5e4] ss:$16 sps:$4 sm:$0xff]  }
 0x7b6   :  { %v9471_v11 = vmax.f32 %v9470_v6, %v8151_v21  ;;  %v8152_v47 = vmax.f32 %v7277_v17, 0.0  ;;  %v7281_v14 = vadd.f32 %v7280_v59, %v17122_v19  ;;  %v6671_v57 = vpop.f32.mrf.mxu0  ;;  %11374 = vmatprep.mubr.bf16.mxu1 %v17619_v3  ;;  %11398 = vmatpush1.bf16.msra.mxu0 %v14080_v39  ;;  %v14083_v17 = vld [vmem:[#allocation9 + $0x5e0] ss:$16 sps:$4 sm:$0xff]  }
 0x7b7   :  { %v9358_v23 = vmax.f32 %v9357_v61, %v8253_v9  ;;  %v8254_v18 = vmax.f32 %v6670_v48, 0.0  ;;  %v6672_v31 = vadd.f32 %v6671_v57, %v17019_v50  ;;  %v7282_v35 = vpop.f32.mrf.mxu1  ;;  %11399 = vmatprep.subr.bf16.mxu0 %v14085_v54 }
 0x7b8   :  { %v8159_v10 = vmax.f32 %v7281_v14, 0.0  ;;  %v7283_v2 = vadd.f32 %v7282_v35, %v17129_v42  ;;  %v6673_v30 = vpop.f32.mrf.mxu0  ;;  %v9534_v16 = vmax.f32 %v9533_v32, %v8152_v47 }
 0x7b9   :  { %v9421_v20 = vmax.f32 %v9420_v1, %v8254_v18  ;;  %v8261_v63 = vmax.f32 %v6672_v31, 0.0  ;;  %v6674_v46 = vadd.f32 %v6673_v30, %v17027_v49  ;;  %v7284_v0 = vpop.f32.mrf.mxu1  ;;  %v14088_v31 = vld [vmem:[#allocation9 + $0x5c4] ss:$16 sps:$4 sm:$0xff]   ;;  %v14086_v30 = vld [vmem:[#allocation9 + $0x5c0] ss:$16 sps:$4 sm:$0xff]  }
 0x7ba   :  { %v9472_v56 = vmax.f32 %v9471_v11, %v8159_v10  ;;  %v8160_v28 = vmax.f32 %v7283_v2, 0.0  ;;  %v7285_v13 = vadd.f32 %v7284_v0, %v17122_v19  ;;  %v6677_v44 = vpop.f32.mrf.mxu0  ;;  %11400 = vmatpush2.bf16.msra.mxu0 %v14083_v17 }
 0x7bb   :  { %v9359_v7 = vmax.f32 %v9358_v23, %v8261_v63  ;;  %v8262_v5 = vmax.f32 %v6674_v46, 0.0  ;;  %v6678_v25 = vadd.f32 %v6677_v44, %v17019_v50  ;;  %v7286_v22 = vpop.f32.mrf.mxu1  ;;  %11401 = vmatprep.subr.bf16.mxu0 %v14088_v31 }
 0x7bc   :  { %v9535_v55 = vmax.f32 %v9534_v16, %v8160_v28  ;;  %v8167_v12 = vmax.f32 %v7285_v13, 0.0  ;;  %v7287_v8 = vadd.f32 %v7286_v22, %v17129_v42  ;;  %v6679_v53 = vpop.f32.mrf.mxu0 }
 0x7bd   :  { %v9422_v6 = vmax.f32 %v9421_v20, %v8262_v5  ;;  %v8269_v60 = vmax.f32 %v6678_v25, 0.0  ;;  %v6680_v52 = vadd.f32 %v6679_v53, %v17027_v49  ;;  %v7290_v41 = vpop.f32.mrf.mxu1  ;;  %11375 = vmatmul.mubr.bf16.vlgmr.msra.gmra.mxu1 %v17631_v29  ;;  %v14091_v25 = vld [vmem:[#allocation9 + $0x5a4] ss:$16 sps:$4 sm:$0xff]  }
 0x7be   :  { %v9473_v45 = vmax.f32 %v9472_v56, %v8167_v12  ;;  %v8168_v36 = vmax.f32 %v7287_v8, 0.0  ;;  %v7291_v61 = vadd.f32 %v7290_v41, %v17122_v19  ;;  %v6681_v24 = vpop.f32.mrf.mxu0  ;;  %11402 = vmatpush2.bf16.msra.mxu0 %v14086_v30  ;;  %v14089_v8 = vld [vmem:[#allocation9 + $0x5a0] ss:$16 sps:$4 sm:$0xff]   ;;  %v14190_v29 = vld [vmem:[#allocation9 + $0x704] ss:$16 sps:$4 sm:$0xff]  }
 0x7bf   :  { %v9360_v33 = vmax.f32 %v9359_v7, %v8269_v60  ;;  %v8270_v51 = vmax.f32 %v6680_v52, 0.0  ;;  %v6682_v32 = vadd.f32 %v6681_v24, %v17019_v50  ;;  %v7292_v21 = vpop.f32.mrf.mxu1  ;;  %11403 = vmatprep.subr.bf16.mxu0 %v14091_v25  ;;  %v14095_v30 = vld [vmem:[#allocation9 + $0x560] ss:$16 sps:$4 sm:$0xff]  }
 0x7c0   :  { %v8175_v38 = vmax.f32 %v7291_v61, 0.0  ;;  %v7293_v1 = vadd.f32 %v7292_v21, %v17129_v42  ;;  %v6683_v9 = vpop.f32.mrf.mxu0  ;;  %v9536_v14 = vmax.f32 %v9535_v55, %v8168_v36 }
 0x7c1   :  { %v9423_v48 = vmax.f32 %v9422_v6, %v8270_v51  ;;  %v8277_v59 = vmax.f32 %v6682_v32, 0.0  ;;  %v6684_v11 = vadd.f32 %v6683_v9, %v17027_v49  ;;  %v7294_v47 = vpop.f32.mrf.mxu1  ;;  %v14094_v32 = vld [vmem:[#allocation9 + $0x584] ss:$16 sps:$4 sm:$0xff]   ;;  %v14092_v9 = vld [vmem:[#allocation9 + $0x580] ss:$16 sps:$4 sm:$0xff]  }
 0x7c2   :  { %v9474_v57 = vmax.f32 %v9473_v45, %v8175_v38  ;;  %v8176_v34 = vmax.f32 %v7293_v1, 0.0  ;;  %v7295_v23 = vadd.f32 %v7294_v47, %v17122_v19  ;;  %v6687_v18 = vpop.f32.mrf.mxu0  ;;  %11404 = vmatpush2.bf16.msra.mxu0 %v14089_v8 }
 0x7c3   :  { %v9361_v35 = vmax.f32 %v9360_v33, %v8277_v59  ;;  %v8278_v27 = vmax.f32 %v6684_v11, 0.0  ;;  %v6688_v10 = vadd.f32 %v6687_v18, %v17019_v50  ;;  %v7296_v2 = vpop.f32.mrf.mxu1  ;;  %11405 = vmatprep.subr.bf16.mxu0 %v14094_v32 }
 0x7c4   :  { %v9537_v20 = vmax.f32 %v9536_v14, %v8176_v34  ;;  %v8183_v63 = vmax.f32 %v7295_v23, 0.0  ;;  %v7297_v46 = vadd.f32 %v7296_v2, %v17129_v42  ;;  %v6689_v0 = vpop.f32.mrf.mxu0 }
 0x7c5   :  { %v9424_v16 = vmax.f32 %v9423_v48, %v8278_v27  ;;  %v8285_v56 = vmax.f32 %v6688_v10, 0.0  ;;  %v6690_v28 = vadd.f32 %v6689_v0, %v17027_v49  ;;  %v7300_v13 = vpop.f32.mrf.mxu1  ;;  %v14097_v27 = vld [vmem:[#allocation9 + $0x564] ss:$16 sps:$4 sm:$0xff]  }
 0x7c6   :  { %v9475_v44 = vmax.f32 %v9474_v57, %v8183_v63  ;;  %v8184_v15 = vmax.f32 %v7297_v46, 0.0  ;;  %v7301_v7 = vadd.f32 %v7300_v13, %v17122_v19  ;;  %v6691_v5 = vpop.f32.mrf.mxu0  ;;  %11406 = vmatpush2.bf16.msra.mxu0 %v14092_v9 }
 0x7c7   :  { %v9362_v22 = vmax.f32 %v9361_v35, %v8285_v56  ;;  %v8286_v39 = vmax.f32 %v6690_v28, 0.0  ;;  %v6692_v55 = vadd.f32 %v6691_v5, %v17019_v50  ;;  %v7302_v12 = vpop.f32.mrf.mxu1  ;;  %11407 = vmatprep.subr.bf16.mxu0 %v14097_v27  ;;  %v14100_v56 = vld [vmem:[#allocation9 + $0x6e4] ss:$16 sps:$4 sm:$0xff]  }
 0x7c8   :  { %v8191_v53 = vmax.f32 %v7301_v7, 0.0  ;;  %v7303_v6 = vadd.f32 %v7302_v12, %v17129_v42  ;;  %v6693_v60 = vpop.f32.mrf.mxu0  ;;  %v9538_v61 = vmax.f32 %v9537_v20, %v8184_v15  ;;  %v14098_v7 = vld [vmem:[#allocation9 + $0x6e0] ss:$16 sps:$4 sm:$0xff]   ;;  %v14103_v5 = vld [vmem:[#allocation9 + $0x544] ss:$16 sps:$4 sm:$0xff]   ;;  %11424 = vmatprep.subr.bf16.mxu1 %v14100_v56 }
 0x7c9   :  { %v9425_v52 = vmax.f32 %v9424_v16, %v8286_v39  ;;  %v8293_v41 = vmax.f32 %v6692_v55, 0.0  ;;  %v6694_v45 = vadd.f32 %v6693_v60, %v17027_v49  ;;  %v7304_v36 = vpop.f32.mrf.mxu1  ;;  %11425 = vmatpush1.bf16.msra.mxu1 %v14098_v7 }
 0x7ca   :  { %v9476_v24 = vmax.f32 %v9475_v44, %v8191_v53  ;;  %v8192_v54 = vmax.f32 %v7303_v6, 0.0  ;;  %v7305_v33 = vadd.f32 %v7304_v36, %v17122_v19  ;;  %v6697_v51 = vpop.f32.mrf.mxu0  ;;  %11408 = vmatpush2.bf16.msra.mxu0 %v14095_v30  ;;  %v14106_v6 = vld [vmem:[#allocation9 + $0x6c4] ss:$16 sps:$4 sm:$0xff]   ;;  %v14104_v36 = vld [vmem:[#allocation9 + $0x6c0] ss:$16 sps:$4 sm:$0xff]  }
 0x7cb   :  { %v9363_v21 = vmax.f32 %v9362_v22, %v8293_v41  ;;  %v8294_v17 = vmax.f32 %v6694_v45, 0.0  ;;  %v6698_v38 = vadd.f32 %v6697_v51, %v17019_v50  ;;  %v7306_v1 = vpop.f32.mrf.mxu1  ;;  %v14101_v22 = vld [vmem:[#allocation9 + $0x540] ss:$16 sps:$4 sm:$0xff]   ;;  %11409 = vmatprep.subr.bf16.mxu0 %v14103_v5  ;;  %11426 = vmatprep.subr.bf16.mxu1 %v14106_v6 }
 0x7cc   :  { %v9539_v48 = vmax.f32 %v9538_v61, %v8192_v54  ;;  %v8199_v59 = vmax.f32 %v7305_v33, 0.0  ;;  %v7307_v11 = vadd.f32 %v7306_v1, %v17129_v42  ;;  %v17652_v47 = vpop.f32.mrf.mxu0  ;;  %v14109_v61 = vld [vmem:[#allocation9 + $0x524] ss:$16 sps:$4 sm:$0xff]   ;;  %v14107_v54 = vld [vmem:[#allocation9 + $0x520] ss:$16 sps:$4 sm:$0xff]  }
 0x7cd   :  { %v17654_v14 = vmax.f32 %v9425_v52, %v8294_v17  ;;  %v8301_v57 = vmax.f32 %v6698_v38, 0.0  ;;  %v7310_v34 = vpop.f32.mrf.mxu1  ;;  %11427 = vmatpush1.bf16.msra.mxu1 %v14104_v36  ;;  %v14112_v38 = vld [vmem:[#allocation9 + $0x6a4] ss:$16 sps:$4 sm:$0xff]  }
 0x7ce   :  { %v9477_v23 = vmax.f32 %v9476_v24, %v8199_v59  ;;  %v8200_v18 = vmax.f32 %v7307_v11, 0.0  ;;  %v7311_v31 = vadd.f32 %v7310_v34, %v17122_v19  ;;  %v17657_v35 = vpop.f32.mrf.mxu0  ;;  %11410 = vmatpush2.bf16.msra.mxu0 %v14101_v22  ;;  %v14110_v11 = vld [vmem:[#allocation9 + $0x6a0] ss:$16 sps:$4 sm:$0xff]   ;;  %11428 = vmatprep.subr.bf16.mxu1 %v14112_v38 }
 0x7cf   :  { %v17659_v10 = vmax.f32 %v9363_v21, %v8301_v57  ;;  %v7312_v2 = vpop.f32.mrf.mxu1  ;;  %11411 = vmatprep.subr.bf16.mxu0 %v14109_v61  ;;  %v14115_v57 = vld [vmem:[#allocation9 + $0x504] ss:$16 sps:$4 sm:$0xff]  }
 0x7d0   :  { %v9540_v20 = vmax.f32 %v9539_v48, %v8200_v18  ;;  %v8207_v63 = vmax.f32 %v7311_v31, 0.0  ;;  %v7313_v46 = vadd.f32 %v7312_v2, %v17129_v42  ;;  %v17662_v0 = vpop.f32.mrf.mxu0 }
 0x7d1   :  { %v7314_v16 = vpop.f32.mrf.mxu1  ;;  %11429 = vmatpush1.bf16.msra.mxu1 %v14110_v11 }
 0x7d2   :  { %v9478_v28 = vmax.f32 %v9477_v23, %v8207_v63  ;;  %v8208_v13 = vmax.f32 %v7313_v46, 0.0  ;;  %v7315_v44 = vadd.f32 %v7314_v16, %v17122_v19  ;;  %v17665_v15 = vpop.f32.mrf.mxu0  ;;  %11412 = vmatpush2.bf16.msra.mxu0 %v14107_v54  ;;  %v14113_v23 = vld [vmem:[#allocation9 + $0x500] ss:$16 sps:$4 sm:$0xff]  }
 0x7d3   :  { %v7316_v25 = vpop.f32.mrf.mxu1  ;;  %11413 = vmatprep.subr.bf16.mxu0 %v14115_v57 }
 0x7d4   :  { %v9541_v39 = vmax.f32 %v9540_v20, %v8208_v13  ;;  %v8215_v55 = vmax.f32 %v7315_v44, 0.0  ;;  %v7317_v12 = vadd.f32 %v7316_v25, %v17129_v42  ;;  %v17668_v8 = vpop.f32.mrf.mxu0  ;;  %v14118_v20 = vld [vmem:[#allocation9 + $0x684] ss:$16 sps:$4 sm:$0xff]   ;;  %v14121_v13 = vld [vmem:[#allocation9 + $0xec] ss:$16 sps:$4 sm:$0xff]  }
 0x7d5   :  { %v7320_v53 = vpop.f32.mrf.mxu1  ;;  %11430 = vmatprep.subr.bf16.mxu1 %v14118_v20 }
 0x7d6   :  { %v9479_v60 = vmax.f32 %v9478_v28, %v8215_v55  ;;  %v8216_v52 = vmax.f32 %v7317_v12, 0.0  ;;  %v7321_v41 = vadd.f32 %v7320_v53, %v17122_v19  ;;  %v17671_v45 = vpop.f32.mrf.mxu0  ;;  %11414 = vmatpush2.bf16.msra.mxu0 %v14113_v23  ;;  %v14116_v28 = vld [vmem:[#allocation9 + $0x680] ss:$16 sps:$4 sm:$0xff]   ;;  %v14124_v55 = vld [vmem:[#allocation9 + $0x664] ss:$16 sps:$4 sm:$0xff]  }
 0x7d7   :  { %v7322_v24 = vpop.f32.mrf.mxu1  ;;  %11431 = vmatpush1.bf16.msra.mxu1 %v14116_v28  ;;  %11465 = vmatprep.subr.bf16.mxu0 %v14121_v13 }
 0x7d8   :  { %v9542_v33 = vmax.f32 %v9541_v39, %v8216_v52  ;;  %v8223_v51 = vmax.f32 %v7321_v41, 0.0  ;;  %v7323_v32 = vadd.f32 %v7322_v24, %v17129_v42  ;;  %v17674_v21 = vpop.f32.mrf.mxu0  ;;  %v14122_v52 = vld [vmem:[#allocation9 + $0x660] ss:$16 sps:$4 sm:$0xff]   ;;  %11432 = vmatprep.subr.bf16.mxu1 %v14124_v55 }
 0x7d9   :  { %v7324_v17 = vpop.f32.mrf.mxu1 }
 0x7da   :  { %v9480_v1 = vmax.f32 %v9479_v60, %v8223_v51  ;;  %v8224_v9 = vmax.f32 %v7323_v32, 0.0  ;;  %v7325_v48 = vadd.f32 %v7324_v17, %v17122_v19  ;;  %v17677_v59 = vpop.f32.mrf.mxu0  ;;  %v14130_v51 = vld [vmem:[#allocation9 + $0x644] ss:$16 sps:$4 sm:$0xff]  }
 0x7db   :  { %v7326_v34 = vpop.f32.mrf.mxu1  ;;  %11433 = vmatpush1.bf16.msra.mxu1 %v14122_v52  ;;  %v6718_v37 = vadd.f32 %v17677_v59, %v17019_v50 }
 0x7dc   :  { %v9543_v18 = vmax.f32 %v9542_v33, %v8224_v9  ;;  %v8231_v31 = vmax.f32 %v7325_v48, 0.0  ;;  %v7327_v27 = vadd.f32 %v7326_v34, %v17129_v42  ;;  %v17680_v2 = vpop.f32.mrf.mxu0  ;;  %v14128_v9 = vld [vmem:[#allocation9 + $0x640] ss:$16 sps:$4 sm:$0xff]   ;;  %11434 = vmatprep.subr.bf16.mxu1 %v14130_v51  ;;  %v14148_v51 = vld [vmem:[#allocation9 + $0x7e4] ss:$16 sps:$4 sm:$0xff]  }
 0x7dd   :  { %v7330_v30 = vpop.f32.mrf.mxu1 }
 0x7de   :  { %v9481_v63 = vmax.f32 %v9480_v1, %v8231_v31  ;;  %v8232_v46 = vmax.f32 %v7327_v27, 0.0  ;;  %v7331_v16 = vadd.f32 %v7330_v30, %v17122_v19  ;;  %v17683_v56 = vpop.f32.mrf.mxu0  ;;  %v14136_v31 = vld [vmem:[#allocation9 + $0x624] ss:$16 sps:$4 sm:$0xff]  }
 0x7df   :  { %v7332_v44 = vpop.f32.mrf.mxu1  ;;  %11435 = vmatpush1.bf16.msra.mxu1 %v14128_v9 }
 0x7e0   :  { %v9544_v7 = vmax.f32 %v9543_v18, %v8232_v46  ;;  %v8239_v5 = vmax.f32 %v7331_v16, 0.0  ;;  %v7333_v25 = vadd.f32 %v7332_v44, %v17129_v42  ;;  %v17686_v22 = vpop.f32.mrf.mxu0  ;;  %v14134_v46 = vld [vmem:[#allocation9 + $0x620] ss:$16 sps:$4 sm:$0xff]   ;;  %11436 = vmatprep.subr.bf16.mxu1 %v14136_v31 }
 0x7e1   :  { %v7334_v39 = vpop.f32.mrf.mxu1 }
 0x7e2   :  { %v9482_v12 = vmax.f32 %v9481_v63, %v8239_v5  ;;  %v8240_v53 = vmax.f32 %v7333_v25, 0.0  ;;  %v7335_v6 = vadd.f32 %v7334_v39, %v17122_v19  ;;  %v17689_v60 = vpop.f32.mrf.mxu0  ;;  %v14142_v25 = vld [vmem:[#allocation9 + $0x604] ss:$16 sps:$4 sm:$0xff]  }
 0x7e3   :  { %v7336_v41 = vpop.f32.mrf.mxu1  ;;  %11437 = vmatpush1.bf16.msra.mxu1 %v14134_v46 }
 0x7e4   :  { %v9545_v36 = vmax.f32 %v9544_v7, %v8240_v53  ;;  %v8247_v61 = vmax.f32 %v7335_v6, 0.0  ;;  %v7337_v24 = vadd.f32 %v7336_v41, %v17129_v42  ;;  %v17692_v54 = vpop.f32.mrf.mxu0  ;;  %v14140_v6 = vld [vmem:[#allocation9 + $0x600] ss:$16 sps:$4 sm:$0xff]   ;;  %11438 = vmatprep.subr.bf16.mxu1 %v14142_v25 }
 0x7e5   :  { %v7340_v33 = vpop.f32.mrf.mxu1 }
 0x7e6   :  { %v9483_v32 = vmax.f32 %v9482_v12, %v8247_v61  ;;  %v8248_v17 = vmax.f32 %v7337_v24, 0.0  ;;  %v7341_v38 = vadd.f32 %v7340_v33, %v17122_v19  ;;  %v17695_v1 = vpop.f32.mrf.mxu0 }
 0x7e7   :  { %v7342_v48 = vpop.f32.mrf.mxu1  ;;  %11439 = vmatpush1.bf16.msra.mxu1 %v14140_v6  ;;  %v14160_v6 = vld [vmem:[#allocation9 + $0x7a4] ss:$16 sps:$4 sm:$0xff]  }
 0x7e8   :  { %v9546_v11 = vmax.f32 %v9545_v36, %v8248_v17  ;;  %v8255_v57 = vmax.f32 %v7341_v38, 0.0  ;;  %v7343_v34 = vadd.f32 %v7342_v48, %v17129_v42  ;;  %v17698_v23 = vpop.f32.mrf.mxu0  ;;  %v14146_v48 = vld [vmem:[#allocation9 + $0x7e0] ss:$16 sps:$4 sm:$0xff]   ;;  %11440 = vmatprep.subr.bf16.mxu1 %v14148_v51 }
 0x7e9   :  { %v7344_v18 = vpop.f32.mrf.mxu1 }
 0x7ea   :  { %v9484_v27 = vmax.f32 %v9483_v32, %v8255_v57  ;;  %v8256_v30 = vmax.f32 %v7343_v34, 0.0  ;;  %v7345_v20 = vadd.f32 %v7344_v18, %v17122_v19  ;;  %v17701_v63 = vpop.f32.mrf.mxu0 }
 0x7eb   :  { %v7346_v16 = vpop.f32.mrf.mxu1  ;;  %11441 = vmatpush2.bf16.msra.mxu1 %v14146_v48 }
 0x7ec   :  { %v9547_v28 = vmax.f32 %v9546_v11, %v8256_v30  ;;  %v8263_v13 = vmax.f32 %v7345_v20, 0.0  ;;  %v7347_v44 = vadd.f32 %v7346_v16, %v17129_v42  ;;  %v17704_v7 = vpop.f32.mrf.mxu0  ;;  %v14154_v30 = vld [vmem:[#allocation9 + $0x7c4] ss:$16 sps:$4 sm:$0xff]  }
 0x7ed   :  { %v7350_v5 = vpop.f32.mrf.mxu1  ;;  %11442 = vmatprep.subr.bf16.mxu1 %v14154_v30 }
 0x7ee   :  { %v9485_v39 = vmax.f32 %v9484_v27, %v8263_v13  ;;  %v8264_v55 = vmax.f32 %v7347_v44, 0.0  ;;  %v7351_v12 = vadd.f32 %v7350_v5, %v17122_v19  ;;  %v17707_v53 = vpop.f32.mrf.mxu0  ;;  %v14152_v13 = vld [vmem:[#allocation9 + $0x7c0] ss:$16 sps:$4 sm:$0xff]  }
 0x7ef   :  { %v7352_v52 = vpop.f32.mrf.mxu1  ;;  %11443 = vmatpush2.bf16.msra.mxu1 %v14152_v13 }
 0x7f0   :  { %v9548_v41 = vmax.f32 %v9547_v28, %v8264_v55  ;;  %v8271_v36 = vmax.f32 %v7351_v12, 0.0  ;;  %v7353_v61 = vadd.f32 %v7352_v52, %v17129_v42  ;;  %v17710_v24 = vpop.f32.mrf.mxu0  ;;  %11444 = vmatprep.subr.bf16.mxu1 %v14160_v6  ;;  %v14170_v6 = vld [vmem:[#allocation9 + $0x760] ss:$16 sps:$4 sm:$0xff]  }
 0x7f1   :  { %v7354_v33 = vpop.f32.mrf.mxu1 }
 0x7f2   :  { %v9486_v32 = vmax.f32 %v9485_v39, %v8271_v36  ;;  %v8272_v17 = vmax.f32 %v7353_v61, 0.0  ;;  %v7355_v38 = vadd.f32 %v7354_v33, %v17122_v19  ;;  %v17713_v9 = vpop.f32.mrf.mxu0  ;;  %v14158_v33 = vld [vmem:[#allocation9 + $0x7a0] ss:$16 sps:$4 sm:$0xff]  }
 0x7f3   :  { %v7356_v11 = vpop.f32.mrf.mxu1  ;;  %11445 = vmatpush2.bf16.msra.mxu1 %v14158_v33  ;;  %v14178_v33 = vld [vmem:[#allocation9 + $0x744] ss:$16 sps:$4 sm:$0xff]  }
 0x7f4   :  { %v9549_v57 = vmax.f32 %v9548_v41, %v8272_v17  ;;  %v8279_v34 = vmax.f32 %v7355_v38, 0.0  ;;  %v7357_v18 = vadd.f32 %v7356_v11, %v17129_v42  ;;  %v17716_v31 = vpop.f32.mrf.mxu0 }
 0x7f5   :  { %v7360_v27 = vpop.f32.mrf.mxu1 }
 0x7f6   :  { %v9487_v20 = vmax.f32 %v9486_v32, %v8279_v34  ;;  %v8280_v46 = vmax.f32 %v7357_v18, 0.0  ;;  %v7361_v16 = vadd.f32 %v7360_v27, %v17122_v19  ;;  %v17719_v28 = vpop.f32.mrf.mxu0 }
 0x7f7   :  { %v7362_v44 = vpop.f32.mrf.mxu1 }
 0x7f8   :  { %v9550_v5 = vmax.f32 %v9549_v57, %v8280_v46  ;;  %v8287_v25 = vmax.f32 %v7361_v16, 0.0  ;;  %v7363_v39 = vadd.f32 %v7362_v44, %v17129_v42  ;;  %v17722_v55 = vpop.f32.mrf.mxu0  ;;  %v14166_v57 = vld [vmem:[#allocation9 + $0x784] ss:$16 sps:$4 sm:$0xff]  }
 0x7f9   :  { %v7364_v12 = vpop.f32.mrf.mxu1  ;;  %11446 = vmatprep.subr.bf16.mxu1 %v14166_v57  ;;  %v6704_v57 = vadd.f32 %v17662_v0, %v17027_v49  ;;  %v6712_v0 = vadd.f32 %v17671_v45, %v17019_v50 }
 0x7fa   :  { %v9488_v52 = vmax.f32 %v9487_v20, %v8287_v25  ;;  %v8288_v41 = vmax.f32 %v7363_v39, 0.0  ;;  %v7365_v36 = vadd.f32 %v7364_v12, %v17122_v19  ;;  %v17725_v61 = vpop.f32.mrf.mxu0  ;;  %v14164_v20 = vld [vmem:[#allocation9 + $0x780] ss:$16 sps:$4 sm:$0xff]   ;;  %v14172_v25 = vld [vmem:[#allocation9 + $0x764] ss:$16 sps:$4 sm:$0xff]  }
 0x7fb   :  { %v7366_v51 = vpop.f32.mrf.mxu1  ;;  %11447 = vmatpush2.bf16.msra.mxu1 %v14164_v20 }
 0x7fc   :  { %v9551_v32 = vmax.f32 %v9550_v5, %v8288_v41  ;;  %v8295_v17 = vmax.f32 %v7365_v36, 0.0  ;;  %v7367_v38 = vadd.f32 %v7366_v51, %v17129_v42  ;;  %v17728_v48 = vpop.f32.mrf.mxu0  ;;  %11448 = vmatprep.subr.bf16.mxu1 %v14172_v25  ;;  %v6700_v51 = vadd.f32 %v17652_v47, %v17027_v49  ;;  %v14184_v47 = vld [vmem:[#allocation9 + $0x724] ss:$16 sps:$4 sm:$0xff]   ;;  %v14182_v25 = vld [vmem:[#allocation9 + $0x720] ss:$16 sps:$4 sm:$0xff]  }
 0x7fd   :  { %v7370_v11 = vpop.f32.mrf.mxu1 }
 0x7fe   :  { %v9489_v34 = vmax.f32 %v9488_v52, %v8295_v17  ;;  %v8296_v18 = vmax.f32 %v7367_v38, 0.0  ;;  %v7371_v27 = vadd.f32 %v7370_v11, %v17122_v19  ;;  %v17731_v30 = vpop.f32.mrf.mxu0  ;;  %v14176_v17 = vld [vmem:[#allocation9 + $0x740] ss:$16 sps:$4 sm:$0xff]   ;;  %v6702_v38 = vadd.f32 %v17657_v35, %v17019_v50 }
 0x7ff   :  { %v17733_v46 = vpop.f32.mrf.mxu1  ;;  %11449 = vmatpush2.bf16.msra.mxu1 %v14170_v6  ;;  %v8302_v20 = vmax.f32 %v6700_v51, 0.0  ;;  %v14188_v51 = vld [vmem:[#allocation9 + $0x700] ss:$16 sps:$4 sm:$0xff]  }
 0x800   :  { %v17735_v16 = vmax.f32 %v9551_v32, %v8296_v18  ;;  %v8303_v13 = vmax.f32 %v7371_v27, 0.0  ;;  %v17737_v44 = vpop.f32.mrf.mxu0  ;;  %11450 = vmatprep.subr.bf16.mxu1 %v14178_v33  ;;  %v6708_v18 = vadd.f32 %v17665_v15, %v17019_v50  ;;  %v8309_v6 = vmax.f32 %v6702_v38, 0.0 }
 0x801   :  { %v17739_v5 = vpop.f32.mrf.mxu1  ;;  %v6714_v15 = vadd.f32 %v17674_v21, %v17027_v49  ;;  %v9427_v45 = vmax.f32 %v17654_v14, %v8302_v20  ;;  %v6724_v14 = vadd.f32 %v17686_v22, %v17027_v49 }
 0x802   :  { %v17741_v39 = vmax.f32 %v9489_v34, %v8303_v13  ;;  %v17743_v12 = vpop.f32.mrf.mxu0  ;;  %v6710_v13 = vadd.f32 %v17668_v8, %v17027_v49  ;;  %v8317_v8 = vmax.f32 %v6708_v18, 0.0  ;;  %v9365_v21 = vmax.f32 %v17659_v10, %v8309_v6  ;;  %v14196_v6 = vld [vmem:[#allocation9 + $0x2ec] ss:$16 sps:$4 sm:$0xff]  }
 0x803   :  { %v17745_v52 = vpop.f32.mrf.mxu1  ;;  %11451 = vmatpush2.bf16.msra.mxu1 %v14176_v17  ;;  %v8310_v17 = vmax.f32 %v6704_v57, 0.0  ;;  %v6720_v57 = vadd.f32 %v17680_v2, %v17027_v49  ;;  %v6722_v18 = vadd.f32 %v17683_v56, %v17019_v50  ;;  %v8326_v40 = vmax.f32 %v6714_v15, 0.0 }
 0x804   :  { %v17747_v41 = vpop.f32.mrf.mxu0  ;;  %11452 = vmatprep.subr.bf16.mxu1 %v14184_v47  ;;  %v8318_v3 = vmax.f32 %v6710_v13, 0.0  ;;  %v9366_v2 = vmax.f32 %v9365_v21, %v8317_v8  ;;  %v8333_v13 = vmax.f32 %v6718_v37, 0.0  ;;  %v6734_v21 = vadd.f32 %v17698_v23, %v17027_v49 }
 0x805   :  { %v17749_v36 = vpop.f32.mrf.mxu1  ;;  %v9428_v59 = vmax.f32 %v9427_v45, %v8310_v17  ;;  %v8334_v56 = vmax.f32 %v6720_v57, 0.0  ;;  %v6730_v17 = vadd.f32 %v17692_v54, %v17027_v49  ;;  %v8341_v22 = vmax.f32 %v6722_v18, 0.0 }
 0x806   :  { %v17753_v32 = vpop.f32.mrf.mxu0  ;;  %v6738_v54 = vadd.f32 %v17701_v63, %v17019_v50  ;;  %v8358_v63 = vmax.f32 %v6734_v21, 0.0 }
 0x807   :  { %v17757_v11 = vpop.f32.mrf.mxu1  ;;  %11453 = vmatpush2.bf16.msra.mxu1 %v14182_v25  ;;  %v8325_v25 = vmax.f32 %v6712_v0, 0.0  ;;  %v9429_v0 = vmax.f32 %v9428_v59, %v8318_v3 }
 0x808   :  { %v17761_v34 = vpop.f32.mrf.mxu0  ;;  %11454 = vmatprep.subr.bf16.mxu1 %v14190_v29  ;;  %v6728_v29 = vadd.f32 %v17689_v60, %v17019_v50  ;;  %v8342_v60 = vmax.f32 %v6724_v14, 0.0 }
 0x809   :  { %v17765_v27 = vpop.f32.mrf.mxu1  ;;  %v9367_v45 = vmax.f32 %v9366_v2, %v8325_v25  ;;  %v9430_v37 = vmax.f32 %v9429_v0, %v8326_v40  ;;  %v8350_v2 = vmax.f32 %v6730_v17, 0.0  ;;  %v9645_v40 = vrot.slane %v17453_v58, 4 }
 0x80a   :  { %v17769_v35 = vpop.f32.mrf.mxu0  ;;  %v8349_v59 = vmax.f32 %v6728_v29, 0.0 }
 0x80b   :  { %v17773_v33 = vpop.f32.mrf.mxu1  ;;  %11455 = vmatpush2.bf16.msra.mxu1 %v14188_v51  ;;  %v6732_v51 = vadd.f32 %v17695_v1, %v17019_v50  ;;  %v9368_v57 = vmax.f32 %v9367_v45, %v8333_v13  ;;  %v9431_v18 = vmax.f32 %v9430_v37, %v8334_v56  ;;  %v6740_v1 = vadd.f32 %v17704_v7, %v17027_v49 }
 0x80c   :  { %v17777_v4 = vpop.f32.mrf.mxu0  ;;  %11506 = vmatprep.subr.bf16.mxu1 %v14196_v6  ;;  %v6742_v13 = vadd.f32 %v17707_v53, %v17019_v50  ;;  %v6744_v56 = vadd.f32 %v17710_v24, %v17027_v49  ;;  %v8365_v7 = vmax.f32 %v6738_v54, 0.0  ;;  %v6748_v37 = vadd.f32 %v17713_v9, %v17019_v50 }
 0x80d   :  { %v17781_v38 = vpop.f32.mrf.mxu1  ;;  %v9369_v14 = vmax.f32 %v9368_v57, %v8341_v22  ;;  %v8357_v23 = vmax.f32 %v6732_v51, 0.0  ;;  %v9432_v0 = vmax.f32 %v9431_v18, %v8342_v60  ;;  %v8366_v51 = vmax.f32 %v6740_v1, 0.0 }
 0x80e   :  { %v17786_v47 = vpop.f32.mrf.mxu0  ;;  %v6750_v53 = vadd.f32 %v17716_v31, %v17027_v49  ;;  %v9646_v60 = vmax.f32 %v17453_v58, %v9645_v40  ;;  %v8373_v24 = vmax.f32 %v6742_v13, 0.0  ;;  %v8374_v9 = vmax.f32 %v6744_v56, 0.0 }
 0x80f   :  { %v17791_v26 = vpop.f32.mrf.mxu1  ;;  %v9370_v45 = vmax.f32 %v9369_v14, %v8349_v59  ;;  %v9433_v22 = vmax.f32 %v9432_v0, %v8350_v2  ;;  %v6752_v59 = vadd.f32 %v17719_v28, %v17019_v50  ;;  %v6754_v2 = vadd.f32 %v17722_v55, %v17027_v49 }
 0x810   :  { %v17795_v20 = vpop.f32.mrf.mxu0  ;;  %v9651_v31 = vrot.slane %v17457_v43, 4  ;;  %v8381_v0 = vmax.f32 %v6748_v37, 0.0  ;;  %v6758_v58 = vadd.f32 %v17725_v61, %v17019_v50  ;;  %v8382_v28 = vmax.f32 %v6750_v53, 0.0 }
 0x811   :  { %v17799_v10 = vpop.f32.mrf.mxu1  ;;  %v9371_v21 = vmax.f32 %v9370_v45, %v8357_v23  ;;  %v9434_v18 = vmax.f32 %v9433_v22, %v8358_v63  ;;  %v6760_v13 = vadd.f32 %v17728_v48, %v17027_v49  ;;  %v9647_v56 = vrot.slane %v9646_v60, 2 }
 0x812   :  { %v17803_v15 = vpop.f32.mrf.mxu0  ;;  %v8389_v45 = vmax.f32 %v6752_v59, 0.0  ;;  %v6762_v22 = vadd.f32 %v17731_v30, %v17019_v50  ;;  %v6764_v61 = vadd.f32 %v17737_v44, %v17027_v49  ;;  %v9652_v53 = vmax.f32 %v17457_v43, %v9651_v31 }
 0x813   :  { %v17807_v8 = vpop.f32.mrf.mxu1  ;;  %v9372_v14 = vmax.f32 %v9371_v21, %v8365_v7  ;;  %v9435_v23 = vmax.f32 %v9434_v18, %v8366_v51  ;;  %v8390_v21 = vmax.f32 %v6754_v2, 0.0  ;;  %v8397_v18 = vmax.f32 %v6758_v58, 0.0 }
 0x814   :  { %v17811_v3 = vpop.f32.mrf.mxu0  ;;  %v8398_v30 = vmax.f32 %v6760_v13, 0.0  ;;  %v6770_v2 = vadd.f32 %v17747_v41, %v17027_v49  ;;  %v8405_v31 = vmax.f32 %v6762_v22, 0.0  ;;  %v7375_v13 = vadd.f32 %v17739_v5, %v17122_v19 }
 0x815   :  { %v17815_v25 = vpop.f32.mrf.mxu1  ;;  %v9373_v55 = vmax.f32 %v9372_v14, %v8373_v24  ;;  %v9436_v37 = vmax.f32 %v9435_v23, %v8374_v9  ;;  %v6768_v24 = vadd.f32 %v17743_v12, %v17019_v50  ;;  %v7373_v9 = vadd.f32 %v17733_v46, %v17129_v42 }
 0x816   :  { %v17819_v6 = vpop.f32.mrf.mxu0  ;;  %v17875_v23 = vmax.f32 %v9646_v60, %v9647_v56  ;;  %v6774_v46 = vadd.f32 %v17761_v34, %v17027_v49 }
 0x817   :  { %v17824_v29 = vpop.f32.mrf.mxu1  ;;  %v9374_v48 = vmax.f32 %v9373_v55, %v8381_v0  ;;  %v9437_v14 = vmax.f32 %v9436_v37, %v8382_v28  ;;  %v6772_v0 = vadd.f32 %v17753_v32, %v17019_v50  ;;  %v8406_v28 = vmax.f32 %v6764_v61, 0.0 }
 0x818   :  { %v17828_v17 = vpop.f32.mrf.mxu0  ;;  %v9653_v55 = vrot.slane %v9652_v53, 2  ;;  %v8413_v56 = vmax.f32 %v6768_v24, 0.0  ;;  %v8304_v37 = vmax.f32 %v7373_v9, 0.0  ;;  %v6780_v61 = vadd.f32 %v17777_v4, %v17027_v49 }
 0x819   :  { %v17832_v62 = vpop.f32.mrf.mxu1  ;;  %v9375_v43 = vmax.f32 %v9374_v48, %v8389_v45  ;;  %v9438_v58 = vmax.f32 %v9437_v14, %v8390_v21  ;;  %v6778_v45 = vadd.f32 %v17769_v35, %v17019_v50  ;;  %v8414_v21 = vmax.f32 %v6770_v2, 0.0 }
 0x81a   :  { %v17836_v57 = vpop.f32.mrf.mxu0  ;;  %v8421_v14 = vmax.f32 %v6772_v0, 0.0  ;;  %v17902_v2 = vmax.f32 %v9652_v53, %v9653_v55  ;;  %v8430_v34 = vmax.f32 %v6780_v61, 0.0  ;;  %v6792_v55 = vadd.f32 %v17819_v6, %v17019_v50 }
 0x81b   :  { %v17841_v54 = vpop.f32.mrf.mxu1  ;;  %v9376_v60 = vmax.f32 %v9375_v43, %v8397_v18  ;;  %v9439_v32 = vmax.f32 %v9438_v58, %v8398_v30  ;;  %v6782_v18 = vadd.f32 %v17786_v47, %v17019_v50  ;;  %v8311_v43 = vmax.f32 %v7375_v13, 0.0 }
 0x81c   :  { %v17845_v1 = vpop.f32.mrf.mxu0  ;;  %v6784_v30 = vadd.f32 %v17795_v20, %v17027_v49  ;;  %v8429_v58 = vmax.f32 %v6778_v45, 0.0  ;;  %v9553_v47 = vmax.f32 %v17735_v16, %v8304_v37  ;;  %v7377_v20 = vadd.f32 %v17745_v52, %v17129_v42 }
 0x81d   :  { %v17850_v40 = vpop.f32.mrf.mxu1  ;;  %v9377_v48 = vmax.f32 %v9376_v60, %v8405_v31  ;;  %v9440_v35 = vmax.f32 %v9439_v32, %v8406_v28  ;;  %v6788_v31 = vadd.f32 %v17803_v15, %v17019_v50  ;;  %v6790_v28 = vadd.f32 %v17811_v3, %v17027_v49 }
 0x81e   :  { %v17854_v63 = vpop.f32.mrf.mxu0  ;;  %v9491_v15 = vmax.f32 %v17741_v39, %v8311_v43  ;;  %v8438_v16 = vmax.f32 %v6784_v30, 0.0  ;;  %v6794_v32 = vadd.f32 %v17828_v17, %v17027_v49  ;;  %v7381_v3 = vadd.f32 %v17749_v36, %v17122_v19 }
 0x81f   :  { %v17858_v7 = vpop.f32.mrf.mxu1  ;;  %v9378_v4 = vmax.f32 %v9377_v48, %v8413_v56  ;;  %v9441_v60 = vmax.f32 %v9440_v35, %v8414_v21  ;;  %v8445_v52 = vmax.f32 %v6788_v31, 0.0  ;;  %v6798_v61 = vadd.f32 %v17836_v57, %v17019_v50 }
 0x820   :  { %v17862_v51 = vpop.f32.mrf.mxu0  ;;  %v7383_v6 = vadd.f32 %v17757_v11, %v17129_v42  ;;  %v8453_v43 = vmax.f32 %v6792_v55, 0.0  ;;  %v6802_v36 = vadd.f32 %v17854_v63, %v17019_v50  ;;  %v7385_v57 = vadd.f32 %v17765_v27, %v17122_v19 }
 0x821   :  { %v17867_v59 = vpop.f32.mrf.mxu1  ;;  %v9379_v53 = vmax.f32 %v9378_v4, %v8421_v14  ;;  %v6800_v14 = vadd.f32 %v17845_v1, %v17027_v49  ;;  %v6804_v11 = vadd.f32 %v17862_v51, %v17027_v49  ;;  %v8319_v31 = vmax.f32 %v7381_v3, 0.0 }
 0x822   :  { %v17873_v44 = vpop.f32.mrf.mxu0  ;;  %v8320_v63 = vmax.f32 %v7383_v6, 0.0 }
 0x823   :  { %v17879_v12 = vpop.f32.mrf.mxu1  ;;  %v9380_v21 = vmax.f32 %v9379_v53, %v8429_v58  ;;  %v8454_v58 = vmax.f32 %v6794_v32, 0.0  ;;  %v8469_v32 = vmax.f32 %v6802_v36, 0.0 }
 0x824   :  { %v17885_v41 = vpop.f32.mrf.mxu0 }
 0x825   :  { %v17889_v22 = vpop.f32.mrf.mxu1  ;;  %v6810_v27 = vadd.f32 %v17885_v41, %v17027_v49 }
 0x826   :  { %18394 = vst [vmem:[#allocation26_spill] sm:$0xff] %v17889_v22  ;;  %v17893_v5 = vpop.f32.mrf.mxu0  ;;  %v8422_v22 = vmax.f32 %v6774_v46, 0.0  ;;  %v8437_v46 = vmax.f32 %v6782_v18, 0.0  ;;  %v8312_v18 = vmax.f32 %v7377_v20, 0.0 }
 0x827   :  { %v17898_v24 = vpop.f32.mrf.mxu1  ;;  %v6812_v51 = vadd.f32 %v17893_v5, %v17019_v50 }
 0x828   :  { %v6813_v9 = vpop.f32.mrf.mxu0  ;;  %v9442_v45 = vmax.f32 %v9441_v60, %v8422_v22  ;;  %v8446_v22 = vmax.f32 %v6790_v28, 0.0  ;;  %v9381_v35 = vmax.f32 %v9380_v21, %v8437_v46  ;;  %v8461_v60 = vmax.f32 %v6798_v61, 0.0 }
 0x829   :  { %v17906_v0 = vpop.f32.mrf.mxu1  ;;  %v6808_v28 = vadd.f32 %v17873_v44, %v17019_v50  ;;  %v8462_v46 = vmax.f32 %v6800_v14, 0.0  ;;  %v8327_v21 = vmax.f32 %v7385_v57, 0.0  ;;  %v8470_v44 = vmax.f32 %v6804_v11, 0.0 }
 0x82a   :  { %v6817_v13 = vpop.f32.mrf.mxu0  ;;  %v9443_v39 = vmax.f32 %v9442_v45, %v8430_v34  ;;  %v9382_v1 = vmax.f32 %v9381_v35, %v8445_v52  ;;  %v9554_v45 = vmax.f32 %v9553_v47, %v8312_v18  ;;  %v6814_v61 = vadd.f32 %v6813_v9, %v17027_v49 }
 0x82b   :  { %v17915_v56 = vpop.f32.mrf.mxu1  ;;  %v8477_v14 = vmax.f32 %v6808_v28, 0.0  ;;  %v6818_v41 = vadd.f32 %v6817_v13, %v17019_v50  ;;  %v7387_v57 = vadd.f32 %v17773_v33, %v17129_v42  ;;  %v7391_v28 = vadd.f32 %v17781_v38, %v17122_v19 }
 0x82c   :  { %v6819_v37 = vpop.f32.mrf.mxu0  ;;  %v9444_v4 = vmax.f32 %v9443_v39, %v8438_v16  ;;  %v9383_v16 = vmax.f32 %v9382_v1, %v8453_v43  ;;  %v9492_v39 = vmax.f32 %v9491_v15, %v8319_v31  ;;  %v9555_v47 = vmax.f32 %v9554_v45, %v8320_v63 }
 0x82d   :  { %v17924_v48 = vpop.f32.mrf.mxu1  ;;  %v8478_v43 = vmax.f32 %v6810_v27, 0.0  ;;  %v6820_v5 = vadd.f32 %v6819_v37, %v17027_v49  ;;  %v8486_v13 = vmax.f32 %v6814_v61, 0.0  ;;  %v8493_v63 = vmax.f32 %v6818_v41, 0.0 }
 0x82e   :  { %v6821_v17 = vpop.f32.mrf.mxu0  ;;  %v9445_v53 = vmax.f32 %v9444_v4, %v8446_v22  ;;  %v9384_v22 = vmax.f32 %v9383_v16, %v8461_v60  ;;  %v9493_v11 = vmax.f32 %v9492_v39, %v8327_v21  ;;  %v8335_v39 = vmax.f32 %v7391_v28, 0.0 }
 0x82f   :  { %v17932_v30 = vpop.f32.mrf.mxu1  ;;  %v6822_v9 = vadd.f32 %v6821_v17, %v17019_v50  ;;  %v7393_v17 = vadd.f32 %v17791_v26, %v17129_v42  ;;  %v8494_v27 = vmax.f32 %v6820_v5, 0.0 }
 0x830   :  { %v6823_v34 = vpop.f32.mrf.mxu0  ;;  %v9446_v52 = vmax.f32 %v9445_v53, %v8454_v58  ;;  %v9385_v4 = vmax.f32 %v9384_v22, %v8469_v32  ;;  %v8485_v58 = vmax.f32 %v6812_v51, 0.0  ;;  %v8328_v32 = vmax.f32 %v7387_v57, 0.0 }
 0x831   :  { %v17940_v20 = vpop.f32.mrf.mxu1  ;;  %v6824_v1 = vadd.f32 %v6823_v34, %v17027_v49  ;;  %v8501_v51 = vmax.f32 %v6822_v9, 0.0 }
 0x832   :  { %v6827_v55 = vpop.f32.mrf.mxu0  ;;  %v9447_v18 = vmax.f32 %v9446_v52, %v8462_v46  ;;  %v9386_v37 = vmax.f32 %v9385_v4, %v8477_v14 }
 0x833   :  { %v17946_v3 = vpop.f32.mrf.mxu1  ;;  %v6828_v53 = vadd.f32 %v6827_v55, %v17019_v50  ;;  %v7395_v55 = vadd.f32 %v17799_v10, %v17122_v19 }
 0x834   :  { %v6829_v6 = vpop.f32.mrf.mxu0  ;;  %v9448_v31 = vmax.f32 %v9447_v18, %v8470_v44  ;;  %v9387_v34 = vmax.f32 %v9386_v37, %v8485_v58  ;;  %v8502_v44 = vmax.f32 %v6824_v1, 0.0  ;;  %v8336_v18 = vmax.f32 %v7393_v17, 0.0 }
 0x835   :  { %v17950_v35 = vpop.f32.mrf.mxu1  ;;  %v6830_v45 = vadd.f32 %v6829_v6, %v17027_v49  ;;  %v8509_v14 = vmax.f32 %v6828_v53, 0.0  ;;  %v8343_v1 = vmax.f32 %v7395_v55, 0.0 }
 0x836   :  { %v6831_v36 = vpop.f32.mrf.mxu0  ;;  %v9449_v46 = vmax.f32 %v9448_v31, %v8478_v43  ;;  %v9388_v22 = vmax.f32 %v9387_v34, %v8493_v63  ;;  %v7397_v43 = vadd.f32 %v17807_v8, %v17129_v42  ;;  %v9494_v63 = vmax.f32 %v9493_v11, %v8335_v39 }
 0x837   :  { %v17956_v15 = vpop.f32.mrf.mxu1  ;;  %v6832_v21 = vadd.f32 %v6831_v36, %v17019_v50  ;;  %v8510_v36 = vmax.f32 %v6830_v45, 0.0 }
 0x838   :  { %v6833_v60 = vpop.f32.mrf.mxu0  ;;  %v9450_v52 = vmax.f32 %v9449_v46, %v8486_v13  ;;  %v9389_v10 = vmax.f32 %v9388_v22, %v8501_v51  ;;  %v9556_v13 = vmax.f32 %v9555_v47, %v8328_v32  ;;  %v8344_v45 = vmax.f32 %v7397_v43, 0.0 }
 0x839   :  { %v17962_v33 = vpop.f32.mrf.mxu1  ;;  %v6834_v61 = vadd.f32 %v6833_v60, %v17027_v49  ;;  %v8517_v4 = vmax.f32 %v6832_v21, 0.0  ;;  %v9495_v11 = vmax.f32 %v9494_v63, %v8343_v1 }
 0x83a   :  { %v6837_v16 = vpop.f32.mrf.mxu0  ;;  %v9451_v5 = vmax.f32 %v9450_v52, %v8494_v27  ;;  %v9390_v53 = vmax.f32 %v9389_v10, %v8509_v14  ;;  %v9557_v27 = vmax.f32 %v9556_v13, %v8336_v18 }
 0x83b   :  { %v17968_v38 = vpop.f32.mrf.mxu1  ;;  %v6838_v6 = vadd.f32 %v6837_v16, %v17019_v50  ;;  %v8518_v28 = vmax.f32 %v6834_v61, 0.0  ;;  %v7401_v16 = vadd.f32 %v17815_v25, %v17122_v19  ;;  %v7405_v61 = vadd.f32 %v17832_v62, %v17122_v19 }
 0x83c   :  { %v6839_v26 = vpop.f32.mrf.mxu0  ;;  %v9452_v60 = vmax.f32 %v9451_v5, %v8502_v44  ;;  %v9391_v21 = vmax.f32 %v9390_v53, %v8517_v4  ;;  %v7403_v44 = vadd.f32 %v17824_v29, %v17129_v42  ;;  %v9558_v43 = vmax.f32 %v9557_v27, %v8344_v45 }
 0x83d   :  { %v17974_v41 = vpop.f32.mrf.mxu1  ;;  %v6840_v58 = vadd.f32 %v6839_v26, %v17027_v49  ;;  %v8525_v17 = vmax.f32 %v6838_v6, 0.0  ;;  %v8351_v5 = vmax.f32 %v7401_v16, 0.0  ;;  %v7411_v29 = vadd.f32 %v17850_v40, %v17122_v19 }
 0x83e   :  { %v6841_v57 = vpop.f32.mrf.mxu0  ;;  %v9453_v34 = vmax.f32 %v9452_v60, %v8510_v36  ;;  %v7407_v36 = vadd.f32 %v17841_v54, %v17129_v42  ;;  %v8352_v13 = vmax.f32 %v7403_v44, 0.0  ;;  %v8359_v1 = vmax.f32 %v7405_v61, 0.0 }
 0x83f   :  { %v6842_v9 = vadd.f32 %v6841_v57, %v17019_v50  ;;  %v17980_v31 = vpop.f32.mrf.mxu1  ;;  %v8526_v47 = vmax.f32 %v6840_v58, 0.0  ;;  %v9392_v22 = vmax.f32 %v9391_v21, %v8525_v17  ;;  %v7413_v60 = vadd.f32 %v17858_v7, %v17129_v42  ;;  %v18395_v7 = vld [vmem:[#allocation26_spill] sm:$0xff] }
 0x840   :  { %v6843_v37 = vpop.f32.mrf.mxu0  ;;  %v9454_v26 = vmax.f32 %v9453_v34, %v8518_v28  ;;  %v7415_v28 = vadd.f32 %v17867_v59, %v17122_v19  ;;  %v8367_v27 = vmax.f32 %v7411_v29, 0.0  ;;  %v7417_v45 = vadd.f32 %v17879_v12, %v17129_v42 }
 0x841   :  { %v6844_v8 = vadd.f32 %v6843_v37, %v17027_v49  ;;  %v17983_v46 = vpop.f32.mrf.mxu1  ;;  %v8533_v32 = vmax.f32 %v6842_v9, 0.0  ;;  %v7421_v34 = vadd.f32 %v18395_v7, %v17122_v19  ;;  %v7423_v12 = vadd.f32 %v17898_v24, %v17129_v42 }
 0x842   :  { %v6847_v51 = vpop.f32.mrf.mxu0  ;;  %v9455_v10 = vmax.f32 %v9454_v26, %v8526_v47  ;;  %v8375_v26 = vmax.f32 %v7415_v28, 0.0 }
 0x843   :  { %v6848_v55 = vadd.f32 %v6847_v51, %v17019_v50  ;;  %v17988_v52 = vpop.f32.mrf.mxu1  ;;  %v8534_v25 = vmax.f32 %v6844_v8, 0.0  ;;  %v9393_v62 = vmax.f32 %v9392_v22, %v8533_v32  ;;  %v9496_v8 = vmax.f32 %v9495_v11, %v8351_v5 }
 0x844   :  { %v6849_v39 = vpop.f32.mrf.mxu0  ;;  %v8368_v11 = vmax.f32 %v7413_v60, 0.0  ;;  %v7425_v5 = vadd.f32 %v17906_v0, %v17122_v19  ;;  %v8383_v29 = vmax.f32 %v7421_v34, 0.0  ;;  %v9655_v0 = vrot.slane %v17902_v2, 1 }
 0x845   :  { %v8541_v14 = vmax.f32 %v6848_v55, 0.0  ;;  %v6850_v6 = vadd.f32 %v6849_v39, %v17027_v49  ;;  %v17995_v18 = vpop.f32.mrf.mxu1  ;;  %v9456_v37 = vmax.f32 %v9455_v10, %v8534_v25  ;;  %v9559_v55 = vmax.f32 %v9558_v43, %v8352_v13 }
 0x846   :  { %v6851_v57 = vpop.f32.mrf.mxu0  ;;  %v9497_v61 = vmax.f32 %v9496_v8, %v8359_v1  ;;  %v7433_v13 = vadd.f32 %v17932_v30, %v17129_v42 }
 0x847   :  { %v8542_v4 = vmax.f32 %v6850_v6, 0.0  ;;  %v6852_v58 = vadd.f32 %v6851_v57, %v17019_v50  ;;  %v18002_v9 = vpop.f32.mrf.mxu1  ;;  %v9394_v63 = vmax.f32 %v9393_v62, %v8541_v14  ;;  %v8360_v50 = vmax.f32 %v7407_v36, 0.0 }
 0x848   :  { %v6853_v54 = vpop.f32.mrf.mxu0  ;;  %v8376_v6 = vmax.f32 %v7417_v45, 0.0  ;;  %v9498_v36 = vmax.f32 %v9497_v61, %v8367_v27  ;;  %v8400_v34 = vmax.f32 %v7433_v13, 0.0  ;;  %v7445_v61 = vadd.f32 %v17962_v33, %v17122_v19 }
 0x849   :  { %v8549_v40 = vmax.f32 %v6852_v58, 0.0  ;;  %v6854_v53 = vadd.f32 %v6853_v54, %v17027_v49  ;;  %v18009_v17 = vpop.f32.mrf.mxu1  ;;  %v9457_v59 = vmax.f32 %v9456_v37, %v8542_v4  ;;  %v18396_v49 = vrot.slane %v17875_v23, 1 }
 0x84a   :  { %v18013_v16 = vpop.f32.mrf.mxu0  ;;  %v9560_v14 = vmax.f32 %v9559_v55, %v8360_v50  ;;  %v8384_v4 = vmax.f32 %v7423_v12, 0.0  ;;  %v7431_v58 = vadd.f32 %v17924_v48, %v17122_v19  ;;  %v9499_v60 = vmax.f32 %v9498_v36, %v8375_v26 }
 0x84b   :  { %v9395_v51 = vmax.f32 %v9394_v63, %v8549_v40  ;;  %v8550_v21 = vmax.f32 %v6854_v53, 0.0  ;;  %v18017_v47 = vpop.f32.mrf.mxu1  ;;  %v18022_v32 = vmax.f32 %v17875_v23, %v18396_v49  ;;  %v7427_v23 = vadd.f32 %v17915_v56, %v17129_v42 }
 0x84c   :  { %v18026_v44 = vpop.f32.mrf.mxu0  ;;  %v9561_v62 = vmax.f32 %v9560_v14, %v8368_v11  ;;  %v8391_v63 = vmax.f32 %v7425_v5, 0.0  ;;  %v7435_v53 = vadd.f32 %v17940_v20, %v17122_v19  ;;  %v9500_v8 = vmax.f32 %v9499_v60, %v8383_v29 }
 0x84d   :  { %v9701_v39 = vrot.slane %v9395_v51, 4  ;;  %v9458_v22 = vmax.f32 %v9457_v59, %v8550_v21  ;;  %v18028_v25 = vpop.f32.mrf.mxu1  ;;  %v8392_v40 = vmax.f32 %v7427_v23, 0.0  ;;  %v7437_v48 = vadd.f32 %v17946_v3, %v17129_v42 }
 0x84e   :  { %v11339_v43 = vpop.f32.mrf.mxu0  ;;  %v9562_v37 = vmax.f32 %v9561_v62, %v8376_v6  ;;  %v8399_v7 = vmax.f32 %v7431_v58, 0.0  ;;  %v7441_v59 = vadd.f32 %v17950_v35, %v17122_v19  ;;  %v9656_v55 = vmax.f32 %v17902_v2, %v9655_v0 }
 0x84f   :  { %v9702_v24 = vmax.f32 %v9395_v51, %v9701_v39  ;;  %v9707_v57 = vrot.slane %v9458_v22, 4  ;;  %v18034_v10 = vpop.f32.mrf.mxu1  ;;  %v7443_v51 = vadd.f32 %v17956_v15, %v17129_v42  ;;  %v9501_v3 = vmax.f32 %v9500_v8, %v8391_v63 }
 0x850   :  { %v11340_v1 = vpop.f32.mrf.mxu0  ;;  %v9563_v45 = vmax.f32 %v9562_v37, %v8384_v4  ;;  %v8407_v12 = vmax.f32 %v7435_v53, 0.0  ;;  %v8408_v26 = vmax.f32 %v7437_v48, 0.0  ;;  %v7447_v39 = vadd.f32 %v17968_v38, %v17129_v42 }
 0x851   :  { %v9703_v56 = vrot.slane %v9702_v24, 2  ;;  %v9708_v28 = vmax.f32 %v9458_v22, %v9707_v57  ;;  %v18041_v54 = vpop.f32.mrf.mxu1  ;;  %v9502_v15 = vmax.f32 %v9501_v3, %v8399_v7  ;;  %v8415_v5 = vmax.f32 %v7441_v59, 0.0  ;;  %v14125_v59 = vld [vmem:[#allocation9 + $0xc8] ss:$16 sps:$4 sm:$0xff]  }
 0x852   :  { %v9564_v11 = vmax.f32 %v9563_v45, %v8392_v40  ;;  %v7451_v2 = vadd.f32 %v17974_v41, %v17122_v19  ;;  %v8416_v23 = vmax.f32 %v7443_v51, 0.0  ;;  %v7453_v43 = vadd.f32 %v17980_v31, %v17129_v42 }
 0x853   :  { %v9704_v50 = vmax.f32 %v9702_v24, %v9703_v56  ;;  %v9709_v30 = vrot.slane %v9708_v28, 2  ;;  %v18047_v27 = vpop.f32.mrf.mxu1  ;;  %v9503_v29 = vmax.f32 %v9502_v15, %v8407_v12  ;;  %v8423_v24 = vmax.f32 %v7445_v61, 0.0 }
 0x854   :  { %v9565_v6 = vmax.f32 %v9564_v11, %v8400_v34  ;;  %v7455_v57 = vadd.f32 %v17983_v46, %v17122_v19  ;;  %v8424_v4 = vmax.f32 %v7447_v39, 0.0  ;;  %v7457_v41 = vadd.f32 %v17988_v52, %v17129_v42  ;;  %v14127_v52 = vld [vmem:[#allocation9 + $0xcc] ss:$16 sps:$4 sm:$0xff]   ;;  %v18397_v34 = vld [vmem:[#allocation22_spill] sm:$0xff] }
 0x855   :  { %v9705_v21 = vrot.slane %v9704_v50, 1  ;;  %v9710_v49 = vmax.f32 %v9708_v28, %v9709_v30  ;;  %v18053_v20 = vpop.f32.mrf.mxu1  ;;  %v9504_v31 = vmax.f32 %v9503_v29, %v8415_v5  ;;  %v8431_v1 = vmax.f32 %v7451_v2, 0.0 }
 0x856   :  { %v9566_v62 = vmax.f32 %v9565_v6, %v8408_v26  ;;  %v7461_v0 = vadd.f32 %v17995_v18, %v17122_v19  ;;  %v8432_v28 = vmax.f32 %v7453_v43, 0.0  ;;  %v7463_v46 = vadd.f32 %v18002_v9, %v17129_v42 }
 0x857   :  { %v9706_v35 = vmax.f32 %v9704_v50, %v9705_v21  ;;  %v9711_v22 = vrot.slane %v9710_v49, 1  ;;  %v18060_v14 = vpop.f32.mrf.mxu1  ;;  %v9505_v40 = vmax.f32 %v9504_v31, %v8423_v24  ;;  %v8439_v53 = vmax.f32 %v7455_v57, 0.0 }
 0x858   :  { %v9567_v56 = vmax.f32 %v9566_v62, %v8416_v23  ;;  %v7465_v8 = vadd.f32 %v18009_v17, %v17122_v19  ;;  %v8440_v48 = vmax.f32 %v7457_v41, 0.0  ;;  %v7467_v50 = vadd.f32 %v18017_v47, %v17129_v42  ;;  %v14133_v47 = vld [vmem:[#allocation9 + $0xac] ss:$16 sps:$4 sm:$0xff]  }
 0x859   :  { %v18066_v36 = vpop.f32.mrf.mxu1  ;;  %v9712_v33 = vmax.f32 %v9710_v49, %v9711_v22  ;;  %v9730_v38 = vsel %vm9725_vm3, %v18022_v32, %v9706_v35  ;;  %v14119_v32 = vld [vmem:[#allocation9 + $0xe8] ss:$16 sps:$4 sm:$0xff]   ;;  %v9506_v9 = vmax.f32 %v9505_v40, %v8431_v1  ;;  %v8447_v45 = vmax.f32 %v7461_v0, 0.0  ;;  %v14145_v1 = vld [vmem:[#allocation9 + $0x6c] ss:$16 sps:$4 sm:$0xff]  }
 0x85a   :  { %v18081_v63 = vpack.c.bf16 %v9730_v38, %v9730_v38  ;;  %v9568_v18 = vmax.f32 %v9567_v56, %v8424_v4  ;;  %v7471_v7 = vadd.f32 %v18028_v25, %v17122_v19  ;;  %v8448_v51 = vmax.f32 %v7463_v46, 0.0  ;;  %v14137_v4 = vld [vmem:[#allocation9 + $0x88] ss:$16 sps:$4 sm:$0xff]  }
 0x85b   :  { %v7486_v58 = vpop.f32.mrf.mxu1  ;;  %v9731_v13 = vsel %vm9725_vm3, %v9656_v55, %v9712_v33  ;;  %v7473_v21 = vadd.f32 %v18034_v10, %v17129_v42  ;;  %v9507_v55 = vmax.f32 %v9506_v9, %v8439_v53  ;;  %v8455_v3 = vmax.f32 %v7465_v8, 0.0  ;;  %v14131_v10 = vld [vmem:[#allocation9 + $0xa8] ss:$16 sps:$4 sm:$0xff]  }
 0x85c   :  { %v18077_v60 = vpack.c.bf16 %v9731_v13, %v9731_v13  ;;  %v9569_v17 = vmax.f32 %v9568_v18, %v8432_v28  ;;  %v7475_v11 = vadd.f32 %v18041_v54, %v17122_v19  ;;  %v8456_v61 = vmax.f32 %v7467_v50, 0.0  ;;  %v14139_v54 = vld [vmem:[#allocation9 + $0x8c] ss:$16 sps:$4 sm:$0xff]   ;;  %v14143_v53 = vld [vmem:[#allocation9 + $0x68] ss:$16 sps:$4 sm:$0xff]  }
 0x85d   :  { %v7490_v37 = vpop.f32.mrf.mxu1  ;;  %v7477_v25 = vadd.f32 %v18047_v27, %v17129_v42  ;;  %v9508_v39 = vmax.f32 %v9507_v55, %v8447_v45  ;;  %v8463_v35 = vmax.f32 %v7471_v7, 0.0  ;;  %v7481_v22 = vadd.f32 %v18053_v20, %v17122_v19  ;;  %v14149_v55 = vld [vmem:[#allocation9 + $0x48] ss:$16 sps:$4 sm:$0xff]  }
 0x85e   :  { %11415 = vmatprep.mubr.bf16.mxu0 %v18077_v60  ;;  %v9570_v12 = vmax.f32 %v9569_v17, %v8440_v48  ;;  %v8464_v6 = vmax.f32 %v7473_v21, 0.0  ;;  %v7483_v5 = vadd.f32 %v18060_v14, %v17129_v42  ;;  %v8471_v43 = vmax.f32 %v7475_v11, 0.0 }
 0x85f   :  { %v7492_v30 = vpop.f32.mrf.mxu1  ;;  %11416 = vmatmul.mubr.bf16.vlgmr.msra.gmra.mxu0 %v18081_v63  ;;  %v9509_v23 = vmax.f32 %v9508_v39, %v8455_v3  ;;  %v7485_v27 = vadd.f32 %v18066_v36, %v17122_v19  ;;  %v8472_v38 = vmax.f32 %v7477_v25, 0.0  ;;  %v7487_v29 = vadd.f32 %v7486_v58, %v17129_v42 }
 0x860   :  { %11466 = vmatpush1.bf16.msra.mxu0 %v14119_v32  ;;  %11497 = vmatprep.mubr.bf16.mxu0 %v18397_v34  ;;  %v9571_v15 = vmax.f32 %v9570_v12, %v8448_v51  ;;  %v8479_v57 = vmax.f32 %v7481_v22, 0.0  ;;  %v7491_v62 = vadd.f32 %v7490_v37, %v17122_v19  ;;  %v8480_v41 = vmax.f32 %v7483_v5, 0.0 }
 0x861   :  { %v7494_v49 = vpop.f32.mrf.mxu1  ;;  %11467 = vmatprep.subr.bf16.mxu0 %v14127_v52  ;;  %v9510_v24 = vmax.f32 %v9509_v23, %v8463_v35  ;;  %v7493_v13 = vadd.f32 %v7492_v30, %v17129_v42  ;;  %v8487_v36 = vmax.f32 %v7485_v27, 0.0  ;;  %v8488_v58 = vmax.f32 %v7487_v29, 0.0  ;;  %v14151_v30 = vld [vmem:[#allocation9 + $0x4c] ss:$16 sps:$4 sm:$0xff]   ;;  %v14155_v23 = vld [vmem:[#allocation9 + $0x28] ss:$16 sps:$4 sm:$0xff]  }
 0x862   :  { %v9572_v33 = vmax.f32 %v9571_v15, %v8456_v61  ;;  %v7495_v32 = vadd.f32 %v7494_v49, %v17122_v19  ;;  %v8495_v37 = vmax.f32 %v7491_v62, 0.0  ;;  %v14157_v61 = vld [vmem:[#allocation9 + $0x2c] ss:$16 sps:$4 sm:$0xff]  }
 0x863   :  { %v7496_v26 = vpop.f32.mrf.mxu1  ;;  %v9511_v0 = vmax.f32 %v9510_v24, %v8471_v43  ;;  %v8496_v18 = vmax.f32 %v7493_v13, 0.0  ;;  %v18398_v43 = vld [vmem:[#allocation20_spill] sm:$0xff]  ;;  %v14163_v29 = vld [vmem:[#allocation9 + $0xc] ss:$16 sps:$4 sm:$0xff]  }
 0x864   :  { %11468 = vmatpush1.bf16.msra.mxu0 %v14125_v59  ;;  %v9573_v14 = vmax.f32 %v9572_v33, %v8464_v6  ;;  %v7497_v28 = vadd.f32 %v7496_v26, %v17129_v42  ;;  %v8503_v45 = vmax.f32 %v7495_v32, 0.0  ;;  %v18116_v6 = vld [vmem:[#allocation3 + $0x5] ss:$8 sm:$0xf]  ;;  %v9657_v27 = vrot.slane %v18398_v43, 4 }
 0x865   :  { %v7500_v2 = vpop.f32.mrf.mxu1  ;;  %11469 = vmatprep.subr.bf16.mxu0 %v14133_v47  ;;  %v9512_v52 = vmax.f32 %v9511_v0, %v8479_v57 }
 0x866   :  { %v9574_v56 = vmax.f32 %v9573_v14, %v8472_v38  ;;  %v7501_v40 = vadd.f32 %v7500_v2, %v17122_v19  ;;  %v8504_v59 = vmax.f32 %v7497_v28, 0.0  ;;  %v9658_v28 = vmax.f32 %v18398_v43, %v9657_v27  ;;  %v14187_v43 = vld [vmem:[#allocation9 + $0x18c] ss:$16 sps:$4 sm:$0xff]  }
 0x867   :  { %v7502_v20 = vpop.f32.mrf.mxu1  ;;  %v9513_v9 = vmax.f32 %v9512_v52, %v8487_v36 }
 0x868   :  { %11470 = vmatpush1.bf16.msra.mxu0 %v14131_v10  ;;  %v9575_v8 = vmax.f32 %v9574_v56, %v8480_v41  ;;  %v7503_v48 = vadd.f32 %v7502_v20, %v17129_v42  ;;  %v8511_v49 = vmax.f32 %v7501_v40, 0.0  ;;  %v18400_v41 = vld [vmem:[#allocation51_spill] sm:$0xff] }
 0x869   :  { %v7504_v31 = vpop.f32.mrf.mxu1  ;;  %11471 = vmatprep.subr.bf16.mxu0 %v14139_v54  ;;  %v9514_v21 = vmax.f32 %v9513_v9, %v8495_v37  ;;  %v10004_v13 = vrot.slane %v18116_v6, %v18400_v41  ;;  %v14169_v40 = vld [vmem:[#allocation9 + $0x1ec] ss:$16 sps:$4 sm:$0xff]  }
 0x86a   :  { %v7505_v7 = vadd.f32 %v7504_v31, %v17122_v19  ;;  %v9576_v34 = vmax.f32 %v9575_v8, %v8488_v58  ;;  %v8512_v11 = vmax.f32 %v7503_v48, 0.0  ;;  %v14161_v58 = vld [vmem:[#allocation9 + $0x8] ss:$16 sps:$4 sm:$0xff]  }
 0x86b   :  { %v7506_v46 = vpop.f32.mrf.mxu1  ;;  %v9515_v25 = vmax.f32 %v9514_v21, %v8503_v45 }
 0x86c   :  { %11472 = vmatpush1.bf16.msra.mxu0 %v14137_v4  ;;  %v7507_v17 = vadd.f32 %v7506_v46, %v17129_v42  ;;  %v9577_v3 = vmax.f32 %v9576_v34, %v8496_v18  ;;  %v8519_v26 = vmax.f32 %v7505_v7, 0.0  ;;  %v18399_v4 = vld [vmem:[#allocation21_spill] sm:$0xff] }
 0x86d   :  { %v7510_v50 = vpop.f32.mrf.mxu1  ;;  %11473 = vmatprep.subr.bf16.mxu0 %v14145_v1  ;;  %v9516_v5 = vmax.f32 %v9515_v25, %v8511_v49  ;;  %v9663_v14 = vrot.slane %v18399_v4, 4  ;;  %v18401_v46 = vld [vmem:[#allocation53_spill] sm:$0xff] }
 0x86e   :  { %v7511_v47 = vadd.f32 %v7510_v50, %v17122_v19  ;;  %v9578_v22 = vmax.f32 %v9577_v3, %v8504_v59  ;;  %v8520_v10 = vmax.f32 %v7507_v17, 0.0  ;;  %v10008_v52 = vrot.slane %v18116_v6, %v18401_v46  ;;  %v14167_v17 = vld [vmem:[#allocation9 + $0x1e8] ss:$16 sps:$4 sm:$0xff]  }
 0x86f   :  { %v7512_v51 = vpop.f32.mrf.mxu1  ;;  %v9517_v20 = vmax.f32 %v9516_v5, %v8519_v26  ;;  %v9664_v50 = vmax.f32 %v18399_v4, %v9663_v14 }
 0x870   :  { %11474 = vmatpush1.bf16.msra.mxu0 %v14143_v53  ;;  %v7513_v39 = vadd.f32 %v7512_v51, %v17129_v42  ;;  %v8527_v2 = vmax.f32 %v7511_v47, 0.0  ;;  %v9579_v33 = vmax.f32 %v9578_v22, %v8512_v11  ;;  %v9659_v51 = vrot.slane %v9658_v28, 2  ;;  %v14175_v47 = vld [vmem:[#allocation9 + $0x1cc] ss:$16 sps:$4 sm:$0xff]  }
 0x871   :  { %v7514_v12 = vpop.f32.mrf.mxu1  ;;  %11475 = vmatprep.subr.bf16.mxu0 %v14151_v30  ;;  %v11336_v30 = vadd.f32 %v18013_v16, %v10004_v13  ;;  %v11338_v21 = vadd.f32 %v18026_v44, %v10008_v52 }
 0x872   :  { %v7515_v35 = vadd.f32 %v7514_v12, %v17122_v19  ;;  %v8528_v24 = vmax.f32 %v7513_v39, 0.0  ;;  %v9580_v31 = vmax.f32 %v9579_v33, %v8520_v10  ;;  %v9518_v0 = vmax.f32 %v9517_v20, %v8527_v2 }
 0x873   :  { %v7516_v15 = vpop.f32.mrf.mxu1  ;;  %v9665_v12 = vrot.slane %v9664_v50, 2  ;;  %v9660_v44 = vmax.f32 %v9658_v28, %v9659_v51  ;;  %v14194_v28 = vld [vmem:[#allocation9 + $0x2e8] ss:$16 sps:$4 sm:$0xff]   ;;  %v14220_v51 = vld [vmem:[#allocation9 + $0x26c] ss:$16 sps:$4 sm:$0xff]  }
 0x874   :  { %v7517_v54 = vadd.f32 %v7516_v15, %v17129_v42  ;;  %11476 = vmatpush1.bf16.msra.mxu0 %v14149_v55  ;;  %v8535_v57 = vmax.f32 %v7515_v35, 0.0  ;;  %v9581_v53 = vmax.f32 %v9580_v31, %v8528_v24  ;;  %v14181_v35 = vld [vmem:[#allocation9 + $0x1ac] ss:$16 sps:$4 sm:$0xff]   ;;  %v14191_v31 = vld [vmem:[#allocation9 + $0x168] ss:$16 sps:$4 sm:$0xff]  }
 0x875   :  { %v7520_v38 = vpop.f32.mrf.mxu1  ;;  %11477 = vmatprep.subr.bf16.mxu0 %v14157_v61  ;;  %v9666_v5 = vmax.f32 %v9664_v50, %v9665_v12  ;;  %v9661_v27 = vrot.slane %v9660_v44, 1  ;;  %v14208_v50 = vld [vmem:[#allocation9 + $0x2ac] ss:$16 sps:$4 sm:$0xff]   ;;  %v14227_v12 = vld [vmem:[#allocation9 + $0x4a8] ss:$16 sps:$4 sm:$0xff]  }
 0x876   :  { %v7521_v62 = vadd.f32 %v7520_v38, %v17122_v19  ;;  %v8536_v36 = vmax.f32 %v7517_v54, 0.0  ;;  %v9519_v8 = vmax.f32 %v9518_v0, %v8535_v57  ;;  %v14185_v57 = vld [vmem:[#allocation9 + $0x188] ss:$16 sps:$4 sm:$0xff]  }
 0x877   :  { %v7522_v1 = vpop.f32.mrf.mxu1  ;;  %v9662_v4 = vmax.f32 %v9660_v44, %v9661_v27  ;;  %v14236_v44 = vld [vmem:[#allocation9 + $0x208] ss:$16 sps:$4 sm:$0xff]  }
 0x878   :  { %v8543_v32 = vmax.f32 %v7521_v62, 0.0  ;;  %v7523_v56 = vadd.f32 %v7522_v1, %v17129_v42  ;;  %11478 = vmatpush1.bf16.msra.mxu0 %v14155_v23  ;;  %v9582_v45 = vmax.f32 %v9581_v53, %v8536_v36  ;;  %v14179_v23 = vld [vmem:[#allocation9 + $0x1a8] ss:$16 sps:$4 sm:$0xff]   ;;  %v14193_v62 = vld [vmem:[#allocation9 + $0x16c] ss:$16 sps:$4 sm:$0xff]  }
 0x879   :  { %v7524_v37 = vpop.f32.mrf.mxu1  ;;  %11479 = vmatprep.subr.bf16.mxu0 %v14163_v29  ;;  %v9667_v29 = vrot.slane %v9666_v5, 1  ;;  %v14205_v53 = vld [vmem:[#allocation9 + $0x12c] ss:$16 sps:$4 sm:$0xff]   ;;  %v14251_v27 = vld [vmem:[#allocation9 + $0x428] ss:$16 sps:$4 sm:$0xff]  }
 0x87a   :  { %v8544_v18 = vmax.f32 %v7523_v56, 0.0  ;;  %v7525_v48 = vadd.f32 %v7524_v37, %v17122_v19  ;;  %v9520_v7 = vmax.f32 %v9519_v8, %v8543_v32  ;;  %v14199_v32 = vld [vmem:[#allocation9 + $0x14c] ss:$16 sps:$4 sm:$0xff]   ;;  %v14197_v37 = vld [vmem:[#allocation9 + $0x148] ss:$16 sps:$4 sm:$0xff]  }
 0x87b   :  { %v7526_v9 = vpop.f32.mrf.mxu1  ;;  %v9668_v1 = vmax.f32 %v9666_v5, %v9667_v29  ;;  %v18402_v8 = vld [vmem:[#allocation24_spill] sm:$0xff] }
 0x87c   :  { %v8551_v34 = vmax.f32 %v7525_v48, 0.0  ;;  %v7527_v59 = vadd.f32 %v7526_v9, %v17129_v42  ;;  %11480 = vmatpush1.bf16.msra.mxu0 %v14161_v58  ;;  %v9583_v55 = vmax.f32 %v9582_v45, %v8544_v18  ;;  %v14173_v42 = vld [vmem:[#allocation9 + $0x1c8] ss:$16 sps:$4 sm:$0xff]  }
 0x87d   :  { %v11376_v49 = vpop.f32.mrf.mxu1  ;;  %11481 = vmatprep.subr.bf16.mxu0 %v14169_v40  ;;  %v14202_v40 = vld [vmem:[#allocation9 + $0x2cc] ss:$16 sps:$4 sm:$0xff]   ;;  %v14200_v18 = vld [vmem:[#allocation9 + $0x2c8] ss:$16 sps:$4 sm:$0xff]  }
 0x87e   :  { %v9521_v19 = vmax.f32 %v9520_v7, %v8551_v34  ;;  %v8552_v3 = vmax.f32 %v7527_v59, 0.0  ;;  %v18133_v11 = vadd.f32 %v11376_v49, %v11336_v30  ;;  %v14203_v48 = vld [vmem:[#allocation9 + $0x128] ss:$16 sps:$4 sm:$0xff]   ;;  %v14211_v30 = vld [vmem:[#allocation9 + $0x10c] ss:$16 sps:$4 sm:$0xff]  }
 0x87f   :  { %v11378_v16 = vpop.f32.mrf.mxu1  ;;  %v14206_v9 = vld [vmem:[#allocation9 + $0x2a8] ss:$16 sps:$4 sm:$0xff]   ;;  %v14214_v7 = vld [vmem:[#allocation9 + $0x28c] ss:$16 sps:$4 sm:$0xff]  }
 0x880   :  { %v9713_v61 = vrot.slane %v9521_v19, 4  ;;  %v9584_v25 = vmax.f32 %v9583_v55, %v8552_v3  ;;  %v18135_v26 = vadd.f32 %v11378_v16, %v11338_v21  ;;  %11482 = vmatpush2.bf16.msra.mxu0 %v14167_v17  ;;  %v14209_v45 = vld [vmem:[#allocation9 + $0x108] ss:$16 sps:$4 sm:$0xff]   ;;  %v14217_v34 = vld [vmem:[#allocation9 + $0x4ec] ss:$16 sps:$4 sm:$0xff]  }
 0x881   :  { %v11380_v39 = vpop.f32.mrf.mxu1  ;;  %11483 = vmatprep.subr.bf16.mxu0 %v14175_v47  ;;  %v14212_v59 = vld [vmem:[#allocation9 + $0x288] ss:$16 sps:$4 sm:$0xff]   ;;  %v14223_v21 = vld [vmem:[#allocation9 + $0x4cc] ss:$16 sps:$4 sm:$0xff]  }
 0x882   :  { %v9714_v22 = vmax.f32 %v9521_v19, %v9713_v61  ;;  %v9719_v10 = vrot.slane %v9584_v25, 4  ;;  %v14215_v17 = vld [vmem:[#allocation9 + $0x4e8] ss:$16 sps:$4 sm:$0xff]   ;;  %v14226_v19 = vld [vmem:[#allocation9 + $0x24c] ss:$16 sps:$4 sm:$0xff]  }
 0x883   :  { %v11381_v15 = vpop.f32.mrf.mxu1  ;;  %v18403_v49 = vld [vmem:[#allocation23_spill] sm:$0xff] }
 0x884   :  { %v9715_v2 = vrot.slane %v9714_v22, 2  ;;  %v9720_v54 = vmax.f32 %v9584_v25, %v9719_v10  ;;  %11484 = vmatpush2.bf16.msra.mxu0 %v14173_v42  ;;  %v14218_v47 = vld [vmem:[#allocation9 + $0x268] ss:$16 sps:$4 sm:$0xff]   ;;  %v14229_v3 = vld [vmem:[#allocation9 + $0x4ac] ss:$16 sps:$4 sm:$0xff]  }
 0x885   :  { %11485 = vmatprep.subr.bf16.mxu0 %v14181_v35  ;;  %v14221_v55 = vld [vmem:[#allocation9 + $0x4c8] ss:$16 sps:$4 sm:$0xff]   ;;  %v14232_v61 = vld [vmem:[#allocation9 + $0x22c] ss:$16 sps:$4 sm:$0xff]  }
 0x886   :  { %v9716_v33 = vmax.f32 %v9714_v22, %v9715_v2  ;;  %v9721_v38 = vrot.slane %v9720_v54, 2  ;;  %v14224_v16 = vld [vmem:[#allocation9 + $0x248] ss:$16 sps:$4 sm:$0xff]   ;;  %v14235_v25 = vld [vmem:[#allocation9 + $0x48c] ss:$16 sps:$4 sm:$0xff]  }
 0x887   :  { %v14230_v42 = vld [vmem:[#allocation9 + $0x228] ss:$16 sps:$4 sm:$0xff]   ;;  %v14238_v35 = vld [vmem:[#allocation9 + $0x20c] ss:$16 sps:$4 sm:$0xff]  }
 0x888   :  { %v9717_v20 = vrot.slane %v9716_v33, 1  ;;  %v9722_v24 = vmax.f32 %v9720_v54, %v9721_v38  ;;  %11486 = vmatpush2.bf16.msra.mxu0 %v14179_v23  ;;  %v14233_v39 = vld [vmem:[#allocation9 + $0x488] ss:$16 sps:$4 sm:$0xff]   ;;  %v14244_v10 = vld [vmem:[#allocation9 + $0x3ec] ss:$16 sps:$4 sm:$0xff]  }
 0x889   :  { %11487 = vmatprep.subr.bf16.mxu0 %v14187_v43  ;;  %v14239_v22 = vld [vmem:[#allocation9 + $0x468] ss:$16 sps:$4 sm:$0xff]   ;;  %v14247_v15 = vld [vmem:[#allocation9 + $0x44c] ss:$16 sps:$4 sm:$0xff]  }
 0x88a   :  { %v9718_v14 = vmax.f32 %v9716_v33, %v9717_v20  ;;  %v9723_v13 = vrot.slane %v9722_v24, 1  ;;  %v14242_v5 = vld [vmem:[#allocation9 + $0x3e8] ss:$16 sps:$4 sm:$0xff]   ;;  %v14250_v54 = vld [vmem:[#allocation9 + $0x3cc] ss:$16 sps:$4 sm:$0xff]  }
 0x88b   :  { %v14245_v2 = vld [vmem:[#allocation9 + $0x448] ss:$16 sps:$4 sm:$0xff]   ;;  %v14253_v23 = vld [vmem:[#allocation9 + $0x42c] ss:$16 sps:$4 sm:$0xff]  }
 0x88c   :  { %11488 = vmatpush2.bf16.msra.mxu0 %v14185_v57  ;;  %v9724_v0 = vmax.f32 %v9722_v24, %v9723_v13  ;;  %v9732_v36 = vsel %vm9725_vm3, %v9662_v4, %v9718_v14  ;;  %v14248_v43 = vld [vmem:[#allocation9 + $0x3c8] ss:$16 sps:$4 sm:$0xff]   ;;  %v14256_v33 = vld [vmem:[#allocation9 + $0x3ac] ss:$16 sps:$4 sm:$0xff]  }
 0x88d   :  { %11489 = vmatprep.subr.bf16.mxu0 %v14193_v62  ;;  %v18141_v52 = vpack.c.bf16 %v9732_v36, %v9732_v36  ;;  %v14259_v38 = vld [vmem:[#allocation9 + $0x40c] ss:$16 sps:$4 sm:$0xff]   ;;  %v14254_v29 = vld [vmem:[#allocation9 + $0x3a8] ss:$16 sps:$4 sm:$0xff]  }
 0x88e   :  { %v9733_v56 = vsel %vm9725_vm3, %v9668_v1, %v9724_v0  ;;  %v14257_v20 = vld [vmem:[#allocation9 + $0x408] ss:$16 sps:$4 sm:$0xff]   ;;  %v14262_v24 = vld [vmem:[#allocation9 + $0x38c] ss:$16 sps:$4 sm:$0xff]  }
 0x88f   :  { %v18139_v58 = vpack.c.bf16 %v9733_v56, %v9733_v56  ;;  %v14265_v57 = vld [vmem:[#allocation9 + $0x5ec] ss:$16 sps:$4 sm:$0xff]   ;;  %v14260_v62 = vld [vmem:[#allocation9 + $0x388] ss:$16 sps:$4 sm:$0xff]  }
 0x890   :  { %11490 = vmatpush2.bf16.msra.mxu0 %v14191_v31  ;;  %v14263_v4 = vld [vmem:[#allocation9 + $0x5e8] ss:$16 sps:$4 sm:$0xff]   ;;  %v14268_v14 = vld [vmem:[#allocation9 + $0x36c] ss:$16 sps:$4 sm:$0xff]  }
 0x891   :  { %11456 = vmatprep.mubr.bf16.mxu1 %v18139_v58  ;;  %11491 = vmatprep.subr.bf16.mxu0 %v14199_v32  ;;  %v14271_v13 = vld [vmem:[#allocation9 + $0x5cc] ss:$16 sps:$4 sm:$0xff]   ;;  %v14266_v31 = vld [vmem:[#allocation9 + $0x368] ss:$16 sps:$4 sm:$0xff]  }
 0x892   :  { %11457 = vmatmul.mubr.bf16.vlgmr.msra.gmra.mxu1 %v18141_v52  ;;  %v14269_v1 = vld [vmem:[#allocation9 + $0x5c8] ss:$16 sps:$4 sm:$0xff]   ;;  %v14274_v0 = vld [vmem:[#allocation9 + $0x34c] ss:$16 sps:$4 sm:$0xff]  }
 0x893   :  { %11507 = vmatpush1.bf16.msra.mxu1 %v14194_v28  ;;  %11538 = vmatprep.mubr.bf16.mxu1 %v18402_v8  ;;  %v14277_v36 = vld [vmem:[#allocation9 + $0x5ac] ss:$16 sps:$4 sm:$0xff]   ;;  %v14272_v32 = vld [vmem:[#allocation9 + $0x348] ss:$16 sps:$4 sm:$0xff]  }
 0x894   :  { %11492 = vmatpush2.bf16.msra.mxu0 %v14197_v37  ;;  %11508 = vmatprep.subr.bf16.mxu1 %v14202_v40  ;;  %v14275_v56 = vld [vmem:[#allocation9 + $0x5a8] ss:$16 sps:$4 sm:$0xff]   ;;  %v14280_v28 = vld [vmem:[#allocation9 + $0x32c] ss:$16 sps:$4 sm:$0xff]  }
 0x895   :  { %11493 = vmatprep.subr.bf16.mxu0 %v14205_v53  ;;  %v14283_v37 = vld [vmem:[#allocation9 + $0x58c] ss:$16 sps:$4 sm:$0xff]   ;;  %v14278_v40 = vld [vmem:[#allocation9 + $0x328] ss:$16 sps:$4 sm:$0xff]  }
 0x896   :  { %v14281_v53 = vld [vmem:[#allocation9 + $0x588] ss:$16 sps:$4 sm:$0xff]   ;;  %v14286_v8 = vld [vmem:[#allocation9 + $0x30c] ss:$16 sps:$4 sm:$0xff]  }
 0x897   :  { %11509 = vmatpush1.bf16.msra.mxu1 %v14200_v18  ;;  %v14289_v18 = vld [vmem:[#allocation9 + $0x56c] ss:$16 sps:$4 sm:$0xff]  }
 0x898   :  { %11494 = vmatpush2.bf16.msra.mxu0 %v14203_v48  ;;  %11510 = vmatprep.subr.bf16.mxu1 %v14208_v50  ;;  %v14284_v48 = vld [vmem:[#allocation9 + $0x308] ss:$16 sps:$4 sm:$0xff]  }
 0x899   :  { %11495 = vmatprep.subr.bf16.mxu0 %v14211_v30  ;;  %v14287_v50 = vld [vmem:[#allocation9 + $0x568] ss:$16 sps:$4 sm:$0xff]   ;;  %v14292_v30 = vld [vmem:[#allocation9 + $0x6ec] ss:$16 sps:$4 sm:$0xff]  }
 0x89b   :  { %11511 = vmatpush1.bf16.msra.mxu1 %v14206_v9  ;;  %v14295_v9 = vld [vmem:[#allocation9 + $0x54c] ss:$16 sps:$4 sm:$0xff]  }
 0x89c   :  { %11496 = vmatpush2.bf16.msra.mxu0 %v14209_v45  ;;  %11512 = vmatprep.subr.bf16.mxu1 %v14214_v7  ;;  %v14290_v45 = vld [vmem:[#allocation9 + $0x6e8] ss:$16 sps:$4 sm:$0xff]  }
 0x89d   :  { %11547 = vmatprep.subr.bf16.mxu0 %v14217_v34  ;;  %v14293_v7 = vld [vmem:[#allocation9 + $0x548] ss:$16 sps:$4 sm:$0xff]   ;;  %v14298_v34 = vld [vmem:[#allocation9 + $0x6cc] ss:$16 sps:$4 sm:$0xff]  }
 0x89f   :  { %11498 = vmatmul.mubr.bf16.vlgmr.msra.gmra.mxu0 %v18403_v49  ;;  %11513 = vmatpush1.bf16.msra.mxu1 %v14212_v59  ;;  %v14301_v59 = vld [vmem:[#allocation9 + $0x52c] ss:$16 sps:$4 sm:$0xff]  }
 0x8a0   :  { %11548 = vmatpush1.bf16.msra.mxu0 %v14215_v17  ;;  %11579 = vmatprep.mubr.bf16.mxu0 %v18077_v60  ;;  %v14241_v60 = vld [vmem:[#allocation9 + $0x46c] ss:$16 sps:$4 sm:$0xff]  }
 0x8a1   :  { %11514 = vmatprep.subr.bf16.mxu1 %v14220_v51  ;;  %11549 = vmatprep.subr.bf16.mxu0 %v14223_v21  ;;  %v18404_v17 = vld [vmem:[#allocation25_spill] sm:$0xff] }
 0x8a2   :  { %v14296_v51 = vld [vmem:[#allocation9 + $0x6c8] ss:$16 sps:$4 sm:$0xff]   ;;  %v14304_v49 = vld [vmem:[#allocation9 + $0x6ac] ss:$16 sps:$4 sm:$0xff]  }
 0x8a3   :  { %11515 = vmatpush1.bf16.msra.mxu1 %v14218_v47  ;;  %v14299_v21 = vld [vmem:[#allocation9 + $0x528] ss:$16 sps:$4 sm:$0xff]   ;;  %v14307_v47 = vld [vmem:[#allocation9 + $0x50c] ss:$16 sps:$4 sm:$0xff]  }
 0x8a4   :  { %11550 = vmatpush1.bf16.msra.mxu0 %v14221_v55  ;;  %11516 = vmatprep.subr.bf16.mxu1 %v14226_v19  ;;  %v14302_v55 = vld [vmem:[#allocation9 + $0x6a8] ss:$16 sps:$4 sm:$0xff]  }
 0x8a5   :  { %11551 = vmatprep.subr.bf16.mxu0 %v14229_v3  ;;  %v14305_v19 = vld [vmem:[#allocation9 + $0x508] ss:$16 sps:$4 sm:$0xff]   ;;  %v14310_v3 = vld [vmem:[#allocation9 + $0x68c] ss:$16 sps:$4 sm:$0xff]  }
 0x8a7   :  { %11517 = vmatpush1.bf16.msra.mxu1 %v14224_v16  ;;  %v14349_v16 = vld [vmem:[#allocation11 + $0x74] ss:$8 sps:$4 sm:$0xff]  }
 0x8a8   :  { %11552 = vmatpush1.bf16.msra.mxu0 %v14227_v12  ;;  %11518 = vmatprep.subr.bf16.mxu1 %v14232_v61  ;;  %v14308_v12 = vld [vmem:[#allocation9 + $0x688] ss:$16 sps:$4 sm:$0xff]  }
 0x8a9   :  { %11553 = vmatprep.subr.bf16.mxu0 %v14235_v25  ;;  %v14347_v61 = vld [vmem:[#allocation11 + $0x70] ss:$8 sps:$4 sm:$0xff]   ;;  %v14352_v25 = vld [vmem:[#allocation11 + $0x64] ss:$8 sps:$4 sm:$0xff]  }
 0x8ab   :  { %11519 = vmatpush1.bf16.msra.mxu1 %v14230_v42  ;;  %v14311_v42 = vld [vmem:[#allocation9 + $0x668] ss:$16 sps:$4 sm:$0xff]  }
 0x8ac   :  { %11554 = vmatpush1.bf16.msra.mxu0 %v14233_v39  ;;  %11520 = vmatprep.subr.bf16.mxu1 %v14238_v35  ;;  %v14316_v39 = vld [vmem:[#allocation9 + $0x64c] ss:$16 sps:$4 sm:$0xff]   ;;  %v14350_v35 = vld [vmem:[#allocation11 + $0x60] ss:$8 sps:$4 sm:$0xff]  }
 0x8ad   :  { %11555 = vmatprep.subr.bf16.mxu0 %v14241_v60  ;;  %v14355_v60 = vld [vmem:[#allocation11 + $0x54] ss:$8 sps:$4 sm:$0xff]  }
 0x8af   :  { %11521 = vmatpush1.bf16.msra.mxu1 %v14236_v44  ;;  %v14314_v44 = vld [vmem:[#allocation9 + $0x648] ss:$16 sps:$4 sm:$0xff]  }
 0x8b0   :  { %11556 = vmatpush1.bf16.msra.mxu0 %v14239_v22  ;;  %11522 = vmatprep.subr.bf16.mxu1 %v14244_v10  ;;  %v14319_v22 = vld [vmem:[#allocation9 + $0x62c] ss:$16 sps:$4 sm:$0xff]   ;;  %v14353_v10 = vld [vmem:[#allocation11 + $0x50] ss:$8 sps:$4 sm:$0xff]  }
 0x8b1   :  { %11557 = vmatprep.subr.bf16.mxu0 %v14247_v15  ;;  %v14358_v15 = vld [vmem:[#allocation11 + $0x44] ss:$8 sps:$4 sm:$0xff]  }
 0x8b3   :  { %11523 = vmatpush2.bf16.msra.mxu1 %v14242_v5  ;;  %v14317_v5 = vld [vmem:[#allocation9 + $0x628] ss:$16 sps:$4 sm:$0xff]  }
 0x8b4   :  { %11558 = vmatpush1.bf16.msra.mxu0 %v14245_v2  ;;  %11524 = vmatprep.subr.bf16.mxu1 %v14250_v54  ;;  %v14356_v2 = vld [vmem:[#allocation11 + $0x40] ss:$8 sps:$4 sm:$0xff]   ;;  %v14361_v54 = vld [vmem:[#allocation11 + $0x34] ss:$8 sps:$4 sm:$0xff]  }
 0x8b5   :  { %11559 = vmatprep.subr.bf16.mxu0 %v14253_v23  ;;  %v14320_v23 = vld [vmem:[#allocation9 + $0x608] ss:$16 sps:$4 sm:$0xff]  }
 0x8b7   :  { %11525 = vmatpush2.bf16.msra.mxu1 %v14248_v43  ;;  %v14325_v43 = vld [vmem:[#allocation9 + $0x7ec] ss:$16 sps:$4 sm:$0xff]  }
 0x8b8   :  { %11560 = vmatpush1.bf16.msra.mxu0 %v14251_v27  ;;  %11526 = vmatprep.subr.bf16.mxu1 %v14256_v33  ;;  %v14359_v27 = vld [vmem:[#allocation11 + $0x30] ss:$8 sps:$4 sm:$0xff]   ;;  %v14364_v33 = vld [vmem:[#allocation11 + $0x24] ss:$8 sps:$4 sm:$0xff]  }
 0x8b9   :  { %11561 = vmatprep.subr.bf16.mxu0 %v14259_v38  ;;  %v14323_v38 = vld [vmem:[#allocation9 + $0x7e8] ss:$16 sps:$4 sm:$0xff]  }
 0x8bb   :  { %11527 = vmatpush2.bf16.msra.mxu1 %v14254_v29  ;;  %v14328_v29 = vld [vmem:[#allocation9 + $0x7cc] ss:$16 sps:$4 sm:$0xff]  }
 0x8bc   :  { %11562 = vmatpush1.bf16.msra.mxu0 %v14257_v20  ;;  %11528 = vmatprep.subr.bf16.mxu1 %v14262_v24  ;;  %v14362_v20 = vld [vmem:[#allocation11 + $0x20] ss:$8 sps:$4 sm:$0xff]   ;;  %v14367_v24 = vld [vmem:[#allocation11 + $0x14] ss:$8 sps:$4 sm:$0xff]  }
 0x8bd   :  { %11563 = vmatprep.subr.bf16.mxu0 %v14265_v57  ;;  %v14326_v57 = vld [vmem:[#allocation9 + $0x7c8] ss:$16 sps:$4 sm:$0xff]  }
 0x8bf   :  { %11529 = vmatpush2.bf16.msra.mxu1 %v14260_v62  ;;  %v14331_v62 = vld [vmem:[#allocation9 + $0x7ac] ss:$16 sps:$4 sm:$0xff]  }
 0x8c0   :  { %11564 = vmatpush2.bf16.msra.mxu0 %v14263_v4  ;;  %11530 = vmatprep.subr.bf16.mxu1 %v14268_v14  ;;  %v14365_v4 = vld [vmem:[#allocation11 + $0x10] ss:$8 sps:$4 sm:$0xff]   ;;  %v14370_v14 = vld [vmem:[#allocation11 + $0x4] ss:$8 sps:$4 sm:$0xff]  }
 0x8c1   :  { %11565 = vmatprep.subr.bf16.mxu0 %v14271_v13  ;;  %v14329_v13 = vld [vmem:[#allocation9 + $0x7a8] ss:$16 sps:$4 sm:$0xff]  }
 0x8c3   :  { %11531 = vmatpush2.bf16.msra.mxu1 %v14266_v31  ;;  %v14334_v31 = vld [vmem:[#allocation9 + $0x78c] ss:$16 sps:$4 sm:$0xff]  }
 0x8c4   :  { %11566 = vmatpush2.bf16.msra.mxu0 %v14269_v1  ;;  %11532 = vmatprep.subr.bf16.mxu1 %v14274_v0  ;;  %v14368_v1 = vld [vmem:[#allocation11] ss:$8 sps:$4 sm:$0xff]   ;;  %v14373_v0 = vld [vmem:[#allocation11 + $0xf4] ss:$8 sps:$4 sm:$0xff]  }
 0x8c5   :  { %11567 = vmatprep.subr.bf16.mxu0 %v14277_v36  ;;  %v14332_v36 = vld [vmem:[#allocation9 + $0x788] ss:$16 sps:$4 sm:$0xff]  }
 0x8c7   :  { %11533 = vmatpush2.bf16.msra.mxu1 %v14272_v32  ;;  %v14337_v32 = vld [vmem:[#allocation9 + $0x76c] ss:$16 sps:$4 sm:$0xff]  }
 0x8c8   :  { %11568 = vmatpush2.bf16.msra.mxu0 %v14275_v56  ;;  %11534 = vmatprep.subr.bf16.mxu1 %v14280_v28  ;;  %v14371_v56 = vld [vmem:[#allocation11 + $0xf0] ss:$8 sps:$4 sm:$0xff]   ;;  %v14376_v28 = vld [vmem:[#allocation11 + $0xe4] ss:$8 sps:$4 sm:$0xff]  }
 0x8c9   :  { %11569 = vmatprep.subr.bf16.mxu0 %v14283_v37  ;;  %v14335_v37 = vld [vmem:[#allocation9 + $0x768] ss:$16 sps:$4 sm:$0xff]  }
 0x8cb   :  { %11535 = vmatpush2.bf16.msra.mxu1 %v14278_v40  ;;  %v14340_v40 = vld [vmem:[#allocation9 + $0x74c] ss:$16 sps:$4 sm:$0xff]  }
 0x8cc   :  { %11570 = vmatpush2.bf16.msra.mxu0 %v14281_v53  ;;  %11536 = vmatprep.subr.bf16.mxu1 %v14286_v8  ;;  %v14374_v53 = vld [vmem:[#allocation11 + $0xe0] ss:$8 sps:$4 sm:$0xff]   ;;  %v14379_v8 = vld [vmem:[#allocation11 + $0xd4] ss:$8 sps:$4 sm:$0xff]  }
 0x8cd   :  { %11571 = vmatprep.subr.bf16.mxu0 %v14289_v18  ;;  %v14338_v18 = vld [vmem:[#allocation9 + $0x748] ss:$16 sps:$4 sm:$0xff]  }
 0x8cf   :  { %11537 = vmatpush2.bf16.msra.mxu1 %v14284_v48  ;;  %v14343_v48 = vld [vmem:[#allocation9 + $0x72c] ss:$16 sps:$4 sm:$0xff]  }
 0x8d0   :  { %11572 = vmatpush2.bf16.msra.mxu0 %v14287_v50  ;;  %11588 = vmatprep.subr.bf16.mxu1 %v14292_v30  ;;  %v14377_v50 = vld [vmem:[#allocation11 + $0xd0] ss:$8 sps:$4 sm:$0xff]   ;;  %v14382_v30 = vld [vmem:[#allocation11 + $0xc4] ss:$8 sps:$4 sm:$0xff]  }
 0x8d1   :  { %11573 = vmatprep.subr.bf16.mxu0 %v14295_v9  ;;  %v14341_v9 = vld [vmem:[#allocation9 + $0x728] ss:$16 sps:$4 sm:$0xff]  }
 0x8d2   :  { %11539 = vmatmul.mubr.bf16.vlgmr.msra.gmra.mxu1 %v18404_v17  ;;  %v14383_v17 = vld [vmem:[#allocation11 + $0xb0] ss:$8 sps:$4 sm:$0xff]  }
 0x8d3   :  { %11589 = vmatpush1.bf16.msra.mxu1 %v14290_v45  ;;  %11620 = vmatprep.mubr.bf16.mxu1 %v18139_v58  ;;  %v14313_v58 = vld [vmem:[#allocation9 + $0x66c] ss:$16 sps:$4 sm:$0xff]  }
 0x8d4   :  { %11574 = vmatpush2.bf16.msra.mxu0 %v14293_v7  ;;  %11590 = vmatprep.subr.bf16.mxu1 %v14298_v34  ;;  %v14346_v45 = vld [vmem:[#allocation9 + $0x70c] ss:$16 sps:$4 sm:$0xff]   ;;  %v14380_v7 = vld [vmem:[#allocation11 + $0xc0] ss:$8 sps:$4 sm:$0xff]  }
 0x8d5   :  { %11575 = vmatprep.subr.bf16.mxu0 %v14301_v59  ;;  %v14385_v34 = vld [vmem:[#allocation11 + $0xb4] ss:$8 sps:$4 sm:$0xff]   ;;  %v14344_v59 = vld [vmem:[#allocation9 + $0x708] ss:$16 sps:$4 sm:$0xff]  }
 0x8d7   :  { %11591 = vmatpush1.bf16.msra.mxu1 %v14296_v51  ;;  %v14388_v51 = vld [vmem:[#allocation11 + $0xa4] ss:$8 sps:$4 sm:$0xff]  }
 0x8d8   :  { %11576 = vmatpush2.bf16.msra.mxu0 %v14299_v21  ;;  %11592 = vmatprep.subr.bf16.mxu1 %v14304_v49  ;;  %v14386_v21 = vld [vmem:[#allocation11 + $0xa0] ss:$8 sps:$4 sm:$0xff]   ;;  %v14391_v49 = vld [vmem:[#allocation11 + $0x94] ss:$8 sps:$4 sm:$0xff]  }
 0x8d9   :  { %11577 = vmatprep.subr.bf16.mxu0 %v14307_v47  ;;  %v14389_v47 = vld [vmem:[#allocation11 + $0x90] ss:$8 sps:$4 sm:$0xff]  }
 0x8db   :  { %11593 = vmatpush1.bf16.msra.mxu1 %v14302_v55  ;;  %v14394_v55 = vld [vmem:[#allocation11 + $0x84] ss:$8 sps:$4 sm:$0xff]  }
 0x8dc   :  { %11578 = vmatpush2.bf16.msra.mxu0 %v14305_v19  ;;  %11594 = vmatprep.subr.bf16.mxu1 %v14310_v3  ;;  %v14392_v19 = vld [vmem:[#allocation11 + $0x80] ss:$8 sps:$4 sm:$0xff]   ;;  %v14395_v3 = vld [vmem:[#allocation11 + $0x170] ss:$8 sps:$4 sm:$0xff]  }
 0x8dd   :  { %12034 = vmatprep.subr.bf16.mxu0 %v14349_v16  ;;  %v14397_v16 = vld [vmem:[#allocation11 + $0x174] ss:$8 sps:$4 sm:$0xff]  }
 0x8df   :  { %11580 = vmatmul.mubr.bf16.vlgmr.msra.gmra.mxu0 %v18081_v63  ;;  %11595 = vmatpush1.bf16.msra.mxu1 %v14308_v12  ;;  %v14322_v63 = vld [vmem:[#allocation9 + $0x60c] ss:$16 sps:$4 sm:$0xff]  }
 0x8e0   :  { %11596 = vmatprep.subr.bf16.mxu1 %v14313_v58  ;;  %12035 = vmatpush1.bf16.msra.mxu0 %v14347_v61  ;;  %v14400_v58 = vld [vmem:[#allocation11 + $0x164] ss:$8 sps:$4 sm:$0xff]   ;;  %v14398_v61 = vld [vmem:[#allocation11 + $0x160] ss:$8 sps:$4 sm:$0xff]  }
 0x8e1   :  { %12036 = vmatprep.subr.bf16.mxu0 %v14352_v25 }
 0x8e3   :  { %11597 = vmatpush1.bf16.msra.mxu1 %v14311_v42 }
 0x8e4   :  { %11598 = vmatprep.subr.bf16.mxu1 %v14316_v39  ;;  %12037 = vmatpush1.bf16.msra.mxu0 %v14350_v35  ;;  %v14403_v39 = vld [vmem:[#allocation11 + $0x154] ss:$8 sps:$4 sm:$0xff]  }
 0x8e5   :  { %12038 = vmatprep.subr.bf16.mxu0 %v14355_v60  ;;  %v14406_v60 = vld [vmem:[#allocation11 + $0x144] ss:$8 sps:$4 sm:$0xff]  }
 0x8e7   :  { %11599 = vmatpush1.bf16.msra.mxu1 %v14314_v44  ;;  %v14404_v44 = vld [vmem:[#allocation11 + $0x140] ss:$8 sps:$4 sm:$0xff]  }
 0x8e8   :  { %11600 = vmatprep.subr.bf16.mxu1 %v14319_v22  ;;  %12039 = vmatpush1.bf16.msra.mxu0 %v14353_v10  ;;  %v14409_v22 = vld [vmem:[#allocation11 + $0x134] ss:$8 sps:$4 sm:$0xff]   ;;  %v14407_v10 = vld [vmem:[#allocation11 + $0x130] ss:$8 sps:$4 sm:$0xff]  }
 0x8e9   :  { %12040 = vmatprep.subr.bf16.mxu0 %v14358_v15  ;;  %v14412_v15 = vld [vmem:[#allocation11 + $0x124] ss:$8 sps:$4 sm:$0xff]  }
 0x8eb   :  { %11601 = vmatpush1.bf16.msra.mxu1 %v14317_v5  ;;  %v14410_v5 = vld [vmem:[#allocation11 + $0x120] ss:$8 sps:$4 sm:$0xff]  }
 0x8ec   :  { %11602 = vmatprep.subr.bf16.mxu1 %v14322_v63  ;;  %12041 = vmatpush1.bf16.msra.mxu0 %v14356_v2  ;;  %v14415_v63 = vld [vmem:[#allocation11 + $0x114] ss:$8 sps:$4 sm:$0xff]   ;;  %v14413_v2 = vld [vmem:[#allocation11 + $0x110] ss:$8 sps:$4 sm:$0xff]  }
 0x8ed   :  { %12042 = vmatprep.subr.bf16.mxu0 %v14361_v54  ;;  %v14418_v54 = vld [vmem:[#allocation11 + $0x104] ss:$8 sps:$4 sm:$0xff]  }
 0x8ef   :  { %11603 = vmatpush1.bf16.msra.mxu1 %v14320_v23  ;;  %v14416_v23 = vld [vmem:[#allocation11 + $0x100] ss:$8 sps:$4 sm:$0xff]  }
 0x8f0   :  { %11604 = vmatprep.subr.bf16.mxu1 %v14325_v43  ;;  %12043 = vmatpush1.bf16.msra.mxu0 %v14359_v27  ;;  %v14421_v43 = vld [vmem:[#allocation11 + $0x1f4] ss:$8 sps:$4 sm:$0xff]   ;;  %v14419_v27 = vld [vmem:[#allocation11 + $0x1f0] ss:$8 sps:$4 sm:$0xff]  }
 0x8f1   :  { %12044 = vmatprep.subr.bf16.mxu0 %v14364_v33  ;;  %v14424_v33 = vld [vmem:[#allocation11 + $0x1e4] ss:$8 sps:$4 sm:$0xff]  }
 0x8f3   :  { %11605 = vmatpush2.bf16.msra.mxu1 %v14323_v38  ;;  %v14422_v38 = vld [vmem:[#allocation11 + $0x1e0] ss:$8 sps:$4 sm:$0xff]  }
 0x8f4   :  { %11606 = vmatprep.subr.bf16.mxu1 %v14328_v29  ;;  %12045 = vmatpush1.bf16.msra.mxu0 %v14362_v20  ;;  %v14427_v29 = vld [vmem:[#allocation11 + $0x1d4] ss:$8 sps:$4 sm:$0xff]   ;;  %v14425_v20 = vld [vmem:[#allocation11 + $0x1d0] ss:$8 sps:$4 sm:$0xff]  }
 0x8f5   :  { %12046 = vmatprep.subr.bf16.mxu0 %v14367_v24  ;;  %v14430_v24 = vld [vmem:[#allocation11 + $0x1c4] ss:$8 sps:$4 sm:$0xff]  }
 0x8f7   :  { %11607 = vmatpush2.bf16.msra.mxu1 %v14326_v57  ;;  %v14428_v57 = vld [vmem:[#allocation11 + $0x1c0] ss:$8 sps:$4 sm:$0xff]  }
 0x8f8   :  { %11608 = vmatprep.subr.bf16.mxu1 %v14331_v62  ;;  %12047 = vmatpush1.bf16.msra.mxu0 %v14365_v4  ;;  %v14433_v62 = vld [vmem:[#allocation11 + $0x1b4] ss:$8 sps:$4 sm:$0xff]   ;;  %v14431_v4 = vld [vmem:[#allocation11 + $0x1b0] ss:$8 sps:$4 sm:$0xff]  }
 0x8f9   :  { %12048 = vmatprep.subr.bf16.mxu0 %v14370_v14  ;;  %v14436_v14 = vld [vmem:[#allocation11 + $0x1a4] ss:$8 sps:$4 sm:$0xff]  }
 0x8fb   :  { %11609 = vmatpush2.bf16.msra.mxu1 %v14329_v13  ;;  %v14434_v13 = vld [vmem:[#allocation11 + $0x1a0] ss:$8 sps:$4 sm:$0xff]  }
 0x8fc   :  { %11610 = vmatprep.subr.bf16.mxu1 %v14334_v31  ;;  %12049 = vmatpush1.bf16.msra.mxu0 %v14368_v1 }
 0x8fd   :  { %12050 = vmatprep.subr.bf16.mxu0 %v14373_v0 }
 0x8ff   :  { %11611 = vmatpush2.bf16.msra.mxu1 %v14332_v36 }
 0x900   :  { %11612 = vmatprep.subr.bf16.mxu1 %v14337_v32  ;;  %12051 = vmatpush2.bf16.msra.mxu0 %v14371_v56  ;;  %v14439_v32 = vld [vmem:[#allocation11 + $0x194] ss:$8 sps:$4 sm:$0xff]  }
 0x901   :  { %12052 = vmatprep.subr.bf16.mxu0 %v14376_v28  ;;  %v14437_v28 = vld [vmem:[#allocation11 + $0x190] ss:$8 sps:$4 sm:$0xff]  }
 0x903   :  { %11613 = vmatpush2.bf16.msra.mxu1 %v14335_v37 }
 0x904   :  { %11614 = vmatprep.subr.bf16.mxu1 %v14340_v40  ;;  %12053 = vmatpush2.bf16.msra.mxu0 %v14374_v53 }
 0x905   :  { %12054 = vmatprep.subr.bf16.mxu0 %v14379_v8 }
 0x907   :  { %11615 = vmatpush2.bf16.msra.mxu1 %v14338_v18  ;;  %v14442_v18 = vld [vmem:[#allocation11 + $0x184] ss:$8 sps:$4 sm:$0xff]  }
 0x908   :  { %11616 = vmatprep.subr.bf16.mxu1 %v14343_v48  ;;  %12055 = vmatpush2.bf16.msra.mxu0 %v14377_v50  ;;  %v14440_v50 = vld [vmem:[#allocation11 + $0x180] ss:$8 sps:$4 sm:$0xff]  }
 0x909   :  { %12056 = vmatprep.subr.bf16.mxu0 %v14382_v30 }
 0x90b   :  { %11617 = vmatpush2.bf16.msra.mxu1 %v14341_v9 }
 0x90c   :  { %11618 = vmatprep.subr.bf16.mxu1 %v14346_v45  ;;  %12057 = vmatpush2.bf16.msra.mxu0 %v14380_v7 }
 0x90d   :  { %12058 = vmatprep.subr.bf16.mxu0 %v14385_v34 }
 0x90f   :  { %11619 = vmatpush2.bf16.msra.mxu1 %v14344_v59 }
 0x910   :  { %12059 = vmatpush2.bf16.msra.mxu0 %v14383_v17  ;;  %12075 = vmatprep.subr.bf16.mxu1 %v14397_v16 }
 0x911   :  { %12060 = vmatprep.subr.bf16.mxu0 %v14388_v51 }
 0x912   :  { %11621 = vmatmul.mubr.bf16.vlgmr.msra.gmra.mxu1 %v18141_v52  ;;  %v14401_v52 = vld [vmem:[#allocation11 + $0x150] ss:$8 sps:$4 sm:$0xff]  }
 0x913   :  { %12076 = vmatpush1.bf16.msra.mxu1 %v14395_v3 }
 0x914   :  { %12061 = vmatpush2.bf16.msra.mxu0 %v14386_v21  ;;  %12077 = vmatprep.subr.bf16.mxu1 %v14400_v58  ;;  %v14447_v58 = vld [vmem:[#allocation12 + $0x68] sm:$0xff]  }
 0x915   :  { %12062 = vmatprep.subr.bf16.mxu0 %v14391_v49 }
 0x917   :  { %12078 = vmatpush1.bf16.msra.mxu1 %v14398_v61  ;;  %v14448_v61 = vld [vmem:[#allocation12 + $0x28] sm:$0xff]  }
 0x918   :  { %12063 = vmatpush2.bf16.msra.mxu0 %v14389_v47  ;;  %12079 = vmatprep.subr.bf16.mxu1 %v14403_v39  ;;  %v14443_v47 = vld [vmem:[#allocation12 + $0x78] sm:$0xff]  }
 0x919   :  { %12064 = vmatprep.subr.bf16.mxu0 %v14394_v55  ;;  %v14444_v55 = vld [vmem:[#allocation12 + $0x38] sm:$0xff]  }
 0x91a   :  { %v14452_v39 = vld [vmem:[#allocation12 + $0x18] sm:$0xff]  }
 0x91b   :  { %12080 = vmatpush1.bf16.msra.mxu1 %v14401_v52  ;;  %v14451_v52 = vld [vmem:[#allocation12 + $0x58] sm:$0xff]  }
 0x91c   :  { %12065 = vmatpush2.bf16.msra.mxu0 %v14392_v19  ;;  %12081 = vmatprep.subr.bf16.mxu1 %v14406_v60  ;;  %v14445_v19 = vld [vmem:[#allocation12 + $0x70] sm:$0xff]  }
 0x91d   :  { %13309 = vmatprep.subr.bf16.mxu0 %v14443_v47  ;;  %v14454_v60 = vld [vmem:[#allocation12 + $0x10] sm:$0xff]  }
 0x91f   :  { %v11417_v12 = vpop.f32.mrf.mxu0  ;;  %12082 = vmatpush1.bf16.msra.mxu1 %v14404_v44  ;;  %v18405_v44 = vld [vmem:[#allocation49_spill] sm:$0xff] }
 0x920   :  { %12083 = vmatprep.subr.bf16.mxu1 %v14409_v22  ;;  %v11418_v31 = vadd.f32 %v11417_v12, %v18133_v11  ;;  %v14446_v12 = vld [vmem:[#allocation12 + $0x30] sm:$0xff]   ;;  %v18406_v22 = vsub.s32 2, %v18405_v44 }
 0x921   :  { %v11419_v25 = vpop.f32.mrf.mxu0 }
 0x922   :  { %v11420_v0 = vadd.f32 %v11419_v25, %v18135_v26  ;;  %v14449_v25 = vld [vmem:[#allocation12 + $0x60] sm:$0xff]  }
 0x923   :  { %v11421_v42 = vpop.f32.mrf.mxu0  ;;  %12084 = vmatpush1.bf16.msra.mxu1 %v14407_v10  ;;  %v10012_v10 = vrot.slane %v18116_v6, %v18406_v22 }
 0x924   :  { %12085 = vmatprep.subr.bf16.mxu1 %v14412_v15  ;;  %v14450_v42 = vld [vmem:[#allocation12 + $0x20] sm:$0xff]   ;;  %v18407_v15 = vsub.s32 3, %v18405_v44 }
 0x925   :  { %v11422_v35 = vpop.f32.mrf.mxu0 }
 0x926   :  { %v14453_v35 = vld [vmem:[#allocation12 + $0x50] sm:$0xff]  }
 0x927   :  { %12086 = vmatpush1.bf16.msra.mxu1 %v14410_v5  ;;  %v10016_v5 = vrot.slane %v18116_v6, %v18407_v15  ;;  %v14455_v6 = vld [vmem:[#allocation12 + $0x48] sm:$0xff]  }
 0x928   :  { %12087 = vmatprep.subr.bf16.mxu1 %v14415_v63 }
 0x92b   :  { %12088 = vmatpush1.bf16.msra.mxu1 %v14413_v2 }
 0x92c   :  { %12089 = vmatprep.subr.bf16.mxu1 %v14418_v54 }
 0x92f   :  { %12090 = vmatpush1.bf16.msra.mxu1 %v14416_v23 }
 0x930   :  { %12091 = vmatprep.subr.bf16.mxu1 %v14421_v43 }
 0x933   :  { %12092 = vmatpush2.bf16.msra.mxu1 %v14419_v27 }
 0x934   :  { %12093 = vmatprep.subr.bf16.mxu1 %v14424_v33 }
 0x937   :  { %12094 = vmatpush2.bf16.msra.mxu1 %v14422_v38 }
 0x938   :  { %12095 = vmatprep.subr.bf16.mxu1 %v14427_v29 }
 0x93b   :  { %12096 = vmatpush2.bf16.msra.mxu1 %v14425_v20 }
 0x93c   :  { %12097 = vmatprep.subr.bf16.mxu1 %v14430_v24 }
 0x93f   :  { %12098 = vmatpush2.bf16.msra.mxu1 %v14428_v57 }
 0x940   :  { %12099 = vmatprep.subr.bf16.mxu1 %v14433_v62 }
 0x943   :  { %12100 = vmatpush2.bf16.msra.mxu1 %v14431_v4 }
 0x944   :  { %12101 = vmatprep.subr.bf16.mxu1 %v14436_v14 }
 0x947   :  { %12102 = vmatpush2.bf16.msra.mxu1 %v14434_v13 }
 0x948   :  { %12103 = vmatprep.subr.bf16.mxu1 %v14439_v32  ;;  %v14457_v32 = vld [vmem:[#allocation12 + $0x40] sm:$0xff]  }
 0x94b   :  { %12104 = vmatpush2.bf16.msra.mxu1 %v14437_v28  ;;  %v14458_v28 = vld [vmem:[#allocation12] sm:$0xff]  }
 0x94c   :  { %12105 = vmatprep.subr.bf16.mxu1 %v14442_v18 }
 0x94f   :  { %12106 = vmatpush2.bf16.msra.mxu1 %v14440_v50 }
 0x952   :  { %v11458_v1 = vpop.f32.mrf.mxu1 }
 0x953   :  { %v11459_v36 = vadd.f32 %v11458_v1, %v11418_v31 }
 0x954   :  { %v11460_v56 = vpop.f32.mrf.mxu1 }
 0x955   :  { %v11461_v37 = vadd.f32 %v11460_v56, %v11420_v0  ;;  %v11629_v40 = vmax.f32 %v11459_v36, 0.0  ;;  %v14456_v0 = vld [vmem:[#allocation12 + $0x8] sm:$0xff]  }
 0x956   :  { %v11462_v53 = vpop.f32.mrf.mxu1 }
 0x957   :  { %v11630_v8 = vmax.f32 %v11461_v37, 0.0  ;;  %v11633_v11 = vpack.c.bf16 %v11629_v40, %v11629_v40  ;;  %v11702_v37 = vld [vmem:[#allocation3 + $0x6] ss:$8 sm:$0x3] }
 0x958   :  { %v11463_v48 = vpop.f32.mrf.mxu1  ;;  %v11707_v40 = vrot.slane %v11702_v37, %v18400_v41  ;;  %v11711_v53 = vrot.slane %v11702_v37, %v18401_v46 }
 0x959   :  { %v11634_v30 = vpack.c.bf16 %v11630_v8, %v11630_v8 }
 0x95b   :  { %12066 = vmatprep.mubr.bf16.mxu0 %v11634_v30 }
 0x95c   :  { %12067 = vmatmul.mubr.bf16.vlgmr.msra.gmra.mxu0 %v11633_v11 }
 0x95d   :  { %13310 = vmatpush3.bf16.msra.mxu0 %v14444_v55 }
 0x95e   :  { %13311 = vmatprep.subr.bf16.mxu0 %v14445_v19 }
 0x95f   :  { %v11499_v26 = vpop.f32.mrf.mxu0 }
 0x960   :  { %v11500_v63 = vadd.f32 %v11499_v26, %v10012_v10 }
 0x961   :  { %v11501_v9 = vpop.f32.mrf.mxu0  ;;  %13312 = vmatpush3.bf16.msra.mxu0 %v14446_v12 }
 0x962   :  { %13313 = vmatprep.subr.bf16.mxu0 %v14447_v58  ;;  %v11502_v2 = vadd.f32 %v11501_v9, %v10016_v5 }
 0x963   :  { %v11503_v45 = vpop.f32.mrf.mxu0 }
 0x965   :  { %v11504_v7 = vpop.f32.mrf.mxu0  ;;  %13314 = vmatpush3.bf16.msra.mxu0 %v14448_v61 }
 0x966   :  { %13315 = vmatprep.subr.bf16.mxu0 %v14449_v25 }
 0x969   :  { %13316 = vmatpush3.bf16.msra.mxu0 %v14450_v42 }
 0x96a   :  { %13317 = vmatprep.subr.bf16.mxu0 %v14451_v52 }
 0x96d   :  { %13318 = vmatpush3.bf16.msra.mxu0 %v14452_v39 }
 0x96e   :  { %13319 = vmatprep.subr.bf16.mxu0 %v14453_v35 }
 0x971   :  { %13320 = vmatpush3.bf16.msra.mxu0 %v14454_v60 }
 0x972   :  { %13321 = vmatprep.subr.bf16.mxu0 %v14455_v6 }
 0x975   :  { %13322 = vmatpush3.bf16.msra.mxu0 %v14456_v0 }
 0x976   :  { %13323 = vmatprep.subr.bf16.mxu0 %v14457_v32 }
 0x979   :  { %13324 = vmatpush3.bf16.msra.mxu0 %v14458_v28 }
 0x992   :  { %v11540_v34 = vpop.f32.mrf.mxu1 }
 0x993   :  { %v11541_v54 = vadd.f32 %v11540_v34, %v11500_v63 }
 0x994   :  { %v11542_v59 = vpop.f32.mrf.mxu1 }
 0x995   :  { %v11543_v23 = vadd.f32 %v11542_v59, %v11502_v2 }
 0x996   :  { %v11544_v17 = vpop.f32.mrf.mxu1 }
 0x998   :  { %v11545_v51 = vpop.f32.mrf.mxu1 }
 0x999   :  { %v12152_v51 = vld [vmem:[#allocation3 + $0x7] ss:$0 sm:$0xff] }
 0x99f   :  { %v11581_v21 = vpop.f32.mrf.mxu0 }
 0x9a0   :  { %v11582_v43 = vadd.f32 %v11581_v21, %v11541_v54 }
 0x9a1   :  { %v11583_v49 = vpop.f32.mrf.mxu0 }
 0x9a2   :  { %v11584_v33 = vadd.f32 %v11583_v49, %v11543_v23 }
 0x9a3   :  { %v11585_v3 = vpop.f32.mrf.mxu0 }
 0x9a5   :  { %v11586_v16 = vpop.f32.mrf.mxu0 }
 0x9d2   :  { %v11622_v27 = vpop.f32.mrf.mxu1 }
 0x9d3   :  { %v11623_v38 = vadd.f32 %v11622_v27, %v11582_v43 }
 0x9d4   :  { %v11624_v29 = vpop.f32.mrf.mxu1 }
 0x9d5   :  { %v11625_v20 = vadd.f32 %v11624_v29, %v11584_v33  ;;  %v11631_v24 = vmax.f32 %v11623_v38, 0.0 }
 0x9d6   :  { %v11626_v57 = vpop.f32.mrf.mxu1 }
 0x9d7   :  { %v11632_v62 = vmax.f32 %v11625_v20, 0.0  ;;  %v11635_v13 = vpack.c.bf16 %v11631_v24, %v11631_v24 }
 0x9d8   :  { %v11627_v4 = vpop.f32.mrf.mxu1 }
 0x9d9   :  { %v11636_v14 = vpack.c.bf16 %v11632_v62, %v11632_v62 }
 0x9db   :  { %12107 = vmatprep.mubr.bf16.mxu1 %v11636_v14 }
 0x9dc   :  { %12108 = vmatmul.mubr.bf16.vlgmr.msra.gmra.mxu1 %v11635_v13 }
 0xa1c   :  { %v12068_v31 = vpop.f32.mrf.mxu0 }
 0xa1d   :  { %v12069_v8 = vadd.f32 %v12068_v31, %v11707_v40 }
 0xa1e   :  { %v12070_v1 = vpop.f32.mrf.mxu0 }
 0xa1f   :  { %v12071_v48 = vadd.f32 %v12070_v1, %v11711_v53 }
 0xa20   :  { %v12072_v36 = vpop.f32.mrf.mxu0 }
 0xa22   :  { %v12073_v56 = vpop.f32.mrf.mxu0 }
 0xa9c   :  { %v12109_v18 = vpop.f32.mrf.mxu1 }
 0xa9d   :  { %v12110_v50 = vadd.f32 %v12109_v18, %v12069_v8 }
 0xa9e   :  { %v12111_v30 = vpop.f32.mrf.mxu1 }
 0xa9f   :  { %v12112_v11 = vadd.f32 %v12111_v30, %v12071_v48  ;;  %v12116_v26 = vmax.f32 %v12110_v50, 0.0 }
 0xaa0   :  { %v12113_v9 = vpop.f32.mrf.mxu1 }
 0xaa1   :  { %v12117_v45 = vmax.f32 %v12112_v11, 0.0  ;;  %v12118_v59 = vpack.c.bf16 %v12116_v26, %v12116_v26 }
 0xaa2   :  { %v12114_v7 = vpop.f32.mrf.mxu1 }
 0xaa3   :  { %v12119_v34 = vpack.c.bf16 %v12117_v45, %v12117_v45 }
 0xaa5   :  { %12281 = vmatprep.mubr.bf16.mxu0 %v12119_v34 }
 0xaa6   :  { %12282 = vmatmul.mubr.bf16.vlgmr.msra.gmra.mxu0 %v12118_v59 }
 0xb66   :  { %v13325_v17 = vpop.f32.mrf.mxu0 }
 0xb68   :  { %v13326_v21 = vpop.f32.mrf.mxu0 }
 0xb69   :  { %v13327_v41 = vadd.f32 %v13326_v21, %v13325_v17 }
 0xb6a   :  { %v13328_v46 = vpop.f32.mrf.mxu0 }
 0xb6b   :  { %v12284_v49 = vadd.f32 %v13327_v41, %v12152_v51 }
 0xb6c   :  { %v13329_v47 = vpop.f32.mrf.mxu0 }
 0xb6d   :  { %12289 = vst [vmem:[#allocation14] sm:$0x3] %v12284_v49 }
 0xb6e   :  { %14594 = shalt.err (!%p14591_p6)
}
 0xb6f   :  { %12299 = dma.vmem_to_hbm [thread:$0]  %s12297_s12, 32, %s18175_s10, [#allocation5]  }
 0xb70   :  { %14611 = dma.done.wait [#allocation5], 32  }
 0xb71   :  { %14612 = vsyncadd [#allocation5], 4294967264 }
 0xb72   :  { %12303 = vsyncpa [#allocation4], 1 }
 0xb73   :  { %12304 = vsyncpa [#allocation7], 1 }
 0xb74   :  { %12305 = vsyncpa [#allocation10], 1 }
 0xb75   :  { %12306 = vsyncpa [#allocation13], 1 }
 0xb76   :  { %12307 = vsyncpa [#allocation5], 1 }

</bundles_post_ra>
